<compile_context>
chip_gen: v7x
topology: tpu7x:2x2x1
jax: 0.10.0
libtpu: 0.0.40
codegen_flags: <defaults>
</compile_context>

<pallas_src>
import functools

import jax
import jax.numpy as jnp
from jax import lax
from jax.experimental import pallas as pl
from jax.experimental.pallas import tpu as pltpu

# ----------------------------- small config -----------------------------------
VOCAB_SIZE = 64          # synthetic wordpiece vocab for BertModel embeddings
HIDDEN = 128             # BERT hidden size (module uses 768)
NUM_LAYERS = 2           # BERT encoder layers
NUM_HEADS = 2
HEAD_DIM = HIDDEN // NUM_HEADS
HEAD_PAD = 128           # each head padded to a full 128-lane slab
INTERMEDIATE = 256       # BERT FFN intermediate size
MAX_POS = 16
TAGSET = 10              # len(hp.VOCAB)
TAG_PAD = 128            # classifier output padded to a lane-dense width
LSTM_HIDDEN = HIDDEN // 2  # module: hidden_size = 768 // 2 (bidirectional -> concat back to HIDDEN)
LN_EPS = 1e-12


# ----------------------------- in-kernel helpers --------------------------------
def _ln(x, g, b, eps=LN_EPS):
    mu = jnp.mean(x, axis=-1, keepdims=True)
    xc = x - mu
    var = jnp.mean(xc * xc, axis=-1, keepdims=True)
    return xc * lax.rsqrt(var + eps) * g + b


def _gelu(x):
    # original BERT gelu: x * 0.5 * (1 + erf(x / sqrt(2)))
    return 0.5 * x * (1.0 + lax.erf(x * 0.7071067811865476))


# ----------------------------- fused BERT stack kernel ---------------------------
def _bert_stack_kernel(emb_ref, m_ref, eg_ref, eb_ref,
                       wqkv_ref, bqkv_ref, wo_ref, bo_ref, ln1g_ref, ln1b_ref,
                       wi_ref, bi_ref, wf_ref, bf_ref, ln2g_ref, ln2b_ref,
                       o_ref, *, layers, heads, head_dim, head_pad):
    """Embedding LayerNorm + `layers` full encoder layers for one batch element."""
    HP = head_pad
    T = emb_ref.shape[1]
    bf16 = jnp.bfloat16

    x = _ln(emb_ref[0], eg_ref[...], eb_ref[...])                  # (T, H) f32
    addm = (1.0 - m_ref[0]) * (-10000.0)                           # (1, T) additive mask
    scale = 1.0 / (head_dim ** 0.5)

    for l in range(layers):                                        # layer loop, weights in VMEM
        # ---- fused QKV projection: one (T,H)@(H,3*heads*128) matmul (bf16 MXU, f32 acc) ----
        qkv = jnp.dot(x.astype(bf16), wqkv_ref[l],
                      preferred_element_type=jnp.float32) + bqkv_ref[l]
        # lane layout: [q_h0|q_h1|k_h0|k_h1|v_h0|v_h1], each head a full 128-lane slab
        q_h = [qkv[:, h * HP:(h + 1) * HP] for h in range(heads)]
        k_h = [qkv[:, (heads + h) * HP:(heads + h + 1) * HP] for h in range(heads)]
        v_h = [qkv[:, (2 * heads + h) * HP:(2 * heads + h + 1) * HP] for h in range(heads)]
        # ---- scores for all heads, sublane-stacked -> one batched masked softmax ----
        s_all = jnp.concatenate(
            [jnp.einsum("qd,kd->qk", q_h[h].astype(bf16), k_h[h].astype(bf16),
                        preferred_element_type=jnp.float32) for h in range(heads)],
            axis=0)                                                # (heads*T, T)
        s_all = s_all * scale + addm
        s_all = s_all - jnp.max(s_all, axis=-1, keepdims=True)
        p_all = jnp.exp(s_all)
        p_all = p_all * pl.reciprocal(jnp.sum(p_all, axis=-1, keepdims=True), approx=True)
        # ---- context per head written into lane-aligned 128-wide offsets of one slab ----
        ctx = jnp.concatenate(
            [jnp.dot(p_all[h * T:(h + 1) * T, :].astype(bf16), v_h[h].astype(bf16),
                     preferred_element_type=jnp.float32) for h in range(heads)],
            axis=-1)                                               # (T, heads*128)
        # ---- output projection + residual + LN ----
        attn = jnp.dot(ctx.astype(bf16), wo_ref[l],
                       preferred_element_type=jnp.float32) + bo_ref[l]
        h1 = _ln(attn + x, ln1g_ref[l], ln1b_ref[l])
        # ---- FFN + residual + LN ----
        inter = _gelu(jnp.dot(h1.astype(bf16), wi_ref[l],
                              preferred_element_type=jnp.float32) + bi_ref[l])
        ffn = jnp.dot(inter.astype(bf16), wf_ref[l],
                      preferred_element_type=jnp.float32) + bf_ref[l]
        x = _ln(ffn + h1, ln2g_ref[l], ln2b_ref[l])
    o_ref[0] = x


def bert_stack(emb, mask_n1t, pb):
    """emb: (N, T, H); mask_n1t: (N, 1, T) float32; pb: prepared (stacked) BERT weights."""
    N, T, H = emb.shape
    L = NUM_LAYERS
    HP3 = 3 * NUM_HEADS * HEAD_PAD
    HPH = NUM_HEADS * HEAD_PAD

    def wspec(shape):
        return pl.BlockSpec(shape, lambda b, _s=len(shape): (0,) * _s)

    return pl.pallas_call(
        functools.partial(_bert_stack_kernel, layers=L, heads=NUM_HEADS,
                          head_dim=HEAD_DIM, head_pad=HEAD_PAD),
        out_shape=jax.ShapeDtypeStruct((N, T, H), jnp.float32),
        grid=(N,),
        in_specs=[pl.BlockSpec((1, T, H), lambda b: (b, 0, 0)),
                  pl.BlockSpec((1, 1, T), lambda b: (b, 0, 0)),
                  wspec((1, H)), wspec((1, H)),
                  wspec((L, H, HP3)), wspec((L, 1, HP3)),
                  wspec((L, HPH, H)), wspec((L, 1, H)),
                  wspec((L, 1, H)), wspec((L, 1, H)),
                  wspec((L, H, INTERMEDIATE)), wspec((L, 1, INTERMEDIATE)),
                  wspec((L, INTERMEDIATE, H)), wspec((L, 1, H)),
                  wspec((L, 1, H)), wspec((L, 1, H))],
        out_specs=pl.BlockSpec((1, T, H), lambda b: (b, 0, 0)),
        compiler_params=pltpu.CompilerParams(dimension_semantics=("parallel",)),
    )(emb, mask_n1t, pb["emb_ln_g"], pb["emb_ln_b"],
      pb["wqkv_t"], pb["bqkv"], pb["wo_t"], pb["bo"], pb["ln1_g"], pb["ln1_b"],
      pb["wi_t"], pb["bi"], pb["wf_t"], pb["bf"], pb["ln2_g"], pb["ln2_b"])


# --------------------- fused 2-layer BiLSTM + classifier + argmax ------------------
def _lstm_fc_kernel(x_ref, valid_ref, wih_ref, b_ref, whh_ref, fcw_ref, fcb_ref,
                    logit_ref, yhat_ref, *, T, N, HID, layers, tagset):
    """Both packed bidirectional LSTM layers + Linear + argmax, in one kernel.

    Gate lane layout: [i_f|i_b|f_f|f_b|g_f|g_b|o_f|o_b] (8*HID lanes) with block-diagonal
    W_hh so the recurrent state hc/cc = [h_f|h_b] is one lane-dense (N, 2*HID) slab.
    The backward direction walks time in reverse inside the same unrolled loop; mask==0
    steps keep (h, c) unchanged and emit zeros (pad_packed_sequence semantics).
    """
    G = 2 * HID

    # ---- time-major input rows (row = t*N + n), built once from the batch-major BERT output ----
    x_nm = x_ref[...]                                              # (N, T, H)
    cur = jnp.concatenate([x_nm[:, t, :] for t in range(T)], axis=0)   # (T*N, H)

    # ---- hoisted validity (pre-broadcast in the wrapper): fwd half mask[t], bwd half mask[T-1-t]
    v_all = valid_ref[...]                                         # (T, N, G)
    vlist = [v_all[t] for t in range(T)]
    nvlist = [1.0 - v for v in vlist]
    fwd_lane_g = lax.broadcasted_iota(jnp.int32, (N, 4 * G), 1) % G < HID   # fwd half per gate slab
    fwd_lane_h = lax.broadcasted_iota(jnp.int32, (N, G), 1) < HID

    for l in range(layers):
        # ---- hoisted input projection for BOTH directions: one (T*N, I)@(I, 8*HID) matmul ----
        gx = jnp.dot(cur, wih_ref[l], preferred_element_type=jnp.float32) + b_ref[l]
        whh = whh_ref[l]                                           # (2*HID, 8*HID) block-diag
        # ---- hoisted gate interleave (off the recurrence critical path) ----
        gxt = [gx[t * N:(t + 1) * N, :] for t in range(T)]
        g_in = [jnp.where(fwd_lane_g, gxt[t], gxt[T - 1 - t]) for t in range(T)]

        hc = jnp.zeros((N, G), jnp.float32)
        cc = jnp.zeros((N, G), jnp.float32)
        ys = [None] * T
        for t in range(T):                                         # fully unrolled recurrence
            gates = g_in[t] + jnp.dot(hc, whh, preferred_element_type=jnp.float32)  # (N, 8*HID)
            i_g = jax.nn.sigmoid(gates[:, 0 * G:1 * G])
            f_g = jax.nn.sigmoid(gates[:, 1 * G:2 * G])
            g_g = jnp.tanh(gates[:, 2 * G:3 * G])
            o_g = jax.nn.sigmoid(gates[:, 3 * G:4 * G])
            cc_new = f_g * cc + i_g * g_g
            hc_new = o_g * jnp.tanh(cc_new)
            v, nv = vlist[t], nvlist[t]
            hc = v * hc_new + nv * hc
            cc = v * cc_new + nv * cc
            ys[t] = v * hc_new                                     # [fwd(t) | bwd(T-1-t)], masked
        # ---- re-align the bwd half to its true time index: lane-dense selects, kept in vregs ----
        cur = jnp.concatenate(
            [jnp.where(fwd_lane_h, ys[t], ys[T - 1 - t]) for t in range(T)], axis=0)  # (T*N, G)

    # ---- classifier + argmax (lane-dense 128-wide logits store) ----
    logits = jnp.dot(cur, fcw_ref[...], preferred_element_type=jnp.float32) + fcb_ref[...]
    logit_ref[...] = logits                                        # (T*N, 128)
    M, P = logits.shape
    col = lax.broadcasted_iota(jnp.int32, (M, P), 1)
    masked = jnp.where(col < tagset, logits, -1e30)
    mx = jnp.max(masked, axis=-1, keepdims=True)
    yhat_ref[...] = jnp.min(jnp.where(masked == mx, col, P), axis=-1, keepdims=True)


def lstm_fc(enc, valid, prep):
    """enc: (N, T, HIDDEN); valid: (T, N, 2*LSTM_HIDDEN); returns (padded logits, argmax)."""
    N, T, H = enc.shape
    G = 2 * LSTM_HIDDEN
    L = prep["lstm_wih"].shape[0]
    return pl.pallas_call(
        functools.partial(_lstm_fc_kernel, T=T, N=N, HID=LSTM_HIDDEN, layers=L, tagset=TAGSET),
        out_shape=(jax.ShapeDtypeStruct((T * N, TAG_PAD), jnp.float32),
                   jax.ShapeDtypeStruct((T * N, 1), jnp.int32)),
        grid=(1,),
        in_specs=[pl.BlockSpec((N, T, H), lambda i: (0, 0, 0)),
                  pl.BlockSpec((T, N, G), lambda i: (0, 0, 0)),
                  pl.BlockSpec((L, H, 4 * G), lambda i: (0, 0, 0)),
                  pl.BlockSpec((L, 1, 4 * G), lambda i: (0, 0, 0)),
                  pl.BlockSpec((L, G, 4 * G), lambda i: (0, 0, 0)),
                  pl.BlockSpec((G, TAG_PAD), lambda i: (0, 0)),
                  pl.BlockSpec((1, TAG_PAD), lambda i: (0, 0))],
        out_specs=(pl.BlockSpec((T * N, TAG_PAD), lambda i: (0, 0)),
                   pl.BlockSpec((T * N, 1), lambda i: (0, 0))),
        compiler_params=pltpu.CompilerParams(dimension_semantics=("arbitrary",)),
    )(enc, valid, prep["lstm_wih"], prep["lstm_b"], prep["lstm_whh"],
      prep["fc_w_t"], prep["fc_b"])


# ----------------------------- model glue (plain JAX) ----------------------------
def net_forward(prep, x, y, seqlens):
    """Mirrors Net.forward: x, y (N, T) int, seqlens (N,) -> (logits, y, y_hat)."""
    N, T = x.shape
    pb = prep["bert"]
    mask_nt = (jnp.arange(T)[None, :] < seqlens[:, None]).astype(jnp.float32)   # (N, T)

    emb = (pb["word_emb"][x]
           + pb["pos_emb"][:T][None, :, :]
           + pb["type_emb"][0][None, None, :])                     # (N, T, HIDDEN)
    enc = bert_stack(emb, mask_nt[:, None, :], pb)                 # (N, T, HIDDEN), one pallas_call

    # packed-BiLSTM validity, pre-broadcast to a lane-dense slab (hoists selects off the
    # recurrence critical path): fwd half follows mask[t], bwd half follows mask[T-1-t].
    m_tn = mask_nt.T                                               # (T, N)
    valid = jnp.concatenate(
        [jnp.broadcast_to(m_tn[:, :, None], (T, N, LSTM_HIDDEN)),
         jnp.broadcast_to(m_tn[::-1, :, None], (T, N, LSTM_HIDDEN))], axis=-1)   # (T, N, 128)

    logits_p, yhat_flat = lstm_fc(enc, valid, prep)                # one pallas_call
    logits = jnp.transpose(logits_p.reshape(T, N, TAG_PAD)[:, :, :TAGSET], (1, 0, 2))
    y_hat = jnp.transpose(yhat_flat.reshape(T, N), (1, 0))         # TODO(synk): PyTorch returns int64; int32 here
    return logits, y, y_hat


# ----------------------------- parameter preparation -----------------------------
def _pad_head_cols(w_t):
    """(HIDDEN, heads*HEAD_DIM) -> (HIDDEN, heads*HEAD_PAD): zero-pad each head to 128 lanes."""
    out = jnp.zeros((HIDDEN, NUM_HEADS * HEAD_PAD), jnp.float32)
    for h in range(NUM_HEADS):
        out = out.at[:, h * HEAD_PAD:h * HEAD_PAD + HEAD_DIM].set(
            w_t[:, h * HEAD_DIM:(h + 1) * HEAD_DIM])
    return out


def _pad_head_vec(v):
    out = jnp.zeros((NUM_HEADS * HEAD_PAD,), jnp.float32)
    for h in range(NUM_HEADS):
        out = out.at[h * HEAD_PAD:h * HEAD_PAD + HEAD_DIM].set(
            v[h * HEAD_DIM:(h + 1) * HEAD_DIM])
    return out


def _pad_head_rows(w_t):
    """(heads*HEAD_DIM, HIDDEN) -> (heads*HEAD_PAD, HIDDEN)."""
    out = jnp.zeros((NUM_HEADS * HEAD_PAD, HIDDEN), jnp.float32)
    for h in range(NUM_HEADS):
        out = out.at[h * HEAD_PAD:h * HEAD_PAD + HEAD_DIM, :].set(
            w_t[h * HEAD_DIM:(h + 1) * HEAD_DIM, :])
    return out


def prepare_params(params):
    """One-time conversion of PyTorch-layout params into fused / pre-transposed / head-padded /
    layer-stacked, lane-friendly layouts consumed by the Pallas kernels."""
    bert = params["bert"]
    wqkv_l, bqkv_l, wo_l, bo_l = [], [], [], []
    ln1g_l, ln1b_l, wi_l, bi_l, wf_l, bf_l, ln2g_l, ln2b_l = [], [], [], [], [], [], [], []
    for lp in bert["layers"]:
        wqkv_l.append(jnp.concatenate([_pad_head_cols(lp["wq"].T),
                                       _pad_head_cols(lp["wk"].T),
                                       _pad_head_cols(lp["wv"].T)], axis=1))
        bqkv_l.append(jnp.concatenate([_pad_head_vec(lp["bq"]),
                                       _pad_head_vec(lp["bk"]),
                                       _pad_head_vec(lp["bv"])]).reshape(1, -1))
        wo_l.append(_pad_head_rows(lp["wo"].T))
        bo_l.append(lp["bo"].reshape(1, HIDDEN))
        ln1g_l.append(lp["ln1_g"].reshape(1, HIDDEN))
        ln1b_l.append(lp["ln1_b"].reshape(1, HIDDEN))
        wi_l.append(lp["wi"].T)
        bi_l.append(lp["bi"].reshape(1, INTERMEDIATE))
        wf_l.append(lp["wf"].T)
        bf_l.append(lp["bf"].reshape(1, HIDDEN))
        ln2g_l.append(lp["ln2_g"].reshape(1, HIDDEN))
        ln2b_l.append(lp["ln2_b"].reshape(1, HIDDEN))
    pbert = dict(
        word_emb=bert["word_emb"], pos_emb=bert["pos_emb"], type_emb=bert["type_emb"],
        emb_ln_g=bert["emb_ln_g"].reshape(1, HIDDEN),
        emb_ln_b=bert["emb_ln_b"].reshape(1, HIDDEN),
        # bf16 MXU operands (f32 accumulate in-kernel); biases / LN params stay f32
        wqkv_t=jnp.stack(wqkv_l).astype(jnp.bfloat16), bqkv=jnp.stack(bqkv_l),
        wo_t=jnp.stack(wo_l).astype(jnp.bfloat16), bo=jnp.stack(bo_l),
        ln1_g=jnp.stack(ln1g_l), ln1_b=jnp.stack(ln1b_l),
        wi_t=jnp.stack(wi_l).astype(jnp.bfloat16), bi=jnp.stack(bi_l),
        wf_t=jnp.stack(wf_l).astype(jnp.bfloat16), bf=jnp.stack(bf_l),
        ln2_g=jnp.stack(ln2g_l), ln2_b=jnp.stack(ln2b_l))

    # LSTM: lane-interleaved gate layout [i_f|i_b|f_f|f_b|g_f|g_b|o_f|o_b] and block-diagonal
    # W_hh so both directions share one lane-dense matmul per step; both layers stacked (same I).
    H = LSTM_HIDDEN
    wih_l, whh_l, b_l = [], [], []
    for layer in params["lstm"]:
        fw, bw = layer["fwd"], layer["bwd"]
        I = fw["w_ih"].shape[1]
        wih_l.append(jnp.stack([fw["w_ih"].T.reshape(I, 4, H),
                                bw["w_ih"].T.reshape(I, 4, H)], axis=2).reshape(I, 8 * H))
        b_l.append(jnp.stack([fw["b"].reshape(4, H),
                              bw["b"].reshape(4, H)], axis=1).reshape(1, 8 * H))
        whh4 = jnp.zeros((2 * H, 4, 2, H), jnp.float32)
        whh4 = whh4.at[:H, :, 0, :].set(fw["w_hh"].T.reshape(H, 4, H))
        whh4 = whh4.at[H:, :, 1, :].set(bw["w_hh"].T.reshape(H, 4, H))
        whh_l.append(whh4.reshape(2 * H, 8 * H))

    # classifier: transpose once and pad TAGSET -> 128 lanes (lane-dense stores in-kernel)
    fc_w_t = jnp.zeros((2 * H, TAG_PAD), jnp.float32).at[:, :TAGSET].set(params["fc_w"].T)
    fc_b = jnp.zeros((1, TAG_PAD), jnp.float32).at[0, :TAGSET].set(params["fc_b"])
    return dict(bert=pbert,
                lstm_wih=jnp.stack(wih_l), lstm_b=jnp.stack(b_l), lstm_whh=jnp.stack(whh_l),
                fc_w_t=fc_w_t, fc_b=fc_b)


# ----------------------------- deterministic params ------------------------------
def init_params(key):
    def nrm(k, shape, scale=0.02):
        return scale * jax.random.normal(k, shape, jnp.float32)

    keys = iter(jax.random.split(key, 256))
    bert = dict(
        word_emb=nrm(next(keys), (VOCAB_SIZE, HIDDEN)),
        pos_emb=nrm(next(keys), (MAX_POS, HIDDEN)),
        type_emb=nrm(next(keys), (2, HIDDEN)),
        emb_ln_g=jnp.ones((HIDDEN,), jnp.float32),
        emb_ln_b=jnp.zeros((HIDDEN,), jnp.float32),
        layers=[],
    )
    for _ in range(NUM_LAYERS):
        bert["layers"].append(dict(
            wq=nrm(next(keys), (HIDDEN, HIDDEN)), bq=jnp.zeros((HIDDEN,), jnp.float32),
            wk=nrm(next(keys), (HIDDEN, HIDDEN)), bk=jnp.zeros((HIDDEN,), jnp.float32),
            wv=nrm(next(keys), (HIDDEN, HIDDEN)), bv=jnp.zeros((HIDDEN,), jnp.float32),
            wo=nrm(next(keys), (HIDDEN, HIDDEN)), bo=jnp.zeros((HIDDEN,), jnp.float32),
            ln1_g=jnp.ones((HIDDEN,), jnp.float32), ln1_b=jnp.zeros((HIDDEN,), jnp.float32),
            wi=nrm(next(keys), (INTERMEDIATE, HIDDEN)), bi=jnp.zeros((INTERMEDIATE,), jnp.float32),
            wf=nrm(next(keys), (HIDDEN, INTERMEDIATE)), bf=jnp.zeros((HIDDEN,), jnp.float32),
            ln2_g=jnp.ones((HIDDEN,), jnp.float32), ln2_b=jnp.zeros((HIDDEN,), jnp.float32),
        ))
    lstm = []
    in_size = HIDDEN
    for _ in range(2):                                             # num_layers=2
        layer = {}
        for d in ("fwd", "bwd"):                                   # bidirectional
            layer[d] = dict(
                w_ih=nrm(next(keys), (4 * LSTM_HIDDEN, in_size), 0.05),
                w_hh=nrm(next(keys), (4 * LSTM_HIDDEN, LSTM_HIDDEN), 0.05),
                b=nrm(next(keys), (4 * LSTM_HIDDEN,), 0.05),       # b_ih + b_hh combined
            )
        lstm.append(layer)
        in_size = 2 * LSTM_HIDDEN
    fc_w = nrm(next(keys), (TAGSET, 2 * LSTM_HIDDEN))
    fc_b = jnp.zeros((TAGSET,), jnp.float32)
    return dict(bert=bert, lstm=lstm, fc_w=fc_w, fc_b=fc_b)


# ----------------------------- main ---------------------------------------------
if __name__ == "__main__":
    key = jax.random.PRNGKey(0)
    kp, kx, ky = jax.random.split(key, 3)
    params = init_params(kp)
    prep = prepare_params(params)                                  # one-time weight prep

    N, T = 2, 8
    x = jax.random.randint(kx, (N, T), 0, VOCAB_SIZE, dtype=jnp.int32)
    y = jax.random.randint(ky, (N, T), 0, TAGSET, dtype=jnp.int32)
    seqlens = jnp.array([8, 5], dtype=jnp.int32)                   # maxlen == T

    forward = jax.jit(net_forward)
    logits, y_out, y_hat = forward(prep, x, y, seqlens)
    jax.block_until_ready((logits, y_out, y_hat))

    assert logits.shape == (N, T, TAGSET)
    assert y_out.shape == (N, T)
    assert y_hat.shape == (N, T)
    print("KERNEL_OK")
</pallas_src>

<mosaic_0001>
module attributes {stable_mosaic.version = 11 : i64} {
  func.func @_bert_stack_kernel(%arg0: i32, %arg1: memref<1x8x128xf32, #tpu.memory_space<vmem>>, %arg2: memref<1x1x8xf32, #tpu.memory_space<vmem>>, %arg3: memref<1x128xf32, #tpu.memory_space<vmem>>, %arg4: memref<1x128xf32, #tpu.memory_space<vmem>>, %arg5: memref<2x128x768xbf16, #tpu.memory_space<vmem>>, %arg6: memref<2x1x768xf32, #tpu.memory_space<vmem>>, %arg7: memref<2x256x128xbf16, #tpu.memory_space<vmem>>, %arg8: memref<2x1x128xf32, #tpu.memory_space<vmem>>, %arg9: memref<2x1x128xf32, #tpu.memory_space<vmem>>, %arg10: memref<2x1x128xf32, #tpu.memory_space<vmem>>, %arg11: memref<2x128x256xbf16, #tpu.memory_space<vmem>>, %arg12: memref<2x1x256xf32, #tpu.memory_space<vmem>>, %arg13: memref<2x256x128xbf16, #tpu.memory_space<vmem>>, %arg14: memref<2x1x128xf32, #tpu.memory_space<vmem>>, %arg15: memref<2x1x128xf32, #tpu.memory_space<vmem>>, %arg16: memref<2x1x128xf32, #tpu.memory_space<vmem>>, %arg17: memref<1x8x128xf32, #tpu.memory_space<vmem>>) attributes {dimension_semantics = [#tpu.dimension_semantics<parallel>], iteration_bounds = array<i64: 2>, scalar_prefetch = 0 : i64, scratch_operands = 0 : i64, tpu.core_type = #tpu.core_type<tc>, window_params = [{transform_indices = @transform_0, window_bounds = array<i64: 1, 8, 128>}, {transform_indices = @transform_1, window_bounds = array<i64: 1, 1, 8>}, {pipeline_mode = #tpu.pipeline_mode<synchronous>, transform_indices = @transform_2, window_bounds = array<i64: 1, 128>}, {pipeline_mode = #tpu.pipeline_mode<synchronous>, transform_indices = @transform_3, window_bounds = array<i64: 1, 128>}, {pipeline_mode = #tpu.pipeline_mode<synchronous>, transform_indices = @transform_4, window_bounds = array<i64: 2, 128, 768>}, {pipeline_mode = #tpu.pipeline_mode<synchronous>, transform_indices = @transform_5, window_bounds = array<i64: 2, 1, 768>}, {pipeline_mode = #tpu.pipeline_mode<synchronous>, transform_indices = @transform_6, window_bounds = array<i64: 2, 256, 128>}, {pipeline_mode = #tpu.pipeline_mode<synchronous>, transform_indices = @transform_7, window_bounds = array<i64: 2, 1, 128>}, {pipeline_mode = #tpu.pipeline_mode<synchronous>, transform_indices = @transform_8, window_bounds = array<i64: 2, 1, 128>}, {pipeline_mode = #tpu.pipeline_mode<synchronous>, transform_indices = @transform_9, window_bounds = array<i64: 2, 1, 128>}, {pipeline_mode = #tpu.pipeline_mode<synchronous>, transform_indices = @transform_10, window_bounds = array<i64: 2, 128, 256>}, {pipeline_mode = #tpu.pipeline_mode<synchronous>, transform_indices = @transform_11, window_bounds = array<i64: 2, 1, 256>}, {pipeline_mode = #tpu.pipeline_mode<synchronous>, transform_indices = @transform_12, window_bounds = array<i64: 2, 256, 128>}, {pipeline_mode = #tpu.pipeline_mode<synchronous>, transform_indices = @transform_13, window_bounds = array<i64: 2, 1, 128>}, {pipeline_mode = #tpu.pipeline_mode<synchronous>, transform_indices = @transform_14, window_bounds = array<i64: 2, 1, 128>}, {pipeline_mode = #tpu.pipeline_mode<synchronous>, transform_indices = @transform_15, window_bounds = array<i64: 2, 1, 128>}, {transform_indices = @transform_16, window_bounds = array<i64: 1, 8, 128>}]} {
    %c0 = arith.constant 0 : index
    %c0_0 = arith.constant 0 : index
    %c0_1 = arith.constant 0 : index
    %0 = vector.load %arg1[%c0, %c0_0, %c0_1] : memref<1x8x128xf32, #tpu.memory_space<vmem>>, vector<1x8x128xf32>
    %1 = vector.shape_cast %0 : vector<1x8x128xf32> to vector<8x128xf32>
    %c0_2 = arith.constant 0 : index
    %c0_3 = arith.constant 0 : index
    %2 = vector.load %arg3[%c0_2, %c0_3] : memref<1x128xf32, #tpu.memory_space<vmem>>, vector<1x128xf32>
    %c0_4 = arith.constant 0 : index
    %c0_5 = arith.constant 0 : index
    %3 = vector.load %arg4[%c0_4, %c0_5] : memref<1x128xf32, #tpu.memory_space<vmem>>, vector<1x128xf32>
    %cst = arith.constant dense<0.000000e+00> : vector<8xf32>
    %4 = vector.multi_reduction <add>, %1, %cst [1] : vector<8x128xf32> to vector<8xf32>
    %5 = vector.shape_cast %4 : vector<8xf32> to vector<8x1xf32>
    %cst_6 = arith.constant 1.280000e+02 : f32
    %6 = vector.broadcast %cst_6 : f32 to vector<8x1xf32>
    %7 = arith.divf %5, %6 : vector<8x1xf32>
    %8 = vector.broadcast %7 : vector<8x1xf32> to vector<8x128xf32>
    %9 = arith.subf %1, %8 : vector<8x128xf32>
    %10 = arith.mulf %9, %9 : vector<8x128xf32>
    %cst_7 = arith.constant dense<0.000000e+00> : vector<8xf32>
    %11 = vector.multi_reduction <add>, %10, %cst_7 [1] : vector<8x128xf32> to vector<8xf32>
    %12 = vector.shape_cast %11 : vector<8xf32> to vector<8x1xf32>
    %cst_8 = arith.constant 1.280000e+02 : f32
    %13 = vector.broadcast %cst_8 : f32 to vector<8x1xf32>
    %14 = arith.divf %12, %13 : vector<8x1xf32>
    %cst_9 = arith.constant 9.99999996E-13 : f32
    %15 = vector.broadcast %cst_9 : f32 to vector<8x1xf32>
    %16 = arith.addf %14, %15 : vector<8x1xf32>
    %17 = math.rsqrt %16 : vector<8x1xf32>
    %18 = vector.broadcast %17 : vector<8x1xf32> to vector<8x128xf32>
    %19 = arith.mulf %9, %18 : vector<8x128xf32>
    %20 = vector.broadcast %2 : vector<1x128xf32> to vector<8x128xf32>
    %21 = arith.mulf %19, %20 : vector<8x128xf32>
    %22 = vector.broadcast %3 : vector<1x128xf32> to vector<8x128xf32>
    %23 = arith.addf %21, %22 : vector<8x128xf32>
    %c0_10 = arith.constant 0 : index
    %c0_11 = arith.constant 0 : index
    %c0_12 = arith.constant 0 : index
    %24 = vector.load %arg2[%c0_10, %c0_11, %c0_12] : memref<1x1x8xf32, #tpu.memory_space<vmem>>, vector<1x1x8xf32>
    %25 = vector.shape_cast %24 : vector<1x1x8xf32> to vector<1x8xf32>
    %cst_13 = arith.constant 1.000000e+00 : f32
    %26 = vector.broadcast %cst_13 : f32 to vector<1x8xf32>
    %27 = arith.subf %26, %25 : vector<1x8xf32>
    %cst_14 = arith.constant -1.000000e+04 : f32
    %28 = vector.broadcast %cst_14 : f32 to vector<1x8xf32>
    %29 = arith.mulf %27, %28 : vector<1x8xf32>
    %30 = arith.truncf %23 : vector<8x128xf32> to vector<8x128xbf16>
    %c0_15 = arith.constant 0 : index
    %c0_16 = arith.constant 0 : index
    %c0_17 = arith.constant 0 : index
    %31 = vector.load %arg5[%c0_15, %c0_16, %c0_17] : memref<2x128x768xbf16, #tpu.memory_space<vmem>>, vector<1x128x768xbf16>
    %32 = vector.shape_cast %31 : vector<1x128x768xbf16> to vector<128x768xbf16>
    %cst_18 = arith.constant dense<0.000000e+00> : vector<8x768xf32>
    %33 = tpu.matmul %30, %32, %cst_18 {dimension_numbers = #tpu.dot_dimension_numbers<[1], [0], [0], [1], [0, 0, 1, 1], [], []>} : vector<8x128xbf16>, vector<128x768xbf16>, vector<8x768xf32> -> vector<8x768xf32>
    %c0_19 = arith.constant 0 : index
    %c0_20 = arith.constant 0 : index
    %c0_21 = arith.constant 0 : index
    %34 = vector.load %arg6[%c0_19, %c0_20, %c0_21] : memref<2x1x768xf32, #tpu.memory_space<vmem>>, vector<1x1x768xf32>
    %35 = vector.shape_cast %34 : vector<1x1x768xf32> to vector<1x768xf32>
    %36 = vector.broadcast %35 : vector<1x768xf32> to vector<8x768xf32>
    %37 = arith.addf %33, %36 : vector<8x768xf32>
    %38 = vector.extract_strided_slice %37 {offsets = [0, 0], sizes = [8, 128], strides = [1, 1]} : vector<8x768xf32> to vector<8x128xf32>
    %39 = vector.extract_strided_slice %37 {offsets = [0, 128], sizes = [8, 128], strides = [1, 1]} : vector<8x768xf32> to vector<8x128xf32>
    %40 = vector.extract_strided_slice %37 {offsets = [0, 256], sizes = [8, 128], strides = [1, 1]} : vector<8x768xf32> to vector<8x128xf32>
    %41 = vector.extract_strided_slice %37 {offsets = [0, 384], sizes = [8, 128], strides = [1, 1]} : vector<8x768xf32> to vector<8x128xf32>
    %42 = vector.extract_strided_slice %37 {offsets = [0, 512], sizes = [8, 128], strides = [1, 1]} : vector<8x768xf32> to vector<8x128xf32>
    %43 = vector.extract_strided_slice %37 {offsets = [0, 640], sizes = [8, 128], strides = [1, 1]} : vector<8x768xf32> to vector<8x128xf32>
    %44 = arith.truncf %38 : vector<8x128xf32> to vector<8x128xbf16>
    %45 = arith.truncf %40 : vector<8x128xf32> to vector<8x128xbf16>
    "tpu.trace_start"() <{level = 10 : i32, message = "qd,kd->qk"}> : () -> ()
    %cst_22 = arith.constant dense<0.000000e+00> : vector<8x8xf32>
    %46 = tpu.matmul %44, %45, %cst_22 {dimension_numbers = #tpu.dot_dimension_numbers<[1], [1], [0], [0], [0, 0, 1, 0], [], []>} : vector<8x128xbf16>, vector<8x128xbf16>, vector<8x8xf32> -> vector<8x8xf32>
    "tpu.trace_stop"() : () -> ()
    %47 = arith.truncf %39 : vector<8x128xf32> to vector<8x128xbf16>
    %48 = arith.truncf %41 : vector<8x128xf32> to vector<8x128xbf16>
    "tpu.trace_start"() <{level = 10 : i32, message = "qd,kd->qk"}> : () -> ()
    %cst_23 = arith.constant dense<0.000000e+00> : vector<8x8xf32>
    %49 = tpu.matmul %47, %48, %cst_23 {dimension_numbers = #tpu.dot_dimension_numbers<[1], [1], [0], [0], [0, 0, 1, 0], [], []>} : vector<8x128xbf16>, vector<8x128xbf16>, vector<8x8xf32> -> vector<8x8xf32>
    "tpu.trace_stop"() : () -> ()
    %50 = tpu.concatenate %46, %49 in 0 : vector<8x8xf32>, vector<8x8xf32> -> vector<16x8xf32>
    %cst_24 = arith.constant 1.250000e-01 : f32
    %51 = vector.broadcast %cst_24 : f32 to vector<16x8xf32>
    %52 = arith.mulf %50, %51 : vector<16x8xf32>
    %53 = vector.broadcast %29 : vector<1x8xf32> to vector<16x8xf32>
    %54 = arith.addf %52, %53 : vector<16x8xf32>
    %cst_25 = arith.constant dense<0xFF800000> : vector<16xf32>
    %55 = vector.multi_reduction <maximumf>, %54, %cst_25 [1] : vector<16x8xf32> to vector<16xf32>
    %56 = vector.shape_cast %55 : vector<16xf32> to vector<16x1xf32>
    %57 = vector.broadcast %56 : vector<16x1xf32> to vector<16x8xf32>
    %58 = arith.subf %54, %57 : vector<16x8xf32>
    %59 = math.exp %58 : vector<16x8xf32>
    %cst_26 = arith.constant dense<0.000000e+00> : vector<16xf32>
    %60 = vector.multi_reduction <add>, %59, %cst_26 [1] : vector<16x8xf32> to vector<16xf32>
    %61 = vector.shape_cast %60 : vector<16xf32> to vector<16x1xf32>
    %62 = tpu.reciprocal %61 {approx = true} : vector<16x1xf32> -> vector<16x1xf32>
    %63 = vector.broadcast %62 : vector<16x1xf32> to vector<16x8xf32>
    %64 = arith.mulf %59, %63 : vector<16x8xf32>
    %65 = vector.extract_strided_slice %64 {offsets = [0, 0], sizes = [8, 8], strides = [1, 1]} : vector<16x8xf32> to vector<8x8xf32>
    %66 = arith.truncf %65 : vector<8x8xf32> to vector<8x8xbf16>
    %67 = arith.truncf %42 : vector<8x128xf32> to vector<8x128xbf16>
    %cst_27 = arith.constant dense<0.000000e+00> : vector<8x128xf32>
    %68 = tpu.matmul %66, %67, %cst_27 {dimension_numbers = #tpu.dot_dimension_numbers<[1], [0], [0], [1], [0, 0, 1, 1], [], []>} : vector<8x8xbf16>, vector<8x128xbf16>, vector<8x128xf32> -> vector<8x128xf32>
    %69 = vector.extract_strided_slice %64 {offsets = [8, 0], sizes = [8, 8], strides = [1, 1]} : vector<16x8xf32> to vector<8x8xf32>
    %70 = arith.truncf %69 : vector<8x8xf32> to vector<8x8xbf16>
    %71 = arith.truncf %43 : vector<8x128xf32> to vector<8x128xbf16>
    %cst_28 = arith.constant dense<0.000000e+00> : vector<8x128xf32>
    %72 = tpu.matmul %70, %71, %cst_28 {dimension_numbers = #tpu.dot_dimension_numbers<[1], [0], [0], [1], [0, 0, 1, 1], [], []>} : vector<8x8xbf16>, vector<8x128xbf16>, vector<8x128xf32> -> vector<8x128xf32>
    %73 = tpu.concatenate %68, %72 in 1 : vector<8x128xf32>, vector<8x128xf32> -> vector<8x256xf32>
    %74 = arith.truncf %73 : vector<8x256xf32> to vector<8x256xbf16>
    %c0_29 = arith.constant 0 : index
    %c0_30 = arith.constant 0 : index
    %c0_31 = arith.constant 0 : index
    %75 = vector.load %arg7[%c0_29, %c0_30, %c0_31] : memref<2x256x128xbf16, #tpu.memory_space<vmem>>, vector<1x256x128xbf16>
    %76 = vector.shape_cast %75 : vector<1x256x128xbf16> to vector<256x128xbf16>
    %cst_32 = arith.constant dense<0.000000e+00> : vector<8x128xf32>
    %77 = tpu.matmul %74, %76, %cst_32 {dimension_numbers = #tpu.dot_dimension_numbers<[1], [0], [0], [1], [0, 0, 1, 1], [], []>} : vector<8x256xbf16>, vector<256x128xbf16>, vector<8x128xf32> -> vector<8x128xf32>
    %c0_33 = arith.constant 0 : index
    %c0_34 = arith.constant 0 : index
    %c0_35 = arith.constant 0 : index
    %78 = vector.load %arg8[%c0_33, %c0_34, %c0_35] : memref<2x1x128xf32, #tpu.memory_space<vmem>>, vector<1x1x128xf32>
    %79 = vector.shape_cast %78 : vector<1x1x128xf32> to vector<1x128xf32>
    %80 = vector.broadcast %79 : vector<1x128xf32> to vector<8x128xf32>
    %81 = arith.addf %77, %80 : vector<8x128xf32>
    %82 = arith.addf %81, %23 : vector<8x128xf32>
    %c0_36 = arith.constant 0 : index
    %c0_37 = arith.constant 0 : index
    %c0_38 = arith.constant 0 : index
    %83 = vector.load %arg9[%c0_36, %c0_37, %c0_38] : memref<2x1x128xf32, #tpu.memory_space<vmem>>, vector<1x1x128xf32>
    %84 = vector.shape_cast %83 : vector<1x1x128xf32> to vector<1x128xf32>
    %c0_39 = arith.constant 0 : index
    %c0_40 = arith.constant 0 : index
    %c0_41 = arith.constant 0 : index
    %85 = vector.load %arg10[%c0_39, %c0_40, %c0_41] : memref<2x1x128xf32, #tpu.memory_space<vmem>>, vector<1x1x128xf32>
    %86 = vector.shape_cast %85 : vector<1x1x128xf32> to vector<1x128xf32>
    %cst_42 = arith.constant dense<0.000000e+00> : vector<8xf32>
    %87 = vector.multi_reduction <add>, %82, %cst_42 [1] : vector<8x128xf32> to vector<8xf32>
    %88 = vector.shape_cast %87 : vector<8xf32> to vector<8x1xf32>
    %cst_43 = arith.constant 1.280000e+02 : f32
    %89 = vector.broadcast %cst_43 : f32 to vector<8x1xf32>
    %90 = arith.divf %88, %89 : vector<8x1xf32>
    %91 = vector.broadcast %90 : vector<8x1xf32> to vector<8x128xf32>
    %92 = arith.subf %82, %91 : vector<8x128xf32>
    %93 = arith.mulf %92, %92 : vector<8x128xf32>
    %cst_44 = arith.constant dense<0.000000e+00> : vector<8xf32>
    %94 = vector.multi_reduction <add>, %93, %cst_44 [1] : vector<8x128xf32> to vector<8xf32>
    %95 = vector.shape_cast %94 : vector<8xf32> to vector<8x1xf32>
    %cst_45 = arith.constant 1.280000e+02 : f32
    %96 = vector.broadcast %cst_45 : f32 to vector<8x1xf32>
    %97 = arith.divf %95, %96 : vector<8x1xf32>
    %cst_46 = arith.constant 9.99999996E-13 : f32
    %98 = vector.broadcast %cst_46 : f32 to vector<8x1xf32>
    %99 = arith.addf %97, %98 : vector<8x1xf32>
    %100 = math.rsqrt %99 : vector<8x1xf32>
    %101 = vector.broadcast %100 : vector<8x1xf32> to vector<8x128xf32>
    %102 = arith.mulf %92, %101 : vector<8x128xf32>
    %103 = vector.broadcast %84 : vector<1x128xf32> to vector<8x128xf32>
    %104 = arith.mulf %102, %103 : vector<8x128xf32>
    %105 = vector.broadcast %86 : vector<1x128xf32> to vector<8x128xf32>
    %106 = arith.addf %104, %105 : vector<8x128xf32>
    %107 = arith.truncf %106 : vector<8x128xf32> to vector<8x128xbf16>
    %c0_47 = arith.constant 0 : index
    %c0_48 = arith.constant 0 : index
    %c0_49 = arith.constant 0 : index
    %108 = vector.load %arg11[%c0_47, %c0_48, %c0_49] : memref<2x128x256xbf16, #tpu.memory_space<vmem>>, vector<1x128x256xbf16>
    %109 = vector.shape_cast %108 : vector<1x128x256xbf16> to vector<128x256xbf16>
    %cst_50 = arith.constant dense<0.000000e+00> : vector<8x256xf32>
    %110 = tpu.matmul %107, %109, %cst_50 {dimension_numbers = #tpu.dot_dimension_numbers<[1], [0], [0], [1], [0, 0, 1, 1], [], []>} : vector<8x128xbf16>, vector<128x256xbf16>, vector<8x256xf32> -> vector<8x256xf32>
    %c0_51 = arith.constant 0 : index
    %c0_52 = arith.constant 0 : index
    %c0_53 = arith.constant 0 : index
    %111 = vector.load %arg12[%c0_51, %c0_52, %c0_53] : memref<2x1x256xf32, #tpu.memory_space<vmem>>, vector<1x1x256xf32>
    %112 = vector.shape_cast %111 : vector<1x1x256xf32> to vector<1x256xf32>
    %113 = vector.broadcast %112 : vector<1x256xf32> to vector<8x256xf32>
    %114 = arith.addf %110, %113 : vector<8x256xf32>
    %cst_54 = arith.constant 5.000000e-01 : f32
    %115 = vector.broadcast %cst_54 : f32 to vector<8x256xf32>
    %116 = arith.mulf %115, %114 : vector<8x256xf32>
    %cst_55 = arith.constant 0.707106769 : f32
    %117 = vector.broadcast %cst_55 : f32 to vector<8x256xf32>
    %118 = arith.mulf %114, %117 : vector<8x256xf32>
    %119 = math.erf %118 : vector<8x256xf32>
    %cst_56 = arith.constant 1.000000e+00 : f32
    %120 = vector.broadcast %cst_56 : f32 to vector<8x256xf32>
    %121 = arith.addf %120, %119 : vector<8x256xf32>
    %122 = arith.mulf %116, %121 : vector<8x256xf32>
    %123 = arith.truncf %122 : vector<8x256xf32> to vector<8x256xbf16>
    %c0_57 = arith.constant 0 : index
    %c0_58 = arith.constant 0 : index
    %c0_59 = arith.constant 0 : index
    %124 = vector.load %arg13[%c0_57, %c0_58, %c0_59] : memref<2x256x128xbf16, #tpu.memory_space<vmem>>, vector<1x256x128xbf16>
    %125 = vector.shape_cast %124 : vector<1x256x128xbf16> to vector<256x128xbf16>
    %cst_60 = arith.constant dense<0.000000e+00> : vector<8x128xf32>
    %126 = tpu.matmul %123, %125, %cst_60 {dimension_numbers = #tpu.dot_dimension_numbers<[1], [0], [0], [1], [0, 0, 1, 1], [], []>} : vector<8x256xbf16>, vector<256x128xbf16>, vector<8x128xf32> -> vector<8x128xf32>
    %c0_61 = arith.constant 0 : index
    %c0_62 = arith.constant 0 : index
    %c0_63 = arith.constant 0 : index
    %127 = vector.load %arg14[%c0_61, %c0_62, %c0_63] : memref<2x1x128xf32, #tpu.memory_space<vmem>>, vector<1x1x128xf32>
    %128 = vector.shape_cast %127 : vector<1x1x128xf32> to vector<1x128xf32>
    %129 = vector.broadcast %128 : vector<1x128xf32> to vector<8x128xf32>
    %130 = arith.addf %126, %129 : vector<8x128xf32>
    %131 = arith.addf %130, %106 : vector<8x128xf32>
    %c0_64 = arith.constant 0 : index
    %c0_65 = arith.constant 0 : index
    %c0_66 = arith.constant 0 : index
    %132 = vector.load %arg15[%c0_64, %c0_65, %c0_66] : memref<2x1x128xf32, #tpu.memory_space<vmem>>, vector<1x1x128xf32>
    %133 = vector.shape_cast %132 : vector<1x1x128xf32> to vector<1x128xf32>
    %c0_67 = arith.constant 0 : index
    %c0_68 = arith.constant 0 : index
    %c0_69 = arith.constant 0 : index
    %134 = vector.load %arg16[%c0_67, %c0_68, %c0_69] : memref<2x1x128xf32, #tpu.memory_space<vmem>>, vector<1x1x128xf32>
    %135 = vector.shape_cast %134 : vector<1x1x128xf32> to vector<1x128xf32>
    %cst_70 = arith.constant dense<0.000000e+00> : vector<8xf32>
    %136 = vector.multi_reduction <add>, %131, %cst_70 [1] : vector<8x128xf32> to vector<8xf32>
    %137 = vector.shape_cast %136 : vector<8xf32> to vector<8x1xf32>
    %cst_71 = arith.constant 1.280000e+02 : f32
    %138 = vector.broadcast %cst_71 : f32 to vector<8x1xf32>
    %139 = arith.divf %137, %138 : vector<8x1xf32>
    %140 = vector.broadcast %139 : vector<8x1xf32> to vector<8x128xf32>
    %141 = arith.subf %131, %140 : vector<8x128xf32>
    %142 = arith.mulf %141, %141 : vector<8x128xf32>
    %cst_72 = arith.constant dense<0.000000e+00> : vector<8xf32>
    %143 = vector.multi_reduction <add>, %142, %cst_72 [1] : vector<8x128xf32> to vector<8xf32>
    %144 = vector.shape_cast %143 : vector<8xf32> to vector<8x1xf32>
    %cst_73 = arith.constant 1.280000e+02 : f32
    %145 = vector.broadcast %cst_73 : f32 to vector<8x1xf32>
    %146 = arith.divf %144, %145 : vector<8x1xf32>
    %cst_74 = arith.constant 9.99999996E-13 : f32
    %147 = vector.broadcast %cst_74 : f32 to vector<8x1xf32>
    %148 = arith.addf %146, %147 : vector<8x1xf32>
    %149 = math.rsqrt %148 : vector<8x1xf32>
    %150 = vector.broadcast %149 : vector<8x1xf32> to vector<8x128xf32>
    %151 = arith.mulf %141, %150 : vector<8x128xf32>
    %152 = vector.broadcast %133 : vector<1x128xf32> to vector<8x128xf32>
    %153 = arith.mulf %151, %152 : vector<8x128xf32>
    %154 = vector.broadcast %135 : vector<1x128xf32> to vector<8x128xf32>
    %155 = arith.addf %153, %154 : vector<8x128xf32>
    %156 = arith.truncf %155 : vector<8x128xf32> to vector<8x128xbf16>
    %c1 = arith.constant 1 : index
    %c0_75 = arith.constant 0 : index
    %c0_76 = arith.constant 0 : index
    %157 = vector.load %arg5[%c1, %c0_75, %c0_76] : memref<2x128x768xbf16, #tpu.memory_space<vmem>>, vector<1x128x768xbf16>
    %158 = vector.shape_cast %157 : vector<1x128x768xbf16> to vector<128x768xbf16>
    %cst_77 = arith.constant dense<0.000000e+00> : vector<8x768xf32>
    %159 = tpu.matmul %156, %158, %cst_77 {dimension_numbers = #tpu.dot_dimension_numbers<[1], [0], [0], [1], [0, 0, 1, 1], [], []>} : vector<8x128xbf16>, vector<128x768xbf16>, vector<8x768xf32> -> vector<8x768xf32>
    %c1_78 = arith.constant 1 : index
    %c0_79 = arith.constant 0 : index
    %c0_80 = arith.constant 0 : index
    %160 = vector.load %arg6[%c1_78, %c0_79, %c0_80] : memref<2x1x768xf32, #tpu.memory_space<vmem>>, vector<1x1x768xf32>
    %161 = vector.shape_cast %160 : vector<1x1x768xf32> to vector<1x768xf32>
    %162 = vector.broadcast %161 : vector<1x768xf32> to vector<8x768xf32>
    %163 = arith.addf %159, %162 : vector<8x768xf32>
    %164 = vector.extract_strided_slice %163 {offsets = [0, 0], sizes = [8, 128], strides = [1, 1]} : vector<8x768xf32> to vector<8x128xf32>
    %165 = vector.extract_strided_slice %163 {offsets = [0, 128], sizes = [8, 128], strides = [1, 1]} : vector<8x768xf32> to vector<8x128xf32>
    %166 = vector.extract_strided_slice %163 {offsets = [0, 256], sizes = [8, 128], strides = [1, 1]} : vector<8x768xf32> to vector<8x128xf32>
    %167 = vector.extract_strided_slice %163 {offsets = [0, 384], sizes = [8, 128], strides = [1, 1]} : vector<8x768xf32> to vector<8x128xf32>
    %168 = vector.extract_strided_slice %163 {offsets = [0, 512], sizes = [8, 128], strides = [1, 1]} : vector<8x768xf32> to vector<8x128xf32>
    %169 = vector.extract_strided_slice %163 {offsets = [0, 640], sizes = [8, 128], strides = [1, 1]} : vector<8x768xf32> to vector<8x128xf32>
    %170 = arith.truncf %164 : vector<8x128xf32> to vector<8x128xbf16>
    %171 = arith.truncf %166 : vector<8x128xf32> to vector<8x128xbf16>
    "tpu.trace_start"() <{level = 10 : i32, message = "qd,kd->qk"}> : () -> ()
    %cst_81 = arith.constant dense<0.000000e+00> : vector<8x8xf32>
    %172 = tpu.matmul %170, %171, %cst_81 {dimension_numbers = #tpu.dot_dimension_numbers<[1], [1], [0], [0], [0, 0, 1, 0], [], []>} : vector<8x128xbf16>, vector<8x128xbf16>, vector<8x8xf32> -> vector<8x8xf32>
    "tpu.trace_stop"() : () -> ()
    %173 = arith.truncf %165 : vector<8x128xf32> to vector<8x128xbf16>
    %174 = arith.truncf %167 : vector<8x128xf32> to vector<8x128xbf16>
    "tpu.trace_start"() <{level = 10 : i32, message = "qd,kd->qk"}> : () -> ()
    %cst_82 = arith.constant dense<0.000000e+00> : vector<8x8xf32>
    %175 = tpu.matmul %173, %174, %cst_82 {dimension_numbers = #tpu.dot_dimension_numbers<[1], [1], [0], [0], [0, 0, 1, 0], [], []>} : vector<8x128xbf16>, vector<8x128xbf16>, vector<8x8xf32> -> vector<8x8xf32>
    "tpu.trace_stop"() : () -> ()
    %176 = tpu.concatenate %172, %175 in 0 : vector<8x8xf32>, vector<8x8xf32> -> vector<16x8xf32>
    %cst_83 = arith.constant 1.250000e-01 : f32
    %177 = vector.broadcast %cst_83 : f32 to vector<16x8xf32>
    %178 = arith.mulf %176, %177 : vector<16x8xf32>
    %179 = vector.broadcast %29 : vector<1x8xf32> to vector<16x8xf32>
    %180 = arith.addf %178, %179 : vector<16x8xf32>
    %cst_84 = arith.constant dense<0xFF800000> : vector<16xf32>
    %181 = vector.multi_reduction <maximumf>, %180, %cst_84 [1] : vector<16x8xf32> to vector<16xf32>
    %182 = vector.shape_cast %181 : vector<16xf32> to vector<16x1xf32>
    %183 = vector.broadcast %182 : vector<16x1xf32> to vector<16x8xf32>
    %184 = arith.subf %180, %183 : vector<16x8xf32>
    %185 = math.exp %184 : vector<16x8xf32>
    %cst_85 = arith.constant dense<0.000000e+00> : vector<16xf32>
    %186 = vector.multi_reduction <add>, %185, %cst_85 [1] : vector<16x8xf32> to vector<16xf32>
    %187 = vector.shape_cast %186 : vector<16xf32> to vector<16x1xf32>
    %188 = tpu.reciprocal %187 {approx = true} : vector<16x1xf32> -> vector<16x1xf32>
    %189 = vector.broadcast %188 : vector<16x1xf32> to vector<16x8xf32>
    %190 = arith.mulf %185, %189 : vector<16x8xf32>
    %191 = vector.extract_strided_slice %190 {offsets = [0, 0], sizes = [8, 8], strides = [1, 1]} : vector<16x8xf32> to vector<8x8xf32>
    %192 = arith.truncf %191 : vector<8x8xf32> to vector<8x8xbf16>
    %193 = arith.truncf %168 : vector<8x128xf32> to vector<8x128xbf16>
    %cst_86 = arith.constant dense<0.000000e+00> : vector<8x128xf32>
    %194 = tpu.matmul %192, %193, %cst_86 {dimension_numbers = #tpu.dot_dimension_numbers<[1], [0], [0], [1], [0, 0, 1, 1], [], []>} : vector<8x8xbf16>, vector<8x128xbf16>, vector<8x128xf32> -> vector<8x128xf32>
    %195 = vector.extract_strided_slice %190 {offsets = [8, 0], sizes = [8, 8], strides = [1, 1]} : vector<16x8xf32> to vector<8x8xf32>
    %196 = arith.truncf %195 : vector<8x8xf32> to vector<8x8xbf16>
    %197 = arith.truncf %169 : vector<8x128xf32> to vector<8x128xbf16>
    %cst_87 = arith.constant dense<0.000000e+00> : vector<8x128xf32>
    %198 = tpu.matmul %196, %197, %cst_87 {dimension_numbers = #tpu.dot_dimension_numbers<[1], [0], [0], [1], [0, 0, 1, 1], [], []>} : vector<8x8xbf16>, vector<8x128xbf16>, vector<8x128xf32> -> vector<8x128xf32>
    %199 = tpu.concatenate %194, %198 in 1 : vector<8x128xf32>, vector<8x128xf32> -> vector<8x256xf32>
    %200 = arith.truncf %199 : vector<8x256xf32> to vector<8x256xbf16>
    %c1_88 = arith.constant 1 : index
    %c0_89 = arith.constant 0 : index
    %c0_90 = arith.constant 0 : index
    %201 = vector.load %arg7[%c1_88, %c0_89, %c0_90] : memref<2x256x128xbf16, #tpu.memory_space<vmem>>, vector<1x256x128xbf16>
    %202 = vector.shape_cast %201 : vector<1x256x128xbf16> to vector<256x128xbf16>
    %cst_91 = arith.constant dense<0.000000e+00> : vector<8x128xf32>
    %203 = tpu.matmul %200, %202, %cst_91 {dimension_numbers = #tpu.dot_dimension_numbers<[1], [0], [0], [1], [0, 0, 1, 1], [], []>} : vector<8x256xbf16>, vector<256x128xbf16>, vector<8x128xf32> -> vector<8x128xf32>
    %c1_92 = arith.constant 1 : index
    %c0_93 = arith.constant 0 : index
    %c0_94 = arith.constant 0 : index
    %204 = vector.load %arg8[%c1_92, %c0_93, %c0_94] : memref<2x1x128xf32, #tpu.memory_space<vmem>>, vector<1x1x128xf32>
    %205 = vector.shape_cast %204 : vector<1x1x128xf32> to vector<1x128xf32>
    %206 = vector.broadcast %205 : vector<1x128xf32> to vector<8x128xf32>
    %207 = arith.addf %203, %206 : vector<8x128xf32>
    %208 = arith.addf %207, %155 : vector<8x128xf32>
    %c1_95 = arith.constant 1 : index
    %c0_96 = arith.constant 0 : index
    %c0_97 = arith.constant 0 : index
    %209 = vector.load %arg9[%c1_95, %c0_96, %c0_97] : memref<2x1x128xf32, #tpu.memory_space<vmem>>, vector<1x1x128xf32>
    %210 = vector.shape_cast %209 : vector<1x1x128xf32> to vector<1x128xf32>
    %c1_98 = arith.constant 1 : index
    %c0_99 = arith.constant 0 : index
    %c0_100 = arith.constant 0 : index
    %211 = vector.load %arg10[%c1_98, %c0_99, %c0_100] : memref<2x1x128xf32, #tpu.memory_space<vmem>>, vector<1x1x128xf32>
    %212 = vector.shape_cast %211 : vector<1x1x128xf32> to vector<1x128xf32>
    %cst_101 = arith.constant dense<0.000000e+00> : vector<8xf32>
    %213 = vector.multi_reduction <add>, %208, %cst_101 [1] : vector<8x128xf32> to vector<8xf32>
    %214 = vector.shape_cast %213 : vector<8xf32> to vector<8x1xf32>
    %cst_102 = arith.constant 1.280000e+02 : f32
    %215 = vector.broadcast %cst_102 : f32 to vector<8x1xf32>
    %216 = arith.divf %214, %215 : vector<8x1xf32>
    %217 = vector.broadcast %216 : vector<8x1xf32> to vector<8x128xf32>
    %218 = arith.subf %208, %217 : vector<8x128xf32>
    %219 = arith.mulf %218, %218 : vector<8x128xf32>
    %cst_103 = arith.constant dense<0.000000e+00> : vector<8xf32>
    %220 = vector.multi_reduction <add>, %219, %cst_103 [1] : vector<8x128xf32> to vector<8xf32>
    %221 = vector.shape_cast %220 : vector<8xf32> to vector<8x1xf32>
    %cst_104 = arith.constant 1.280000e+02 : f32
    %222 = vector.broadcast %cst_104 : f32 to vector<8x1xf32>
    %223 = arith.divf %221, %222 : vector<8x1xf32>
    %cst_105 = arith.constant 9.99999996E-13 : f32
    %224 = vector.broadcast %cst_105 : f32 to vector<8x1xf32>
    %225 = arith.addf %223, %224 : vector<8x1xf32>
    %226 = math.rsqrt %225 : vector<8x1xf32>
    %227 = vector.broadcast %226 : vector<8x1xf32> to vector<8x128xf32>
    %228 = arith.mulf %218, %227 : vector<8x128xf32>
    %229 = vector.broadcast %210 : vector<1x128xf32> to vector<8x128xf32>
    %230 = arith.mulf %228, %229 : vector<8x128xf32>
    %231 = vector.broadcast %212 : vector<1x128xf32> to vector<8x128xf32>
    %232 = arith.addf %230, %231 : vector<8x128xf32>
    %233 = arith.truncf %232 : vector<8x128xf32> to vector<8x128xbf16>
    %c1_106 = arith.constant 1 : index
    %c0_107 = arith.constant 0 : index
    %c0_108 = arith.constant 0 : index
    %234 = vector.load %arg11[%c1_106, %c0_107, %c0_108] : memref<2x128x256xbf16, #tpu.memory_space<vmem>>, vector<1x128x256xbf16>
    %235 = vector.shape_cast %234 : vector<1x128x256xbf16> to vector<128x256xbf16>
    %cst_109 = arith.constant dense<0.000000e+00> : vector<8x256xf32>
    %236 = tpu.matmul %233, %235, %cst_109 {dimension_numbers = #tpu.dot_dimension_numbers<[1], [0], [0], [1], [0, 0, 1, 1], [], []>} : vector<8x128xbf16>, vector<128x256xbf16>, vector<8x256xf32> -> vector<8x256xf32>
    %c1_110 = arith.constant 1 : index
    %c0_111 = arith.constant 0 : index
    %c0_112 = arith.constant 0 : index
    %237 = vector.load %arg12[%c1_110, %c0_111, %c0_112] : memref<2x1x256xf32, #tpu.memory_space<vmem>>, vector<1x1x256xf32>
    %238 = vector.shape_cast %237 : vector<1x1x256xf32> to vector<1x256xf32>
    %239 = vector.broadcast %238 : vector<1x256xf32> to vector<8x256xf32>
    %240 = arith.addf %236, %239 : vector<8x256xf32>
    %cst_113 = arith.constant 5.000000e-01 : f32
    %241 = vector.broadcast %cst_113 : f32 to vector<8x256xf32>
    %242 = arith.mulf %241, %240 : vector<8x256xf32>
    %cst_114 = arith.constant 0.707106769 : f32
    %243 = vector.broadcast %cst_114 : f32 to vector<8x256xf32>
    %244 = arith.mulf %240, %243 : vector<8x256xf32>
    %245 = math.erf %244 : vector<8x256xf32>
    %cst_115 = arith.constant 1.000000e+00 : f32
    %246 = vector.broadcast %cst_115 : f32 to vector<8x256xf32>
    %247 = arith.addf %246, %245 : vector<8x256xf32>
    %248 = arith.mulf %242, %247 : vector<8x256xf32>
    %249 = arith.truncf %248 : vector<8x256xf32> to vector<8x256xbf16>
    %c1_116 = arith.constant 1 : index
    %c0_117 = arith.constant 0 : index
    %c0_118 = arith.constant 0 : index
    %250 = vector.load %arg13[%c1_116, %c0_117, %c0_118] : memref<2x256x128xbf16, #tpu.memory_space<vmem>>, vector<1x256x128xbf16>
    %251 = vector.shape_cast %250 : vector<1x256x128xbf16> to vector<256x128xbf16>
    %cst_119 = arith.constant dense<0.000000e+00> : vector<8x128xf32>
    %252 = tpu.matmul %249, %251, %cst_119 {dimension_numbers = #tpu.dot_dimension_numbers<[1], [0], [0], [1], [0, 0, 1, 1], [], []>} : vector<8x256xbf16>, vector<256x128xbf16>, vector<8x128xf32> -> vector<8x128xf32>
    %c1_120 = arith.constant 1 : index
    %c0_121 = arith.constant 0 : index
    %c0_122 = arith.constant 0 : index
    %253 = vector.load %arg14[%c1_120, %c0_121, %c0_122] : memref<2x1x128xf32, #tpu.memory_space<vmem>>, vector<1x1x128xf32>
    %254 = vector.shape_cast %253 : vector<1x1x128xf32> to vector<1x128xf32>
    %255 = vector.broadcast %254 : vector<1x128xf32> to vector<8x128xf32>
    %256 = arith.addf %252, %255 : vector<8x128xf32>
    %257 = arith.addf %256, %232 : vector<8x128xf32>
    %c1_123 = arith.constant 1 : index
    %c0_124 = arith.constant 0 : index
    %c0_125 = arith.constant 0 : index
    %258 = vector.load %arg15[%c1_123, %c0_124, %c0_125] : memref<2x1x128xf32, #tpu.memory_space<vmem>>, vector<1x1x128xf32>
    %259 = vector.shape_cast %258 : vector<1x1x128xf32> to vector<1x128xf32>
    %c1_126 = arith.constant 1 : index
    %c0_127 = arith.constant 0 : index
    %c0_128 = arith.constant 0 : index
    %260 = vector.load %arg16[%c1_126, %c0_127, %c0_128] : memref<2x1x128xf32, #tpu.memory_space<vmem>>, vector<1x1x128xf32>
    %261 = vector.shape_cast %260 : vector<1x1x128xf32> to vector<1x128xf32>
    %cst_129 = arith.constant dense<0.000000e+00> : vector<8xf32>
    %262 = vector.multi_reduction <add>, %257, %cst_129 [1] : vector<8x128xf32> to vector<8xf32>
    %263 = vector.shape_cast %262 : vector<8xf32> to vector<8x1xf32>
    %cst_130 = arith.constant 1.280000e+02 : f32
    %264 = vector.broadcast %cst_130 : f32 to vector<8x1xf32>
    %265 = arith.divf %263, %264 : vector<8x1xf32>
    %266 = vector.broadcast %265 : vector<8x1xf32> to vector<8x128xf32>
    %267 = arith.subf %257, %266 : vector<8x128xf32>
    %268 = arith.mulf %267, %267 : vector<8x128xf32>
    %cst_131 = arith.constant dense<0.000000e+00> : vector<8xf32>
    %269 = vector.multi_reduction <add>, %268, %cst_131 [1] : vector<8x128xf32> to vector<8xf32>
    %270 = vector.shape_cast %269 : vector<8xf32> to vector<8x1xf32>
    %cst_132 = arith.constant 1.280000e+02 : f32
    %271 = vector.broadcast %cst_132 : f32 to vector<8x1xf32>
    %272 = arith.divf %270, %271 : vector<8x1xf32>
    %cst_133 = arith.constant 9.99999996E-13 : f32
    %273 = vector.broadcast %cst_133 : f32 to vector<8x1xf32>
    %274 = arith.addf %272, %273 : vector<8x1xf32>
    %275 = math.rsqrt %274 : vector<8x1xf32>
    %276 = vector.broadcast %275 : vector<8x1xf32> to vector<8x128xf32>
    %277 = arith.mulf %267, %276 : vector<8x128xf32>
    %278 = vector.broadcast %259 : vector<1x128xf32> to vector<8x128xf32>
    %279 = arith.mulf %277, %278 : vector<8x128xf32>
    %280 = vector.broadcast %261 : vector<1x128xf32> to vector<8x128xf32>
    %281 = arith.addf %279, %280 : vector<8x128xf32>
    %c0_134 = arith.constant 0 : index
    %c0_135 = arith.constant 0 : index
    %c0_136 = arith.constant 0 : index
    %282 = vector.load %arg17[%c0_134, %c0_135, %c0_136] : memref<1x8x128xf32, #tpu.memory_space<vmem>>, vector<1x8x128xf32>
    %283 = vector.shape_cast %282 : vector<1x8x128xf32> to vector<8x128xf32>
    %284 = vector.shape_cast %281 : vector<8x128xf32> to vector<1x8x128xf32>
    tpu.vector_store %arg17[%c0_134, %c0_135, %c0_136], %284 {strides = array<i32>} : memref<1x8x128xf32, #tpu.memory_space<vmem>>, vector<1x8x128xf32>,
    return
  }
  func.func @transform_0(%arg0: i32) -> (i32, i32, i32) {
    %c0_i32 = arith.constant 0 : i32
    %c0_i32_0 = arith.constant 0 : i32
    %c0_i32_1 = arith.constant 0 : i32
    return %arg0, %c0_i32, %c0_i32_0 : i32, i32, i32
  }
  func.func @transform_1(%arg0: i32) -> (i32, i32, i32) {
    %c0_i32 = arith.constant 0 : i32
    %c0_i32_0 = arith.constant 0 : i32
    %c0_i32_1 = arith.constant 0 : i32
    return %arg0, %c0_i32, %c0_i32_0 : i32, i32, i32
  }
  func.func @transform_2(%arg0: i32) -> (i32, i32) {
    %c0_i32 = arith.constant 0 : i32
    %c0_i32_0 = arith.constant 0 : i32
    %c0_i32_1 = arith.constant 0 : i32
    return %c0_i32, %c0_i32_0 : i32, i32
  }
  func.func @transform_3(%arg0: i32) -> (i32, i32) {
    %c0_i32 = arith.constant 0 : i32
    %c0_i32_0 = arith.constant 0 : i32
    %c0_i32_1 = arith.constant 0 : i32
    return %c0_i32, %c0_i32_0 : i32, i32
  }
  func.func @transform_4(%arg0: i32) -> (i32, i32, i32) {
    %c0_i32 = arith.constant 0 : i32
    %c0_i32_0 = arith.constant 0 : i32
    %c0_i32_1 = arith.constant 0 : i32
    %c0_i32_2 = arith.constant 0 : i32
    return %c0_i32, %c0_i32_0, %c0_i32_1 : i32, i32, i32
  }
  func.func @transform_5(%arg0: i32) -> (i32, i32, i32) {
    %c0_i32 = arith.constant 0 : i32
    %c0_i32_0 = arith.constant 0 : i32
    %c0_i32_1 = arith.constant 0 : i32
    %c0_i32_2 = arith.constant 0 : i32
    return %c0_i32, %c0_i32_0, %c0_i32_1 : i32, i32, i32
  }
  func.func @transform_6(%arg0: i32) -> (i32, i32, i32) {
    %c0_i32 = arith.constant 0 : i32
    %c0_i32_0 = arith.constant 0 : i32
    %c0_i32_1 = arith.constant 0 : i32
    %c0_i32_2 = arith.constant 0 : i32
    return %c0_i32, %c0_i32_0, %c0_i32_1 : i32, i32, i32
  }
  func.func @transform_7(%arg0: i32) -> (i32, i32, i32) {
    %c0_i32 = arith.constant 0 : i32
    %c0_i32_0 = arith.constant 0 : i32
    %c0_i32_1 = arith.constant 0 : i32
    %c0_i32_2 = arith.constant 0 : i32
    return %c0_i32, %c0_i32_0, %c0_i32_1 : i32, i32, i32
  }
  func.func @transform_8(%arg0: i32) -> (i32, i32, i32) {
    %c0_i32 = arith.constant 0 : i32
    %c0_i32_0 = arith.constant 0 : i32
    %c0_i32_1 = arith.constant 0 : i32
    %c0_i32_2 = arith.constant 0 : i32
    return %c0_i32, %c0_i32_0, %c0_i32_1 : i32, i32, i32
  }
  func.func @transform_9(%arg0: i32) -> (i32, i32, i32) {
    %c0_i32 = arith.constant 0 : i32
    %c0_i32_0 = arith.constant 0 : i32
    %c0_i32_1 = arith.constant 0 : i32
    %c0_i32_2 = arith.constant 0 : i32
    return %c0_i32, %c0_i32_0, %c0_i32_1 : i32, i32, i32
  }
  func.func @transform_10(%arg0: i32) -> (i32, i32, i32) {
    %c0_i32 = arith.constant 0 : i32
    %c0_i32_0 = arith.constant 0 : i32
    %c0_i32_1 = arith.constant 0 : i32
    %c0_i32_2 = arith.constant 0 : i32
    return %c0_i32, %c0_i32_0, %c0_i32_1 : i32, i32, i32
  }
  func.func @transform_11(%arg0: i32) -> (i32, i32, i32) {
    %c0_i32 = arith.constant 0 : i32
    %c0_i32_0 = arith.constant 0 : i32
    %c0_i32_1 = arith.constant 0 : i32
    %c0_i32_2 = arith.constant 0 : i32
    return %c0_i32, %c0_i32_0, %c0_i32_1 : i32, i32, i32
  }
  func.func @transform_12(%arg0: i32) -> (i32, i32, i32) {
    %c0_i32 = arith.constant 0 : i32
    %c0_i32_0 = arith.constant 0 : i32
    %c0_i32_1 = arith.constant 0 : i32
    %c0_i32_2 = arith.constant 0 : i32
    return %c0_i32, %c0_i32_0, %c0_i32_1 : i32, i32, i32
  }
  func.func @transform_13(%arg0: i32) -> (i32, i32, i32) {
    %c0_i32 = arith.constant 0 : i32
    %c0_i32_0 = arith.constant 0 : i32
    %c0_i32_1 = arith.constant 0 : i32
    %c0_i32_2 = arith.constant 0 : i32
    return %c0_i32, %c0_i32_0, %c0_i32_1 : i32, i32, i32
  }
  func.func @transform_14(%arg0: i32) -> (i32, i32, i32) {
    %c0_i32 = arith.constant 0 : i32
    %c0_i32_0 = arith.constant 0 : i32
    %c0_i32_1 = arith.constant 0 : i32
    %c0_i32_2 = arith.constant 0 : i32
    return %c0_i32, %c0_i32_0, %c0_i32_1 : i32, i32, i32
  }
  func.func @transform_15(%arg0: i32) -> (i32, i32, i32) {
    %c0_i32 = arith.constant 0 : i32
    %c0_i32_0 = arith.constant 0 : i32
    %c0_i32_1 = arith.constant 0 : i32
    %c0_i32_2 = arith.constant 0 : i32
    return %c0_i32, %c0_i32_0, %c0_i32_1 : i32, i32, i32
  }
  func.func @transform_16(%arg0: i32) -> (i32, i32, i32) {
    %c0_i32 = arith.constant 0 : i32
    %c0_i32_0 = arith.constant 0 : i32
    %c0_i32_1 = arith.constant 0 : i32
    return %arg0, %c0_i32, %c0_i32_0 : i32, i32, i32
  }
}

module attributes {stable_mosaic.version = 11 : i64} {
  func.func @_lstm_fc_kernel(%arg0: i32, %arg1: memref<2x8x128xf32, #tpu.memory_space<vmem>>, %arg2: memref<8x2x128xf32, #tpu.memory_space<vmem>>, %arg3: memref<2x128x512xf32, #tpu.memory_space<vmem>>, %arg4: memref<2x1x512xf32, #tpu.memory_space<vmem>>, %arg5: memref<2x128x512xf32, #tpu.memory_space<vmem>>, %arg6: memref<128x128xf32, #tpu.memory_space<vmem>>, %arg7: memref<1x128xf32, #tpu.memory_space<vmem>>, %arg8: memref<16x128xf32, #tpu.memory_space<vmem>>, %arg9: memref<16x1xi32, #tpu.memory_space<vmem>>) attributes {dimension_semantics = [#tpu.dimension_semantics<arbitrary>], iteration_bounds = array<i64: 1>, scalar_prefetch = 0 : i64, scratch_operands = 0 : i64, tpu.core_type = #tpu.core_type<tc>, window_params = [{pipeline_mode = #tpu.pipeline_mode<synchronous>, transform_indices = @transform_0, window_bounds = array<i64: 2, 8, 128>}, {pipeline_mode = #tpu.pipeline_mode<synchronous>, transform_indices = @transform_1, window_bounds = array<i64: 8, 2, 128>}, {pipeline_mode = #tpu.pipeline_mode<synchronous>, transform_indices = @transform_2, window_bounds = array<i64: 2, 128, 512>}, {pipeline_mode = #tpu.pipeline_mode<synchronous>, transform_indices = @transform_3, window_bounds = array<i64: 2, 1, 512>}, {pipeline_mode = #tpu.pipeline_mode<synchronous>, transform_indices = @transform_4, window_bounds = array<i64: 2, 128, 512>}, {pipeline_mode = #tpu.pipeline_mode<synchronous>, transform_indices = @transform_5, window_bounds = array<i64: 128, 128>}, {pipeline_mode = #tpu.pipeline_mode<synchronous>, transform_indices = @transform_6, window_bounds = array<i64: 1, 128>}, {pipeline_mode = #tpu.pipeline_mode<synchronous>, transform_indices = @transform_7, window_bounds = array<i64: 16, 128>}, {pipeline_mode = #tpu.pipeline_mode<synchronous>, transform_indices = @transform_8, window_bounds = array<i64: 16, 1>}]} {
    %c0 = arith.constant 0 : index
    %c0_0 = arith.constant 0 : index
    %c0_1 = arith.constant 0 : index
    %0 = vector.load %arg1[%c0, %c0_0, %c0_1] : memref<2x8x128xf32, #tpu.memory_space<vmem>>, vector<2x8x128xf32>
    %1 = vector.extract_strided_slice %0 {offsets = [0, 0, 0], sizes = [2, 1, 128], strides = [1, 1, 1]} : vector<2x8x128xf32> to vector<2x1x128xf32>
    %2 = vector.shape_cast %1 : vector<2x1x128xf32> to vector<2x128xf32>
    %3 = vector.extract_strided_slice %0 {offsets = [0, 1, 0], sizes = [2, 1, 128], strides = [1, 1, 1]} : vector<2x8x128xf32> to vector<2x1x128xf32>
    %4 = vector.shape_cast %3 : vector<2x1x128xf32> to vector<2x128xf32>
    %5 = vector.extract_strided_slice %0 {offsets = [0, 2, 0], sizes = [2, 1, 128], strides = [1, 1, 1]} : vector<2x8x128xf32> to vector<2x1x128xf32>
    %6 = vector.shape_cast %5 : vector<2x1x128xf32> to vector<2x128xf32>
    %7 = vector.extract_strided_slice %0 {offsets = [0, 3, 0], sizes = [2, 1, 128], strides = [1, 1, 1]} : vector<2x8x128xf32> to vector<2x1x128xf32>
    %8 = vector.shape_cast %7 : vector<2x1x128xf32> to vector<2x128xf32>
    %9 = vector.extract_strided_slice %0 {offsets = [0, 4, 0], sizes = [2, 1, 128], strides = [1, 1, 1]} : vector<2x8x128xf32> to vector<2x1x128xf32>
    %10 = vector.shape_cast %9 : vector<2x1x128xf32> to vector<2x128xf32>
    %11 = vector.extract_strided_slice %0 {offsets = [0, 5, 0], sizes = [2, 1, 128], strides = [1, 1, 1]} : vector<2x8x128xf32> to vector<2x1x128xf32>
    %12 = vector.shape_cast %11 : vector<2x1x128xf32> to vector<2x128xf32>
    %13 = vector.extract_strided_slice %0 {offsets = [0, 6, 0], sizes = [2, 1, 128], strides = [1, 1, 1]} : vector<2x8x128xf32> to vector<2x1x128xf32>
    %14 = vector.shape_cast %13 : vector<2x1x128xf32> to vector<2x128xf32>
    %15 = vector.extract_strided_slice %0 {offsets = [0, 7, 0], sizes = [2, 1, 128], strides = [1, 1, 1]} : vector<2x8x128xf32> to vector<2x1x128xf32>
    %16 = vector.shape_cast %15 : vector<2x1x128xf32> to vector<2x128xf32>
    %17 = tpu.concatenate %2, %4, %6, %8, %10, %12, %14, %16 in 0 : vector<2x128xf32>, vector<2x128xf32>, vector<2x128xf32>, vector<2x128xf32>, vector<2x128xf32>, vector<2x128xf32>, vector<2x128xf32>, vector<2x128xf32> -> vector<16x128xf32>
    %c0_2 = arith.constant 0 : index
    %c0_3 = arith.constant 0 : index
    %c0_4 = arith.constant 0 : index
    %18 = vector.load %arg2[%c0_2, %c0_3, %c0_4] : memref<8x2x128xf32, #tpu.memory_space<vmem>>, vector<8x2x128xf32>
    %19 = vector.extract_strided_slice %18 {offsets = [0, 0, 0], sizes = [1, 2, 128], strides = [1, 1, 1]} : vector<8x2x128xf32> to vector<1x2x128xf32>
    %20 = vector.shape_cast %19 : vector<1x2x128xf32> to vector<2x128xf32>
    %21 = vector.extract_strided_slice %18 {offsets = [1, 0, 0], sizes = [1, 2, 128], strides = [1, 1, 1]} : vector<8x2x128xf32> to vector<1x2x128xf32>
    %22 = vector.shape_cast %21 : vector<1x2x128xf32> to vector<2x128xf32>
    %23 = vector.extract_strided_slice %18 {offsets = [2, 0, 0], sizes = [1, 2, 128], strides = [1, 1, 1]} : vector<8x2x128xf32> to vector<1x2x128xf32>
    %24 = vector.shape_cast %23 : vector<1x2x128xf32> to vector<2x128xf32>
    %25 = vector.extract_strided_slice %18 {offsets = [3, 0, 0], sizes = [1, 2, 128], strides = [1, 1, 1]} : vector<8x2x128xf32> to vector<1x2x128xf32>
    %26 = vector.shape_cast %25 : vector<1x2x128xf32> to vector<2x128xf32>
    %27 = vector.extract_strided_slice %18 {offsets = [4, 0, 0], sizes = [1, 2, 128], strides = [1, 1, 1]} : vector<8x2x128xf32> to vector<1x2x128xf32>
    %28 = vector.shape_cast %27 : vector<1x2x128xf32> to vector<2x128xf32>
    %29 = vector.extract_strided_slice %18 {offsets = [5, 0, 0], sizes = [1, 2, 128], strides = [1, 1, 1]} : vector<8x2x128xf32> to vector<1x2x128xf32>
    %30 = vector.shape_cast %29 : vector<1x2x128xf32> to vector<2x128xf32>
    %31 = vector.extract_strided_slice %18 {offsets = [6, 0, 0], sizes = [1, 2, 128], strides = [1, 1, 1]} : vector<8x2x128xf32> to vector<1x2x128xf32>
    %32 = vector.shape_cast %31 : vector<1x2x128xf32> to vector<2x128xf32>
    %33 = vector.extract_strided_slice %18 {offsets = [7, 0, 0], sizes = [1, 2, 128], strides = [1, 1, 1]} : vector<8x2x128xf32> to vector<1x2x128xf32>
    %34 = vector.shape_cast %33 : vector<1x2x128xf32> to vector<2x128xf32>
    %cst = arith.constant 1.000000e+00 : f32
    %35 = vector.broadcast %cst : f32 to vector<2x128xf32>
    %36 = arith.subf %35, %20 : vector<2x128xf32>
    %cst_5 = arith.constant 1.000000e+00 : f32
    %37 = vector.broadcast %cst_5 : f32 to vector<2x128xf32>
    %38 = arith.subf %37, %22 : vector<2x128xf32>
    %cst_6 = arith.constant 1.000000e+00 : f32
    %39 = vector.broadcast %cst_6 : f32 to vector<2x128xf32>
    %40 = arith.subf %39, %24 : vector<2x128xf32>
    %cst_7 = arith.constant 1.000000e+00 : f32
    %41 = vector.broadcast %cst_7 : f32 to vector<2x128xf32>
    %42 = arith.subf %41, %26 : vector<2x128xf32>
    %cst_8 = arith.constant 1.000000e+00 : f32
    %43 = vector.broadcast %cst_8 : f32 to vector<2x128xf32>
    %44 = arith.subf %43, %28 : vector<2x128xf32>
    %cst_9 = arith.constant 1.000000e+00 : f32
    %45 = vector.broadcast %cst_9 : f32 to vector<2x128xf32>
    %46 = arith.subf %45, %30 : vector<2x128xf32>
    %cst_10 = arith.constant 1.000000e+00 : f32
    %47 = vector.broadcast %cst_10 : f32 to vector<2x128xf32>
    %48 = arith.subf %47, %32 : vector<2x128xf32>
    %49 = tpu.iota {dimensions = array<i32: 1>} : vector<2x512xi32>
    %c128_i32 = arith.constant 128 : i32
    %c0_i32 = arith.constant 0 : i32
    %50 = arith.cmpi eq, %c128_i32, %c0_i32 : i32
    %c1_i32 = arith.constant 1 : i32
    %51 = arith.select %50, %c1_i32, %c128_i32 : i32
    %52 = vector.broadcast %51 : i32 to vector<2x512xi32>
    %53 = arith.remsi %49, %52 : vector<2x512xi32>
    %c0_i32_11 = arith.constant 0 : i32
    %54 = vector.broadcast %c0_i32_11 : i32 to vector<2x512xi32>
    %55 = arith.cmpi ne, %53, %54 : vector<2x512xi32>
    %c0_i32_12 = arith.constant 0 : i32
    %56 = vector.broadcast %c0_i32_12 : i32 to vector<2x512xi32>
    %57 = arith.cmpi slt, %53, %56 : vector<2x512xi32>
    %c0_i32_13 = arith.constant 0 : i32
    %58 = arith.cmpi slt, %51, %c0_i32_13 : i32
    %59 = vector.broadcast %58 : i1 to vector<2x512xi1>
    %60 = vector.broadcast %59 : vector<2x512xi1> to vector<2x512xi1>
    %61 = arith.xori %57, %60 : vector<2x512xi1>
    %62 = arith.andi %61, %55 : vector<2x512xi1>
    %63 = vector.broadcast %51 : i32 to vector<2x512xi32>
    %64 = arith.addi %53, %63 : vector<2x512xi32>
    %65 = arith.select %62, %64, %53 : vector<2x512xi1>, vector<2x512xi32>
    %c64_i32 = arith.constant 64 : i32
    %66 = vector.broadcast %c64_i32 : i32 to vector<2x512xi32>
    %67 = arith.cmpi slt, %65, %66 : vector<2x512xi32>
    %68 = tpu.iota {dimensions = array<i32: 1>} : vector<2x128xi32>
    %c64_i32_14 = arith.constant 64 : i32
    %69 = vector.broadcast %c64_i32_14 : i32 to vector<2x128xi32>
    %70 = arith.cmpi slt, %68, %69 : vector<2x128xi32>
    %c0_15 = arith.constant 0 : index
    %c0_16 = arith.constant 0 : index
    %c0_17 = arith.constant 0 : index
    %71 = vector.load %arg3[%c0_15, %c0_16, %c0_17] : memref<2x128x512xf32, #tpu.memory_space<vmem>>, vector<1x128x512xf32>
    %72 = vector.shape_cast %71 : vector<1x128x512xf32> to vector<128x512xf32>
    %cst_18 = arith.constant dense<0.000000e+00> : vector<16x512xf32>
    %73 = tpu.matmul %17, %72, %cst_18 {dimension_numbers = #tpu.dot_dimension_numbers<[1], [0], [0], [1], [0, 0, 1, 1], [], []>} : vector<16x128xf32>, vector<128x512xf32>, vector<16x512xf32> -> vector<16x512xf32>
    %c0_19 = arith.constant 0 : index
    %c0_20 = arith.constant 0 : index
    %c0_21 = arith.constant 0 : index
    %74 = vector.load %arg4[%c0_19, %c0_20, %c0_21] : memref<2x1x512xf32, #tpu.memory_space<vmem>>, vector<1x1x512xf32>
    %75 = vector.shape_cast %74 : vector<1x1x512xf32> to vector<1x512xf32>
    %76 = vector.broadcast %75 : vector<1x512xf32> to vector<16x512xf32>
    %77 = arith.addf %73, %76 : vector<16x512xf32>
    %c0_22 = arith.constant 0 : index
    %c0_23 = arith.constant 0 : index
    %c0_24 = arith.constant 0 : index
    %78 = vector.load %arg5[%c0_22, %c0_23, %c0_24] : memref<2x128x512xf32, #tpu.memory_space<vmem>>, vector<1x128x512xf32>
    %79 = vector.shape_cast %78 : vector<1x128x512xf32> to vector<128x512xf32>
    %80 = vector.extract_strided_slice %77 {offsets = [0, 0], sizes = [2, 512], strides = [1, 1]} : vector<16x512xf32> to vector<2x512xf32>
    %81 = vector.extract_strided_slice %77 {offsets = [2, 0], sizes = [2, 512], strides = [1, 1]} : vector<16x512xf32> to vector<2x512xf32>
    %82 = vector.extract_strided_slice %77 {offsets = [4, 0], sizes = [2, 512], strides = [1, 1]} : vector<16x512xf32> to vector<2x512xf32>
    %83 = vector.extract_strided_slice %77 {offsets = [6, 0], sizes = [2, 512], strides = [1, 1]} : vector<16x512xf32> to vector<2x512xf32>
    %84 = vector.extract_strided_slice %77 {offsets = [8, 0], sizes = [2, 512], strides = [1, 1]} : vector<16x512xf32> to vector<2x512xf32>
    %85 = vector.extract_strided_slice %77 {offsets = [10, 0], sizes = [2, 512], strides = [1, 1]} : vector<16x512xf32> to vector<2x512xf32>
    %86 = vector.extract_strided_slice %77 {offsets = [12, 0], sizes = [2, 512], strides = [1, 1]} : vector<16x512xf32> to vector<2x512xf32>
    %87 = vector.extract_strided_slice %77 {offsets = [14, 0], sizes = [2, 512], strides = [1, 1]} : vector<16x512xf32> to vector<2x512xf32>
    %88 = arith.select %67, %80, %87 : vector<2x512xi1>, vector<2x512xf32>
    %89 = arith.select %67, %81, %86 : vector<2x512xi1>, vector<2x512xf32>
    %90 = arith.select %67, %82, %85 : vector<2x512xi1>, vector<2x512xf32>
    %91 = arith.select %67, %83, %84 : vector<2x512xi1>, vector<2x512xf32>
    %92 = arith.select %67, %84, %83 : vector<2x512xi1>, vector<2x512xf32>
    %93 = arith.select %67, %85, %82 : vector<2x512xi1>, vector<2x512xf32>
    %94 = arith.select %67, %86, %81 : vector<2x512xi1>, vector<2x512xf32>
    %95 = arith.select %67, %87, %80 : vector<2x512xi1>, vector<2x512xf32>
    %cst_25 = arith.constant 0.000000e+00 : f32
    %96 = vector.broadcast %cst_25 : f32 to vector<2x128xf32>
    %cst_26 = arith.constant 0.000000e+00 : f32
    %97 = vector.broadcast %cst_26 : f32 to vector<2x128xf32>
    %cst_27 = arith.constant dense<0.000000e+00> : vector<2x512xf32>
    %98 = tpu.matmul %96, %79, %cst_27 {dimension_numbers = #tpu.dot_dimension_numbers<[1], [0], [0], [1], [0, 0, 1, 1], [], []>} : vector<2x128xf32>, vector<128x512xf32>, vector<2x512xf32> -> vector<2x512xf32>
    %99 = arith.addf %88, %98 : vector<2x512xf32>
    %100 = vector.extract_strided_slice %99 {offsets = [0, 0], sizes = [2, 128], strides = [1, 1]} : vector<2x512xf32> to vector<2x128xf32>
    %101 = arith.negf %100 : vector<2x128xf32>
    %102 = math.exp %101 : vector<2x128xf32>
    %cst_28 = arith.constant 1.000000e+00 : f32
    %103 = vector.broadcast %cst_28 : f32 to vector<2x128xf32>
    %104 = arith.addf %103, %102 : vector<2x128xf32>
    %105 = arith.divf %103, %104 : vector<2x128xf32>
    %106 = vector.extract_strided_slice %99 {offsets = [0, 128], sizes = [2, 128], strides = [1, 1]} : vector<2x512xf32> to vector<2x128xf32>
    %107 = arith.negf %106 : vector<2x128xf32>
    %108 = math.exp %107 : vector<2x128xf32>
    %cst_29 = arith.constant 1.000000e+00 : f32
    %109 = vector.broadcast %cst_29 : f32 to vector<2x128xf32>
    %110 = arith.addf %109, %108 : vector<2x128xf32>
    %111 = arith.divf %109, %110 : vector<2x128xf32>
    %112 = vector.extract_strided_slice %99 {offsets = [0, 256], sizes = [2, 128], strides = [1, 1]} : vector<2x512xf32> to vector<2x128xf32>
    %113 = math.tanh %112 : vector<2x128xf32>
    %114 = vector.extract_strided_slice %99 {offsets = [0, 384], sizes = [2, 128], strides = [1, 1]} : vector<2x512xf32> to vector<2x128xf32>
    %115 = arith.negf %114 : vector<2x128xf32>
    %116 = math.exp %115 : vector<2x128xf32>
    %cst_30 = arith.constant 1.000000e+00 : f32
    %117 = vector.broadcast %cst_30 : f32 to vector<2x128xf32>
    %118 = arith.addf %117, %116 : vector<2x128xf32>
    %119 = arith.divf %117, %118 : vector<2x128xf32>
    %120 = arith.mulf %111, %97 : vector<2x128xf32>
    %121 = arith.mulf %105, %113 : vector<2x128xf32>
    %122 = arith.addf %120, %121 : vector<2x128xf32>
    %123 = math.tanh %122 : vector<2x128xf32>
    %124 = arith.mulf %119, %123 : vector<2x128xf32>
    %125 = arith.mulf %20, %124 : vector<2x128xf32>
    %126 = arith.mulf %36, %96 : vector<2x128xf32>
    %127 = arith.addf %125, %126 : vector<2x128xf32>
    %128 = arith.mulf %20, %122 : vector<2x128xf32>
    %129 = arith.mulf %36, %97 : vector<2x128xf32>
    %130 = arith.addf %128, %129 : vector<2x128xf32>
    %131 = arith.mulf %20, %124 : vector<2x128xf32>
    %cst_31 = arith.constant dense<0.000000e+00> : vector<2x512xf32>
    %132 = tpu.matmul %127, %79, %cst_31 {dimension_numbers = #tpu.dot_dimension_numbers<[1], [0], [0], [1], [0, 0, 1, 1], [], []>} : vector<2x128xf32>, vector<128x512xf32>, vector<2x512xf32> -> vector<2x512xf32>
    %133 = arith.addf %89, %132 : vector<2x512xf32>
    %134 = vector.extract_strided_slice %133 {offsets = [0, 0], sizes = [2, 128], strides = [1, 1]} : vector<2x512xf32> to vector<2x128xf32>
    %135 = arith.negf %134 : vector<2x128xf32>
    %136 = math.exp %135 : vector<2x128xf32>
    %cst_32 = arith.constant 1.000000e+00 : f32
    %137 = vector.broadcast %cst_32 : f32 to vector<2x128xf32>
    %138 = arith.addf %137, %136 : vector<2x128xf32>
    %139 = arith.divf %137, %138 : vector<2x128xf32>
    %140 = vector.extract_strided_slice %133 {offsets = [0, 128], sizes = [2, 128], strides = [1, 1]} : vector<2x512xf32> to vector<2x128xf32>
    %141 = arith.negf %140 : vector<2x128xf32>
    %142 = math.exp %141 : vector<2x128xf32>
    %cst_33 = arith.constant 1.000000e+00 : f32
    %143 = vector.broadcast %cst_33 : f32 to vector<2x128xf32>
    %144 = arith.addf %143, %142 : vector<2x128xf32>
    %145 = arith.divf %143, %144 : vector<2x128xf32>
    %146 = vector.extract_strided_slice %133 {offsets = [0, 256], sizes = [2, 128], strides = [1, 1]} : vector<2x512xf32> to vector<2x128xf32>
    %147 = math.tanh %146 : vector<2x128xf32>
    %148 = vector.extract_strided_slice %133 {offsets = [0, 384], sizes = [2, 128], strides = [1, 1]} : vector<2x512xf32> to vector<2x128xf32>
    %149 = arith.negf %148 : vector<2x128xf32>
    %150 = math.exp %149 : vector<2x128xf32>
    %cst_34 = arith.constant 1.000000e+00 : f32
    %151 = vector.broadcast %cst_34 : f32 to vector<2x128xf32>
    %152 = arith.addf %151, %150 : vector<2x128xf32>
    %153 = arith.divf %151, %152 : vector<2x128xf32>
    %154 = arith.mulf %145, %130 : vector<2x128xf32>
    %155 = arith.mulf %139, %147 : vector<2x128xf32>
    %156 = arith.addf %154, %155 : vector<2x128xf32>
    %157 = math.tanh %156 : vector<2x128xf32>
    %158 = arith.mulf %153, %157 : vector<2x128xf32>
    %159 = arith.mulf %22, %158 : vector<2x128xf32>
    %160 = arith.mulf %38, %127 : vector<2x128xf32>
    %161 = arith.addf %159, %160 : vector<2x128xf32>
    %162 = arith.mulf %22, %156 : vector<2x128xf32>
    %163 = arith.mulf %38, %130 : vector<2x128xf32>
    %164 = arith.addf %162, %163 : vector<2x128xf32>
    %165 = arith.mulf %22, %158 : vector<2x128xf32>
    %cst_35 = arith.constant dense<0.000000e+00> : vector<2x512xf32>
    %166 = tpu.matmul %161, %79, %cst_35 {dimension_numbers = #tpu.dot_dimension_numbers<[1], [0], [0], [1], [0, 0, 1, 1], [], []>} : vector<2x128xf32>, vector<128x512xf32>, vector<2x512xf32> -> vector<2x512xf32>
    %167 = arith.addf %90, %166 : vector<2x512xf32>
    %168 = vector.extract_strided_slice %167 {offsets = [0, 0], sizes = [2, 128], strides = [1, 1]} : vector<2x512xf32> to vector<2x128xf32>
    %169 = arith.negf %168 : vector<2x128xf32>
    %170 = math.exp %169 : vector<2x128xf32>
    %cst_36 = arith.constant 1.000000e+00 : f32
    %171 = vector.broadcast %cst_36 : f32 to vector<2x128xf32>
    %172 = arith.addf %171, %170 : vector<2x128xf32>
    %173 = arith.divf %171, %172 : vector<2x128xf32>
    %174 = vector.extract_strided_slice %167 {offsets = [0, 128], sizes = [2, 128], strides = [1, 1]} : vector<2x512xf32> to vector<2x128xf32>
    %175 = arith.negf %174 : vector<2x128xf32>
    %176 = math.exp %175 : vector<2x128xf32>
    %cst_37 = arith.constant 1.000000e+00 : f32
    %177 = vector.broadcast %cst_37 : f32 to vector<2x128xf32>
    %178 = arith.addf %177, %176 : vector<2x128xf32>
    %179 = arith.divf %177, %178 : vector<2x128xf32>
    %180 = vector.extract_strided_slice %167 {offsets = [0, 256], sizes = [2, 128], strides = [1, 1]} : vector<2x512xf32> to vector<2x128xf32>
    %181 = math.tanh %180 : vector<2x128xf32>
    %182 = vector.extract_strided_slice %167 {offsets = [0, 384], sizes = [2, 128], strides = [1, 1]} : vector<2x512xf32> to vector<2x128xf32>
    %183 = arith.negf %182 : vector<2x128xf32>
    %184 = math.exp %183 : vector<2x128xf32>
    %cst_38 = arith.constant 1.000000e+00 : f32
    %185 = vector.broadcast %cst_38 : f32 to vector<2x128xf32>
    %186 = arith.addf %185, %184 : vector<2x128xf32>
    %187 = arith.divf %185, %186 : vector<2x128xf32>
    %188 = arith.mulf %179, %164 : vector<2x128xf32>
    %189 = arith.mulf %173, %181 : vector<2x128xf32>
    %190 = arith.addf %188, %189 : vector<2x128xf32>
    %191 = math.tanh %190 : vector<2x128xf32>
    %192 = arith.mulf %187, %191 : vector<2x128xf32>
    %193 = arith.mulf %24, %192 : vector<2x128xf32>
    %194 = arith.mulf %40, %161 : vector<2x128xf32>
    %195 = arith.addf %193, %194 : vector<2x128xf32>
    %196 = arith.mulf %24, %190 : vector<2x128xf32>
    %197 = arith.mulf %40, %164 : vector<2x128xf32>
    %198 = arith.addf %196, %197 : vector<2x128xf32>
    %199 = arith.mulf %24, %192 : vector<2x128xf32>
    %cst_39 = arith.constant dense<0.000000e+00> : vector<2x512xf32>
    %200 = tpu.matmul %195, %79, %cst_39 {dimension_numbers = #tpu.dot_dimension_numbers<[1], [0], [0], [1], [0, 0, 1, 1], [], []>} : vector<2x128xf32>, vector<128x512xf32>, vector<2x512xf32> -> vector<2x512xf32>
    %201 = arith.addf %91, %200 : vector<2x512xf32>
    %202 = vector.extract_strided_slice %201 {offsets = [0, 0], sizes = [2, 128], strides = [1, 1]} : vector<2x512xf32> to vector<2x128xf32>
    %203 = arith.negf %202 : vector<2x128xf32>
    %204 = math.exp %203 : vector<2x128xf32>
    %cst_40 = arith.constant 1.000000e+00 : f32
    %205 = vector.broadcast %cst_40 : f32 to vector<2x128xf32>
    %206 = arith.addf %205, %204 : vector<2x128xf32>
    %207 = arith.divf %205, %206 : vector<2x128xf32>
    %208 = vector.extract_strided_slice %201 {offsets = [0, 128], sizes = [2, 128], strides = [1, 1]} : vector<2x512xf32> to vector<2x128xf32>
    %209 = arith.negf %208 : vector<2x128xf32>
    %210 = math.exp %209 : vector<2x128xf32>
    %cst_41 = arith.constant 1.000000e+00 : f32
    %211 = vector.broadcast %cst_41 : f32 to vector<2x128xf32>
    %212 = arith.addf %211, %210 : vector<2x128xf32>
    %213 = arith.divf %211, %212 : vector<2x128xf32>
    %214 = vector.extract_strided_slice %201 {offsets = [0, 256], sizes = [2, 128], strides = [1, 1]} : vector<2x512xf32> to vector<2x128xf32>
    %215 = math.tanh %214 : vector<2x128xf32>
    %216 = vector.extract_strided_slice %201 {offsets = [0, 384], sizes = [2, 128], strides = [1, 1]} : vector<2x512xf32> to vector<2x128xf32>
    %217 = arith.negf %216 : vector<2x128xf32>
    %218 = math.exp %217 : vector<2x128xf32>
    %cst_42 = arith.constant 1.000000e+00 : f32
    %219 = vector.broadcast %cst_42 : f32 to vector<2x128xf32>
    %220 = arith.addf %219, %218 : vector<2x128xf32>
    %221 = arith.divf %219, %220 : vector<2x128xf32>
    %222 = arith.mulf %213, %198 : vector<2x128xf32>
    %223 = arith.mulf %207, %215 : vector<2x128xf32>
    %224 = arith.addf %222, %223 : vector<2x128xf32>
    %225 = math.tanh %224 : vector<2x128xf32>
    %226 = arith.mulf %221, %225 : vector<2x128xf32>
    %227 = arith.mulf %26, %226 : vector<2x128xf32>
    %228 = arith.mulf %42, %195 : vector<2x128xf32>
    %229 = arith.addf %227, %228 : vector<2x128xf32>
    %230 = arith.mulf %26, %224 : vector<2x128xf32>
    %231 = arith.mulf %42, %198 : vector<2x128xf32>
    %232 = arith.addf %230, %231 : vector<2x128xf32>
    %233 = arith.mulf %26, %226 : vector<2x128xf32>
    %cst_43 = arith.constant dense<0.000000e+00> : vector<2x512xf32>
    %234 = tpu.matmul %229, %79, %cst_43 {dimension_numbers = #tpu.dot_dimension_numbers<[1], [0], [0], [1], [0, 0, 1, 1], [], []>} : vector<2x128xf32>, vector<128x512xf32>, vector<2x512xf32> -> vector<2x512xf32>
    %235 = arith.addf %92, %234 : vector<2x512xf32>
    %236 = vector.extract_strided_slice %235 {offsets = [0, 0], sizes = [2, 128], strides = [1, 1]} : vector<2x512xf32> to vector<2x128xf32>
    %237 = arith.negf %236 : vector<2x128xf32>
    %238 = math.exp %237 : vector<2x128xf32>
    %cst_44 = arith.constant 1.000000e+00 : f32
    %239 = vector.broadcast %cst_44 : f32 to vector<2x128xf32>
    %240 = arith.addf %239, %238 : vector<2x128xf32>
    %241 = arith.divf %239, %240 : vector<2x128xf32>
    %242 = vector.extract_strided_slice %235 {offsets = [0, 128], sizes = [2, 128], strides = [1, 1]} : vector<2x512xf32> to vector<2x128xf32>
    %243 = arith.negf %242 : vector<2x128xf32>
    %244 = math.exp %243 : vector<2x128xf32>
    %cst_45 = arith.constant 1.000000e+00 : f32
    %245 = vector.broadcast %cst_45 : f32 to vector<2x128xf32>
    %246 = arith.addf %245, %244 : vector<2x128xf32>
    %247 = arith.divf %245, %246 : vector<2x128xf32>
    %248 = vector.extract_strided_slice %235 {offsets = [0, 256], sizes = [2, 128], strides = [1, 1]} : vector<2x512xf32> to vector<2x128xf32>
    %249 = math.tanh %248 : vector<2x128xf32>
    %250 = vector.extract_strided_slice %235 {offsets = [0, 384], sizes = [2, 128], strides = [1, 1]} : vector<2x512xf32> to vector<2x128xf32>
    %251 = arith.negf %250 : vector<2x128xf32>
    %252 = math.exp %251 : vector<2x128xf32>
    %cst_46 = arith.constant 1.000000e+00 : f32
    %253 = vector.broadcast %cst_46 : f32 to vector<2x128xf32>
    %254 = arith.addf %253, %252 : vector<2x128xf32>
    %255 = arith.divf %253, %254 : vector<2x128xf32>
    %256 = arith.mulf %247, %232 : vector<2x128xf32>
    %257 = arith.mulf %241, %249 : vector<2x128xf32>
    %258 = arith.addf %256, %257 : vector<2x128xf32>
    %259 = math.tanh %258 : vector<2x128xf32>
    %260 = arith.mulf %255, %259 : vector<2x128xf32>
    %261 = arith.mulf %28, %260 : vector<2x128xf32>
    %262 = arith.mulf %44, %229 : vector<2x128xf32>
    %263 = arith.addf %261, %262 : vector<2x128xf32>
    %264 = arith.mulf %28, %258 : vector<2x128xf32>
    %265 = arith.mulf %44, %232 : vector<2x128xf32>
    %266 = arith.addf %264, %265 : vector<2x128xf32>
    %267 = arith.mulf %28, %260 : vector<2x128xf32>
    %cst_47 = arith.constant dense<0.000000e+00> : vector<2x512xf32>
    %268 = tpu.matmul %263, %79, %cst_47 {dimension_numbers = #tpu.dot_dimension_numbers<[1], [0], [0], [1], [0, 0, 1, 1], [], []>} : vector<2x128xf32>, vector<128x512xf32>, vector<2x512xf32> -> vector<2x512xf32>
    %269 = arith.addf %93, %268 : vector<2x512xf32>
    %270 = vector.extract_strided_slice %269 {offsets = [0, 0], sizes = [2, 128], strides = [1, 1]} : vector<2x512xf32> to vector<2x128xf32>
    %271 = arith.negf %270 : vector<2x128xf32>
    %272 = math.exp %271 : vector<2x128xf32>
    %cst_48 = arith.constant 1.000000e+00 : f32
    %273 = vector.broadcast %cst_48 : f32 to vector<2x128xf32>
    %274 = arith.addf %273, %272 : vector<2x128xf32>
    %275 = arith.divf %273, %274 : vector<2x128xf32>
    %276 = vector.extract_strided_slice %269 {offsets = [0, 128], sizes = [2, 128], strides = [1, 1]} : vector<2x512xf32> to vector<2x128xf32>
    %277 = arith.negf %276 : vector<2x128xf32>
    %278 = math.exp %277 : vector<2x128xf32>
    %cst_49 = arith.constant 1.000000e+00 : f32
    %279 = vector.broadcast %cst_49 : f32 to vector<2x128xf32>
    %280 = arith.addf %279, %278 : vector<2x128xf32>
    %281 = arith.divf %279, %280 : vector<2x128xf32>
    %282 = vector.extract_strided_slice %269 {offsets = [0, 256], sizes = [2, 128], strides = [1, 1]} : vector<2x512xf32> to vector<2x128xf32>
    %283 = math.tanh %282 : vector<2x128xf32>
    %284 = vector.extract_strided_slice %269 {offsets = [0, 384], sizes = [2, 128], strides = [1, 1]} : vector<2x512xf32> to vector<2x128xf32>
    %285 = arith.negf %284 : vector<2x128xf32>
    %286 = math.exp %285 : vector<2x128xf32>
    %cst_50 = arith.constant 1.000000e+00 : f32
    %287 = vector.broadcast %cst_50 : f32 to vector<2x128xf32>
    %288 = arith.addf %287, %286 : vector<2x128xf32>
    %289 = arith.divf %287, %288 : vector<2x128xf32>
    %290 = arith.mulf %281, %266 : vector<2x128xf32>
    %291 = arith.mulf %275, %283 : vector<2x128xf32>
    %292 = arith.addf %290, %291 : vector<2x128xf32>
    %293 = math.tanh %292 : vector<2x128xf32>
    %294 = arith.mulf %289, %293 : vector<2x128xf32>
    %295 = arith.mulf %30, %294 : vector<2x128xf32>
    %296 = arith.mulf %46, %263 : vector<2x128xf32>
    %297 = arith.addf %295, %296 : vector<2x128xf32>
    %298 = arith.mulf %30, %292 : vector<2x128xf32>
    %299 = arith.mulf %46, %266 : vector<2x128xf32>
    %300 = arith.addf %298, %299 : vector<2x128xf32>
    %301 = arith.mulf %30, %294 : vector<2x128xf32>
    %cst_51 = arith.constant dense<0.000000e+00> : vector<2x512xf32>
    %302 = tpu.matmul %297, %79, %cst_51 {dimension_numbers = #tpu.dot_dimension_numbers<[1], [0], [0], [1], [0, 0, 1, 1], [], []>} : vector<2x128xf32>, vector<128x512xf32>, vector<2x512xf32> -> vector<2x512xf32>
    %303 = arith.addf %94, %302 : vector<2x512xf32>
    %304 = vector.extract_strided_slice %303 {offsets = [0, 0], sizes = [2, 128], strides = [1, 1]} : vector<2x512xf32> to vector<2x128xf32>
    %305 = arith.negf %304 : vector<2x128xf32>
    %306 = math.exp %305 : vector<2x128xf32>
    %cst_52 = arith.constant 1.000000e+00 : f32
    %307 = vector.broadcast %cst_52 : f32 to vector<2x128xf32>
    %308 = arith.addf %307, %306 : vector<2x128xf32>
    %309 = arith.divf %307, %308 : vector<2x128xf32>
    %310 = vector.extract_strided_slice %303 {offsets = [0, 128], sizes = [2, 128], strides = [1, 1]} : vector<2x512xf32> to vector<2x128xf32>
    %311 = arith.negf %310 : vector<2x128xf32>
    %312 = math.exp %311 : vector<2x128xf32>
    %cst_53 = arith.constant 1.000000e+00 : f32
    %313 = vector.broadcast %cst_53 : f32 to vector<2x128xf32>
    %314 = arith.addf %313, %312 : vector<2x128xf32>
    %315 = arith.divf %313, %314 : vector<2x128xf32>
    %316 = vector.extract_strided_slice %303 {offsets = [0, 256], sizes = [2, 128], strides = [1, 1]} : vector<2x512xf32> to vector<2x128xf32>
    %317 = math.tanh %316 : vector<2x128xf32>
    %318 = vector.extract_strided_slice %303 {offsets = [0, 384], sizes = [2, 128], strides = [1, 1]} : vector<2x512xf32> to vector<2x128xf32>
    %319 = arith.negf %318 : vector<2x128xf32>
    %320 = math.exp %319 : vector<2x128xf32>
    %cst_54 = arith.constant 1.000000e+00 : f32
    %321 = vector.broadcast %cst_54 : f32 to vector<2x128xf32>
    %322 = arith.addf %321, %320 : vector<2x128xf32>
    %323 = arith.divf %321, %322 : vector<2x128xf32>
    %324 = arith.mulf %315, %300 : vector<2x128xf32>
    %325 = arith.mulf %309, %317 : vector<2x128xf32>
    %326 = arith.addf %324, %325 : vector<2x128xf32>
    %327 = math.tanh %326 : vector<2x128xf32>
    %328 = arith.mulf %323, %327 : vector<2x128xf32>
    %329 = arith.mulf %32, %328 : vector<2x128xf32>
    %330 = arith.mulf %48, %297 : vector<2x128xf32>
    %331 = arith.addf %329, %330 : vector<2x128xf32>
    %332 = arith.mulf %32, %326 : vector<2x128xf32>
    %333 = arith.mulf %48, %300 : vector<2x128xf32>
    %334 = arith.addf %332, %333 : vector<2x128xf32>
    %335 = arith.mulf %32, %328 : vector<2x128xf32>
    %cst_55 = arith.constant dense<0.000000e+00> : vector<2x512xf32>
    %336 = tpu.matmul %331, %79, %cst_55 {dimension_numbers = #tpu.dot_dimension_numbers<[1], [0], [0], [1], [0, 0, 1, 1], [], []>} : vector<2x128xf32>, vector<128x512xf32>, vector<2x512xf32> -> vector<2x512xf32>
    %337 = arith.addf %95, %336 : vector<2x512xf32>
    %338 = vector.extract_strided_slice %337 {offsets = [0, 0], sizes = [2, 128], strides = [1, 1]} : vector<2x512xf32> to vector<2x128xf32>
    %339 = arith.negf %338 : vector<2x128xf32>
    %340 = math.exp %339 : vector<2x128xf32>
    %cst_56 = arith.constant 1.000000e+00 : f32
    %341 = vector.broadcast %cst_56 : f32 to vector<2x128xf32>
    %342 = arith.addf %341, %340 : vector<2x128xf32>
    %343 = arith.divf %341, %342 : vector<2x128xf32>
    %344 = vector.extract_strided_slice %337 {offsets = [0, 128], sizes = [2, 128], strides = [1, 1]} : vector<2x512xf32> to vector<2x128xf32>
    %345 = arith.negf %344 : vector<2x128xf32>
    %346 = math.exp %345 : vector<2x128xf32>
    %cst_57 = arith.constant 1.000000e+00 : f32
    %347 = vector.broadcast %cst_57 : f32 to vector<2x128xf32>
    %348 = arith.addf %347, %346 : vector<2x128xf32>
    %349 = arith.divf %347, %348 : vector<2x128xf32>
    %350 = vector.extract_strided_slice %337 {offsets = [0, 256], sizes = [2, 128], strides = [1, 1]} : vector<2x512xf32> to vector<2x128xf32>
    %351 = math.tanh %350 : vector<2x128xf32>
    %352 = vector.extract_strided_slice %337 {offsets = [0, 384], sizes = [2, 128], strides = [1, 1]} : vector<2x512xf32> to vector<2x128xf32>
    %353 = arith.negf %352 : vector<2x128xf32>
    %354 = math.exp %353 : vector<2x128xf32>
    %cst_58 = arith.constant 1.000000e+00 : f32
    %355 = vector.broadcast %cst_58 : f32 to vector<2x128xf32>
    %356 = arith.addf %355, %354 : vector<2x128xf32>
    %357 = arith.divf %355, %356 : vector<2x128xf32>
    %358 = arith.mulf %349, %334 : vector<2x128xf32>
    %359 = arith.mulf %343, %351 : vector<2x128xf32>
    %360 = arith.addf %358, %359 : vector<2x128xf32>
    %361 = math.tanh %360 : vector<2x128xf32>
    %362 = arith.mulf %357, %361 : vector<2x128xf32>
    %363 = arith.mulf %34, %362 : vector<2x128xf32>
    %364 = arith.select %70, %131, %363 : vector<2x128xi1>, vector<2x128xf32>
    %365 = arith.select %70, %165, %335 : vector<2x128xi1>, vector<2x128xf32>
    %366 = arith.select %70, %199, %301 : vector<2x128xi1>, vector<2x128xf32>
    %367 = arith.select %70, %233, %267 : vector<2x128xi1>, vector<2x128xf32>
    %368 = arith.select %70, %267, %233 : vector<2x128xi1>, vector<2x128xf32>
    %369 = arith.select %70, %301, %199 : vector<2x128xi1>, vector<2x128xf32>
    %370 = arith.select %70, %335, %165 : vector<2x128xi1>, vector<2x128xf32>
    %371 = arith.select %70, %363, %131 : vector<2x128xi1>, vector<2x128xf32>
    %372 = tpu.concatenate %364, %365, %366, %367, %368, %369, %370, %371 in 0 : vector<2x128xf32>, vector<2x128xf32>, vector<2x128xf32>, vector<2x128xf32>, vector<2x128xf32>, vector<2x128xf32>, vector<2x128xf32>, vector<2x128xf32> -> vector<16x128xf32>
    %c1 = arith.constant 1 : index
    %c0_59 = arith.constant 0 : index
    %c0_60 = arith.constant 0 : index
    %373 = vector.load %arg3[%c1, %c0_59, %c0_60] : memref<2x128x512xf32, #tpu.memory_space<vmem>>, vector<1x128x512xf32>
    %374 = vector.shape_cast %373 : vector<1x128x512xf32> to vector<128x512xf32>
    %cst_61 = arith.constant dense<0.000000e+00> : vector<16x512xf32>
    %375 = tpu.matmul %372, %374, %cst_61 {dimension_numbers = #tpu.dot_dimension_numbers<[1], [0], [0], [1], [0, 0, 1, 1], [], []>} : vector<16x128xf32>, vector<128x512xf32>, vector<16x512xf32> -> vector<16x512xf32>
    %c1_62 = arith.constant 1 : index
    %c0_63 = arith.constant 0 : index
    %c0_64 = arith.constant 0 : index
    %376 = vector.load %arg4[%c1_62, %c0_63, %c0_64] : memref<2x1x512xf32, #tpu.memory_space<vmem>>, vector<1x1x512xf32>
    %377 = vector.shape_cast %376 : vector<1x1x512xf32> to vector<1x512xf32>
    %378 = vector.broadcast %377 : vector<1x512xf32> to vector<16x512xf32>
    %379 = arith.addf %375, %378 : vector<16x512xf32>
    %c1_65 = arith.constant 1 : index
    %c0_66 = arith.constant 0 : index
    %c0_67 = arith.constant 0 : index
    %380 = vector.load %arg5[%c1_65, %c0_66, %c0_67] : memref<2x128x512xf32, #tpu.memory_space<vmem>>, vector<1x128x512xf32>
    %381 = vector.shape_cast %380 : vector<1x128x512xf32> to vector<128x512xf32>
    %382 = vector.extract_strided_slice %379 {offsets = [0, 0], sizes = [2, 512], strides = [1, 1]} : vector<16x512xf32> to vector<2x512xf32>
    %383 = vector.extract_strided_slice %379 {offsets = [2, 0], sizes = [2, 512], strides = [1, 1]} : vector<16x512xf32> to vector<2x512xf32>
    %384 = vector.extract_strided_slice %379 {offsets = [4, 0], sizes = [2, 512], strides = [1, 1]} : vector<16x512xf32> to vector<2x512xf32>
    %385 = vector.extract_strided_slice %379 {offsets = [6, 0], sizes = [2, 512], strides = [1, 1]} : vector<16x512xf32> to vector<2x512xf32>
    %386 = vector.extract_strided_slice %379 {offsets = [8, 0], sizes = [2, 512], strides = [1, 1]} : vector<16x512xf32> to vector<2x512xf32>
    %387 = vector.extract_strided_slice %379 {offsets = [10, 0], sizes = [2, 512], strides = [1, 1]} : vector<16x512xf32> to vector<2x512xf32>
    %388 = vector.extract_strided_slice %379 {offsets = [12, 0], sizes = [2, 512], strides = [1, 1]} : vector<16x512xf32> to vector<2x512xf32>
    %389 = vector.extract_strided_slice %379 {offsets = [14, 0], sizes = [2, 512], strides = [1, 1]} : vector<16x512xf32> to vector<2x512xf32>
    %390 = arith.select %67, %382, %389 : vector<2x512xi1>, vector<2x512xf32>
    %391 = arith.select %67, %383, %388 : vector<2x512xi1>, vector<2x512xf32>
    %392 = arith.select %67, %384, %387 : vector<2x512xi1>, vector<2x512xf32>
    %393 = arith.select %67, %385, %386 : vector<2x512xi1>, vector<2x512xf32>
    %394 = arith.select %67, %386, %385 : vector<2x512xi1>, vector<2x512xf32>
    %395 = arith.select %67, %387, %384 : vector<2x512xi1>, vector<2x512xf32>
    %396 = arith.select %67, %388, %383 : vector<2x512xi1>, vector<2x512xf32>
    %397 = arith.select %67, %389, %382 : vector<2x512xi1>, vector<2x512xf32>
    %cst_68 = arith.constant 0.000000e+00 : f32
    %398 = vector.broadcast %cst_68 : f32 to vector<2x128xf32>
    %cst_69 = arith.constant 0.000000e+00 : f32
    %399 = vector.broadcast %cst_69 : f32 to vector<2x128xf32>
    %cst_70 = arith.constant dense<0.000000e+00> : vector<2x512xf32>
    %400 = tpu.matmul %398, %381, %cst_70 {dimension_numbers = #tpu.dot_dimension_numbers<[1], [0], [0], [1], [0, 0, 1, 1], [], []>} : vector<2x128xf32>, vector<128x512xf32>, vector<2x512xf32> -> vector<2x512xf32>
    %401 = arith.addf %390, %400 : vector<2x512xf32>
    %402 = vector.extract_strided_slice %401 {offsets = [0, 0], sizes = [2, 128], strides = [1, 1]} : vector<2x512xf32> to vector<2x128xf32>
    %403 = arith.negf %402 : vector<2x128xf32>
    %404 = math.exp %403 : vector<2x128xf32>
    %cst_71 = arith.constant 1.000000e+00 : f32
    %405 = vector.broadcast %cst_71 : f32 to vector<2x128xf32>
    %406 = arith.addf %405, %404 : vector<2x128xf32>
    %407 = arith.divf %405, %406 : vector<2x128xf32>
    %408 = vector.extract_strided_slice %401 {offsets = [0, 128], sizes = [2, 128], strides = [1, 1]} : vector<2x512xf32> to vector<2x128xf32>
    %409 = arith.negf %408 : vector<2x128xf32>
    %410 = math.exp %409 : vector<2x128xf32>
    %cst_72 = arith.constant 1.000000e+00 : f32
    %411 = vector.broadcast %cst_72 : f32 to vector<2x128xf32>
    %412 = arith.addf %411, %410 : vector<2x128xf32>
    %413 = arith.divf %411, %412 : vector<2x128xf32>
    %414 = vector.extract_strided_slice %401 {offsets = [0, 256], sizes = [2, 128], strides = [1, 1]} : vector<2x512xf32> to vector<2x128xf32>
    %415 = math.tanh %414 : vector<2x128xf32>
    %416 = vector.extract_strided_slice %401 {offsets = [0, 384], sizes = [2, 128], strides = [1, 1]} : vector<2x512xf32> to vector<2x128xf32>
    %417 = arith.negf %416 : vector<2x128xf32>
    %418 = math.exp %417 : vector<2x128xf32>
    %cst_73 = arith.constant 1.000000e+00 : f32
    %419 = vector.broadcast %cst_73 : f32 to vector<2x128xf32>
    %420 = arith.addf %419, %418 : vector<2x128xf32>
    %421 = arith.divf %419, %420 : vector<2x128xf32>
    %422 = arith.mulf %413, %399 : vector<2x128xf32>
    %423 = arith.mulf %407, %415 : vector<2x128xf32>
    %424 = arith.addf %422, %423 : vector<2x128xf32>
    %425 = math.tanh %424 : vector<2x128xf32>
    %426 = arith.mulf %421, %425 : vector<2x128xf32>
    %427 = arith.mulf %20, %426 : vector<2x128xf32>
    %428 = arith.mulf %36, %398 : vector<2x128xf32>
    %429 = arith.addf %427, %428 : vector<2x128xf32>
    %430 = arith.mulf %20, %424 : vector<2x128xf32>
    %431 = arith.mulf %36, %399 : vector<2x128xf32>
    %432 = arith.addf %430, %431 : vector<2x128xf32>
    %433 = arith.mulf %20, %426 : vector<2x128xf32>
    %cst_74 = arith.constant dense<0.000000e+00> : vector<2x512xf32>
    %434 = tpu.matmul %429, %381, %cst_74 {dimension_numbers = #tpu.dot_dimension_numbers<[1], [0], [0], [1], [0, 0, 1, 1], [], []>} : vector<2x128xf32>, vector<128x512xf32>, vector<2x512xf32> -> vector<2x512xf32>
    %435 = arith.addf %391, %434 : vector<2x512xf32>
    %436 = vector.extract_strided_slice %435 {offsets = [0, 0], sizes = [2, 128], strides = [1, 1]} : vector<2x512xf32> to vector<2x128xf32>
    %437 = arith.negf %436 : vector<2x128xf32>
    %438 = math.exp %437 : vector<2x128xf32>
    %cst_75 = arith.constant 1.000000e+00 : f32
    %439 = vector.broadcast %cst_75 : f32 to vector<2x128xf32>
    %440 = arith.addf %439, %438 : vector<2x128xf32>
    %441 = arith.divf %439, %440 : vector<2x128xf32>
    %442 = vector.extract_strided_slice %435 {offsets = [0, 128], sizes = [2, 128], strides = [1, 1]} : vector<2x512xf32> to vector<2x128xf32>
    %443 = arith.negf %442 : vector<2x128xf32>
    %444 = math.exp %443 : vector<2x128xf32>
    %cst_76 = arith.constant 1.000000e+00 : f32
    %445 = vector.broadcast %cst_76 : f32 to vector<2x128xf32>
    %446 = arith.addf %445, %444 : vector<2x128xf32>
    %447 = arith.divf %445, %446 : vector<2x128xf32>
    %448 = vector.extract_strided_slice %435 {offsets = [0, 256], sizes = [2, 128], strides = [1, 1]} : vector<2x512xf32> to vector<2x128xf32>
    %449 = math.tanh %448 : vector<2x128xf32>
    %450 = vector.extract_strided_slice %435 {offsets = [0, 384], sizes = [2, 128], strides = [1, 1]} : vector<2x512xf32> to vector<2x128xf32>
    %451 = arith.negf %450 : vector<2x128xf32>
    %452 = math.exp %451 : vector<2x128xf32>
    %cst_77 = arith.constant 1.000000e+00 : f32
    %453 = vector.broadcast %cst_77 : f32 to vector<2x128xf32>
    %454 = arith.addf %453, %452 : vector<2x128xf32>
    %455 = arith.divf %453, %454 : vector<2x128xf32>
    %456 = arith.mulf %447, %432 : vector<2x128xf32>
    %457 = arith.mulf %441, %449 : vector<2x128xf32>
    %458 = arith.addf %456, %457 : vector<2x128xf32>
    %459 = math.tanh %458 : vector<2x128xf32>
    %460 = arith.mulf %455, %459 : vector<2x128xf32>
    %461 = arith.mulf %22, %460 : vector<2x128xf32>
    %462 = arith.mulf %38, %429 : vector<2x128xf32>
    %463 = arith.addf %461, %462 : vector<2x128xf32>
    %464 = arith.mulf %22, %458 : vector<2x128xf32>
    %465 = arith.mulf %38, %432 : vector<2x128xf32>
    %466 = arith.addf %464, %465 : vector<2x128xf32>
    %467 = arith.mulf %22, %460 : vector<2x128xf32>
    %cst_78 = arith.constant dense<0.000000e+00> : vector<2x512xf32>
    %468 = tpu.matmul %463, %381, %cst_78 {dimension_numbers = #tpu.dot_dimension_numbers<[1], [0], [0], [1], [0, 0, 1, 1], [], []>} : vector<2x128xf32>, vector<128x512xf32>, vector<2x512xf32> -> vector<2x512xf32>
    %469 = arith.addf %392, %468 : vector<2x512xf32>
    %470 = vector.extract_strided_slice %469 {offsets = [0, 0], sizes = [2, 128], strides = [1, 1]} : vector<2x512xf32> to vector<2x128xf32>
    %471 = arith.negf %470 : vector<2x128xf32>
    %472 = math.exp %471 : vector<2x128xf32>
    %cst_79 = arith.constant 1.000000e+00 : f32
    %473 = vector.broadcast %cst_79 : f32 to vector<2x128xf32>
    %474 = arith.addf %473, %472 : vector<2x128xf32>
    %475 = arith.divf %473, %474 : vector<2x128xf32>
    %476 = vector.extract_strided_slice %469 {offsets = [0, 128], sizes = [2, 128], strides = [1, 1]} : vector<2x512xf32> to vector<2x128xf32>
    %477 = arith.negf %476 : vector<2x128xf32>
    %478 = math.exp %477 : vector<2x128xf32>
    %cst_80 = arith.constant 1.000000e+00 : f32
    %479 = vector.broadcast %cst_80 : f32 to vector<2x128xf32>
    %480 = arith.addf %479, %478 : vector<2x128xf32>
    %481 = arith.divf %479, %480 : vector<2x128xf32>
    %482 = vector.extract_strided_slice %469 {offsets = [0, 256], sizes = [2, 128], strides = [1, 1]} : vector<2x512xf32> to vector<2x128xf32>
    %483 = math.tanh %482 : vector<2x128xf32>
    %484 = vector.extract_strided_slice %469 {offsets = [0, 384], sizes = [2, 128], strides = [1, 1]} : vector<2x512xf32> to vector<2x128xf32>
    %485 = arith.negf %484 : vector<2x128xf32>
    %486 = math.exp %485 : vector<2x128xf32>
    %cst_81 = arith.constant 1.000000e+00 : f32
    %487 = vector.broadcast %cst_81 : f32 to vector<2x128xf32>
    %488 = arith.addf %487, %486 : vector<2x128xf32>
    %489 = arith.divf %487, %488 : vector<2x128xf32>
    %490 = arith.mulf %481, %466 : vector<2x128xf32>
    %491 = arith.mulf %475, %483 : vector<2x128xf32>
    %492 = arith.addf %490, %491 : vector<2x128xf32>
    %493 = math.tanh %492 : vector<2x128xf32>
    %494 = arith.mulf %489, %493 : vector<2x128xf32>
    %495 = arith.mulf %24, %494 : vector<2x128xf32>
    %496 = arith.mulf %40, %463 : vector<2x128xf32>
    %497 = arith.addf %495, %496 : vector<2x128xf32>
    %498 = arith.mulf %24, %492 : vector<2x128xf32>
    %499 = arith.mulf %40, %466 : vector<2x128xf32>
    %500 = arith.addf %498, %499 : vector<2x128xf32>
    %501 = arith.mulf %24, %494 : vector<2x128xf32>
    %cst_82 = arith.constant dense<0.000000e+00> : vector<2x512xf32>
    %502 = tpu.matmul %497, %381, %cst_82 {dimension_numbers = #tpu.dot_dimension_numbers<[1], [0], [0], [1], [0, 0, 1, 1], [], []>} : vector<2x128xf32>, vector<128x512xf32>, vector<2x512xf32> -> vector<2x512xf32>
    %503 = arith.addf %393, %502 : vector<2x512xf32>
    %504 = vector.extract_strided_slice %503 {offsets = [0, 0], sizes = [2, 128], strides = [1, 1]} : vector<2x512xf32> to vector<2x128xf32>
    %505 = arith.negf %504 : vector<2x128xf32>
    %506 = math.exp %505 : vector<2x128xf32>
    %cst_83 = arith.constant 1.000000e+00 : f32
    %507 = vector.broadcast %cst_83 : f32 to vector<2x128xf32>
    %508 = arith.addf %507, %506 : vector<2x128xf32>
    %509 = arith.divf %507, %508 : vector<2x128xf32>
    %510 = vector.extract_strided_slice %503 {offsets = [0, 128], sizes = [2, 128], strides = [1, 1]} : vector<2x512xf32> to vector<2x128xf32>
    %511 = arith.negf %510 : vector<2x128xf32>
    %512 = math.exp %511 : vector<2x128xf32>
    %cst_84 = arith.constant 1.000000e+00 : f32
    %513 = vector.broadcast %cst_84 : f32 to vector<2x128xf32>
    %514 = arith.addf %513, %512 : vector<2x128xf32>
    %515 = arith.divf %513, %514 : vector<2x128xf32>
    %516 = vector.extract_strided_slice %503 {offsets = [0, 256], sizes = [2, 128], strides = [1, 1]} : vector<2x512xf32> to vector<2x128xf32>
    %517 = math.tanh %516 : vector<2x128xf32>
    %518 = vector.extract_strided_slice %503 {offsets = [0, 384], sizes = [2, 128], strides = [1, 1]} : vector<2x512xf32> to vector<2x128xf32>
    %519 = arith.negf %518 : vector<2x128xf32>
    %520 = math.exp %519 : vector<2x128xf32>
    %cst_85 = arith.constant 1.000000e+00 : f32
    %521 = vector.broadcast %cst_85 : f32 to vector<2x128xf32>
    %522 = arith.addf %521, %520 : vector<2x128xf32>
    %523 = arith.divf %521, %522 : vector<2x128xf32>
    %524 = arith.mulf %515, %500 : vector<2x128xf32>
    %525 = arith.mulf %509, %517 : vector<2x128xf32>
    %526 = arith.addf %524, %525 : vector<2x128xf32>
    %527 = math.tanh %526 : vector<2x128xf32>
    %528 = arith.mulf %523, %527 : vector<2x128xf32>
    %529 = arith.mulf %26, %528 : vector<2x128xf32>
    %530 = arith.mulf %42, %497 : vector<2x128xf32>
    %531 = arith.addf %529, %530 : vector<2x128xf32>
    %532 = arith.mulf %26, %526 : vector<2x128xf32>
    %533 = arith.mulf %42, %500 : vector<2x128xf32>
    %534 = arith.addf %532, %533 : vector<2x128xf32>
    %535 = arith.mulf %26, %528 : vector<2x128xf32>
    %cst_86 = arith.constant dense<0.000000e+00> : vector<2x512xf32>
    %536 = tpu.matmul %531, %381, %cst_86 {dimension_numbers = #tpu.dot_dimension_numbers<[1], [0], [0], [1], [0, 0, 1, 1], [], []>} : vector<2x128xf32>, vector<128x512xf32>, vector<2x512xf32> -> vector<2x512xf32>
    %537 = arith.addf %394, %536 : vector<2x512xf32>
    %538 = vector.extract_strided_slice %537 {offsets = [0, 0], sizes = [2, 128], strides = [1, 1]} : vector<2x512xf32> to vector<2x128xf32>
    %539 = arith.negf %538 : vector<2x128xf32>
    %540 = math.exp %539 : vector<2x128xf32>
    %cst_87 = arith.constant 1.000000e+00 : f32
    %541 = vector.broadcast %cst_87 : f32 to vector<2x128xf32>
    %542 = arith.addf %541, %540 : vector<2x128xf32>
    %543 = arith.divf %541, %542 : vector<2x128xf32>
    %544 = vector.extract_strided_slice %537 {offsets = [0, 128], sizes = [2, 128], strides = [1, 1]} : vector<2x512xf32> to vector<2x128xf32>
    %545 = arith.negf %544 : vector<2x128xf32>
    %546 = math.exp %545 : vector<2x128xf32>
    %cst_88 = arith.constant 1.000000e+00 : f32
    %547 = vector.broadcast %cst_88 : f32 to vector<2x128xf32>
    %548 = arith.addf %547, %546 : vector<2x128xf32>
    %549 = arith.divf %547, %548 : vector<2x128xf32>
    %550 = vector.extract_strided_slice %537 {offsets = [0, 256], sizes = [2, 128], strides = [1, 1]} : vector<2x512xf32> to vector<2x128xf32>
    %551 = math.tanh %550 : vector<2x128xf32>
    %552 = vector.extract_strided_slice %537 {offsets = [0, 384], sizes = [2, 128], strides = [1, 1]} : vector<2x512xf32> to vector<2x128xf32>
    %553 = arith.negf %552 : vector<2x128xf32>
    %554 = math.exp %553 : vector<2x128xf32>
    %cst_89 = arith.constant 1.000000e+00 : f32
    %555 = vector.broadcast %cst_89 : f32 to vector<2x128xf32>
    %556 = arith.addf %555, %554 : vector<2x128xf32>
    %557 = arith.divf %555, %556 : vector<2x128xf32>
    %558 = arith.mulf %549, %534 : vector<2x128xf32>
    %559 = arith.mulf %543, %551 : vector<2x128xf32>
    %560 = arith.addf %558, %559 : vector<2x128xf32>
    %561 = math.tanh %560 : vector<2x128xf32>
    %562 = arith.mulf %557, %561 : vector<2x128xf32>
    %563 = arith.mulf %28, %562 : vector<2x128xf32>
    %564 = arith.mulf %44, %531 : vector<2x128xf32>
    %565 = arith.addf %563, %564 : vector<2x128xf32>
    %566 = arith.mulf %28, %560 : vector<2x128xf32>
    %567 = arith.mulf %44, %534 : vector<2x128xf32>
    %568 = arith.addf %566, %567 : vector<2x128xf32>
    %569 = arith.mulf %28, %562 : vector<2x128xf32>
    %cst_90 = arith.constant dense<0.000000e+00> : vector<2x512xf32>
    %570 = tpu.matmul %565, %381, %cst_90 {dimension_numbers = #tpu.dot_dimension_numbers<[1], [0], [0], [1], [0, 0, 1, 1], [], []>} : vector<2x128xf32>, vector<128x512xf32>, vector<2x512xf32> -> vector<2x512xf32>
    %571 = arith.addf %395, %570 : vector<2x512xf32>
    %572 = vector.extract_strided_slice %571 {offsets = [0, 0], sizes = [2, 128], strides = [1, 1]} : vector<2x512xf32> to vector<2x128xf32>
    %573 = arith.negf %572 : vector<2x128xf32>
    %574 = math.exp %573 : vector<2x128xf32>
    %cst_91 = arith.constant 1.000000e+00 : f32
    %575 = vector.broadcast %cst_91 : f32 to vector<2x128xf32>
    %576 = arith.addf %575, %574 : vector<2x128xf32>
    %577 = arith.divf %575, %576 : vector<2x128xf32>
    %578 = vector.extract_strided_slice %571 {offsets = [0, 128], sizes = [2, 128], strides = [1, 1]} : vector<2x512xf32> to vector<2x128xf32>
    %579 = arith.negf %578 : vector<2x128xf32>
    %580 = math.exp %579 : vector<2x128xf32>
    %cst_92 = arith.constant 1.000000e+00 : f32
    %581 = vector.broadcast %cst_92 : f32 to vector<2x128xf32>
    %582 = arith.addf %581, %580 : vector<2x128xf32>
    %583 = arith.divf %581, %582 : vector<2x128xf32>
    %584 = vector.extract_strided_slice %571 {offsets = [0, 256], sizes = [2, 128], strides = [1, 1]} : vector<2x512xf32> to vector<2x128xf32>
    %585 = math.tanh %584 : vector<2x128xf32>
    %586 = vector.extract_strided_slice %571 {offsets = [0, 384], sizes = [2, 128], strides = [1, 1]} : vector<2x512xf32> to vector<2x128xf32>
    %587 = arith.negf %586 : vector<2x128xf32>
    %588 = math.exp %587 : vector<2x128xf32>
    %cst_93 = arith.constant 1.000000e+00 : f32
    %589 = vector.broadcast %cst_93 : f32 to vector<2x128xf32>
    %590 = arith.addf %589, %588 : vector<2x128xf32>
    %591 = arith.divf %589, %590 : vector<2x128xf32>
    %592 = arith.mulf %583, %568 : vector<2x128xf32>
    %593 = arith.mulf %577, %585 : vector<2x128xf32>
    %594 = arith.addf %592, %593 : vector<2x128xf32>
    %595 = math.tanh %594 : vector<2x128xf32>
    %596 = arith.mulf %591, %595 : vector<2x128xf32>
    %597 = arith.mulf %30, %596 : vector<2x128xf32>
    %598 = arith.mulf %46, %565 : vector<2x128xf32>
    %599 = arith.addf %597, %598 : vector<2x128xf32>
    %600 = arith.mulf %30, %594 : vector<2x128xf32>
    %601 = arith.mulf %46, %568 : vector<2x128xf32>
    %602 = arith.addf %600, %601 : vector<2x128xf32>
    %603 = arith.mulf %30, %596 : vector<2x128xf32>
    %cst_94 = arith.constant dense<0.000000e+00> : vector<2x512xf32>
    %604 = tpu.matmul %599, %381, %cst_94 {dimension_numbers = #tpu.dot_dimension_numbers<[1], [0], [0], [1], [0, 0, 1, 1], [], []>} : vector<2x128xf32>, vector<128x512xf32>, vector<2x512xf32> -> vector<2x512xf32>
    %605 = arith.addf %396, %604 : vector<2x512xf32>
    %606 = vector.extract_strided_slice %605 {offsets = [0, 0], sizes = [2, 128], strides = [1, 1]} : vector<2x512xf32> to vector<2x128xf32>
    %607 = arith.negf %606 : vector<2x128xf32>
    %608 = math.exp %607 : vector<2x128xf32>
    %cst_95 = arith.constant 1.000000e+00 : f32
    %609 = vector.broadcast %cst_95 : f32 to vector<2x128xf32>
    %610 = arith.addf %609, %608 : vector<2x128xf32>
    %611 = arith.divf %609, %610 : vector<2x128xf32>
    %612 = vector.extract_strided_slice %605 {offsets = [0, 128], sizes = [2, 128], strides = [1, 1]} : vector<2x512xf32> to vector<2x128xf32>
    %613 = arith.negf %612 : vector<2x128xf32>
    %614 = math.exp %613 : vector<2x128xf32>
    %cst_96 = arith.constant 1.000000e+00 : f32
    %615 = vector.broadcast %cst_96 : f32 to vector<2x128xf32>
    %616 = arith.addf %615, %614 : vector<2x128xf32>
    %617 = arith.divf %615, %616 : vector<2x128xf32>
    %618 = vector.extract_strided_slice %605 {offsets = [0, 256], sizes = [2, 128], strides = [1, 1]} : vector<2x512xf32> to vector<2x128xf32>
    %619 = math.tanh %618 : vector<2x128xf32>
    %620 = vector.extract_strided_slice %605 {offsets = [0, 384], sizes = [2, 128], strides = [1, 1]} : vector<2x512xf32> to vector<2x128xf32>
    %621 = arith.negf %620 : vector<2x128xf32>
    %622 = math.exp %621 : vector<2x128xf32>
    %cst_97 = arith.constant 1.000000e+00 : f32
    %623 = vector.broadcast %cst_97 : f32 to vector<2x128xf32>
    %624 = arith.addf %623, %622 : vector<2x128xf32>
    %625 = arith.divf %623, %624 : vector<2x128xf32>
    %626 = arith.mulf %617, %602 : vector<2x128xf32>
    %627 = arith.mulf %611, %619 : vector<2x128xf32>
    %628 = arith.addf %626, %627 : vector<2x128xf32>
    %629 = math.tanh %628 : vector<2x128xf32>
    %630 = arith.mulf %625, %629 : vector<2x128xf32>
    %631 = arith.mulf %32, %630 : vector<2x128xf32>
    %632 = arith.mulf %48, %599 : vector<2x128xf32>
    %633 = arith.addf %631, %632 : vector<2x128xf32>
    %634 = arith.mulf %32, %628 : vector<2x128xf32>
    %635 = arith.mulf %48, %602 : vector<2x128xf32>
    %636 = arith.addf %634, %635 : vector<2x128xf32>
    %637 = arith.mulf %32, %630 : vector<2x128xf32>
    %cst_98 = arith.constant dense<0.000000e+00> : vector<2x512xf32>
    %638 = tpu.matmul %633, %381, %cst_98 {dimension_numbers = #tpu.dot_dimension_numbers<[1], [0], [0], [1], [0, 0, 1, 1], [], []>} : vector<2x128xf32>, vector<128x512xf32>, vector<2x512xf32> -> vector<2x512xf32>
    %639 = arith.addf %397, %638 : vector<2x512xf32>
    %640 = vector.extract_strided_slice %639 {offsets = [0, 0], sizes = [2, 128], strides = [1, 1]} : vector<2x512xf32> to vector<2x128xf32>
    %641 = arith.negf %640 : vector<2x128xf32>
    %642 = math.exp %641 : vector<2x128xf32>
    %cst_99 = arith.constant 1.000000e+00 : f32
    %643 = vector.broadcast %cst_99 : f32 to vector<2x128xf32>
    %644 = arith.addf %643, %642 : vector<2x128xf32>
    %645 = arith.divf %643, %644 : vector<2x128xf32>
    %646 = vector.extract_strided_slice %639 {offsets = [0, 128], sizes = [2, 128], strides = [1, 1]} : vector<2x512xf32> to vector<2x128xf32>
    %647 = arith.negf %646 : vector<2x128xf32>
    %648 = math.exp %647 : vector<2x128xf32>
    %cst_100 = arith.constant 1.000000e+00 : f32
    %649 = vector.broadcast %cst_100 : f32 to vector<2x128xf32>
    %650 = arith.addf %649, %648 : vector<2x128xf32>
    %651 = arith.divf %649, %650 : vector<2x128xf32>
    %652 = vector.extract_strided_slice %639 {offsets = [0, 256], sizes = [2, 128], strides = [1, 1]} : vector<2x512xf32> to vector<2x128xf32>
    %653 = math.tanh %652 : vector<2x128xf32>
    %654 = vector.extract_strided_slice %639 {offsets = [0, 384], sizes = [2, 128], strides = [1, 1]} : vector<2x512xf32> to vector<2x128xf32>
    %655 = arith.negf %654 : vector<2x128xf32>
    %656 = math.exp %655 : vector<2x128xf32>
    %cst_101 = arith.constant 1.000000e+00 : f32
    %657 = vector.broadcast %cst_101 : f32 to vector<2x128xf32>
    %658 = arith.addf %657, %656 : vector<2x128xf32>
    %659 = arith.divf %657, %658 : vector<2x128xf32>
    %660 = arith.mulf %651, %636 : vector<2x128xf32>
    %661 = arith.mulf %645, %653 : vector<2x128xf32>
    %662 = arith.addf %660, %661 : vector<2x128xf32>
    %663 = math.tanh %662 : vector<2x128xf32>
    %664 = arith.mulf %659, %663 : vector<2x128xf32>
    %665 = arith.mulf %34, %664 : vector<2x128xf32>
    %666 = arith.select %70, %433, %665 : vector<2x128xi1>, vector<2x128xf32>
    %667 = arith.select %70, %467, %637 : vector<2x128xi1>, vector<2x128xf32>
    %668 = arith.select %70, %501, %603 : vector<2x128xi1>, vector<2x128xf32>
    %669 = arith.select %70, %535, %569 : vector<2x128xi1>, vector<2x128xf32>
    %670 = arith.select %70, %569, %535 : vector<2x128xi1>, vector<2x128xf32>
    %671 = arith.select %70, %603, %501 : vector<2x128xi1>, vector<2x128xf32>
    %672 = arith.select %70, %637, %467 : vector<2x128xi1>, vector<2x128xf32>
    %673 = arith.select %70, %665, %433 : vector<2x128xi1>, vector<2x128xf32>
    %674 = tpu.concatenate %666, %667, %668, %669, %670, %671, %672, %673 in 0 : vector<2x128xf32>, vector<2x128xf32>, vector<2x128xf32>, vector<2x128xf32>, vector<2x128xf32>, vector<2x128xf32>, vector<2x128xf32>, vector<2x128xf32> -> vector<16x128xf32>
    %c0_102 = arith.constant 0 : index
    %c0_103 = arith.constant 0 : index
    %675 = vector.load %arg6[%c0_102, %c0_103] : memref<128x128xf32, #tpu.memory_space<vmem>>, vector<128x128xf32>
    %cst_104 = arith.constant dense<0.000000e+00> : vector<16x128xf32>
    %676 = tpu.matmul %674, %675, %cst_104 {dimension_numbers = #tpu.dot_dimension_numbers<[1], [0], [0], [1], [0, 0, 1, 1], [], []>} : vector<16x128xf32>, vector<128x128xf32>, vector<16x128xf32> -> vector<16x128xf32>
    %c0_105 = arith.constant 0 : index
    %c0_106 = arith.constant 0 : index
    %677 = vector.load %arg7[%c0_105, %c0_106] : memref<1x128xf32, #tpu.memory_space<vmem>>, vector<1x128xf32>
    %678 = vector.broadcast %677 : vector<1x128xf32> to vector<16x128xf32>
    %679 = arith.addf %676, %678 : vector<16x128xf32>
    %c0_107 = arith.constant 0 : index
    %c0_108 = arith.constant 0 : index
    %680 = vector.load %arg8[%c0_107, %c0_108] : memref<16x128xf32, #tpu.memory_space<vmem>>, vector<16x128xf32>
    tpu.vector_store %arg8[%c0_107, %c0_108], %679 {strides = array<i32>} : memref<16x128xf32, #tpu.memory_space<vmem>>, vector<16x128xf32>,
    %681 = tpu.iota {dimensions = array<i32: 1>} : vector<16x128xi32>
    %c10_i32 = arith.constant 10 : i32
    %682 = vector.broadcast %c10_i32 : i32 to vector<16x128xi32>
    %683 = arith.cmpi slt, %681, %682 : vector<16x128xi32>
    %cst_109 = arith.constant -1.000000e+30 : f32
    %684 = vector.broadcast %cst_109 : f32 to vector<16x128xf32>
    %685 = arith.select %683, %679, %684 : vector<16x128xi1>, vector<16x128xf32>
    %cst_110 = arith.constant dense<0xFF800000> : vector<16xf32>
    %686 = vector.multi_reduction <maximumf>, %685, %cst_110 [1] : vector<16x128xf32> to vector<16xf32>
    %687 = vector.shape_cast %686 : vector<16xf32> to vector<16x1xf32>
    %688 = vector.broadcast %687 : vector<16x1xf32> to vector<16x128xf32>
    %689 = arith.cmpf oeq, %685, %688 : vector<16x128xf32>
    %c128_i32_111 = arith.constant 128 : i32
    %690 = vector.broadcast %c128_i32_111 : i32 to vector<16x128xi32>
    %691 = arith.select %689, %681, %690 : vector<16x128xi1>, vector<16x128xi32>
    %cst_112 = arith.constant dense<2147483647> : vector<16xi32>
    %692 = vector.multi_reduction <minsi>, %691, %cst_112 [1] : vector<16x128xi32> to vector<16xi32>
    %693 = vector.shape_cast %692 : vector<16xi32> to vector<16x1xi32>
    %c0_113 = arith.constant 0 : index
    %c0_114 = arith.constant 0 : index
    %694 = vector.load %arg9[%c0_113, %c0_114] : memref<16x1xi32, #tpu.memory_space<vmem>>, vector<16x1xi32>
    tpu.vector_store %arg9[%c0_113, %c0_114], %693 {strides = array<i32>} : memref<16x1xi32, #tpu.memory_space<vmem>>, vector<16x1xi32>,
    return
  }
  func.func @transform_0(%arg0: i32) -> (i32, i32, i32) {
    %c0_i32 = arith.constant 0 : i32
    %c0_i32_0 = arith.constant 0 : i32
    %c0_i32_1 = arith.constant 0 : i32
    %c0_i32_2 = arith.constant 0 : i32
    return %c0_i32, %c0_i32_0, %c0_i32_1 : i32, i32, i32
  }
  func.func @transform_1(%arg0: i32) -> (i32, i32, i32) {
    %c0_i32 = arith.constant 0 : i32
    %c0_i32_0 = arith.constant 0 : i32
    %c0_i32_1 = arith.constant 0 : i32
    %c0_i32_2 = arith.constant 0 : i32
    return %c0_i32, %c0_i32_0, %c0_i32_1 : i32, i32, i32
  }
  func.func @transform_2(%arg0: i32) -> (i32, i32, i32) {
    %c0_i32 = arith.constant 0 : i32
    %c0_i32_0 = arith.constant 0 : i32
    %c0_i32_1 = arith.constant 0 : i32
    %c0_i32_2 = arith.constant 0 : i32
    return %c0_i32, %c0_i32_0, %c0_i32_1 : i32, i32, i32
  }
  func.func @transform_3(%arg0: i32) -> (i32, i32, i32) {
    %c0_i32 = arith.constant 0 : i32
    %c0_i32_0 = arith.constant 0 : i32
    %c0_i32_1 = arith.constant 0 : i32
    %c0_i32_2 = arith.constant 0 : i32
    return %c0_i32, %c0_i32_0, %c0_i32_1 : i32, i32, i32
  }
  func.func @transform_4(%arg0: i32) -> (i32, i32, i32) {
    %c0_i32 = arith.constant 0 : i32
    %c0_i32_0 = arith.constant 0 : i32
    %c0_i32_1 = arith.constant 0 : i32
    %c0_i32_2 = arith.constant 0 : i32
    return %c0_i32, %c0_i32_0, %c0_i32_1 : i32, i32, i32
  }
  func.func @transform_5(%arg0: i32) -> (i32, i32) {
    %c0_i32 = arith.constant 0 : i32
    %c0_i32_0 = arith.constant 0 : i32
    %c0_i32_1 = arith.constant 0 : i32
    return %c0_i32, %c0_i32_0 : i32, i32
  }
  func.func @transform_6(%arg0: i32) -> (i32, i32) {
    %c0_i32 = arith.constant 0 : i32
    %c0_i32_0 = arith.constant 0 : i32
    %c0_i32_1 = arith.constant 0 : i32
    return %c0_i32, %c0_i32_0 : i32, i32
  }
  func.func @transform_7(%arg0: i32) -> (i32, i32) {
    %c0_i32 = arith.constant 0 : i32
    %c0_i32_0 = arith.constant 0 : i32
    %c0_i32_1 = arith.constant 0 : i32
    return %c0_i32, %c0_i32_0 : i32, i32
  }
  func.func @transform_8(%arg0: i32) -> (i32, i32) {
    %c0_i32 = arith.constant 0 : i32
    %c0_i32_0 = arith.constant 0 : i32
    %c0_i32_1 = arith.constant 0 : i32
    return %c0_i32, %c0_i32_0 : i32, i32
  }
}

</mosaic_0001>

<bundles_post_ra>
// kernel: net_forward.2
= control target key start
LH: loop header
LB: loop body
LE: loop exit
PB: predicated region body
PF: predicated region fallthrough
CT: control target
= control target key end

     0   :  { %s4516_s0 = inlined_call_operand.vmem [shape: f32[2,8,128], index: 0, kind: input, shape index: {}]   ;;  %s4517_s1 = inlined_call_operand.vmem [shape: f32[2,1,8], index: 1, kind: input, shape index: {}]   ;;  %s4518_s2 = inlined_call_operand.vmem [shape: f32[1,128], index: 2, kind: input, shape index: {}]   ;;  %s4519_s3 = inlined_call_operand.vmem [shape: f32[1,128], index: 3, kind: input, shape index: {}]   ;;  %s4520_s4 = inlined_call_operand.hbm [shape: bf16[2,128,768], index: 4, kind: input, shape index: {}]   ;;  %s4521_s5 = inlined_call_operand.vmem [shape: f32[2,1,768], index: 5, kind: input, shape index: {}]   ;;  %s4522_s6 = inlined_call_operand.vmem [shape: bf16[2,256,128], index: 6, kind: input, shape index: {}]   ;;  %s4523_s7 = inlined_call_operand.vmem [shape: f32[2,1,128], index: 7, kind: input, shape index: {}]   ;;  %s4524_s8 = inlined_call_operand.vmem [shape: f32[2,1,128], index: 8, kind: input, shape index: {}]   ;;  %s4525_s9 = inlined_call_operand.vmem [shape: f32[2,1,128], index: 9, kind: input, shape index: {}]   ;;  %s4526_s10 = inlined_call_operand.hbm [shape: bf16[2,128,256], index: 10, kind: input, shape index: {}]   ;;  %s4527_s11 = inlined_call_operand.vmem [shape: f32[2,1,256], index: 11, kind: input, shape index: {}]   ;;  %s4528_s12 = inlined_call_operand.hbm [shape: bf16[2,256,128], index: 12, kind: input, shape index: {}]   ;;  %s4529_s13 = inlined_call_operand.vmem [shape: f32[2,1,128], index: 13, kind: input, shape index: {}]   ;;  %s4530_s14 = inlined_call_operand.vmem [shape: f32[2,1,128], index: 14, kind: input, shape index: {}]   ;;  %s4531_s15 = inlined_call_operand.vmem [shape: f32[2,1,128], index: 15, kind: input, shape index: {}]   ;;  %s4532_s16 = inlined_call_operand.vmem [shape: f32[2,8,128], index: 16, kind: output, shape index: {}]  }
   0x1   :  { %4538 = sst [smem:[#allocation10_spill]] %s4516_s0 }
   0x2   :  { %4539 = sst [smem:[#allocation11_spill]] %s4530_s14 }
   0x3   :  { %4540 = sst [smem:[#allocation12_spill]] %s4531_s15 }
   0x4   :  { %4541 = sst [smem:[#allocation13_spill]] %s4532_s16 }
   0x5   :  { %21 = vsyncpa [#allocation3], 0 }
   0x6   :  { %22 = vsyncpa [#allocation5], 0  ;;  %s4114_s21 = smov 0  }
   0x7 LB: > { %4542 = sst [smem:[#allocation9_spill]] %s4015_s21  ;;  %s4017_s22 = smov [#allocation4]   ;;  %s4015_s21 = sphi %s4114_s21, %s28_s21  }
   0x8   : > { %s451_s23 = sshll.u32 %s4017_s22, 4  ;;  %s4120_s24 = sadd.s32 4294967295, %s4015_s21   ;;  %s4125_s23 = int_to_ptr.vmem [resolvable:$true] %s451_s23 }
   0x9   : > { %p3164_p0 = scmp.ge.s32.totalorder %s4015_s21, 1  ;;  %p405_p1 = scmp.lt.s32.totalorder %s4015_s21, 3 }
   0xa   : > { %p4536_p2 = scmp.eq.s32.totalorder %s4120_s24, 0  ;;  %s4018_s26 = smov [#allocation2]  }
   0xb   : > { %p4127_p3 = pnand %p3164_p0, %p405_p1  ;;  %s423_s27 = sshll.u32 %s4018_s26, 4  ;;  %s4133_s27 = int_to_ptr.vmem [resolvable:$true] %s423_s27 }
   0xc   : > { %s4019_s29 = smov [#allocation6]   ;;  %s3917_s18 = scalar_lea.hbm %s4526_s10, 4096 }
   0xd   : > { %s4543_s25 = scalar_select %p4127_p3, 1, 0 }
   0xe   : > { %p3591_p4 = pneg %p4127_p3  ;;  %s4141_s30 = sshll.u32 %s4019_s29, 4  ;;  %s468_s30 = int_to_ptr.vmem [resolvable:$true] %s4141_s30 }
   0xf   : > { %p3918_p6 = scmp.ne.s32.totalorder %s4526_s10, %s3917_s18  ;;  %p3924_p10 = scmp.lt.u32.totalorder %s3917_s18, %s4526_s10 }
  0x10   : > { %p4137_p5 = pnand %p4536_p2, %p3591_p4 }
  0x12   : > { %p4151_p7 = pneg %p4137_p5 }
  0x14   : > { %p3920_p8 = pnand %p4151_p7, %p3918_p6 }
  0x16   : > { %p3921_p9 = pneg %p3920_p8 }
  0x18   : > { %p3926_p11 = pnand %p3924_p10, %p3921_p9 }
  0x1a   : > { %3929 = shalt.err (!%p3926_p11)
}
  0x1b   : > { %s3930_s0 = scalar_lea.vmem %s4125_s23, 4096  ;;  %p3938_p1 = scmp.lt.s32.totalorder %s4125_s23, %s4125_s23 }
  0x1c   : > { %p3931_p12 = scmp.ne.s32.totalorder %s4125_s23, %s3930_s0  ;;  %p3939_p4 = scmp.lt.s32.totalorder %s3930_s0, %s3930_s0 }
  0x1e   : > { %p3933_p13 = pnand %p3931_p12, %p4151_p7  ;;  %p3940_p6 = por %p3939_p4, %p3938_p1 }
  0x20   : > { %p3934_p0 = pneg %p3933_p13 }
  0x22   : > { %p3941_p8 = pnand %p3940_p6, %p3934_p0 }
  0x24   : > { %3944 = shalt.err (!%p3941_p8)
}
  0x25   : > { %s4020_s17 = smov 128   ;;  %s4021_s18 = smov 8  }
  0x26   : > { %3597 = dma.hbm_to_vmem [thread:$0]  (!%p4137_p5), %s4526_s10, 4096, %s4125_s23, [#allocation5], %s4020_s17, %s4020_s17, %s4021_s18  }
  0x27   : > { %s3945_s21 = scalar_lea.hbm %s4520_s4, 12288 }
  0x28   : > { %p3946_p9 = scmp.ne.s32.totalorder %s4520_s4, %s3945_s21  ;;  %p3952_p12 = scmp.lt.u32.totalorder %s3945_s21, %s4520_s4 }
  0x2a   : > { %p3948_p10 = pnand %p3946_p9, %p4151_p7 }
  0x2c   : > { %p3949_p11 = pneg %p3948_p10 }
  0x2e   : > { %p3954_p13 = pnand %p3952_p12, %p3949_p11 }
  0x30   : > { %3957 = shalt.err (!%p3954_p13)
}
  0x31   : > { %s3958_s23 = scalar_lea.vmem %s4133_s27, 12288  ;;  %p3966_p6 = scmp.lt.s32.totalorder %s4133_s27, %s4133_s27 }
  0x32   : > { %p3959_p0 = scmp.ne.s32.totalorder %s4133_s27, %s3958_s23  ;;  %p3967_p8 = scmp.lt.s32.totalorder %s3958_s23, %s3958_s23 }
  0x34   : > { %p3961_p1 = pnand %p3959_p0, %p4151_p7  ;;  %p3968_p9 = por %p3967_p8, %p3966_p6 }
  0x36   : > { %p3962_p4 = pneg %p3961_p1 }
  0x38   : > { %p3969_p10 = pnand %p3968_p9, %p3962_p4 }
  0x3a   : > { %3972 = shalt.err (!%p3969_p10)
}
  0x3b   : > { %s4022_s15 = smov 384   ;;  %s4023_s14 = smov 24  }
  0x3c   : > { %3594 = dma.hbm_to_vmem [thread:$0]  (!%p4137_p5), %s4520_s4, 12288, %s4133_s27, [#allocation3], %s4022_s15, %s4022_s15, %s4023_s14  }
  0x3d   : > { %s3973_s19 = scalar_lea.hbm %s4528_s12, 4096 }
  0x3e   : > { %p3974_p11 = scmp.ne.s32.totalorder %s4528_s12, %s3973_s19  ;;  %p3980_p0 = scmp.lt.u32.totalorder %s3973_s19, %s4528_s12 }
  0x40   : > { %p3976_p12 = pnand %p3974_p11, %p4151_p7 }
  0x42   : > { %p3977_p13 = pneg %p3976_p12 }
  0x44   : > { %p3982_p1 = pnand %p3980_p0, %p3977_p13 }
  0x46   : > { %3985 = shalt.err (!%p3982_p1)
}
  0x47   : > { %s3986_s23 = scalar_lea.vmem %s468_s30, 4096  ;;  %p3994_p9 = scmp.lt.s32.totalorder %s468_s30, %s468_s30 }
  0x48   : > { %p3987_p4 = scmp.ne.s32.totalorder %s468_s30, %s3986_s23  ;;  %p3995_p10 = scmp.lt.s32.totalorder %s3986_s23, %s3986_s23 }
  0x4a   : > { %p3989_p6 = pnand %p3987_p4, %p4151_p7  ;;  %p3996_p2 = por %p3995_p10, %p3994_p9 }
  0x4c   : > { %p3990_p8 = pneg %p3989_p6 }
  0x4e   : > { %p3997_p3 = pnand %p3996_p2, %p3990_p8 }
  0x50   : > { %4000 = shalt.err (!%p3997_p3)
}
  0x51   : > { %s4024_s27 = smov 64   ;;  %s4025_s15 = smov 4  }
  0x52   : > { %3600 = dma.hbm_to_vmem [thread:$0]  (!%p4137_p5), %s4528_s12, 4096, %s468_s30, [#allocation5], %s4024_s27, %s4024_s27, %s4025_s15  }
  0x53   : > { %p4546_p11 = scmp.ne.s32.totalorder %s4543_s25, 0 }
  0x54   : > { %p4547_p12 = scmp.eq.s32.totalorder (!%p4546_p11), %s4120_s24, 0 }
  0x55   : > { %505 = sbr.rel (%p4546_p11) target bundleno = 4971 (0x136b), region = 84 }
  0x5c   : > { %4006 = dma.done.wait (%p4547_p12), [#allocation3], 12288   ;;  %p4548_p7 = pmov %p4547_p12 }
  0x5e   : > { %4008 = vsyncadd (%p4548_p7), [#allocation3], 4294955008  ;;  %p4549_p2 = pmov %p4548_p7 }
  0x60   : > { %4010 = dma.done.wait (%p4549_p2), [#allocation5], 8192   ;;  %p4550_p3 = pmov %p4549_p2 }
  0x61   : > { %p564_p13 = scmp.lt.s32.totalorder %s4120_s24, 1  ;;  %s4551_s22 = sld [smem:[#allocation10_spill]]  ;;  %v3627_v1 = vld [vmem:[#allocation2 + $0x4] ss:$24 sps:$4 sm:$0xff]   ;;  %v3629_v2 = vld [vmem:[#allocation2] ss:$24 sps:$4 sm:$0xff]  }
  0x62   : > { %4012 = vsyncadd (%p4550_p3), [#allocation5], 4294959104  ;;  %v3630_v3 = vld [vmem:[#allocation2 + $0xc] ss:$24 sps:$4 sm:$0xff]   ;;  %v3632_v4 = vld [vmem:[#allocation2 + $0x8] ss:$24 sps:$4 sm:$0xff]   ;;  %929 = vmatprep.subr.bf16.mxu0 %v3627_v1  ;;  %v659_v1 = vlaneseq }
  0x63   : > { %s4557_s24 = smov (!%p564_p13, %s4120_s24), 1  ;;  %v3633_v5 = vld [vmem:[#allocation2 + $0x34] ss:$24 sps:$4 sm:$0xff]   ;;  %970 = vmatprep.subr.bf16.mxu1 %v3630_v3  ;;  %v3635_v6 = vld [vmem:[#allocation2 + $0x30] ss:$24 sps:$4 sm:$0xff]   ;;  %930 = vmatpush1.bf16.msra.mxu0 %v3629_v2  ;;  %v4026_v31 = vmov 0  }
  0x64   : > { %s3173_s25 = sshll.u32 %s4557_s24, 3  ;;  %v3636_v7 = vld [vmem:[#allocation2 + $0x3c] ss:$24 sps:$4 sm:$0xff]   ;;  %v3638_v8 = vld [vmem:[#allocation2 + $0x38] ss:$24 sps:$4 sm:$0xff]   ;;  %971 = vmatpush1.bf16.msra.mxu1 %v3632_v4  ;;  %931 = vmatprep.subr.bf16.mxu0 %v3633_v5  ;;  %vm4028_vm0 = vmmov 0   ;;  %s570_s27 = scalar_lea.vmem %s4517_s1, %s4557_s24 }
  0x65   : > { %v3639_v9 = vld [vmem:[#allocation2 + $0x64] ss:$24 sps:$4 sm:$0xff]   ;;  %972 = vmatprep.subr.bf16.mxu1 %v3636_v7  ;;  %v3641_v11 = vld [vmem:[#allocation2 + $0x60] ss:$24 sps:$4 sm:$0xff]   ;;  %v3645_v17 = vld [vmem:[#allocation2 + $0x94] ss:$24 sps:$4 sm:$0xff]   ;;  %961 = vmatprep.mubr.bf16.mxu0 %v4026_v31 }
  0x66   : > { %v3642_v10 = vld [vmem:[#allocation2 + $0x6c] ss:$24 sps:$4 sm:$0xff]   ;;  %v3644_v16 = vld [vmem:[#allocation2 + $0x68] ss:$24 sps:$4 sm:$0xff]   ;;  %v3648_v19 = vld [vmem:[#allocation2 + $0x9c] ss:$24 sps:$4 sm:$0xff]   ;;  %1002 = vmatprep.mubr.bf16.mxu1 %v4026_v31 }
  0x67   : > { %s567_s21 = scalar_lea.vmem %s4551_s22, %s3173_s25  ;;  %932 = vmatpush1.bf16.msra.mxu0 %v3635_v6  ;;  %v3647_v18 = vld [vmem:[#allocation2 + $0x90] ss:$24 sps:$4 sm:$0xff]   ;;  %v3651_v21 = vld [vmem:[#allocation2 + $0xc4] ss:$24 sps:$4 sm:$0xff]   ;;  %v3653_v22 = vld [vmem:[#allocation2 + $0xc0] ss:$24 sps:$4 sm:$0xff]  }
  0x68   : > { %v576_v0 = vld [vmem:[%s567_s21] sm:$0xff]  ;;  %973 = vmatpush1.bf16.msra.mxu1 %v3638_v8  ;;  %933 = vmatprep.subr.bf16.mxu0 %v3639_v9  ;;  %v3650_v20 = vld [vmem:[#allocation2 + $0x98] ss:$24 sps:$4 sm:$0xff]   ;;  %v3657_v25 = vld [vmem:[#allocation2 + $0xf4] ss:$24 sps:$4 sm:$0xff]   ;;  %v4250_v2 = vshrl.u32 %v659_v1, 7 }
  0x69   : > { %579 = vadd.xlane.f32.xlu0 %v576_v0  ;;  %974 = vmatprep.subr.bf16.mxu1 %v3642_v10  ;;  %v3654_v23 = vld [vmem:[#allocation2 + $0xcc] ss:$24 sps:$4 sm:$0xff]   ;;  %v3656_v24 = vld [vmem:[#allocation2 + $0xc8] ss:$24 sps:$4 sm:$0xff]   ;;  %v3660_v26 = vld [vmem:[#allocation2 + $0xfc] ss:$24 sps:$4 sm:$0xff]  }
  0x6a   : > { %v3659_v27 = vld [vmem:[#allocation2 + $0xf0] ss:$24 sps:$4 sm:$0xff]   ;;  %v3663_v29 = vld [vmem:[#allocation2 + $0x124] ss:$24 sps:$4 sm:$0xff]   ;;  %v3665_v32 = vld [vmem:[#allocation2 + $0x120] ss:$24 sps:$4 sm:$0xff]  }
  0x6b   : > { %934 = vmatpush1.bf16.msra.mxu0 %v3641_v11  ;;  %v3662_v28 = vld [vmem:[#allocation2 + $0xf8] ss:$24 sps:$4 sm:$0xff]   ;;  %v3666_v30 = vld [vmem:[#allocation2 + $0x12c] ss:$24 sps:$4 sm:$0xff]   ;;  %v3668_v33 = vld [vmem:[#allocation2 + $0x128] ss:$24 sps:$4 sm:$0xff]  }
  0x6c   : > { %975 = vmatpush1.bf16.msra.mxu1 %v3644_v16  ;;  %935 = vmatprep.subr.bf16.mxu0 %v3645_v17  ;;  %v3669_v34 = vld [vmem:[#allocation2 + $0x154] ss:$24 sps:$4 sm:$0xff]   ;;  %v3671_v36 = vld [vmem:[#allocation2 + $0x150] ss:$24 sps:$4 sm:$0xff]   ;;  %v3175_v43 = vld [vmem:[%s4518_s2] ss:$0 sm:$0xff] }
  0x6d   : > { %976 = vmatprep.subr.bf16.mxu1 %v3648_v19  ;;  %v3672_v35 = vld [vmem:[#allocation2 + $0x15c] ss:$24 sps:$4 sm:$0xff]   ;;  %v3674_v37 = vld [vmem:[#allocation2 + $0x158] ss:$24 sps:$4 sm:$0xff]   ;;  %v3176_v45 = vld [vmem:[%s4519_s3] ss:$0 sm:$0xff] }
  0x6e   : > { %v3677_v38 = vld [vmem:[#allocation2 + $0x14] ss:$24 sps:$4 sm:$0xff]   ;;  %v3675_v48 = vld [vmem:[#allocation2 + $0x10] ss:$24 sps:$4 sm:$0xff]   ;;  %v3680_v50 = vld [vmem:[#allocation2 + $0x44] ss:$24 sps:$4 sm:$0xff]  }
  0x6f   : > { %936 = vmatpush1.bf16.msra.mxu0 %v3647_v18  ;;  %v3678_v51 = vld [vmem:[#allocation2 + $0x40] ss:$24 sps:$4 sm:$0xff]   ;;  %v3683_v52 = vld [vmem:[#allocation2 + $0x74] ss:$24 sps:$4 sm:$0xff]   ;;  %v3681_v53 = vld [vmem:[#allocation2 + $0x70] ss:$24 sps:$4 sm:$0xff]  }
  0x70   : > { %977 = vmatpush1.bf16.msra.mxu1 %v3650_v20  ;;  %937 = vmatprep.subr.bf16.mxu0 %v3651_v21  ;;  %v3686_v54 = vld [vmem:[#allocation2 + $0xa4] ss:$24 sps:$4 sm:$0xff]   ;;  %v3684_v55 = vld [vmem:[#allocation2 + $0xa0] ss:$24 sps:$4 sm:$0xff]   ;;  %v3689_v56 = vld [vmem:[#allocation2 + $0xd4] ss:$24 sps:$4 sm:$0xff]  }
  0x71   : > { %978 = vmatprep.subr.bf16.mxu1 %v3654_v23  ;;  %v3687_v57 = vld [vmem:[#allocation2 + $0xd0] ss:$24 sps:$4 sm:$0xff]   ;;  %v3692_v58 = vld [vmem:[#allocation2 + $0x104] ss:$24 sps:$4 sm:$0xff]   ;;  %v3690_v59 = vld [vmem:[#allocation2 + $0x100] ss:$24 sps:$4 sm:$0xff]  }
  0x72   : > { %v3695_v60 = vld [vmem:[#allocation2 + $0x134] ss:$24 sps:$4 sm:$0xff]   ;;  %v3693_v61 = vld [vmem:[#allocation2 + $0x130] ss:$24 sps:$4 sm:$0xff]   ;;  %v3698_v62 = vld [vmem:[#allocation2 + $0x164] ss:$24 sps:$4 sm:$0xff]  }
  0x73   : > { %938 = vmatpush1.bf16.msra.mxu0 %v3653_v22  ;;  %v3696_v63 = vld [vmem:[#allocation2 + $0x160] ss:$24 sps:$4 sm:$0xff]   ;;  %v669_v3 = vsub.s32 2, %v4250_v2  ;;  %v4262_v6 = vsub.s32 0, %v4250_v2  ;;  %v673_v7 = vsub.s32 3, %v4250_v2  ;;  %v4271_v21 = vsub.s32 1, %v4250_v2 }
  0x74   : > { %979 = vmatpush1.bf16.msra.mxu1 %v3656_v24  ;;  %939 = vmatprep.subr.bf16.mxu0 %v3657_v25  ;;  %v4256_v4 = vld [vmem:[%s4521_s5] sm:$0x3f]  ;;  %vm1174_vm1 = vcmask 1043456   ;;  %vm1146_vm2 = vcmask 64512   ;;  %s4552_s29 = sld [smem:[#allocation11_spill]]  ;;  %s4554_s18 = sld [smem:[#allocation13_spill]] }
  0x75   : > { %980 = vmatprep.subr.bf16.mxu1 %v3660_v26  ;;  %v670_v5 = vrot.slane %v4256_v4, %v669_v3  ;;  %v674_v17 = vrot.slane %v4256_v4, %v673_v7  ;;  %v666_v24 = vrot.slane %v4256_v4, %v4271_v21 }
  0x77   : > { %940 = vmatpush1.bf16.msra.mxu0 %v3659_v27 }
  0x78   : > { %981 = vmatpush1.bf16.msra.mxu1 %v3662_v28  ;;  %941 = vmatprep.subr.bf16.mxu0 %v3663_v29  ;;  %v677_v28 = vsub.s32 4, %v4250_v2 }
  0x79   : > { %982 = vmatprep.subr.bf16.mxu1 %v3666_v30 }
  0x7a   : > { %v678_v29 = vrot.slane %v4256_v4, %v677_v28  ;;  %s574_s19 = scalar_lea.vmem %s4554_s18, %s3173_s25 }
  0x7b   : > { %942 = vmatpush1.bf16.msra.mxu0 %v3665_v32 }
  0x7c   : > { %983 = vmatpush1.bf16.msra.mxu1 %v3668_v33  ;;  %943 = vmatprep.subr.bf16.mxu0 %v3669_v34 }
  0x7d   : > { %984 = vmatprep.subr.bf16.mxu1 %v3672_v35 }
  0x7f   : > { %944 = vmatpush1.bf16.msra.mxu0 %v3671_v36 }
  0x80   : > { %985 = vmatpush1.bf16.msra.mxu1 %v3674_v37  ;;  %1011 = vmatprep.subr.bf16.mxu0 %v3677_v38  ;;  %v605_v38 = vld [vmem:[%s570_s27] sm:$0x1]  ;;  %s4553_s27 = sld [smem:[#allocation12_spill]] }
  0xf6   : > { %v580_v12 = vpop.xlane.xlu0 %579 }
  0xf7   : > { %v582_v13 = vmul.f32 0.0078125, %v580_v12 }
  0xf9   : > { %v583_v14 = vsub.f32 %v576_v0, %v582_v13  ;;  %v4027_v0 = vmov 0.0   ;;  %v662_v13 = vrot.slane %v4256_v4, %v4262_v6 }
  0xfa   : > { %3531 = vmatprep.subr.bf16.mxu1 %v4027_v0 }
  0xfb   : > { %v584_v15 = vmul.f32 %v583_v14, %v583_v14 }
  0xfd   : > { %585 = vadd.xlane.f32.xlu0 %v584_v15 }
 0x18a   : > { %v586_v39 = vpop.xlane.xlu0 %585 }
 0x18b   : > { %v587_v40 = vmul.f32 0.0078125, %v586_v39  ;;  %v606_v39 = vsub.f32 1.0, %v605_v38  ;;  %v3713_v38 = vld [vmem:[%s4522_s6 + $0x78] sm:$0xff]  }
 0x18d   : > { %v588_v41 = vadd.f32 1e-12, %v587_v40  ;;  %v607_v40 = vmul.f32 -10000.0, %v606_v39  ;;  %v3714_v39 = vld [vmem:[%s4522_s6 + $0x38] sm:$0xff]  }
 0x18f   : > { %3883 = vrsqrt.f32 %v588_v41  ;;  %v4294_v41 = vrot.slane %v607_v40, %v4262_v6 }
 0x199   : > { %v3884_v42 = vpop.eup %3883 }
 0x19a   : > { %v590_v44 = vmul.f32 %v3884_v42, %v583_v14 }
 0x19c   : > { %v597_v46 = vmul.f32 %v3175_v43, %v590_v44 }
 0x19e   : > { %v4242_v47 = vadd.f32 %v3176_v45, %v597_v46 }
 0x1a0   : > { %v608_v49 = vpack.c.bf16 %v4242_v47, %v4242_v47 }
 0x1a2   : > { %962 = vmatmul.mubr.bf16.vlgmr.msra.gmra.mrb[0].mxu0 %v608_v49  ;;  %1003 = vmatmul.mubr.bf16.vlgmr.msra.gmra.mrb[0].mxu1 %v608_v49 }
 0x1a3   : > { %1012 = vmatpush1.bf16.msra.mxu0 %v3675_v48  ;;  %1043 = vmatprep.mubr.bf16.mxu0 %v4026_v31 }
 0x1a4   : > { %1013 = vmatprep.subr.bf16.mxu0 %v3680_v50  ;;  %3533 = vmatprep.mubr.msk.bf16.mxu1 %vm4028_vm0, %v4027_v0 }
 0x1a7   : > { %1014 = vmatpush1.bf16.msra.mxu0 %v3678_v51 }
 0x1a8   : > { %1015 = vmatprep.subr.bf16.mxu0 %v3683_v52 }
 0x1ab   : > { %1016 = vmatpush1.bf16.msra.mxu0 %v3681_v53 }
 0x1ac   : > { %1017 = vmatprep.subr.bf16.mxu0 %v3686_v54 }
 0x1af   : > { %1018 = vmatpush1.bf16.msra.mxu0 %v3684_v55 }
 0x1b0   : > { %1019 = vmatprep.subr.bf16.mxu0 %v3689_v56 }
 0x1b3   : > { %1020 = vmatpush1.bf16.msra.mxu0 %v3687_v57 }
 0x1b4   : > { %1021 = vmatprep.subr.bf16.mxu0 %v3692_v58 }
 0x1b7   : > { %1022 = vmatpush1.bf16.msra.mxu0 %v3690_v59 }
 0x1b8   : > { %1023 = vmatprep.subr.bf16.mxu0 %v3695_v60 }
 0x1bb   : > { %1024 = vmatpush1.bf16.msra.mxu0 %v3693_v61 }
 0x1bc   : > { %1025 = vmatprep.subr.bf16.mxu0 %v3698_v62 }
 0x1bf   : > { %1026 = vmatpush1.bf16.msra.mxu0 %v3696_v63 }
 0x1c2   : > { %1044 = vmatmul.mubr.bf16.vlgmr.msra.gmra.mrb[4].mxu0 %v608_v49 }
 0x275   : > { %v963_v8 = vpop.f32.mrb[0].mxu0  ;;  %v1004_v9 = vpop.f32.mrb[0].mxu1 }
 0x276   : > { %v1005_v10 = vadd.f32 %v1004_v9, %v670_v5  ;;  %v965_v11 = vpop.f32.mrb[1].mxu0  ;;  %v1006_v12 = vpop.f32.mrb[1].mxu1  ;;  %v964_v20 = vadd.f32 %v963_v8, %v662_v13  ;;  %v3699_v9 = vld [vmem:[%s4522_s6 + $0x40] sm:$0xff]   ;;  %v3703_v13 = vld [vmem:[%s4522_s6 + $0x50] sm:$0xff]  }
 0x277   : > { %v967_v14 = vpop.f32.mrb[2].mxu0  ;;  %v1008_v15 = vpop.f32.mrb[2].mxu1  ;;  %v1007_v22 = vadd.f32 %v1006_v12, %v674_v17  ;;  %v966_v26 = vadd.f32 %v965_v11, %v666_v24  ;;  %v3701_v11 = vld [vmem:[%s4522_s6 + $0x48] sm:$0xff]   ;;  %3435 = vmatprep.subr.bf16.mxu0 %v3699_v9  ;;  %v3707_v17 = vld [vmem:[%s4522_s6 + $0x60] sm:$0xff]  }
 0x278   : > { %v1053_v16 = vpack.c.bf16 %v1005_v10, %v1005_v10  ;;  %v968_v18 = vpop.f32.mrb[3].mxu0  ;;  %v1009_v19 = vpop.f32.mrb[3].mxu1  ;;  %v1052_v23 = vpack.c.bf16 %v964_v20, %v964_v20  ;;  %v3700_v10 = vld [vmem:[%s4522_s6] sm:$0xff]   ;;  %v3702_v12 = vld [vmem:[%s4522_s6 + $0x8] sm:$0xff]   ;;  %v3704_v14 = vld [vmem:[%s4522_s6 + $0x10] sm:$0xff]  }
 0x279   : > { %v1095_v25 = vpack.c.bf16 %v1007_v22, %v1007_v22  ;;  %v1094_v27 = vpack.c.bf16 %v966_v26, %v966_v26  ;;  %3436 = vmatpush3.bf16.msra.mxu0 %v3700_v10  ;;  %v3705_v15 = vld [vmem:[%s4522_s6 + $0x58] sm:$0xff]   ;;  %v3708_v18 = vld [vmem:[%s4522_s6 + $0x20] sm:$0xff]   ;;  %v681_v19 = vsub.s32 5, %v4250_v2 }
 0x27a   : > { %3532 = vmatpush3.bf16.xpose.msra.mxu1 %v1053_v16  ;;  %3437 = vmatprep.subr.bf16.mxu0 %v3701_v11  ;;  %v3706_v16 = vld [vmem:[%s4522_s6 + $0x18] sm:$0xff]  }
 0x27b   : > { %3537 = vmatprep.subr.bf16.mxu1 %v4027_v0  ;;  %v682_v22 = vrot.slane %v4256_v4, %v681_v19  ;;  %v3709_v4 = vld [vmem:[%s4522_s6 + $0x68] sm:$0xff]  }
 0x27d   : > { %3438 = vmatpush3.bf16.msra.mxu0 %v3702_v12  ;;  %v3726_v12 = vld [vmem:[#allocation4 + $0x34] ss:$8 sps:$4 sm:$0xff]  }
 0x27e   : > { %3439 = vmatprep.subr.bf16.mxu0 %v3703_v13  ;;  %v3729_v13 = vld [vmem:[#allocation4 + $0x44] ss:$8 sps:$4 sm:$0xff]  }
 0x281   : > { %3534 = vmatmul.mubr.bf16.vlgmr.msra.gmra.mrb[4].mxu1 %v1052_v23  ;;  %3440 = vmatpush3.bf16.msra.mxu0 %v3704_v14  ;;  %v3727_v14 = vld [vmem:[#allocation4 + $0x40] ss:$8 sps:$4 sm:$0xff]  }
 0x282   : > { %3538 = vmatpush3.bf16.xpose.msra.mxu1 %v1095_v25  ;;  %3539 = vmatprep.mubr.msk.bf16.mxu1 %vm4028_vm0, %v4027_v0 }
 0x283   : > { %3543 = vmatprep.subr.bf16.mxu1 %v4027_v0  ;;  %3441 = vmatprep.subr.bf16.mxu0 %v3705_v15  ;;  %v3732_v15 = vld [vmem:[#allocation4 + $0x54] ss:$8 sps:$4 sm:$0xff]  }
 0x285   : > { %3442 = vmatpush3.bf16.msra.mxu0 %v3706_v16  ;;  %v3730_v16 = vld [vmem:[#allocation4 + $0x50] ss:$8 sps:$4 sm:$0xff]  }
 0x286   : > { %3443 = vmatprep.subr.bf16.mxu0 %v3707_v17  ;;  %v3735_v17 = vld [vmem:[#allocation4 + $0x64] ss:$8 sps:$4 sm:$0xff]  }
 0x289   : > { %3540 = vmatmul.mubr.bf16.vlgmr.msra.gmra.mrb[8].mxu1 %v1094_v27  ;;  %3444 = vmatpush3.bf16.msra.mxu0 %v3708_v18  ;;  %v3733_v18 = vld [vmem:[#allocation4 + $0x60] ss:$8 sps:$4 sm:$0xff]  }
 0x28a   : > { %3545 = vmatprep.mubr.msk.bf16.mxu1 %vm4028_vm0, %v4027_v0  ;;  %3445 = vmatprep.subr.bf16.mxu0 %v3709_v4  ;;  %v3245_v4 = vld [vmem:[%s4525_s9] ss:$0 sm:$0xff] }
 0x295   : > { %v1045_v30 = vpop.f32.mrb[4].mxu0 }
 0x296   : > { %v1046_v32 = vadd.f32 %v1045_v30, %v678_v29  ;;  %v4285_v33 = vpop.f32.mrb[5].mxu0 }
 0x297   : > { %v1049_v34 = vpop.f32.mrb[6].mxu0  ;;  %v1048_v23 = vadd.f32 %v4285_v33, %v682_v22  ;;  %v3710_v33 = vld [vmem:[%s4522_s6 + $0x28] sm:$0xff]   ;;  %v3736_v22 = vld [vmem:[#allocation4 + $0x70] ss:$8 sps:$4 sm:$0xff]  }
 0x298   : > { %v1170_v35 = vpack.c.bf16 %v1046_v32, %v1046_v32  ;;  %v1050_v36 = vpop.f32.mrb[7].mxu0  ;;  %3446 = vmatpush3.bf16.msra.mxu0 %v3710_v33 }
 0x299   : > { %v1219_v26 = vpack.c.bf16 %v1048_v23, %v1048_v23  ;;  %v3711_v36 = vld [vmem:[%s4522_s6 + $0x70] sm:$0xff]   ;;  %v3739_v23 = vld [vmem:[#allocation6 + $0x40] sm:$0xff]  }
 0x29a   : > { %v1176_v37 = vsel %vm1174_vm1, %v1170_v35, 0  ;;  %3447 = vmatprep.subr.bf16.mxu0 %v3711_v36 }
 0x29b   : > { %3544 = vmatpush3.bf16.msra.mxu1 %v1176_v37  ;;  %v1224_v30 = vsel %vm1174_vm1, %v1219_v26, 0  ;;  %v3712_v37 = vld [vmem:[%s4522_s6 + $0x30] sm:$0xff]   ;;  %v3742_v26 = vld [vmem:[#allocation6 + $0x8] sm:$0xff]  }
 0x29c   : > { %3549 = vmatprep.subr.bf16.mxu1 %v4027_v0  ;;  %3448 = vmatpush3.bf16.msra.mxu0 %v3712_v37 }
 0x29d   : > { %3449 = vmatprep.subr.bf16.mxu0 %v3713_v38  ;;  %v3743_v38 = vld [vmem:[#allocation6 + $0x50] sm:$0xff]  }
 0x2a0   : > { %3450 = vmatpush3.bf16.msra.mxu0 %v3714_v39  ;;  %v3744_v39 = vld [vmem:[#allocation6 + $0x10] sm:$0xff]  }
 0x2a1   : > { %3457 = vmatprep.subr.bf16.mxu0 %v3739_v23 }
 0x354   : > { %v1088_v42 = vpop.f32.mrb[4].mxu1 }
 0x355   : > { %v1136_v43 = vmul.f32 0.125, %v1088_v42  ;;  %v3535_v44 = vpop.f32.mrb[5].mxu1 }
 0x356   : > { %v1091_v45 = vpop.f32.mrb[6].mxu1 }
 0x357   : > { %v3536_v46 = vpop.f32.mrb[7].mxu1  ;;  %v1144_v48 = vadd.f32 %v4294_v41, %v1136_v43 }
 0x359   : > { %v1147_v49 = vsel %vm1146_vm2, %v1144_v48, -inf }
 0x35a   : > { %1148 = vmax.xlane.f32.xlu1 %v1147_v49 }
 0x35c   : > { %v1130_v50 = vpop.f32.mrb[8].mxu1 }
 0x35d   : > { %v1137_v51 = vmul.f32 0.125, %v1130_v50  ;;  %v3541_v52 = vpop.f32.mrb[9].mxu1 }
 0x35e   : > { %v1133_v53 = vpop.f32.mrb[10].mxu1 }
 0x35f   : > { %v3542_v54 = vpop.f32.mrb[11].mxu1  ;;  %v1145_v55 = vadd.f32 %v4294_v41, %v1137_v51  ;;  %v3227_v53 = vld [vmem:[%s4523_s7] ss:$0 sm:$0xff] }
 0x361   : > { %v1150_v56 = vsel %vm1146_vm2, %v1145_v55, -inf }
 0x362   : > { %1151 = vmax.xlane.f32.xlu1 %v1150_v56 }
 0x3e7   : > { %v1149_v57 = vpop.xlane.xlu1 %1148 }
 0x3e8   : > { %v1153_v58 = vsub.f32 %v1144_v48, %v1149_v57 }
 0x3ea   : > { %v1155_v59 = vmul.f32 1.442695, %v1153_v58 }
 0x3ec   : > { %3885 = vpow2.f32 %v1155_v59 }
 0x3ef   : > { %v1152_v60 = vpop.xlane.xlu1 %1151 }
 0x3f0   : > { %v1154_v61 = vsub.f32 %v1145_v55, %v1152_v60  ;;  %v3715_v60 = vld [vmem:[#allocation4] ss:$8 sps:$4 sm:$0xff]  }
 0x3f2   : > { %v1157_v62 = vmul.f32 1.442695, %v1154_v61  ;;  %v3717_v61 = vld [vmem:[#allocation4 + $0x4] ss:$8 sps:$4 sm:$0xff]  }
 0x3f4   : > { %3887 = vpow2.f32 %v1157_v62  ;;  %v3720_v62 = vld [vmem:[#allocation4 + $0x14] ss:$8 sps:$4 sm:$0xff]  }
 0x3f6   : > { %v3886_v63 = vpop.eup %3885 }
 0x3f7   : > { %v1159_v1 = vsel %vm1146_vm2, %v3886_v63, 0.0 }
 0x3f8   : > { %1160 = vadd.xlane.f32.xlu0 %v1159_v1  ;;  %v3723_v1 = vld [vmem:[#allocation4 + $0x24] ss:$8 sps:$4 sm:$0xff]  }
 0x3fe   : > { %v3888_v5 = vpop.eup %3887 }
 0x3ff   : > { %v1162_v8 = vsel %vm1146_vm2, %v3888_v5, 0.0 }
 0x400   : > { %1163 = vadd.xlane.f32.xlu1 %v1162_v8 }
 0x485   : > { %v1161_v20 = vpop.xlane.xlu0 %1160 }
 0x486   : > { %3889 = vrcp.f32 %v1161_v20  ;;  %v3738_v20 = vld [vmem:[#allocation4 + $0x74] ss:$8 sps:$4 sm:$0xff]  }
 0x48d   : > { %v1164_v24 = vpop.xlane.xlu1 %1163 }
 0x48e   : > { %3891 = vrcp.f32 %v1164_v24  ;;  %v3740_v24 = vld [vmem:[#allocation6] sm:$0xff]  }
 0x490   : > { %v3890_v25 = vpop.eup %3889 }
 0x491   : > { %v1167_v27 = vmul.f32 %v3890_v25, %v3886_v63  ;;  %v3718_v63 = vld [vmem:[#allocation4 + $0x10] ss:$8 sps:$4 sm:$0xff]   ;;  %v3741_v25 = vld [vmem:[#allocation6 + $0x48] sm:$0xff]  }
 0x493   : > { %v1169_v29 = vpack.c.bf16 %v1167_v27, %v1167_v27 }
 0x495   : > { %3546 = vmatmul.mubr.msk.bf16.vlgmr.msra.gmra.mrb[12].mxu1 %vm1146_vm2, %v1169_v29 }
 0x496   : > { %3550 = vmatpush3.bf16.msra.mxu1 %v1224_v30  ;;  %3551 = vmatprep.mubr.msk.bf16.mxu1 %vm4028_vm0, %v4027_v0 }
 0x497   : > { %1580 = vmatprep.subr.bf16.mxu1 %v3717_v61 }
 0x498   : > { %v3892_v32 = vpop.eup %3891 }
 0x499   : > { %v1168_v34 = vmul.f32 %v3892_v32, %v3888_v5  ;;  %v3721_v5 = vld [vmem:[#allocation4 + $0x20] ss:$8 sps:$4 sm:$0xff]  }
 0x49b   : > { %v1218_v35 = vpack.c.bf16 %v1168_v34, %v1168_v34  ;;  %v3244_v34 = vld [vmem:[%s4524_s8] ss:$0 sm:$0xff] }
 0x49d   : > { %3552 = vmatmul.mubr.msk.bf16.vlgmr.msra.gmra.mrb[16].mxu1 %vm1146_vm2, %v1218_v35 }
 0x49e   : > { %1612 = vmatprep.mubr.bf16.mxu1 %v4026_v31  ;;  %1581 = vmatpush1.bf16.msra.mxu1 %v3715_v60 }
 0x49f   : > { %1582 = vmatprep.subr.bf16.mxu1 %v3720_v62 }
 0x4a2   : > { %1583 = vmatpush1.bf16.msra.mxu1 %v3718_v63 }
 0x4a3   : > { %1584 = vmatprep.subr.bf16.mxu1 %v3723_v1 }
 0x4a6   : > { %1585 = vmatpush1.bf16.msra.mxu1 %v3721_v5 }
 0x4a7   : > { %1586 = vmatprep.subr.bf16.mxu1 %v3726_v12 }
 0x568   : > { %v1212_v40 = vpop.f32.mrb[12].mxu1 }
 0x569   : > { %v3547_v42 = vpop.f32.mrb[13].mxu1  ;;  %v1266_v49 = vpack.c.bf16 %v1212_v40, %v1212_v40  ;;  %v3745_v40 = vld [vmem:[#allocation6 + $0x58] sm:$0xff]  }
 0x56a   : > { %v1215_v43 = vpop.f32.mrb[14].mxu1  ;;  %v3746_v42 = vld [vmem:[#allocation6 + $0x18] sm:$0xff]  }
 0x56b   : > { %v3548_v44 = vpop.f32.mrb[15].mxu1  ;;  %v3747_v43 = vld [vmem:[#allocation6 + $0x60] sm:$0xff]  }
 0x56c   : > { %v3748_v44 = vld [vmem:[#allocation6 + $0x20] sm:$0xff]  }
 0x570   : > { %v1260_v45 = vpop.f32.mrb[16].mxu1 }
 0x571   : > { %v1267_v46 = vpack.c.bf16 %v1260_v45, %v1260_v45  ;;  %v3553_v48 = vpop.f32.mrb[17].mxu1  ;;  %v3749_v45 = vld [vmem:[#allocation6 + $0x68] sm:$0xff]  }
 0x572   : > { %v1263_v50 = vpop.f32.mrb[18].mxu1  ;;  %v3751_v48 = vld [vmem:[#allocation6 + $0x70] sm:$0xff]  }
 0x573   : > { %v3554_v51 = vpop.f32.mrb[19].mxu1  ;;  %1435 = vmatprep.mubr.bf16.mxu0 %v1267_v46  ;;  %v3750_v46 = vld [vmem:[#allocation6 + $0x28] sm:$0xff]   ;;  %v3753_v50 = vld [vmem:[#allocation6 + $0x78] sm:$0xff]  }
 0x574   : > { %1436 = vmatmul.mubr.bf16.vlgmr.msra.gmra.mrb[8].mxu0 %v1266_v49  ;;  %v3752_v49 = vld [vmem:[#allocation6 + $0x30] sm:$0xff]   ;;  %v3754_v51 = vld [vmem:[#allocation6 + $0x38] sm:$0xff]  }
 0x575   : > { %3458 = vmatpush3.bf16.msra.mxu0 %v3740_v24  ;;  %v3755_v24 = vld [vmem:[#allocation2 + $0x180] ss:$24 sps:$4 sm:$0xff]  }
 0x576   : > { %3459 = vmatprep.subr.bf16.mxu0 %v3741_v25  ;;  %v3757_v25 = vld [vmem:[#allocation2 + $0x184] ss:$24 sps:$4 sm:$0xff]  }
 0x579   : > { %3460 = vmatpush3.bf16.msra.mxu0 %v3742_v26  ;;  %v3758_v26 = vld [vmem:[#allocation2 + $0x188] ss:$24 sps:$4 sm:$0xff]  }
 0x57a   : > { %3461 = vmatprep.subr.bf16.mxu0 %v3743_v38 }
 0x57d   : > { %3462 = vmatpush3.bf16.msra.mxu0 %v3744_v39 }
 0x57e   : > { %3463 = vmatprep.subr.bf16.mxu0 %v3745_v40 }
 0x581   : > { %3464 = vmatpush3.bf16.msra.mxu0 %v3746_v42  ;;  %v3775_v42 = vld [vmem:[#allocation2 + $0x214] ss:$24 sps:$4 sm:$0xff]  }
 0x582   : > { %3465 = vmatprep.subr.bf16.mxu0 %v3747_v43  ;;  %v3773_v43 = vld [vmem:[#allocation2 + $0x210] ss:$24 sps:$4 sm:$0xff]  }
 0x585   : > { %3466 = vmatpush3.bf16.msra.mxu0 %v3748_v44  ;;  %v3778_v44 = vld [vmem:[#allocation2 + $0x21c] ss:$24 sps:$4 sm:$0xff]  }
 0x586   : > { %3467 = vmatprep.subr.bf16.mxu0 %v3749_v45  ;;  %v3776_v45 = vld [vmem:[#allocation2 + $0x218] ss:$24 sps:$4 sm:$0xff]  }
 0x589   : > { %3468 = vmatpush3.bf16.msra.mxu0 %v3750_v46  ;;  %v3781_v46 = vld [vmem:[#allocation2 + $0x244] ss:$24 sps:$4 sm:$0xff]  }
 0x58a   : > { %3469 = vmatprep.subr.bf16.mxu0 %v3751_v48  ;;  %v3779_v48 = vld [vmem:[#allocation2 + $0x240] ss:$24 sps:$4 sm:$0xff]  }
 0x58d   : > { %3470 = vmatpush3.bf16.msra.mxu0 %v3752_v49  ;;  %v3784_v49 = vld [vmem:[#allocation2 + $0x24c] ss:$24 sps:$4 sm:$0xff]  }
 0x58e   : > { %3471 = vmatprep.subr.bf16.mxu0 %v3753_v50  ;;  %v3782_v50 = vld [vmem:[#allocation2 + $0x248] ss:$24 sps:$4 sm:$0xff]  }
 0x591   : > { %3472 = vmatpush3.bf16.msra.mxu0 %v3754_v51  ;;  %v3787_v51 = vld [vmem:[#allocation2 + $0x274] ss:$24 sps:$4 sm:$0xff]  }
 0x647   : > { %v3451_v52 = vpop.f32.mrb[8].mxu0 }
 0x648   : > { %v3452_v54 = vpop.f32.mrb[9].mxu0 }
 0x649   : > { %v3453_v55 = vadd.f32 %v3452_v54, %v3451_v52  ;;  %v3454_v56 = vpop.f32.mrb[10].mxu0  ;;  %v1488_v52 = vld [vmem:[%s4527_s11] sm:$0x3] }
 0x64a   : > { %v3455_v57 = vpop.f32.mrb[11].mxu0  ;;  %v1497_v54 = vrot.slane %v1488_v52, %v4271_v21 }
 0x64b   : > { %v1438_v58 = vadd.f32 %v3453_v55, %v3227_v53  ;;  %v1493_v53 = vrot.slane %v1488_v52, %v4262_v6  ;;  %v3785_v52 = vld [vmem:[#allocation2 + $0x270] ss:$24 sps:$4 sm:$0xff]  }
 0x64d   : > { %v1443_v59 = vadd.f32 %v1438_v58, %v4242_v47  ;;  %v3724_v47 = vld [vmem:[#allocation4 + $0x30] ss:$8 sps:$4 sm:$0xff]  }
 0x64e   : > { %1587 = vmatpush1.bf16.msra.mxu1 %v3724_v47 }
 0x64f   : > { %1446 = vadd.xlane.f32.xlu0 %v1443_v59  ;;  %1588 = vmatprep.subr.bf16.mxu1 %v3729_v13 }
 0x652   : > { %1589 = vmatpush1.bf16.msra.mxu1 %v3727_v14 }
 0x653   : > { %1590 = vmatprep.subr.bf16.mxu1 %v3732_v15  ;;  %v3262_v15 = vld [vmem:[%s4529_s13] ss:$0 sm:$0xff] }
 0x656   : > { %1591 = vmatpush1.bf16.msra.mxu1 %v3730_v16 }
 0x657   : > { %1592 = vmatprep.subr.bf16.mxu1 %v3735_v17 }
 0x65a   : > { %1593 = vmatpush1.bf16.msra.mxu1 %v3733_v18 }
 0x65b   : > { %1594 = vmatprep.subr.bf16.mxu1 %v3738_v20 }
 0x65e   : > { %1595 = vmatpush1.bf16.msra.mxu1 %v3736_v22 }
 0x65f   : > { %2159 = vmatprep.subr.bf16.mxu1 %v3757_v25  ;;  %v3815_v25 = vld [vmem:[#allocation2 + $0x250] ss:$24 sps:$4 sm:$0xff]  }
 0x6dc   : > { %v1447_v8 = vpop.xlane.xlu0 %1446 }
 0x6dd   : > { %v1448_v9 = vmul.f32 0.0078125, %v1447_v8 }
 0x6df   : > { %v1449_v10 = vsub.f32 %v1443_v59, %v1448_v9 }
 0x6e1   : > { %v1450_v11 = vmul.f32 %v1449_v10, %v1449_v10 }
 0x6e3   : > { %1451 = vadd.xlane.f32.xlu1 %v1450_v11 }
 0x770   : > { %v1452_v27 = vpop.xlane.xlu1 %1451 }
 0x771   : > { %v1453_v29 = vmul.f32 0.0078125, %v1452_v27  ;;  %v3760_v27 = vld [vmem:[#allocation2 + $0x18c] ss:$24 sps:$4 sm:$0xff]  }
 0x772   : > { %2200 = vmatprep.subr.bf16.mxu0 %v3760_v27  ;;  %v3818_v27 = vld [vmem:[#allocation2 + $0x280] ss:$24 sps:$4 sm:$0xff]  }
 0x773   : > { %v1454_v30 = vadd.f32 1e-12, %v1453_v29  ;;  %v3763_v29 = vld [vmem:[#allocation2 + $0x1b4] ss:$24 sps:$4 sm:$0xff]  }
 0x775   : > { %3893 = vrsqrt.f32 %v1454_v30  ;;  %v3766_v30 = vld [vmem:[#allocation2 + $0x1bc] ss:$24 sps:$4 sm:$0xff]  }
 0x77f   : > { %v3894_v32 = vpop.eup %3893 }
 0x780   : > { %v1456_v35 = vmul.f32 %v3894_v32, %v1449_v10  ;;  %v3761_v32 = vld [vmem:[#allocation2 + $0x1b0] ss:$24 sps:$4 sm:$0xff]  }
 0x782   : > { %v1463_v33 = vmul.f32 %v3244_v34, %v1456_v35  ;;  %v3764_v34 = vld [vmem:[#allocation2 + $0x1b8] ss:$24 sps:$4 sm:$0xff]   ;;  %v3769_v35 = vld [vmem:[#allocation2 + $0x1e4] ss:$24 sps:$4 sm:$0xff]  }
 0x784   : > { %v1470_v36 = vadd.f32 %v3245_v4, %v1463_v33  ;;  %v3772_v4 = vld [vmem:[#allocation2 + $0x1ec] ss:$24 sps:$4 sm:$0xff]   ;;  %v3767_v33 = vld [vmem:[#allocation2 + $0x1e0] ss:$24 sps:$4 sm:$0xff]  }
 0x786   : > { %v1471_v37 = vpack.c.bf16 %v1470_v36, %v1470_v36 }
 0x788   : > { %1613 = vmatmul.mubr.bf16.vlgmr.msra.gmra.mrb[20].mxu1 %v1471_v37 }
 0x789   : > { %2191 = vmatprep.mubr.bf16.mxu1 %v4026_v31  ;;  %2160 = vmatpush1.bf16.msra.mxu1 %v3755_v24  ;;  %v3817_v24 = vld [vmem:[#allocation2 + $0x254] ss:$24 sps:$4 sm:$0xff]  }
 0x78a   : > { %2161 = vmatprep.subr.bf16.mxu1 %v3763_v29  ;;  %v3823_v29 = vld [vmem:[#allocation2 + $0x2b4] ss:$24 sps:$4 sm:$0xff]  }
 0x78d   : > { %2162 = vmatpush1.bf16.msra.mxu1 %v3761_v32  ;;  %v3826_v32 = vld [vmem:[#allocation2 + $0x2e4] ss:$24 sps:$4 sm:$0xff]  }
 0x78e   : > { %2163 = vmatprep.subr.bf16.mxu1 %v3769_v35  ;;  %v4398_v35 = vld [vmem:[%s4521_s5 + $0x6] sm:$0x3f] }
 0x791   : > { %2164 = vmatpush1.bf16.msra.mxu1 %v3767_v33 }
 0x792   : > { %2165 = vmatprep.subr.bf16.mxu1 %v3775_v42 }
 0x795   : > { %2166 = vmatpush1.bf16.msra.mxu1 %v3773_v43 }
 0x796   : > { %2167 = vmatprep.subr.bf16.mxu1 %v3781_v46 }
 0x799   : > { %2168 = vmatpush1.bf16.msra.mxu1 %v3779_v48 }
 0x79a   : > { %2169 = vmatprep.subr.bf16.mxu1 %v3787_v51  ;;  %v1896_v51 = vrot.slane %v4398_v35, %v4271_v21 }
 0x79d   : > { %2170 = vmatpush1.bf16.msra.mxu1 %v3785_v52 }
 0x85b   : > { %v1614_v55 = vpop.f32.mrb[20].mxu1 }
 0x85c   : > { %v1615_v56 = vadd.f32 %v1614_v55, %v1493_v53  ;;  %v1616_v57 = vpop.f32.mrb[21].mxu1  ;;  %v3790_v53 = vld [vmem:[#allocation2 + $0x27c] ss:$24 sps:$4 sm:$0xff]  }
 0x85d   : > { %v1617_v58 = vadd.f32 %v1616_v57, %v1497_v54  ;;  %v1618_v59 = vpop.f32.mrb[22].mxu1  ;;  %v3788_v54 = vld [vmem:[#allocation2 + $0x278] ss:$24 sps:$4 sm:$0xff]   ;;  %v3793_v55 = vld [vmem:[#allocation2 + $0x2a4] ss:$24 sps:$4 sm:$0xff]  }
 0x85e   : > { %v1623_v60 = vmul.f32 0.70710677, %v1615_v56  ;;  %v1619_v61 = vpop.f32.mrb[23].mxu1  ;;  %v1621_v5 = vmul.f32 0.5, %v1615_v56  ;;  %v3791_v56 = vld [vmem:[#allocation2 + $0x2a0] ss:$24 sps:$4 sm:$0xff]   ;;  %2171 = vmatprep.subr.bf16.mxu1 %v3793_v55 }
 0x85f   : > { %v1624_v62 = vmul.f32 0.70710677, %v1617_v58  ;;  %v1622_v9 = vmul.f32 0.5, %v1617_v58  ;;  %v3796_v57 = vld [vmem:[#allocation2 + $0x2ac] ss:$24 sps:$4 sm:$0xff]   ;;  %2172 = vmatpush1.bf16.msra.mxu1 %v3791_v56 }
 0x860   : > { %3895 = verf.f32 %v1623_v60  ;;  %v3794_v58 = vld [vmem:[#allocation2 + $0x2a8] ss:$24 sps:$4 sm:$0xff]   ;;  %v3799_v59 = vld [vmem:[#allocation2 + $0x2d4] ss:$24 sps:$4 sm:$0xff]  }
 0x861   : > { %3897 = verf.f32 %v1624_v62  ;;  %v3797_v60 = vld [vmem:[#allocation2 + $0x2d0] ss:$24 sps:$4 sm:$0xff]   ;;  %v3802_v61 = vld [vmem:[#allocation2 + $0x2dc] ss:$24 sps:$4 sm:$0xff]   ;;  %2173 = vmatprep.subr.bf16.mxu1 %v3799_v59 }
 0x862   : > { %v3800_v62 = vld [vmem:[#allocation2 + $0x2d8] ss:$24 sps:$4 sm:$0xff]  }
 0x863   : > { %2174 = vmatpush1.bf16.msra.mxu1 %v3797_v60 }
 0x86a   : > { %v3896_v63 = vpop.eup %3895 }
 0x86b   : > { %v3898_v1 = vpop.eup %3897  ;;  %v1627_v8 = vadd.f32 1.0, %v3896_v63  ;;  %v3805_v63 = vld [vmem:[#allocation2 + $0x194] ss:$24 sps:$4 sm:$0xff]  }
 0x86c   : > { %v1628_v10 = vadd.f32 1.0, %v3898_v1  ;;  %2241 = vmatprep.subr.bf16.mxu1 %v3805_v63 }
 0x86d   : > { %v1629_v11 = vmul.f32 %v1627_v8, %v1621_v5 }
 0x86e   : > { %v1630_v12 = vmul.f32 %v1628_v10, %v1622_v9  ;;  %v3279_v10 = vld [vmem:[%s4552_s29] ss:$0 sm:$0xff] }
 0x86f   : > { %v1631_v13 = vpack.c.bf16 %v1629_v11, %v1629_v11 }
 0x870   : > { %v1632_v47 = vpack.c.bf16 %v1630_v12, %v1630_v12  ;;  %v3280_v12 = vld [vmem:[%s4553_s27] ss:$0 sm:$0xff] }
 0x872   : > { %1800 = vmatprep.mubr.bf16.mxu0 %v1632_v47 }
 0x873   : > { %1801 = vmatmul.mubr.bf16.vlgmr.msra.gmra.mrb[12].mxu0 %v1631_v13 }
 0x874   : > { %2232 = vmatprep.mubr.bf16.mxu0 %v4026_v31  ;;  %2201 = vmatpush1.bf16.msra.mxu0 %v3758_v26  ;;  %v3820_v26 = vld [vmem:[#allocation2 + $0x284] ss:$24 sps:$4 sm:$0xff]  }
 0x875   : > { %2202 = vmatprep.subr.bf16.mxu0 %v3766_v30  ;;  %v3821_v30 = vld [vmem:[#allocation2 + $0x2b0] ss:$24 sps:$4 sm:$0xff]  }
 0x878   : > { %2203 = vmatpush1.bf16.msra.mxu0 %v3764_v34  ;;  %v3824_v34 = vld [vmem:[#allocation2 + $0x2e0] ss:$24 sps:$4 sm:$0xff]  }
 0x879   : > { %2204 = vmatprep.subr.bf16.mxu0 %v3772_v4  ;;  %v1900_v4 = vrot.slane %v4398_v35, %v669_v3 }
 0x946   : > { %v3473_v14 = vpop.f32.mrb[12].mxu0 }
 0x947   : > { %v3474_v16 = vpop.f32.mrb[13].mxu0 }
 0x948   : > { %v3475_v17 = vadd.f32 %v3474_v16, %v3473_v14  ;;  %v3476_v18 = vpop.f32.mrb[14].mxu0  ;;  %v3803_v14 = vld [vmem:[#allocation2 + $0x190] ss:$24 sps:$4 sm:$0xff]   ;;  %v3808_v16 = vld [vmem:[#allocation2 + $0x1c4] ss:$24 sps:$4 sm:$0xff]  }
 0x949   : > { %v3477_v20 = vpop.f32.mrb[15].mxu0  ;;  %v3811_v18 = vld [vmem:[#allocation2 + $0x1f4] ss:$24 sps:$4 sm:$0xff]  }
 0x94a   : > { %v1803_v22 = vadd.f32 %v3475_v17, %v3262_v15  ;;  %v3806_v17 = vld [vmem:[#allocation2 + $0x1c0] ss:$24 sps:$4 sm:$0xff]   ;;  %v3809_v20 = vld [vmem:[#allocation2 + $0x1f0] ss:$24 sps:$4 sm:$0xff]  }
 0x94c   : > { %v1808_v23 = vadd.f32 %v1803_v22, %v1470_v36  ;;  %v3770_v36 = vld [vmem:[#allocation2 + $0x1e8] ss:$24 sps:$4 sm:$0xff]   ;;  %v3814_v22 = vld [vmem:[#allocation2 + $0x224] ss:$24 sps:$4 sm:$0xff]  }
 0x94d   : > { %2205 = vmatpush1.bf16.msra.mxu0 %v3770_v36 }
 0x94e   : > { %1811 = vadd.xlane.f32.xlu0 %v1808_v23  ;;  %2206 = vmatprep.subr.bf16.mxu0 %v3778_v44 }
 0x951   : > { %2207 = vmatpush1.bf16.msra.mxu0 %v3776_v45  ;;  %v1904_v45 = vrot.slane %v4398_v35, %v673_v7 }
 0x952   : > { %2208 = vmatprep.subr.bf16.mxu0 %v3784_v49 }
 0x955   : > { %2209 = vmatpush1.bf16.msra.mxu0 %v3782_v50 }
 0x956   : > { %2210 = vmatprep.subr.bf16.mxu0 %v3790_v53 }
 0x959   : > { %2211 = vmatpush1.bf16.msra.mxu0 %v3788_v54  ;;  %v1908_v54 = vrot.slane %v4398_v35, %v677_v28 }
 0x95a   : > { %2212 = vmatprep.subr.bf16.mxu0 %v3796_v57 }
 0x95d   : > { %2213 = vmatpush1.bf16.msra.mxu0 %v3794_v58 }
 0x95e   : > { %2214 = vmatprep.subr.bf16.mxu0 %v3802_v61 }
 0x961   : > { %2215 = vmatpush1.bf16.msra.mxu0 %v3800_v62 }
 0x9db   : > { %v1812_v37 = vpop.xlane.xlu0 %1811 }
 0x9dc   : > { %v1813_v38 = vmul.f32 0.0078125, %v1812_v37 }
 0x9de   : > { %v1814_v39 = vsub.f32 %v1808_v23, %v1813_v38  ;;  %v3812_v23 = vld [vmem:[#allocation2 + $0x220] ss:$24 sps:$4 sm:$0xff]  }
 0x9e0   : > { %v1815_v40 = vmul.f32 %v1814_v39, %v1814_v39 }
 0x9e2   : > { %1816 = vadd.xlane.f32.xlu1 %v1815_v40  ;;  %v1892_v40 = vrot.slane %v4398_v35, %v4262_v6 }
 0xa6f   : > { %v1817_v1 = vpop.xlane.xlu1 %1816 }
 0xa70   : > { %v1818_v5 = vmul.f32 0.0078125, %v1817_v1 }
 0xa72   : > { %v1819_v8 = vadd.f32 1e-12, %v1818_v5 }
 0xa74   : > { %3899 = vrsqrt.f32 %v1819_v8 }
 0xa7e   : > { %v3900_v9 = vpop.eup %3899 }
 0xa7f   : > { %v1821_v11 = vmul.f32 %v3900_v9, %v1814_v39 }
 0xa81   : > { %v1828_v47 = vmul.f32 %v3279_v10, %v1821_v11 }
 0xa83   : > { %v4387_v13 = vadd.f32 %v3280_v12, %v1828_v47 }
 0xa85   : > { %v1836_v15 = vpack.c.bf16 %v4387_v13, %v4387_v13 }
 0xa87   : > { %2192 = vmatmul.mubr.bf16.vlgmr.msra.gmra.mrb[24].mxu1 %v1836_v15  ;;  %2233 = vmatmul.mubr.bf16.vlgmr.msra.gmra.mrb[16].mxu0 %v1836_v15 }
 0xa88   : > { %2242 = vmatpush1.bf16.msra.mxu1 %v3803_v14  ;;  %2273 = vmatprep.mubr.bf16.mxu1 %v4026_v31 }
 0xa89   : > { %2243 = vmatprep.subr.bf16.mxu1 %v3808_v16 }
 0xa8c   : > { %2244 = vmatpush1.bf16.msra.mxu1 %v3806_v17 }
 0xa8d   : > { %2245 = vmatprep.subr.bf16.mxu1 %v3811_v18 }
 0xa90   : > { %2246 = vmatpush1.bf16.msra.mxu1 %v3809_v20 }
 0xa91   : > { %2247 = vmatprep.subr.bf16.mxu1 %v3814_v22 }
 0xa94   : > { %2248 = vmatpush1.bf16.msra.mxu1 %v3812_v23 }
 0xa95   : > { %2249 = vmatprep.subr.bf16.mxu1 %v3817_v24 }
 0xa98   : > { %2250 = vmatpush1.bf16.msra.mxu1 %v3815_v25 }
 0xa99   : > { %2251 = vmatprep.subr.bf16.mxu1 %v3820_v26 }
 0xa9c   : > { %2252 = vmatpush1.bf16.msra.mxu1 %v3818_v27 }
 0xa9d   : > { %2253 = vmatprep.subr.bf16.mxu1 %v3823_v29 }
 0xaa0   : > { %2254 = vmatpush1.bf16.msra.mxu1 %v3821_v30  ;;  %v3828_v30 = vld [vmem:[%s4522_s6 + $0x80] sm:$0xff]  }
 0xaa1   : > { %2255 = vmatprep.subr.bf16.mxu1 %v3826_v32  ;;  %v3829_v32 = vld [vmem:[%s4522_s6 + $0xc8] sm:$0xff]  }
 0xaa4   : > { %2256 = vmatpush1.bf16.msra.mxu1 %v3824_v34  ;;  %v3830_v34 = vld [vmem:[%s4522_s6 + $0x88] sm:$0xff]  }
 0xaa5   : > { %3555 = vmatprep.subr.bf16.mxu1 %v4027_v0 }
 0xaa7   : > { %2274 = vmatmul.mubr.bf16.vlgmr.msra.gmra.mrb[28].mxu1 %v1836_v15 }
 0xaa8   : > { %3557 = vmatprep.mubr.msk.bf16.mxu1 %vm4028_vm0, %v4027_v0 }
 0xb5a   : > { %v2193_v33 = vpop.f32.mrb[24].mxu1  ;;  %v2234_v36 = vpop.f32.mrb[16].mxu0 }
 0xb5b   : > { %v2235_v37 = vadd.f32 %v2234_v36, %v1900_v4  ;;  %v2195_v38 = vpop.f32.mrb[25].mxu1  ;;  %v2236_v39 = vpop.f32.mrb[17].mxu0  ;;  %v2194_v49 = vadd.f32 %v2193_v33, %v1892_v40  ;;  %v3831_v4 = vld [vmem:[%s4522_s6 + $0xd0] sm:$0xff]   ;;  %v3833_v36 = vld [vmem:[%s4522_s6 + $0xd8] sm:$0xff]  }
 0xb5c   : > { %v2197_v42 = vpop.f32.mrb[26].mxu1  ;;  %v2238_v43 = vpop.f32.mrb[18].mxu0  ;;  %v2237_v3 = vadd.f32 %v2236_v39, %v1904_v45  ;;  %v2196_v53 = vadd.f32 %v2195_v38, %v1896_v51  ;;  %v3832_v33 = vld [vmem:[%s4522_s6 + $0x90] sm:$0xff]   ;;  %v3835_v38 = vld [vmem:[%s4522_s6 + $0xe0] sm:$0xff]  }
 0xb5d   : > { %v2283_v44 = vpack.c.bf16 %v2235_v37, %v2235_v37  ;;  %v2198_v46 = vpop.f32.mrb[27].mxu1  ;;  %v2239_v48 = vpop.f32.mrb[19].mxu0  ;;  %v2282_v50 = vpack.c.bf16 %v2194_v49, %v2194_v49  ;;  %v3834_v37 = vld [vmem:[%s4522_s6 + $0x98] sm:$0xff]   ;;  %v3836_v39 = vld [vmem:[%s4522_s6 + $0xa0] sm:$0xff]   ;;  %v1912_v42 = vrot.slane %v4398_v35, %v681_v19  ;;  %v3837_v19 = vld [vmem:[%s4522_s6 + $0xe8] sm:$0xff]  }
 0xb5e   : > { %v2325_v52 = vpack.c.bf16 %v2237_v3, %v2237_v3  ;;  %v2324_v7 = vpack.c.bf16 %v2196_v53, %v2196_v53  ;;  %v3838_v35 = vld [vmem:[%s4522_s6 + $0xa8] sm:$0xff]   ;;  %v3842_v53 = vld [vmem:[%s4522_s6 + $0xb8] sm:$0xff]  }
 0xb5f   : > { %3556 = vmatpush3.bf16.xpose.msra.mxu1 %v2283_v44 }
 0xb60   : > { %3561 = vmatprep.subr.bf16.mxu1 %v4027_v0 }
 0xb66   : > { %3558 = vmatmul.mubr.bf16.vlgmr.msra.gmra.mrb[32].mxu1 %v2282_v50 }
 0xb67   : > { %3562 = vmatpush3.bf16.xpose.msra.mxu1 %v2325_v52  ;;  %3563 = vmatprep.mubr.msk.bf16.mxu1 %vm4028_vm0, %v4027_v0  ;;  %v3840_v52 = vld [vmem:[%s4522_s6 + $0xb0] sm:$0xff]  }
 0xb68   : > { %3567 = vmatprep.subr.bf16.mxu1 %v4027_v0 }
 0xb6e   : > { %3564 = vmatmul.mubr.bf16.vlgmr.msra.gmra.mrb[36].mxu1 %v2324_v7 }
 0xb6f   : > { %3569 = vmatprep.mubr.msk.bf16.mxu1 %vm4028_vm0, %v4027_v0 }
 0xb7a   : > { %v2275_v55 = vpop.f32.mrb[28].mxu1 }
 0xb7b   : > { %v2276_v56 = vadd.f32 %v2275_v55, %v1908_v54  ;;  %v2277_v57 = vpop.f32.mrb[29].mxu1 }
 0xb7c   : > { %v2279_v58 = vpop.f32.mrb[30].mxu1  ;;  %v2278_v43 = vadd.f32 %v2277_v57, %v1912_v42 }
 0xb7d   : > { %v2393_v59 = vpack.c.bf16 %v2276_v56, %v2276_v56  ;;  %v2280_v60 = vpop.f32.mrb[31].mxu1 }
 0xb7e   : > { %v2441_v46 = vpack.c.bf16 %v2278_v43, %v2278_v43  ;;  %v3384_v43 = vld [vmem:[%s4524_s8 + $0x1] ss:$0 sm:$0xff] }
 0xb7f   : > { %v2398_v61 = vsel %vm1174_vm1, %v2393_v59, 0 }
 0xb80   : > { %3568 = vmatpush3.bf16.msra.mxu1 %v2398_v61  ;;  %v2446_v3 = vsel %vm1174_vm1, %v2441_v46, 0 }
 0xb81   : > { %3573 = vmatprep.subr.bf16.mxu1 %v4027_v0 }
 0xc39   : > { %v2318_v62 = vpop.f32.mrb[32].mxu1 }
 0xc3a   : > { %v2366_v63 = vmul.f32 0.125, %v2318_v62  ;;  %v3559_v1 = vpop.f32.mrb[33].mxu1 }
 0xc3b   : > { %v2321_v5 = vpop.f32.mrb[34].mxu1  ;;  %v3365_v1 = vld [vmem:[%s4523_s7 + $0x1] ss:$0 sm:$0xff] }
 0xc3c   : > { %v3560_v8 = vpop.f32.mrb[35].mxu1  ;;  %v2368_v9 = vadd.f32 %v2366_v63, %v4294_v41 }
 0xc3e   : > { %v2370_v28 = vsel %vm1146_vm2, %v2368_v9, -inf }
 0xc3f   : > { %2371 = vmax.xlane.f32.xlu0 %v2370_v28 }
 0xc41   : > { %v2360_v10 = vpop.f32.mrb[36].mxu1 }
 0xc42   : > { %v2367_v11 = vmul.f32 0.125, %v2360_v10  ;;  %v3565_v12 = vpop.f32.mrb[37].mxu1 }
 0xc43   : > { %v2363_v47 = vpop.f32.mrb[38].mxu1  ;;  %v3843_v12 = vld [vmem:[#allocation4 + $0x80] ss:$8 sps:$4 sm:$0xff]  }
 0xc44   : > { %v3566_v14 = vpop.f32.mrb[39].mxu1  ;;  %v2369_v15 = vadd.f32 %v2367_v11, %v4294_v41  ;;  %v3827_v41 = vld [vmem:[%s4522_s6 + $0xc0] sm:$0xff]  }
 0xc45   : > { %3487 = vmatprep.subr.bf16.mxu0 %v3827_v41  ;;  %v3845_v47 = vld [vmem:[#allocation4 + $0x84] ss:$8 sps:$4 sm:$0xff]   ;;  %v3848_v14 = vld [vmem:[#allocation4 + $0x94] ss:$8 sps:$4 sm:$0xff]  }
 0xc46   : > { %v2373_v16 = vsel %vm1146_vm2, %v2369_v15, -inf  ;;  %3488 = vmatpush3.bf16.msra.mxu0 %v3828_v30  ;;  %v3863_v41 = vld [vmem:[#allocation4 + $0xe4] ss:$8 sps:$4 sm:$0xff]   ;;  %v3861_v30 = vld [vmem:[#allocation4 + $0xe0] ss:$8 sps:$4 sm:$0xff]  }
 0xc47   : > { %2374 = vmax.xlane.f32.xlu1 %v2373_v16  ;;  %3489 = vmatprep.subr.bf16.mxu0 %v3829_v32  ;;  %v3851_v16 = vld [vmem:[#allocation4 + $0xa4] ss:$8 sps:$4 sm:$0xff]   ;;  %v3866_v32 = vld [vmem:[#allocation4 + $0xf4] ss:$8 sps:$4 sm:$0xff]  }
 0xc4a   : > { %3490 = vmatpush3.bf16.msra.mxu0 %v3830_v34  ;;  %v3864_v34 = vld [vmem:[#allocation4 + $0xf0] ss:$8 sps:$4 sm:$0xff]  }
 0xc4b   : > { %3491 = vmatprep.subr.bf16.mxu0 %v3831_v4  ;;  %v3867_v4 = vld [vmem:[#allocation6 + $0xc0] sm:$0xff]  }
 0xc4e   : > { %3492 = vmatpush3.bf16.msra.mxu0 %v3832_v33  ;;  %v3868_v33 = vld [vmem:[#allocation6 + $0x80] sm:$0xff]  }
 0xc4f   : > { %3493 = vmatprep.subr.bf16.mxu0 %v3833_v36  ;;  %v3869_v36 = vld [vmem:[#allocation6 + $0xc8] sm:$0xff]  }
 0xc52   : > { %3494 = vmatpush3.bf16.msra.mxu0 %v3834_v37  ;;  %v3870_v37 = vld [vmem:[#allocation6 + $0x88] sm:$0xff]  }
 0xc53   : > { %3495 = vmatprep.subr.bf16.mxu0 %v3835_v38 }
 0xc56   : > { %3496 = vmatpush3.bf16.msra.mxu0 %v3836_v39 }
 0xc57   : > { %3497 = vmatprep.subr.bf16.mxu0 %v3837_v19  ;;  %v3875_v19 = vld [vmem:[#allocation6 + $0xe0] sm:$0xff]  }
 0xc5a   : > { %3498 = vmatpush3.bf16.msra.mxu0 %v3838_v35  ;;  %v3876_v35 = vld [vmem:[#allocation6 + $0xa0] sm:$0xff]  }
 0xccc   : > { %v2372_v17 = vpop.xlane.xlu0 %2371 }
 0xccd   : > { %v2376_v18 = vsub.f32 %v2368_v9, %v2372_v17  ;;  %v3849_v17 = vld [vmem:[#allocation4 + $0xa0] ss:$8 sps:$4 sm:$0xff]  }
 0xccf   : > { %v2378_v20 = vmul.f32 1.442695, %v2376_v18 }
 0xcd1   : > { %3901 = vpow2.f32 %v2378_v20 }
 0xcd4   : > { %v2375_v22 = vpop.xlane.xlu1 %2374 }
 0xcd5   : > { %v2377_v23 = vsub.f32 %v2369_v15, %v2375_v22  ;;  %v3846_v15 = vld [vmem:[#allocation4 + $0x90] ss:$8 sps:$4 sm:$0xff]  }
 0xcd7   : > { %v2380_v24 = vmul.f32 1.442695, %v2377_v23 }
 0xcd9   : > { %3903 = vpow2.f32 %v2380_v24  ;;  %v3854_v24 = vld [vmem:[#allocation4 + $0xb4] ss:$8 sps:$4 sm:$0xff]  }
 0xcdb   : > { %v3902_v25 = vpop.eup %3901 }
 0xcdc   : > { %v2382_v26 = vsel %vm1146_vm2, %v3902_v25, 0.0 }
 0xcdd   : > { %2383 = vadd.xlane.f32.xlu0 %v2382_v26  ;;  %v3855_v26 = vld [vmem:[#allocation4 + $0xc0] ss:$8 sps:$4 sm:$0xff]  }
 0xce3   : > { %v3904_v27 = vpop.eup %3903 }
 0xce4   : > { %v2385_v29 = vsel %vm1146_vm2, %v3904_v27, 0.0 }
 0xce5   : > { %2386 = vadd.xlane.f32.xlu1 %v2385_v29  ;;  %v3858_v29 = vld [vmem:[#allocation4 + $0xd0] ss:$8 sps:$4 sm:$0xff]  }
 0xd6a   : > { %v2384_v40 = vpop.xlane.xlu0 %2383 }
 0xd6b   : > { %3905 = vrcp.f32 %v2384_v40 }
 0xd72   : > { %v2387_v44 = vpop.xlane.xlu1 %2386 }
 0xd73   : > { %3907 = vrcp.f32 %v2387_v44 }
 0xd75   : > { %v3906_v45 = vpop.eup %3905 }
 0xd76   : > { %v2390_v48 = vmul.f32 %v3906_v45, %v3902_v25  ;;  %v3857_v25 = vld [vmem:[#allocation4 + $0xc4] ss:$8 sps:$4 sm:$0xff]   ;;  %v3385_v45 = vld [vmem:[%s4525_s9 + $0x1] ss:$0 sm:$0xff] }
 0xd78   : > { %v2392_v49 = vpack.c.bf16 %v2390_v48, %v2390_v48 }
 0xd7a   : > { %3570 = vmatmul.mubr.msk.bf16.vlgmr.msra.gmra.mrb[40].mxu1 %vm1146_vm2, %v2392_v49 }
 0xd7b   : > { %3574 = vmatpush3.bf16.msra.mxu1 %v2446_v3  ;;  %3575 = vmatprep.mubr.msk.bf16.mxu1 %vm4028_vm0, %v4027_v0  ;;  %v3839_v0 = vld [vmem:[%s4522_s6 + $0xf0] sm:$0xff]  }
 0xd7c   : > { %3499 = vmatprep.subr.bf16.mxu0 %v3839_v0  ;;  %2808 = vmatprep.subr.bf16.mxu1 %v3845_v47  ;;  %v3871_v3 = vld [vmem:[#allocation6 + $0xd0] sm:$0xff]   ;;  %v3877_v0 = vld [vmem:[#allocation6 + $0xe8] sm:$0xff]  }
 0xd7d   : > { %v3908_v50 = vpop.eup %3907  ;;  %3500 = vmatpush3.bf16.msra.mxu0 %v3840_v52  ;;  %v3878_v52 = vld [vmem:[#allocation6 + $0xa8] sm:$0xff]  }
 0xd7e   : > { %v2391_v51 = vmul.f32 %v3908_v50, %v3904_v27  ;;  %v3860_v27 = vld [vmem:[#allocation4 + $0xd4] ss:$8 sps:$4 sm:$0xff]  }
 0xd7f   : > { %v3872_v50 = vld [vmem:[#allocation6 + $0x90] sm:$0xff]  }
 0xd80   : > { %v2440_v2 = vpack.c.bf16 %v2391_v51, %v2391_v51  ;;  %v3873_v51 = vld [vmem:[#allocation6 + $0xd8] sm:$0xff]  }
 0xd82   : > { %3576 = vmatmul.mubr.msk.bf16.vlgmr.msra.gmra.mrb[44].mxu1 %vm1146_vm2, %v2440_v2  ;;  %v3874_v2 = vld [vmem:[#allocation6 + $0x98] sm:$0xff]  }
 0xd83   : > { %2840 = vmatprep.mubr.bf16.mxu1 %v4026_v31  ;;  %v3841_v31 = vld [vmem:[%s4522_s6 + $0xf8] sm:$0xff]   ;;  %2809 = vmatpush1.bf16.msra.mxu1 %v3843_v12 }
 0xd84   : > { %3501 = vmatprep.subr.bf16.mxu0 %v3841_v31  ;;  %2810 = vmatprep.subr.bf16.mxu1 %v3848_v14  ;;  %v3879_v31 = vld [vmem:[#allocation6 + $0xf0] sm:$0xff]  }
 0xd85   : > { %3502 = vmatpush3.bf16.msra.mxu0 %v3842_v53  ;;  %v3880_v53 = vld [vmem:[#allocation6 + $0xb0] sm:$0xff]  }
 0xd86   : > { %3509 = vmatprep.subr.bf16.mxu0 %v3867_v4 }
 0xd87   : > { %2811 = vmatpush1.bf16.msra.mxu1 %v3846_v15 }
 0xd88   : > { %2812 = vmatprep.subr.bf16.mxu1 %v3851_v16  ;;  %v3404_v16 = vld [vmem:[%s4529_s13 + $0x1] ss:$0 sm:$0xff] }
 0xd8b   : > { %2813 = vmatpush1.bf16.msra.mxu1 %v3849_v17 }
 0xd8c   : > { %2814 = vmatprep.subr.bf16.mxu1 %v3854_v24 }
 0xe4d   : > { %v2434_v7 = vpop.f32.mrb[40].mxu1 }
 0xe4e   : > { %v3571_v54 = vpop.f32.mrb[41].mxu1  ;;  %v2488_v60 = vpack.c.bf16 %v2434_v7, %v2434_v7  ;;  %v3881_v7 = vld [vmem:[#allocation6 + $0xf8] sm:$0xff]  }
 0xe4f   : > { %v2437_v55 = vpop.f32.mrb[42].mxu1  ;;  %v3882_v54 = vld [vmem:[#allocation6 + $0xb8] sm:$0xff]  }
 0xe50   : > { %v3572_v56 = vpop.f32.mrb[43].mxu1  ;;  %v3386_v55 = vld [vmem:[%s4527_s11 + $0x2] sm:$0x3] }
 0xe51   : > { %v2721_v56 = vrot.slane %v3386_v55, %v4262_v6 }
 0xe55   : > { %v2482_v57 = vpop.f32.mrb[44].mxu1 }
 0xe56   : > { %v2489_v58 = vpack.c.bf16 %v2482_v57, %v2482_v57  ;;  %v3577_v59 = vpop.f32.mrb[45].mxu1  ;;  %v2725_v57 = vrot.slane %v3386_v55, %v4271_v21 }
 0xe57   : > { %v2485_v61 = vpop.f32.mrb[46].mxu1 }
 0xe58   : > { %v3578_v62 = vpop.f32.mrb[47].mxu1  ;;  %2659 = vmatprep.mubr.bf16.mxu0 %v2489_v58 }
 0xe59   : > { %2660 = vmatmul.mubr.bf16.vlgmr.msra.gmra.mrb[20].mxu0 %v2488_v60 }
 0xe5a   : > { %3510 = vmatpush3.bf16.msra.mxu0 %v3868_v33  ;;  %v3424_v33 = vld [vmem:[%s4553_s27 + $0x1] ss:$0 sm:$0xff] }
 0xe5b   : > { %3511 = vmatprep.subr.bf16.mxu0 %v3869_v36 }
 0xe5e   : > { %3512 = vmatpush3.bf16.msra.mxu0 %v3870_v37 }
 0xe5f   : > { %3513 = vmatprep.subr.bf16.mxu0 %v3871_v3 }
 0xe62   : > { %3514 = vmatpush3.bf16.msra.mxu0 %v3872_v50 }
 0xe63   : > { %3515 = vmatprep.subr.bf16.mxu0 %v3873_v51 }
 0xe66   : > { %3516 = vmatpush3.bf16.msra.mxu0 %v3874_v2 }
 0xe67   : > { %3517 = vmatprep.subr.bf16.mxu0 %v3875_v19 }
 0xe6a   : > { %3518 = vmatpush3.bf16.msra.mxu0 %v3876_v35 }
 0xe6b   : > { %3519 = vmatprep.subr.bf16.mxu0 %v3877_v0 }
 0xe6e   : > { %3520 = vmatpush3.bf16.msra.mxu0 %v3878_v52 }
 0xe6f   : > { %3521 = vmatprep.subr.bf16.mxu0 %v3879_v31 }
 0xe72   : > { %3522 = vmatpush3.bf16.msra.mxu0 %v3880_v53 }
 0xe73   : > { %3523 = vmatprep.subr.bf16.mxu0 %v3881_v7 }
 0xe76   : > { %3524 = vmatpush3.bf16.msra.mxu0 %v3882_v54 }
 0xf2c   : > { %v3503_v63 = vpop.f32.mrb[20].mxu0 }
 0xf2d   : > { %v3504_v5 = vpop.f32.mrb[21].mxu0 }
 0xf2e   : > { %v3505_v8 = vadd.f32 %v3504_v5, %v3503_v63  ;;  %v3506_v9 = vpop.f32.mrb[22].mxu0 }
 0xf2f   : > { %v3507_v28 = vpop.f32.mrb[23].mxu0 }
 0xf30   : > { %v2662_v10 = vadd.f32 %v3505_v8, %v3365_v1 }
 0xf32   : > { %v2667_v11 = vadd.f32 %v2662_v10, %v4387_v13  ;;  %v3852_v13 = vld [vmem:[#allocation4 + $0xb0] ss:$8 sps:$4 sm:$0xff]  }
 0xf33   : > { %2815 = vmatpush1.bf16.msra.mxu1 %v3852_v13 }
 0xf34   : > { %2672 = vadd.xlane.f32.xlu0 %v2667_v11  ;;  %2816 = vmatprep.subr.bf16.mxu1 %v3857_v25 }
 0xf37   : > { %2817 = vmatpush1.bf16.msra.mxu1 %v3855_v26 }
 0xf38   : > { %2818 = vmatprep.subr.bf16.mxu1 %v3860_v27 }
 0xf3b   : > { %2819 = vmatpush1.bf16.msra.mxu1 %v3858_v29 }
 0xf3c   : > { %2820 = vmatprep.subr.bf16.mxu1 %v3863_v41 }
 0xf3f   : > { %2821 = vmatpush1.bf16.msra.mxu1 %v3861_v30 }
 0xf40   : > { %2822 = vmatprep.subr.bf16.mxu1 %v3866_v32 }
 0xf43   : > { %2823 = vmatpush1.bf16.msra.mxu1 %v3864_v34  ;;  %v3423_v34 = vld [vmem:[%s4552_s29 + $0x1] ss:$0 sm:$0xff] }
 0xfc1   : > { %v2673_v18 = vpop.xlane.xlu0 %2672 }
 0xfc2   : > { %v2674_v20 = vmul.f32 0.0078125, %v2673_v18 }
 0xfc4   : > { %v2675_v22 = vsub.f32 %v2667_v11, %v2674_v20 }
 0xfc6   : > { %v2676_v23 = vmul.f32 %v2675_v22, %v2675_v22 }
 0xfc8   : > { %2677 = vadd.xlane.f32.xlu1 %v2676_v23 }
0x1055   : > { %v2678_v38 = vpop.xlane.xlu1 %2677 }
0x1056   : > { %v2679_v39 = vmul.f32 0.0078125, %v2678_v38 }
0x1058   : > { %v2680_v40 = vadd.f32 1e-12, %v2679_v39 }
0x105a   : > { %3909 = vrsqrt.f32 %v2680_v40 }
0x1064   : > { %v3910_v42 = vpop.eup %3909 }
0x1065   : > { %v2682_v44 = vmul.f32 %v3910_v42, %v2675_v22 }
0x1067   : > { %v2689_v46 = vmul.f32 %v3384_v43, %v2682_v44 }
0x1069   : > { %v2696_v48 = vadd.f32 %v3385_v45, %v2689_v46 }
0x106b   : > { %v2697_v49 = vpack.c.bf16 %v2696_v48, %v2696_v48 }
0x106d   : > { %2841 = vmatmul.mubr.bf16.vlgmr.msra.gmra.mrb[48].mxu1 %v2697_v49 }
0x1140   : > { %v2842_v58 = vpop.f32.mrb[48].mxu1 }
0x1141   : > { %v2843_v59 = vadd.f32 %v2842_v58, %v2721_v56  ;;  %v2844_v60 = vpop.f32.mrb[49].mxu1 }
0x1142   : > { %v2845_v61 = vadd.f32 %v2844_v60, %v2725_v57  ;;  %v2846_v62 = vpop.f32.mrb[50].mxu1 }
0x1143   : > { %v2851_v63 = vmul.f32 0.70710677, %v2843_v59  ;;  %v2847_v1 = vpop.f32.mrb[51].mxu1  ;;  %v2849_v28 = vmul.f32 0.5, %v2843_v59 }
0x1144   : > { %v2852_v5 = vmul.f32 0.70710677, %v2845_v61  ;;  %v2850_v11 = vmul.f32 0.5, %v2845_v61 }
0x1145   : > { %3911 = verf.f32 %v2851_v63 }
0x1146   : > { %3913 = verf.f32 %v2852_v5 }
0x114f   : > { %v3912_v8 = vpop.eup %3911 }
0x1150   : > { %v3914_v9 = vpop.eup %3913  ;;  %v2855_v10 = vadd.f32 1.0, %v3912_v8 }
0x1151   : > { %v2856_v12 = vadd.f32 1.0, %v3914_v9 }
0x1152   : > { %v2857_v47 = vmul.f32 %v2855_v10, %v2849_v28 }
0x1153   : > { %v2858_v6 = vmul.f32 %v2856_v12, %v2850_v11 }
0x1154   : > { %v2859_v21 = vpack.c.bf16 %v2857_v47, %v2857_v47 }
0x1155   : > { %v2860_v14 = vpack.c.bf16 %v2858_v6, %v2858_v6 }
0x1157   : > { %3030 = vmatprep.mubr.bf16.mxu0 %v2860_v14 }
0x1158   : > { %3031 = vmatmul.mubr.bf16.vlgmr.msra.gmra.mrb[24].mxu0 %v2859_v21 }
0x122b   : > { %v3525_v15 = vpop.f32.mrb[24].mxu0 }
0x122c   : > { %v3526_v17 = vpop.f32.mrb[25].mxu0 }
0x122d   : > { %v3527_v18 = vadd.f32 %v3526_v17, %v3525_v15  ;;  %v3528_v20 = vpop.f32.mrb[26].mxu0 }
0x122e   : > { %v3529_v22 = vpop.f32.mrb[27].mxu0 }
0x122f   : > { %v3033_v23 = vadd.f32 %v3527_v18, %v3404_v16 }
0x1231   : > { %v3038_v24 = vadd.f32 %v3033_v23, %v2696_v48 }
0x1233   : > { %3043 = vadd.xlane.f32.xlu0 %v3038_v24 }
0x12c0   : > { %v3044_v13 = vpop.xlane.xlu0 %3043 }
0x12c1   : > { %v3045_v25 = vmul.f32 0.0078125, %v3044_v13 }
0x12c3   : > { %v3046_v26 = vsub.f32 %v3038_v24, %v3045_v25 }
0x12c5   : > { %v3047_v27 = vmul.f32 %v3046_v26, %v3046_v26 }
0x12c7   : > { %3048 = vadd.xlane.f32.xlu1 %v3047_v27 }
0x1354   : > { %v3049_v29 = vpop.xlane.xlu1 %3048 }
0x1355   : > { %v3050_v41 = vmul.f32 0.0078125, %v3049_v29 }
0x1357   : > { %v3051_v30 = vadd.f32 1e-12, %v3050_v41 }
0x1359   : > { %3915 = vrsqrt.f32 %v3051_v30 }
0x1363   : > { %v3916_v32 = vpop.eup %3915 }
0x1364   : > { %v3053_v4 = vmul.f32 %v3916_v32, %v3046_v26 }
0x1366   : > { %v3060_v36 = vmul.f32 %v3423_v34, %v3053_v4 }
0x1368   : > { %v3067_v37 = vadd.f32 %v3424_v33, %v3060_v36 }
0x136a   : > { %3068 = vst [vmem:[%s574_s19] sm:$0xff] %v3067_v37 }
0x136b PF: > { %s4555_s20 = sld [smem:[#allocation9_spill]] }
0x1371   : > { %s28_s21 = sadd.s32 1, %s4555_s20  }
0x1372   : > { %p25_p5 = scmp.ge.s32.totalorder %s28_s21, 4  }
0x1374   :  { %27 = sbr.rel (!%p25_p5) target bundleno = 7 (0x7), region = 142 }
0x137b   :  { %3088 = vsyncpa [#allocation3], 1 }
0x137c   :  { %3090 = vsyncpa [#allocation3 + $0x1], 1 }
0x137d   :  { %3091 = vsyncpa [#allocation5], 1 }

// kernel: net_forward.3
= control target key start
LH: loop header
LB: loop body
LE: loop exit
PB: predicated region body
PF: predicated region fallthrough
CT: control target
= control target key end

     0   :  { %14 = vsyncpa [#allocation3], 0  ;;  %s5792_s27 = smov [#allocation2]   ;;  %s7613_s0 = inlined_call_operand.vmem [shape: f32[2,8,128], index: 0, kind: input, shape index: {}]   ;;  %s7614_s1 = inlined_call_operand.vmem [shape: f32[8,2,128], index: 1, kind: input, shape index: {}]   ;;  %s7615_s2 = inlined_call_operand.vmem [shape: f32[2,128,512], index: 2, kind: input, shape index: {}]   ;;  %s7616_s3 = inlined_call_operand.vmem [shape: f32[2,1,512], index: 3, kind: input, shape index: {}]   ;;  %s7617_s4 = inlined_call_operand.hbm [shape: f32[2,128,512], index: 4, kind: input, shape index: {}]   ;;  %s7618_s5 = inlined_call_operand.vmem [shape: f32[128,128], index: 5, kind: input, shape index: {}]   ;;  %s7619_s6 = inlined_call_operand.vmem [shape: f32[1,128], index: 6, kind: input, shape index: {}]   ;;  %s7620_s7 = inlined_call_operand.vmem [shape: f32[16,128], index: 7, kind: output, shape index: {0}]   ;;  %s7621_s8 = inlined_call_operand.vmem [shape: s32[16,1], index: 8, kind: output, shape index: {1}]  }
   0x1   :  { %s28_s28 = sshll.u32 %s5792_s27, 4  ;;  %s5768_s9 = scalar_lea.hbm %s7617_s4, 16384  ;;  %s29_s28 = int_to_ptr.vmem [resolvable:$true] %s28_s28 }
   0x2   :  { %p5769_p0 = scmp.ne.s32.totalorder %s7617_s4, %s5768_s9  ;;  %p5772_p1 = scmp.lt.u32.totalorder %s5768_s9, %s7617_s4 }
   0x4   :  { %p5774_p2 = pnand %p5772_p1, %p5769_p0 }
   0x6   :  { %5777 = shalt.err (!%p5774_p2)
}
   0x7   :  { %s5778_s14 = scalar_lea.vmem %s29_s28, 16384  ;;  %p5783_p4 = scmp.lt.s32.totalorder %s29_s28, %s29_s28 }
   0x8   :  { %p5779_p3 = scmp.ne.s32.totalorder %s29_s28, %s5778_s14  ;;  %p5784_p5 = scmp.lt.s32.totalorder %s5778_s14, %s5778_s14 }
   0xa   :  { %p5785_p6 = por %p5784_p5, %p5783_p4 }
   0xc   :  { %p5786_p7 = pnand %p5785_p6, %p5779_p3 }
   0xe   :  { %5789 = shalt.err (!%p5786_p7)
}
   0xf   :  { %s5793_s15 = smov 512   ;;  %s5794_s16 = smov 32  }
  0x10   :  { %34 = dma.hbm_to_vmem [thread:$0]  %s7617_s4, 16384, %s29_s28, [#allocation3], %s5793_s15, %s5793_s15, %s5794_s16  }
  0x11   :  { %5790 = dma.done.wait [#allocation3], 16384  }
  0x12   :  { %5791 = vsyncadd [#allocation3], 4294950912  ;;  %v7626_v0 = vmov 0.0   ;;  %v163_v1 = vld [vmem:[%s7615_s2 + $0x8] sm:$0xff]  ;;  %v165_v3 = vld [vmem:[%s7615_s2 + $0x18] sm:$0xff]  ;;  %vm47_vm0 = vcmask 1041409  }
  0x13   :  { %312 = vmatprep.mubr.f32.mxu0 %v7626_v0  ;;  %389 = vmatprep.mubr.f32.mxu1 %v7626_v0  ;;  %v167_v2 = vld [vmem:[%s7615_s2 + $0x28] sm:$0xff]  ;;  %v169_v5 = vld [vmem:[%s7615_s2 + $0x38] sm:$0xff]  ;;  %v162_v6 = vld [vmem:[%s7615_s2] sm:$0xff]  ;;  %vm52_vm1 = vcmask 1043459   ;;  %vm57_vm2 = vcmask 1045509   ;;  %vm62_vm3 = vcmask 1047559  }
  0x14   :  { %v4316_v4 = vpack.c.bf16 %v167_v2, %v163_v1  ;;  %v166_v7 = vld [vmem:[%s7615_s2 + $0x20] sm:$0xff]  ;;  %v4348_v8 = vpack.c.bf16 %v169_v5, %v165_v3  ;;  %v164_v10 = vld [vmem:[%s7615_s2 + $0x10] sm:$0xff]  ;;  %v171_v12 = vld [vmem:[%s7615_s2 + $0x48] sm:$0xff]  ;;  %vm80_vm4 = vcmask 1041408   ;;  %vm82_vm5 = vcmask 1043456  }
  0x15   :  { %v4318_v9 = vpack.c.bf16 %v166_v7, %v162_v6  ;;  %v168_v11 = vld [vmem:[%s7615_s2 + $0x30] sm:$0xff]  ;;  %v175_v14 = vld [vmem:[%s7615_s2 + $0x68] sm:$0xff]  ;;  %v173_v15 = vld [vmem:[%s7615_s2 + $0x58] sm:$0xff]  ;;  %vm84_vm6 = vcmask 1045504  }
  0x16   :  { %4317 = vmatprep.subr.bf16.mxu0 %v4316_v4  ;;  %v4350_v13 = vpack.c.bf16 %v168_v11, %v164_v10  ;;  %v177_v16 = vld [vmem:[%s7615_s2 + $0x78] sm:$0xff]  ;;  %4349 = vmatprep.subr.bf16.mxu1 %v4348_v8  ;;  %v4320_v17 = vpack.c.bf16 %v175_v14, %v171_v12  ;;  %v170_v19 = vld [vmem:[%s7615_s2 + $0x40] sm:$0xff]  ;;  %v172_v21 = vld [vmem:[%s7615_s2 + $0x50] sm:$0xff] }
  0x17   :  { %4319 = vmatpush1.bf16.msra.mxu0 %v4318_v9  ;;  %v4352_v18 = vpack.c.bf16 %v177_v16, %v173_v15  ;;  %v174_v20 = vld [vmem:[%s7615_s2 + $0x60] sm:$0xff]  ;;  %v176_v23 = vld [vmem:[%s7615_s2 + $0x70] sm:$0xff]  ;;  %v179_v24 = vld [vmem:[%s7615_s2 + $0x88] sm:$0xff] }
  0x18   :  { %4351 = vmatpush1.bf16.msra.mxu1 %v4350_v13  ;;  %v4322_v22 = vpack.c.bf16 %v174_v20, %v170_v19  ;;  %v183_v25 = vld [vmem:[%s7615_s2 + $0xa8] sm:$0xff]  ;;  %4321 = vmatprep.subr.bf16.mxu0 %v4320_v17  ;;  %v4354_v26 = vpack.c.bf16 %v176_v23, %v172_v21  ;;  %v181_v28 = vld [vmem:[%s7615_s2 + $0x98] sm:$0xff]  ;;  %v178_v30 = vld [vmem:[%s7615_s2 + $0x80] sm:$0xff] }
  0x19   :  { %4353 = vmatprep.subr.bf16.mxu1 %v4352_v18  ;;  %v4324_v27 = vpack.c.bf16 %v183_v25, %v179_v24  ;;  %v185_v29 = vld [vmem:[%s7615_s2 + $0xb8] sm:$0xff]  ;;  %v182_v32 = vld [vmem:[%s7615_s2 + $0xa0] sm:$0xff]  ;;  %v180_v33 = vld [vmem:[%s7615_s2 + $0x90] sm:$0xff] }
  0x1a   :  { %v4356_v31 = vpack.c.bf16 %v185_v29, %v181_v28  ;;  %v184_v34 = vld [vmem:[%s7615_s2 + $0xb0] sm:$0xff]  ;;  %v4326_v35 = vpack.c.bf16 %v182_v32, %v178_v30  ;;  %v187_v36 = vld [vmem:[%s7615_s2 + $0xc8] sm:$0xff]  ;;  %v189_v38 = vld [vmem:[%s7615_s2 + $0xd8] sm:$0xff] }
  0x1b   :  { %4323 = vmatpush1.bf16.msra.mxu0 %v4322_v22  ;;  %v191_v37 = vld [vmem:[%s7615_s2 + $0xe8] sm:$0xff]  ;;  %v4358_v39 = vpack.c.bf16 %v184_v34, %v180_v33  ;;  %v193_v41 = vld [vmem:[%s7615_s2 + $0xf8] sm:$0xff]  ;;  %v186_v42 = vld [vmem:[%s7615_s2 + $0xc0] sm:$0xff] }
  0x1c   :  { %4355 = vmatpush1.bf16.msra.mxu1 %v4354_v26  ;;  %4325 = vmatprep.subr.bf16.mxu0 %v4324_v27  ;;  %v4328_v40 = vpack.c.bf16 %v191_v37, %v187_v36  ;;  %v190_v43 = vld [vmem:[%s7615_s2 + $0xe0] sm:$0xff]  ;;  %v4360_v44 = vpack.c.bf16 %v193_v41, %v189_v38  ;;  %v188_v45 = vld [vmem:[%s7615_s2 + $0xd0] sm:$0xff]  ;;  %v195_v47 = vld [vmem:[%s7615_s2 + $0x108] sm:$0xff] }
  0x1d   :  { %4357 = vmatprep.subr.bf16.mxu1 %v4356_v31  ;;  %v192_v46 = vld [vmem:[%s7615_s2 + $0xf0] sm:$0xff]  ;;  %v199_v48 = vld [vmem:[%s7615_s2 + $0x128] sm:$0xff]  ;;  %v197_v49 = vld [vmem:[%s7615_s2 + $0x118] sm:$0xff]  ;;  %v4330_v51 = vpack.c.bf16 %v190_v43, %v186_v42 }
  0x1e   :  { %v201_v50 = vld [vmem:[%s7615_s2 + $0x138] sm:$0xff]  ;;  %v4362_v52 = vpack.c.bf16 %v192_v46, %v188_v45  ;;  %v4332_v53 = vpack.c.bf16 %v199_v48, %v195_v47  ;;  %v194_v54 = vld [vmem:[%s7615_s2 + $0x100] sm:$0xff]  ;;  %v196_v56 = vld [vmem:[%s7615_s2 + $0x110] sm:$0xff] }
  0x1f   :  { %4327 = vmatpush1.bf16.msra.mxu0 %v4326_v35  ;;  %v198_v55 = vld [vmem:[%s7615_s2 + $0x120] sm:$0xff]  ;;  %v4364_v57 = vpack.c.bf16 %v201_v50, %v197_v49  ;;  %v200_v58 = vld [vmem:[%s7615_s2 + $0x130] sm:$0xff]  ;;  %v203_v59 = vld [vmem:[%s7615_s2 + $0x148] sm:$0xff] }
  0x20   :  { %4359 = vmatpush1.bf16.msra.mxu1 %v4358_v39  ;;  %4329 = vmatprep.subr.bf16.mxu0 %v4328_v40  ;;  %v207_v60 = vld [vmem:[%s7615_s2 + $0x168] sm:$0xff]  ;;  %v205_v61 = vld [vmem:[%s7615_s2 + $0x158] sm:$0xff]  ;;  %v4334_v63 = vpack.c.bf16 %v198_v55, %v194_v54  ;;  %v4366_v1 = vpack.c.bf16 %v200_v58, %v196_v56  ;;  %v202_v3 = vld [vmem:[%s7615_s2 + $0x140] sm:$0xff] }
  0x21   :  { %4361 = vmatprep.subr.bf16.mxu1 %v4360_v44  ;;  %v209_v62 = vld [vmem:[%s7615_s2 + $0x178] sm:$0xff]  ;;  %v4336_v2 = vpack.c.bf16 %v207_v60, %v203_v59  ;;  %v206_v4 = vld [vmem:[%s7615_s2 + $0x160] sm:$0xff]  ;;  %v204_v5 = vld [vmem:[%s7615_s2 + $0x150] sm:$0xff] }
  0x22   :  { %v4368_v6 = vpack.c.bf16 %v209_v62, %v205_v61  ;;  %v208_v7 = vld [vmem:[%s7615_s2 + $0x170] sm:$0xff]  ;;  %v211_v8 = vld [vmem:[%s7615_s2 + $0x188] sm:$0xff]  ;;  %v213_v10 = vld [vmem:[%s7615_s2 + $0x198] sm:$0xff]  ;;  %v4338_v12 = vpack.c.bf16 %v206_v4, %v202_v3 }
  0x23   :  { %4331 = vmatpush1.bf16.msra.mxu0 %v4330_v51  ;;  %v215_v9 = vld [vmem:[%s7615_s2 + $0x1a8] sm:$0xff]  ;;  %v217_v11 = vld [vmem:[%s7615_s2 + $0x1b8] sm:$0xff]  ;;  %v210_v13 = vld [vmem:[%s7615_s2 + $0x180] sm:$0xff]  ;;  %v4370_v16 = vpack.c.bf16 %v208_v7, %v204_v5 }
  0x24   :  { %4363 = vmatpush1.bf16.msra.mxu1 %v4362_v52  ;;  %4333 = vmatprep.subr.bf16.mxu0 %v4332_v53  ;;  %v214_v14 = vld [vmem:[%s7615_s2 + $0x1a0] sm:$0xff]  ;;  %v212_v15 = vld [vmem:[%s7615_s2 + $0x190] sm:$0xff]  ;;  %v4340_v17 = vpack.c.bf16 %v215_v9, %v211_v8  ;;  %v6031_v20 = vld [vmem:[%s7613_s0 + $0x8] sm:$0xff]  ;;  %v4372_v21 = vpack.c.bf16 %v217_v11, %v213_v10 }
  0x25   :  { %4365 = vmatprep.subr.bf16.mxu1 %v4364_v57  ;;  %v216_v18 = vld [vmem:[%s7615_s2 + $0x1b0] sm:$0xff]  ;;  %v6026_v19 = vld [vmem:[%s7613_s0] sm:$0xff]  ;;  %v219_v22 = vld [vmem:[%s7615_s2 + $0x1c8] sm:$0xff]  ;;  %v46_v24 = vrot.slane %v6031_v20, 7  ;;  %v51_v26 = vrot.slane %v6031_v20, 6  ;;  %v56_v30 = vrot.slane %v6031_v20, 5  ;;  %v4342_v31 = vpack.c.bf16 %v214_v14, %v210_v13 }
  0x26   :  { %v223_v23 = vld [vmem:[%s7615_s2 + $0x1e8] sm:$0xff]  ;;  %v50_v25 = vrot.slane %v6026_v19, 7  ;;  %v221_v27 = vld [vmem:[%s7615_s2 + $0x1d8] sm:$0xff]  ;;  %v55_v29 = vrot.slane %v6026_v19, 6  ;;  %v4374_v32 = vpack.c.bf16 %v216_v18, %v212_v15  ;;  %v218_v33 = vld [vmem:[%s7615_s2 + $0x1c0] sm:$0xff]  ;;  %v60_v40 = vrot.slane %v6026_v19, 5 }
  0x27   :  { %4335 = vmatpush1.bf16.msra.mxu0 %v4334_v63  ;;  %v225_v28 = vld [vmem:[%s7615_s2 + $0x1f8] sm:$0xff]  ;;  %v222_v34 = vld [vmem:[%s7615_s2 + $0x1e0] sm:$0xff]  ;;  %v220_v35 = vld [vmem:[%s7615_s2 + $0x1d0] sm:$0xff]  ;;  %v48_v36 = vsel %vm47_vm0, %v46_v24, %v6026_v19  ;;  %v4344_v38 = vpack.c.bf16 %v223_v23, %v219_v22  ;;  %v61_v41 = vrot.slane %v6031_v20, 4  ;;  %v65_v44 = vrot.slane %v6026_v19, 4 }
  0x28   :  { %4367 = vmatpush1.bf16.msra.mxu1 %v4366_v1  ;;  %4337 = vmatprep.subr.bf16.mxu0 %v4336_v2  ;;  %v53_v37 = vsel %vm52_vm1, %v51_v26, %v50_v25  ;;  %v224_v39 = vld [vmem:[%s7615_s2 + $0x1f0] sm:$0xff]  ;;  %v403_v42 = vld [vmem:[#allocation2 + $0x8] sm:$0xff]  ;;  %v4376_v45 = vpack.c.bf16 %v225_v28, %v221_v27  ;;  %v58_v46 = vsel %vm57_vm2, %v56_v30, %v55_v29  ;;  %v66_v48 = vrot.slane %v6031_v20, 3  ;;  %v405_v50 = vld [vmem:[#allocation2 + $0x18] sm:$0xff] }
  0x29   :  { %4369 = vmatprep.subr.bf16.mxu1 %v4368_v6  ;;  %v407_v43 = vld [vmem:[#allocation2 + $0x28] sm:$0xff]  ;;  %v81_v47 = vsel %vm80_vm4, %v48_v36, %v53_v37  ;;  %v4346_v49 = vpack.c.bf16 %v222_v34, %v218_v33  ;;  %v409_v51 = vld [vmem:[#allocation2 + $0x38] sm:$0xff]  ;;  %v69_v52 = vrot.slane %v6026_v19, 3  ;;  %v70_v53 = vrot.slane %v6031_v20, 2  ;;  %v402_v61 = vld [vmem:[#allocation2] sm:$0xff] }
  0x2a   :  { %v73_v54 = vrot.slane %v6026_v19, 2  ;;  %v4378_v55 = vpack.c.bf16 %v224_v39, %v220_v35  ;;  %v6074_v56 = vpack.c.bf16 %v407_v43, %v403_v42  ;;  %v67_v57 = vsel %vm47_vm0, %v66_v48, %v65_v44  ;;  %v406_v62 = vld [vmem:[#allocation2 + $0x20] sm:$0xff]  ;;  %v404_v3 = vld [vmem:[#allocation2 + $0x10] sm:$0xff]  ;;  %v411_v7 = vld [vmem:[#allocation2 + $0x48] sm:$0xff] }
  0x2b   :  { %4339 = vmatpush1.bf16.msra.mxu0 %v4338_v12  ;;  %v74_v58 = vrot.slane %v6031_v20, 1  ;;  %v63_v59 = vsel %vm62_vm3, %v61_v41, %v60_v40  ;;  %v83_v60 = vsel %vm82_vm5, %v81_v47, %v58_v46  ;;  %v71_v63 = vsel %vm52_vm1, %v70_v53, %v69_v52  ;;  %v408_v4 = vld [vmem:[#allocation2 + $0x30] sm:$0xff]  ;;  %v415_v8 = vld [vmem:[#allocation2 + $0x68] sm:$0xff]  ;;  %v413_v9 = vld [vmem:[#allocation2 + $0x58] sm:$0xff] }
  0x2c   :  { %4371 = vmatpush1.bf16.msra.mxu1 %v4370_v16  ;;  %4341 = vmatprep.subr.bf16.mxu0 %v4340_v17  ;;  %7682 = vst [vmem:[#allocation5_spill] sm:$0xff] %v6074_v56  ;;  %v77_v1 = vrot.slane %v6026_v19, 1  ;;  %v6082_v2 = vpack.c.bf16 %v409_v51, %v405_v50  ;;  %v86_v6 = vsel %vm80_vm4, %v67_v57, %v71_v63  ;;  %v417_v10 = vld [vmem:[#allocation2 + $0x78] sm:$0xff]  ;;  %v410_v16 = vld [vmem:[#allocation2 + $0x40] sm:$0xff]  ;;  %v412_v18 = vld [vmem:[#allocation2 + $0x50] sm:$0xff]  ;;  %vm4137_vm0 = vcmask 7168  }
  0x2d   :  { %4373 = vmatprep.subr.bf16.mxu1 %v4372_v21  ;;  %v75_v5 = vsel %vm57_vm2, %v74_v58, %v73_v54  ;;  %v85_v11 = vsel %vm84_vm6, %v83_v60, %v63_v59  ;;  %v6087_v12 = vpack.c.bf16 %v406_v62, %v402_v61  ;;  %v6090_v13 = vpack.c.bf16 %v408_v4, %v404_v3  ;;  %v414_v17 = vld [vmem:[#allocation2 + $0x60] sm:$0xff]  ;;  %v416_v22 = vld [vmem:[#allocation2 + $0x70] sm:$0xff]  ;;  %v419_v23 = vld [vmem:[#allocation2 + $0x88] sm:$0xff] }
  0x2e   :  { %7683 = vst [vmem:[#allocation6_spill] sm:$0xff] %v6082_v2  ;;  %v78_v14 = vsel %vm62_vm3, %v6031_v20, %v77_v1  ;;  %v87_v15 = vsel %vm82_vm5, %v86_v6, %v75_v5  ;;  %v6096_v19 = vpack.c.bf16 %v415_v8, %v411_v7  ;;  %v6098_v21 = vpack.c.bf16 %v417_v10, %v413_v9  ;;  %v423_v24 = vld [vmem:[#allocation2 + $0xa8] sm:$0xff]  ;;  %v421_v25 = vld [vmem:[#allocation2 + $0x98] sm:$0xff]  ;;  %v418_v30 = vld [vmem:[#allocation2 + $0x80] sm:$0xff] }
  0x2f   :  { %4343 = vmatpush1.bf16.msra.mxu0 %v4342_v31  ;;  %v425_v26 = vld [vmem:[#allocation2 + $0xb8] sm:$0xff]  ;;  %v88_v20 = vsel %vm84_vm6, %v87_v15, %v78_v14  ;;  %v6102_v27 = vpack.c.bf16 %v414_v17, %v410_v16  ;;  %v6106_v28 = vpack.c.bf16 %v416_v22, %v412_v18  ;;  %v6108_v29 = vpack.c.bf16 %v423_v24, %v419_v23  ;;  %v422_v31 = vld [vmem:[#allocation2 + $0xa0] sm:$0xff]  ;;  %v424_v34 = vld [vmem:[#allocation2 + $0xb0] sm:$0xff] }
  0x30   :  { %4375 = vmatpush1.bf16.msra.mxu1 %v4374_v32  ;;  %4345 = vmatprep.subr.bf16.mxu0 %v4344_v38  ;;  %v420_v32 = vld [vmem:[#allocation2 + $0x90] sm:$0xff]  ;;  %v6112_v33 = vpack.c.bf16 %v425_v26, %v421_v25  ;;  %v427_v35 = vld [vmem:[#allocation2 + $0xc8] sm:$0xff]  ;;  %v429_v37 = vld [vmem:[#allocation2 + $0xd8] sm:$0xff]  ;;  %v6116_v39 = vpack.c.bf16 %v422_v31, %v418_v30 }
  0x31   :  { %4377 = vmatprep.subr.bf16.mxu1 %v4376_v45  ;;  %v431_v36 = vld [vmem:[#allocation2 + $0xe8] sm:$0xff]  ;;  %v433_v38 = vld [vmem:[#allocation2 + $0xf8] sm:$0xff]  ;;  %v6120_v40 = vpack.c.bf16 %v424_v34, %v420_v32  ;;  %v426_v42 = vld [vmem:[#allocation2 + $0xc0] sm:$0xff] }
  0x32   :  { %v6122_v41 = vpack.c.bf16 %v431_v36, %v427_v35  ;;  %v430_v43 = vld [vmem:[#allocation2 + $0xe0] sm:$0xff]  ;;  %v428_v44 = vld [vmem:[#allocation2 + $0xd0] sm:$0xff]  ;;  %v6125_v45 = vpack.c.bf16 %v433_v38, %v429_v37  ;;  %v435_v47 = vld [vmem:[#allocation2 + $0x108] sm:$0xff] }
  0x33   :  { %4347 = vmatpush1.bf16.msra.mxu0 %v4346_v49  ;;  %v432_v46 = vld [vmem:[#allocation2 + $0xf0] sm:$0xff]  ;;  %v439_v48 = vld [vmem:[#allocation2 + $0x128] sm:$0xff]  ;;  %v437_v49 = vld [vmem:[#allocation2 + $0x118] sm:$0xff]  ;;  %v6130_v51 = vpack.c.bf16 %v430_v43, %v426_v42 }
  0x34   :  { %4379 = vmatpush1.bf16.msra.mxu1 %v4378_v55  ;;  %4381 = vmatprep.subr.bf16.mxu0 %v6074_v56  ;;  %v441_v50 = vld [vmem:[#allocation2 + $0x138] sm:$0xff]  ;;  %v6134_v52 = vpack.c.bf16 %v432_v46, %v428_v44  ;;  %v6136_v53 = vpack.c.bf16 %v439_v48, %v435_v47  ;;  %v434_v54 = vld [vmem:[#allocation2 + $0x100] sm:$0xff]  ;;  %v436_v57 = vld [vmem:[#allocation2 + $0x110] sm:$0xff]  ;;  %v104_v48 = vlaneseq }
  0x35   :  { %4413 = vmatprep.subr.bf16.mxu1 %v6082_v2  ;;  %v438_v55 = vld [vmem:[#allocation2 + $0x120] sm:$0xff]  ;;  %v6139_v58 = vpack.c.bf16 %v441_v50, %v437_v49  ;;  %v440_v59 = vld [vmem:[#allocation2 + $0x130] sm:$0xff]  ;;  %v443_v60 = vld [vmem:[#allocation2 + $0x148] sm:$0xff] }
  0x36   :  { %313 = vmatmul.mubr.f32.vlgmr.msra.gmra.mrb[0].mxu0 %v85_v11  ;;  %v447_v61 = vld [vmem:[#allocation2 + $0x168] sm:$0xff]  ;;  %v445_v62 = vld [vmem:[#allocation2 + $0x158] sm:$0xff]  ;;  %v6142_v1 = vpack.c.bf16 %v438_v55, %v434_v54  ;;  %v6146_v3 = vpack.c.bf16 %v440_v59, %v436_v57  ;;  %v442_v5 = vld [vmem:[#allocation2 + $0x140] sm:$0xff]  ;;  %v6225_v49 = vshrl.u32 %v104_v48, 7  ;;  %v6227_v50 = vand.u32 127, %v104_v48 }
  0x37   :  { %390 = vmatmul.mubr.f32.vlgmr.msra.gmra.mrb[0].mxu1 %v85_v11  ;;  %4383 = vmatpush1.bf16.msra.mxu0 %v6087_v12  ;;  %v449_v63 = vld [vmem:[#allocation2 + $0x178] sm:$0xff]  ;;  %v6148_v4 = vpack.c.bf16 %v447_v61, %v443_v60  ;;  %v446_v6 = vld [vmem:[#allocation2 + $0x160] sm:$0xff]  ;;  %v444_v7 = vld [vmem:[#allocation2 + $0x150] sm:$0xff] }
  0x38   :  { %4415 = vmatpush1.bf16.msra.mxu1 %v6090_v13  ;;  %318 = vmatprep.mubr.f32.mxu0 %v7626_v0  ;;  %v6151_v8 = vpack.c.bf16 %v449_v63, %v445_v62  ;;  %v448_v9 = vld [vmem:[#allocation2 + $0x170] sm:$0xff]  ;;  %v451_v10 = vld [vmem:[#allocation2 + $0x188] sm:$0xff]  ;;  %v453_v14 = vld [vmem:[#allocation2 + $0x198] sm:$0xff]  ;;  %v6154_v16 = vpack.c.bf16 %v446_v6, %v442_v5  ;;  %7684 = vst [vmem:[#allocation7_spill] sm:$0xff] %v6225_v49  ;;  %v7625_v54 = vsub.s32 0, %v6225_v49  ;;  %v7623_v57 = vsub.s32 1, %v6225_v49 }
  0x39   :  { %4385 = vmatprep.subr.bf16.mxu0 %v6096_v19  ;;  %4417 = vmatprep.subr.bf16.mxu1 %v6098_v21  ;;  %v455_v11 = vld [vmem:[#allocation2 + $0x1a8] sm:$0xff]  ;;  %v457_v15 = vld [vmem:[#allocation2 + $0x1b8] sm:$0xff]  ;;  %v6158_v17 = vpack.c.bf16 %v448_v9, %v444_v7  ;;  %v450_v22 = vld [vmem:[#allocation2 + $0x180] sm:$0xff]  ;;  %7685 = vst [vmem:[#allocation8_spill] sm:$0xff] %v6227_v50  ;;  %v106_v59 = vadd.s32 128, %v6227_v50  ;;  %v7624_v60 = vsub.s32 2, %v6225_v49 }
  0x3a   :  { %319 = vmatmul.mubr.f32.gmra.mrb[2].mxu0 %v88_v20  ;;  %395 = vmatprep.mubr.f32.mxu1 %v7626_v0  ;;  %v6160_v18 = vpack.c.bf16 %v455_v11, %v451_v10  ;;  %v454_v23 = vld [vmem:[#allocation2 + $0x1a0] sm:$0xff]  ;;  %v452_v24 = vld [vmem:[#allocation2 + $0x190] sm:$0xff]  ;;  %v6163_v25 = vpack.c.bf16 %v457_v15, %v453_v14  ;;  %v463_v30 = vld [vmem:[#allocation2 + $0x1e8] sm:$0xff]  ;;  %v107_v61 = vadd.s32 256, %v6227_v50  ;;  %v108_v62 = vadd.s32 384, %v6227_v50 }
  0x3b   :  { %4387 = vmatpush1.bf16.msra.mxu0 %v6102_v27  ;;  %396 = vmatmul.mubr.f32.gmra.mrb[2].mxu1 %v88_v20  ;;  %v456_v26 = vld [vmem:[#allocation2 + $0x1b0] sm:$0xff]  ;;  %v459_v20 = vld [vmem:[#allocation2 + $0x1c8] sm:$0xff]  ;;  %v461_v31 = vld [vmem:[#allocation2 + $0x1d8] sm:$0xff]  ;;  %v6166_v34 = vpack.c.bf16 %v454_v23, %v450_v22  ;;  %v7622_v5 = vsub.s32 3, %v6225_v49  ;;  %v120_v7 = vand.u32 127, %v106_v59  ;;  %vm157_vm7 = vcmp.lt.s32.totalorder %v6227_v50, 64 }
  0x3c   :  { %4419 = vmatpush1.bf16.msra.mxu1 %v6106_v28  ;;  %4389 = vmatprep.subr.bf16.mxu0 %v6108_v29  ;;  %v465_v32 = vld [vmem:[#allocation2 + $0x1f8] sm:$0xff]  ;;  %v6170_v35 = vpack.c.bf16 %v456_v26, %v452_v24  ;;  %v6172_v36 = vpack.c.bf16 %v463_v30, %v459_v20  ;;  %v458_v37 = vld [vmem:[#allocation2 + $0x1c0] sm:$0xff]  ;;  %v460_v43 = vld [vmem:[#allocation2 + $0x1d0] sm:$0xff]  ;;  %v127_v11 = vand.u32 127, %v107_v61  ;;  %v134_v14 = vand.u32 127, %v108_v62 }
  0x3d   :  { %4421 = vmatprep.subr.bf16.mxu1 %v6112_v33  ;;  %586 = vmatprep.mubr.f32.mxu0 %v7626_v0  ;;  %v462_v38 = vld [vmem:[#allocation2 + $0x1e0] sm:$0xff]  ;;  %v6175_v42 = vpack.c.bf16 %v465_v32, %v461_v31  ;;  %v464_v44 = vld [vmem:[#allocation2 + $0x1f0] sm:$0xff]  ;;  %vm6248_vm8 = vcmp.lt.s32.totalorder %v120_v7, 64  ;;  %v7686_v32 = vmov 0 }
  0x3e   :  { %657 = vmatprep.mubr.f32.mxu1 %v7626_v0  ;;  %v6178_v46 = vpack.c.bf16 %v462_v38, %v458_v37  ;;  %v6182_v47 = vpack.c.bf16 %v464_v44, %v460_v43  ;;  %v226_v55 = vld [vmem:[%s7616_s3] sm:$0xf]  ;;  %v7687_v32 = vsel %vm6248_vm8, 4294967295, %v7686_v32  ;;  %vm6252_vm9 = vcmp.lt.s32.totalorder %v127_v11, 64 }
  0x3f   :  { %4391 = vmatpush1.bf16.msra.mxu0 %v6116_v39  ;;  %v231_v63 = vrot.slane %v226_v55, %v7625_v54  ;;  %v235_v6 = vrot.slane %v226_v55, %v7623_v57  ;;  %v239_v10 = vrot.slane %v226_v55, %v7624_v60  ;;  %v243_v24 = vrot.slane %v226_v55, %v7622_v5 }
  0x40   :  { %4423 = vmatpush1.bf16.msra.mxu1 %v6120_v40  ;;  %4393 = vmatprep.subr.bf16.mxu0 %v6122_v41  ;;  %7688 = vst [vmem:[#allocation9_spill] sm:$0xff] %v7687_v32  ;;  %v7689_v43 = vmov 0  ;;  %vm6256_vm10 = vcmp.lt.s32.totalorder %v134_v14, 64  ;;  %v7692_v44 = vmov 0 }
  0x41   :  { %4425 = vmatprep.subr.bf16.mxu1 %v6125_v45  ;;  %v7690_v43 = vsel %vm6252_vm9, 4294967295, %v7689_v43  ;;  %v7693_v44 = vsel %vm6256_vm10, 4294967295, %v7692_v44 }
  0x42   :  { %7691 = vst [vmem:[#allocation10_spill] sm:$0xff] %v7690_v43  ;;  %7694 = vst [vmem:[#allocation11_spill] sm:$0xff] %v7693_v44 }
  0x43   :  { %4395 = vmatpush1.bf16.msra.mxu0 %v6130_v51 }
  0x44   :  { %4427 = vmatpush1.bf16.msra.mxu1 %v6134_v52  ;;  %4397 = vmatprep.subr.bf16.mxu0 %v6136_v53 }
  0x45   :  { %4429 = vmatprep.subr.bf16.mxu1 %v6139_v58 }
  0x47   :  { %4399 = vmatpush1.bf16.msra.mxu0 %v6142_v1 }
  0x48   :  { %4431 = vmatpush1.bf16.msra.mxu1 %v6146_v3  ;;  %4401 = vmatprep.subr.bf16.mxu0 %v6148_v4 }
  0x49   :  { %4433 = vmatprep.subr.bf16.mxu1 %v6151_v8 }
  0x4b   :  { %4403 = vmatpush1.bf16.msra.mxu0 %v6154_v16 }
  0x4c   :  { %4435 = vmatpush1.bf16.msra.mxu1 %v6158_v17  ;;  %4405 = vmatprep.subr.bf16.mxu0 %v6160_v18 }
  0x4d   :  { %4437 = vmatprep.subr.bf16.mxu1 %v6163_v25 }
  0x4f   :  { %4407 = vmatpush1.bf16.msra.mxu0 %v6166_v34 }
  0x50   :  { %4439 = vmatpush1.bf16.msra.mxu1 %v6170_v35  ;;  %4409 = vmatprep.subr.bf16.mxu0 %v6172_v36 }
  0x51   :  { %4441 = vmatprep.subr.bf16.mxu1 %v6175_v42 }
  0x53   :  { %4411 = vmatpush1.bf16.msra.mxu0 %v6178_v46 }
  0x54   :  { %4443 = vmatpush1.bf16.msra.mxu1 %v6182_v47  ;;  %4445 = vmatprep.subr.bf16.mxu0 %v6074_v56 }
  0x55   :  { %4477 = vmatprep.subr.bf16.mxu1 %v6082_v2 }
  0x56   :  { %587 = vmatmul.mubr.f32.vlgmr.msra.gmra.mrb[4].mxu0 %v7626_v0 }
  0x57   :  { %658 = vmatmul.mubr.f32.vlgmr.msra.gmra.mrb[4].mxu1 %v7626_v0  ;;  %4447 = vmatpush1.bf16.msra.mxu0 %v6087_v12 }
  0x58   :  { %4479 = vmatpush1.bf16.msra.mxu1 %v6090_v13  ;;  %4449 = vmatprep.subr.bf16.mxu0 %v6096_v19 }
  0x59   :  { %4481 = vmatprep.subr.bf16.mxu1 %v6098_v21  ;;  %761 = vmatprep.mubr.f32.mxu0 %v7626_v0 }
  0x5a   :  { %832 = vmatprep.mubr.f32.mxu1 %v7626_v0 }
  0x5b   :  { %4451 = vmatpush1.bf16.msra.mxu0 %v6102_v27 }
  0x5c   :  { %4483 = vmatpush1.bf16.msra.mxu1 %v6106_v28  ;;  %4453 = vmatprep.subr.bf16.mxu0 %v6108_v29 }
  0x5d   :  { %4485 = vmatprep.subr.bf16.mxu1 %v6112_v33 }
  0x5f   :  { %4455 = vmatpush1.bf16.msra.mxu0 %v6116_v39 }
  0x60   :  { %4487 = vmatpush1.bf16.msra.mxu1 %v6120_v40  ;;  %4457 = vmatprep.subr.bf16.mxu0 %v6122_v41 }
  0x61   :  { %4489 = vmatprep.subr.bf16.mxu1 %v6125_v45 }
  0x63   :  { %4459 = vmatpush1.bf16.msra.mxu0 %v6130_v51 }
  0x64   :  { %4491 = vmatpush1.bf16.msra.mxu1 %v6134_v52  ;;  %4461 = vmatprep.subr.bf16.mxu0 %v6136_v53 }
  0x65   :  { %4493 = vmatprep.subr.bf16.mxu1 %v6139_v58 }
  0x67   :  { %4463 = vmatpush1.bf16.msra.mxu0 %v6142_v1 }
  0x68   :  { %4495 = vmatpush1.bf16.msra.mxu1 %v6146_v3  ;;  %4465 = vmatprep.subr.bf16.mxu0 %v6148_v4 }
  0x69   :  { %4497 = vmatprep.subr.bf16.mxu1 %v6151_v8 }
  0x6b   :  { %4467 = vmatpush1.bf16.msra.mxu0 %v6154_v16 }
  0x6c   :  { %4499 = vmatpush1.bf16.msra.mxu1 %v6158_v17  ;;  %4469 = vmatprep.subr.bf16.mxu0 %v6160_v18 }
  0x6d   :  { %4501 = vmatprep.subr.bf16.mxu1 %v6163_v25 }
  0x6f   :  { %4471 = vmatpush1.bf16.msra.mxu0 %v6166_v34 }
  0x70   :  { %4503 = vmatpush1.bf16.msra.mxu1 %v6170_v35  ;;  %4473 = vmatprep.subr.bf16.mxu0 %v6172_v36 }
  0x71   :  { %4505 = vmatprep.subr.bf16.mxu1 %v6175_v42 }
  0x73   :  { %4475 = vmatpush1.bf16.msra.mxu0 %v6178_v46 }
  0x74   :  { %4507 = vmatpush1.bf16.msra.mxu1 %v6182_v47  ;;  %4509 = vmatprep.subr.bf16.mxu0 %v6074_v56 }
  0x75   :  { %4541 = vmatprep.subr.bf16.mxu1 %v6082_v2 }
 0x109   :  { %v314_v9 = vpop.f32.mrb[0].mxu0 }
 0x10a   :  { %v315_v15 = vadd.f32 %v314_v9, %v231_v63  ;;  %v316_v22 = vpop.f32.mrb[1].mxu0  ;;  %v391_v23 = vpop.f32.mrb[0].mxu1 }
 0x10b   :  { %v317_v26 = vadd.f32 %v316_v22, %v235_v6  ;;  %v392_v20 = vadd.f32 %v391_v23, %v239_v10  ;;  %v393_v30 = vpop.f32.mrb[1].mxu1 }
 0x10c   :  { %v394_v31 = vadd.f32 %v393_v30, %v243_v24  ;;  %v498_v37 = vrot.slane %v315_v15, 6  ;;  %v510_v55 = vrot.slane %v315_v15, 2 }
 0x10d   :  { %v320_v38 = vpop.f32.mrb[2].mxu0  ;;  %v500_v48 = vrot.slane %v392_v20, 6  ;;  %v499_v9 = vrot.slane %v317_v26, 6  ;;  %v512_v7 = vrot.slane %v392_v20, 2  ;;  %v511_v22 = vrot.slane %v317_v26, 2 }
 0x10e   :  { %v321_v59 = vadd.f32 %v320_v38, %v231_v63  ;;  %v322_v61 = vpop.f32.mrb[3].mxu0  ;;  %v397_v62 = vpop.f32.mrb[2].mxu1  ;;  %v501_v57 = vrot.slane %v394_v31, 6  ;;  %v513_v11 = vrot.slane %v394_v31, 2 }
 0x10f   :  { %v323_v23 = vadd.f32 %v322_v61, %v235_v6  ;;  %v398_v30 = vadd.f32 %v397_v62, %v239_v10  ;;  %v399_v5 = vpop.f32.mrb[3].mxu1 }
 0x110   :  { %v400_v60 = vadd.f32 %v399_v5, %v243_v24  ;;  %v470_v54 = vrot.slane %v321_v59, 6  ;;  %v482_v0 = vrot.slane %v321_v59, 2  ;;  %v6262_v14 = vsel %vm157_vm7, %v321_v59, %v498_v37 }
 0x111   :  { %v472_v49 = vrot.slane %v398_v30, 6  ;;  %v471_v2 = vrot.slane %v323_v23, 6  ;;  %v484_v63 = vrot.slane %v398_v30, 2  ;;  %v483_v38 = vrot.slane %v323_v23, 2 }
 0x112   :  { %v6266_v56 = vsel %vm157_vm7, %v315_v15, %v470_v54  ;;  %v473_v6 = vrot.slane %v400_v60, 6  ;;  %v6270_v10 = vsel %vm157_vm7, %v315_v15, %v482_v0  ;;  %v485_v5 = vrot.slane %v400_v60, 2 }
 0x113   :  { %v6274_v24 = vsel %vm6252_vm9, %v392_v20, %v472_v49  ;;  %v6278_v37 = vsel %vm6248_vm8, %v317_v26, %v471_v2  ;;  %v6282_v61 = vsel %vm6252_vm9, %v392_v20, %v484_v63  ;;  %v6286_v54 = vsel %vm6248_vm8, %v317_v26, %v483_v38 }
 0x114   :  { %v6290_v0 = vsel %vm6256_vm10, %v394_v31, %v473_v6  ;;  %v6294_v49 = vsel %vm6256_vm10, %v394_v31, %v485_v5  ;;  %v6298_v2 = vsel %vm6252_vm9, %v398_v30, %v500_v48  ;;  %v6302_v15 = vsel %vm6248_vm8, %v323_v23, %v499_v9 }
 0x115   :  { %7695 = vst [vmem:[#allocation12_spill] sm:$0xff] %v6298_v2  ;;  %7696 = vst [vmem:[#allocation13_spill] sm:$0xff] %v6302_v15  ;;  %v6306_v26 = vsel %vm6256_vm10, %v400_v60, %v501_v57  ;;  %v6310_v20 = vsel %vm157_vm7, %v321_v59, %v510_v55  ;;  %v6314_v31 = vsel %vm6252_vm9, %v398_v30, %v512_v7 }
 0x116   :  { %7697 = vst [vmem:[#allocation14_spill] sm:$0xff] %v6306_v26  ;;  %7698 = vst [vmem:[#allocation15_spill] sm:$0xff] %v6310_v20  ;;  %v6318_v48 = vsel %vm6248_vm8, %v323_v23, %v511_v22  ;;  %v6322_v62 = vsel %vm6256_vm10, %v400_v60, %v513_v11 }
 0x117   :  { %7699 = vst [vmem:[#allocation16_spill] sm:$0xff] %v6314_v31  ;;  %7700 = vst [vmem:[#allocation17_spill] sm:$0xff] %v6318_v48 }
 0x118   :  { %7701 = vst [vmem:[#allocation18_spill] sm:$0xff] %v6322_v62 }
 0x129   :  { %v588_v9 = vpop.f32.mrb[4].mxu0 }
 0x12a   :  { %v664_v57 = vadd.f32 %v588_v9, %v6266_v56  ;;  %v659_v63 = vpop.f32.mrb[4].mxu1  ;;  %v590_v38 = vpop.f32.mrb[5].mxu0 }
 0x12b   :  { %v665_v55 = vadd.f32 %v590_v38, %v6278_v37  ;;  %v661_v59 = vpop.f32.mrb[5].mxu1  ;;  %v666_v23 = vadd.f32 %v659_v63, %v6274_v24  ;;  %v6334_v63 = vld [vmem:[%s7614_s1] sm:$0x3] }
 0x12c   :  { %v4149_v6 = vmul.f32 -1.442695, %v664_v57  ;;  %v667_v7 = vadd.f32 %v661_v59, %v6290_v0 }
 0x12d   :  { %v4150_v5 = vmul.f32 -1.442695, %v665_v55 }
 0x12e   :  { %5504 = vpow2.f32 %v4149_v6  ;;  %v4151_v22 = vmul.f32 -1.442695, %v667_v7  ;;  %v97_v7 = vsub.f32 1.0, %v6334_v63 }
 0x12f   :  { %5506 = vpow2.f32 %v4150_v5 }
 0x130   :  { %5508 = vpow2.f32 %v4151_v22 }
 0x131   :  { %5510 = vtanh.f32 %v666_v23 }
 0x138   :  { %v5505_v30 = vpop.eup %5504 }
 0x139   :  { %v5507_v60 = vpop.eup %5506  ;;  %v671_v11 = vadd.f32 1.0, %v5505_v30  ;;  %v6337_v30 = vmul.f32 0.0, %v97_v7 }
 0x13a   :  { %v677_v9 = vadd.f32 1.0, %v5507_v60  ;;  %v5509_v44 = vpop.eup %5508  ;;  %v7704_v60 = vmov 0.0  }
 0x13b   :  { %5512 = vrcp.f32 %v671_v11  ;;  %v5511_v38 = vpop.eup %5510  ;;  %v684_v6 = vadd.f32 1.0, %v5509_v44  ;;  %7702 = vst [vmem:[#allocation19_spill] sm:$0xff] %v6337_v30  ;;  %v7705_v11 = vld [vmem:[#allocation5_spill] sm:$0xff] }
 0x13c   :  { %5514 = vrcp.f32 %v677_v9  ;;  %v7706_v9 = vld [vmem:[#allocation6_spill] sm:$0xff] }
 0x13d   :  { %5516 = vrcp.f32 %v684_v6 }
 0x145   :  { %v5513_v32 = vpop.eup %5512 }
 0x146   :  { %v5515_v57 = vpop.eup %5514  ;;  %v688_v55 = vmul.f32 %v5513_v32, %v5511_v38 }
 0x147   :  { %v687_v5 = vmul.f32 0.0, %v5515_v57  ;;  %v5517_v59 = vpop.eup %5516 }
 0x149   :  { %v6328_v43 = vadd.f32 %v688_v55, %v687_v5 }
 0x14b   :  { %5518 = vtanh.f32 %v6328_v43 }
 0x155   :  { %v5519_v22 = vpop.eup %5518 }
 0x156   :  { %v691_v23 = vmul.f32 %v5519_v22, %v5517_v59 }
 0x158   :  { %v6340_v32 = vmul.f32 %v691_v23, %v6334_v63 }
 0x15a   :  { %7703 = vst [vmem:[#allocation20_spill] sm:$0xff] %v6340_v32  ;;  %v6344_v44 = vadd.f32 %v6337_v30, %v6340_v32 }
 0x15c   :  { %762 = vmatmul.mubr.f32.vlgmr.msra.gmra.mrb[6].mxu0 %v6344_v44  ;;  %833 = vmatmul.mubr.f32.vlgmr.msra.gmra.mrb[6].mxu1 %v6344_v44 }
 0x15d   :  { %4511 = vmatpush1.bf16.msra.mxu0 %v6087_v12  ;;  %4543 = vmatpush1.bf16.msra.mxu1 %v6090_v13 }
 0x15e   :  { %4513 = vmatprep.subr.bf16.mxu0 %v6096_v19  ;;  %4545 = vmatprep.subr.bf16.mxu1 %v6098_v21 }
 0x15f   :  { %958 = vmatprep.mubr.f32.mxu0 %v7704_v60  ;;  %1029 = vmatprep.mubr.f32.mxu1 %v7704_v60 }
 0x161   :  { %4515 = vmatpush1.bf16.msra.mxu0 %v6102_v27  ;;  %4547 = vmatpush1.bf16.msra.mxu1 %v6106_v28 }
 0x162   :  { %4517 = vmatprep.subr.bf16.mxu0 %v6108_v29  ;;  %4549 = vmatprep.subr.bf16.mxu1 %v6112_v33 }
 0x165   :  { %4519 = vmatpush1.bf16.msra.mxu0 %v6116_v39  ;;  %4551 = vmatpush1.bf16.msra.mxu1 %v6120_v40 }
 0x166   :  { %4521 = vmatprep.subr.bf16.mxu0 %v6122_v41  ;;  %4553 = vmatprep.subr.bf16.mxu1 %v6125_v45 }
 0x169   :  { %4523 = vmatpush1.bf16.msra.mxu0 %v6130_v51  ;;  %4555 = vmatpush1.bf16.msra.mxu1 %v6134_v52 }
 0x16a   :  { %4525 = vmatprep.subr.bf16.mxu0 %v6136_v53  ;;  %4557 = vmatprep.subr.bf16.mxu1 %v6139_v58 }
 0x16d   :  { %4527 = vmatpush1.bf16.msra.mxu0 %v6142_v1  ;;  %4559 = vmatpush1.bf16.msra.mxu1 %v6146_v3 }
 0x16e   :  { %4529 = vmatprep.subr.bf16.mxu0 %v6148_v4  ;;  %4561 = vmatprep.subr.bf16.mxu1 %v6151_v8 }
 0x171   :  { %4531 = vmatpush1.bf16.msra.mxu0 %v6154_v16  ;;  %4563 = vmatpush1.bf16.msra.mxu1 %v6158_v17 }
 0x172   :  { %4533 = vmatprep.subr.bf16.mxu0 %v6160_v18  ;;  %4565 = vmatprep.subr.bf16.mxu1 %v6163_v25 }
 0x175   :  { %4535 = vmatpush1.bf16.msra.mxu0 %v6166_v34  ;;  %4567 = vmatpush1.bf16.msra.mxu1 %v6170_v35 }
 0x176   :  { %4537 = vmatprep.subr.bf16.mxu0 %v6172_v36  ;;  %4569 = vmatprep.subr.bf16.mxu1 %v6175_v42 }
 0x179   :  { %4539 = vmatpush1.bf16.msra.mxu0 %v6178_v46  ;;  %4571 = vmatpush1.bf16.msra.mxu1 %v6182_v47 }
 0x17a   :  { %4573 = vmatprep.subr.bf16.mxu0 %v7705_v11  ;;  %4605 = vmatprep.subr.bf16.mxu1 %v7706_v9 }
 0x22f   :  { %v763_v38 = vpop.f32.mrb[6].mxu0  ;;  %v834_v57 = vpop.f32.mrb[6].mxu1 }
 0x230   :  { %v843_v55 = vrot.slane %v763_v38, 6  ;;  %v765_v6 = vpop.f32.mrb[7].mxu0  ;;  %v836_v5 = vpop.f32.mrb[7].mxu1  ;;  %v845_v62 = vrot.slane %v834_v57, 6 }
 0x231   :  { %v844_v59 = vrot.slane %v765_v6, 6  ;;  %v846_v50 = vrot.slane %v836_v5, 6 }
 0x232   :  { %v851_v7 = vadd.f32 %v843_v55, %v6270_v10  ;;  %v853_v20 = vadd.f32 %v845_v62, %v6282_v61  ;;  %v695_v55 = vmul.f32 %v6328_v43, %v6334_v63  ;;  %v90_v62 = vld [vmem:[%s7614_s1 + $0x2] sm:$0x3] }
 0x233   :  { %v852_v22 = vadd.f32 %v844_v59, %v6286_v54  ;;  %v854_v31 = vadd.f32 %v846_v50, %v6294_v49 }
 0x234   :  { %v4152_v23 = vmul.f32 -1.442695, %v851_v7  ;;  %v696_v5 = vadd.f32 %v695_v55, %v6337_v30  ;;  %v6392_v7 = vsub.f32 1.0, %v90_v62 }
 0x235   :  { %v4153_v32 = vmul.f32 -1.442695, %v852_v22  ;;  %v4154_v48 = vmul.f32 -1.442695, %v854_v31 }
 0x236   :  { %5520 = vpow2.f32 %v4152_v23  ;;  %v875_v57 = vrot.slane %v696_v5, 6  ;;  %7707 = vst [vmem:[#allocation5_spill] sm:$0xff] %v6392_v7  ;;  %v892_v63 = vmul.f32 %v696_v5, %v6392_v7 }
 0x237   :  { %5522 = vpow2.f32 %v4153_v32 }
 0x238   :  { %5524 = vpow2.f32 %v4154_v48 }
 0x239   :  { %5526 = vtanh.f32 %v853_v20 }
 0x240   :  { %v5521_v2 = vpop.eup %5520 }
 0x241   :  { %v5523_v38 = vpop.eup %5522  ;;  %v858_v26 = vadd.f32 1.0, %v5521_v2 }
 0x242   :  { %v864_v6 = vadd.f32 1.0, %v5523_v38  ;;  %v5525_v32 = vpop.eup %5524 }
 0x243   :  { %5528 = vrcp.f32 %v858_v26  ;;  %v5527_v59 = vpop.eup %5526  ;;  %v871_v48 = vadd.f32 1.0, %v5525_v32  ;;  %v886_v32 = vmul.f32 %v6344_v44, %v6392_v7 }
 0x244   :  { %5530 = vrcp.f32 %v864_v6 }
 0x245   :  { %5532 = vrcp.f32 %v871_v48 }
 0x24d   :  { %v5529_v50 = vpop.eup %5528 }
 0x24e   :  { %v5531_v31 = vpop.eup %5530  ;;  %v878_v2 = vmul.f32 %v5529_v50, %v5527_v59 }
 0x24f   :  { %v877_v20 = vmul.f32 %v5531_v31, %v875_v57  ;;  %v5533_v38 = vpop.eup %5532 }
 0x251   :  { %v879_v26 = vadd.f32 %v878_v2, %v877_v20 }
 0x253   :  { %5534 = vtanh.f32 %v879_v26  ;;  %v889_v43 = vrot.slane %v879_v26, 2 }
 0x255   :  { %v891_v22 = vmul.f32 %v889_v43, %v90_v62 }
 0x257   :  { %v6395_v23 = vadd.f32 %v892_v63, %v891_v22 }
 0x25d   :  { %v5535_v6 = vpop.eup %5534 }
 0x25e   :  { %v881_v55 = vmul.f32 %v5535_v6, %v5533_v38 }
 0x260   :  { %v883_v30 = vrot.slane %v881_v55, 2 }
 0x262   :  { %v6397_v15 = vmul.f32 %v883_v30, %v90_v62 }
 0x264   :  { %7708 = vst [vmem:[#allocation6_spill] sm:$0xff] %v6397_v15  ;;  %v6402_v59 = vadd.f32 %v886_v32, %v6397_v15 }
 0x266   :  { %959 = vmatmul.mubr.f32.vlgmr.msra.gmra.mrb[8].mxu0 %v6402_v59  ;;  %1030 = vmatmul.mubr.f32.vlgmr.msra.gmra.mrb[8].mxu1 %v6402_v59 }
 0x267   :  { %4575 = vmatpush1.bf16.msra.mxu0 %v6087_v12  ;;  %4607 = vmatpush1.bf16.msra.mxu1 %v6090_v13 }
 0x268   :  { %4577 = vmatprep.subr.bf16.mxu0 %v6096_v19  ;;  %4609 = vmatprep.subr.bf16.mxu1 %v6098_v21 }
 0x269   :  { %1155 = vmatprep.mubr.f32.mxu0 %v7704_v60  ;;  %1226 = vmatprep.mubr.f32.mxu1 %v7704_v60 }
 0x26b   :  { %4579 = vmatpush1.bf16.msra.mxu0 %v6102_v27  ;;  %4611 = vmatpush1.bf16.msra.mxu1 %v6106_v28 }
 0x26c   :  { %4581 = vmatprep.subr.bf16.mxu0 %v6108_v29  ;;  %4613 = vmatprep.subr.bf16.mxu1 %v6112_v33 }
 0x26f   :  { %4583 = vmatpush1.bf16.msra.mxu0 %v6116_v39  ;;  %4615 = vmatpush1.bf16.msra.mxu1 %v6120_v40 }
 0x270   :  { %4585 = vmatprep.subr.bf16.mxu0 %v6122_v41  ;;  %4617 = vmatprep.subr.bf16.mxu1 %v6125_v45 }
 0x273   :  { %4587 = vmatpush1.bf16.msra.mxu0 %v6130_v51  ;;  %4619 = vmatpush1.bf16.msra.mxu1 %v6134_v52 }
 0x274   :  { %4589 = vmatprep.subr.bf16.mxu0 %v6136_v53  ;;  %4621 = vmatprep.subr.bf16.mxu1 %v6139_v58 }
 0x277   :  { %4591 = vmatpush1.bf16.msra.mxu0 %v6142_v1  ;;  %4623 = vmatpush1.bf16.msra.mxu1 %v6146_v3 }
 0x278   :  { %4593 = vmatprep.subr.bf16.mxu0 %v6148_v4  ;;  %4625 = vmatprep.subr.bf16.mxu1 %v6151_v8 }
 0x27b   :  { %4595 = vmatpush1.bf16.msra.mxu0 %v6154_v16  ;;  %4627 = vmatpush1.bf16.msra.mxu1 %v6158_v17 }
 0x27c   :  { %4597 = vmatprep.subr.bf16.mxu0 %v6160_v18  ;;  %4629 = vmatprep.subr.bf16.mxu1 %v6163_v25 }
 0x27f   :  { %4599 = vmatpush1.bf16.msra.mxu0 %v6166_v34  ;;  %4631 = vmatpush1.bf16.msra.mxu1 %v6170_v35 }
 0x280   :  { %4601 = vmatprep.subr.bf16.mxu0 %v6172_v36  ;;  %4633 = vmatprep.subr.bf16.mxu1 %v6175_v42 }
 0x283   :  { %4603 = vmatpush1.bf16.msra.mxu0 %v6178_v46  ;;  %4635 = vmatpush1.bf16.msra.mxu1 %v6182_v47 }
 0x284   :  { %4637 = vmatprep.subr.bf16.mxu0 %v7705_v11  ;;  %4669 = vmatprep.subr.bf16.mxu1 %v7706_v9 }
 0x339   :  { %v960_v30 = vpop.f32.mrb[8].mxu0  ;;  %v1031_v44 = vpop.f32.mrb[8].mxu1 }
 0x33a   :  { %v1040_v5 = vrot.slane %v960_v30, 4  ;;  %v962_v50 = vpop.f32.mrb[9].mxu0  ;;  %v1033_v57 = vpop.f32.mrb[9].mxu1  ;;  %v1042_v63 = vrot.slane %v1031_v44, 4 }
 0x33b   :  { %v1041_v31 = vrot.slane %v962_v50, 4  ;;  %v1043_v26 = vrot.slane %v1033_v57, 4  ;;  %v1072_v50 = vrot.slane %v6395_v23, 4 }
 0x33c   :  { %v1048_v62 = vadd.f32 %v1040_v5, %v6266_v56  ;;  %v1050_v38 = vadd.f32 %v1042_v63, %v6274_v24  ;;  %v91_v24 = vld [vmem:[%s7614_s1 + $0x4] sm:$0x3] }
 0x33d   :  { %v1049_v2 = vadd.f32 %v1041_v31, %v6278_v37  ;;  %v1051_v43 = vadd.f32 %v1043_v26, %v6290_v0 }
 0x33e   :  { %v4155_v48 = vmul.f32 -1.442695, %v1048_v62 }
 0x33f   :  { %v4156_v20 = vmul.f32 -1.442695, %v1049_v2  ;;  %v4157_v22 = vmul.f32 -1.442695, %v1051_v43  ;;  %v6448_v2 = vsub.f32 1.0, %v91_v24 }
 0x340   :  { %5536 = vpow2.f32 %v4155_v48 }
 0x341   :  { %5538 = vpow2.f32 %v4156_v20  ;;  %7709 = vst [vmem:[#allocation21_spill] sm:$0xff] %v6448_v2  ;;  %v1089_v26 = vmul.f32 %v6395_v23, %v6448_v2 }
 0x342   :  { %5540 = vpow2.f32 %v4157_v22 }
 0x343   :  { %5542 = vtanh.f32 %v1050_v38 }
 0x34a   :  { %v5537_v6 = vpop.eup %5536 }
 0x34b   :  { %v5539_v55 = vpop.eup %5538  ;;  %v1055_v32 = vadd.f32 1.0, %v5537_v6 }
 0x34c   :  { %v1061_v30 = vadd.f32 1.0, %v5539_v55  ;;  %v5541_v56 = vpop.eup %5540 }
 0x34d   :  { %5544 = vrcp.f32 %v1055_v32  ;;  %v5543_v37 = vpop.eup %5542  ;;  %v1068_v0 = vadd.f32 1.0, %v5541_v56  ;;  %v1083_v32 = vmul.f32 %v6402_v59, %v6448_v2 }
 0x34e   :  { %5546 = vrcp.f32 %v1061_v30 }
 0x34f   :  { %5548 = vrcp.f32 %v1068_v0 }
 0x357   :  { %v5545_v5 = vpop.eup %5544 }
 0x358   :  { %v5547_v57 = vpop.eup %5546  ;;  %v1075_v31 = vmul.f32 %v5545_v5, %v5543_v37 }
 0x359   :  { %v1074_v44 = vmul.f32 %v5547_v57, %v1072_v50  ;;  %v5549_v63 = vpop.eup %5548 }
 0x35b   :  { %v1076_v62 = vadd.f32 %v1075_v31, %v1074_v44 }
 0x35d   :  { %5550 = vtanh.f32 %v1076_v62  ;;  %v1086_v48 = vrot.slane %v1076_v62, 4 }
 0x35f   :  { %v1088_v20 = vmul.f32 %v1086_v48, %v91_v24 }
 0x361   :  { %v6452_v43 = vadd.f32 %v1089_v26, %v1088_v20 }
 0x367   :  { %v5551_v22 = vpop.eup %5550 }
 0x368   :  { %v1078_v38 = vmul.f32 %v5551_v22, %v5549_v63 }
 0x36a   :  { %v1080_v6 = vrot.slane %v1078_v38, 4 }
 0x36c   :  { %v6454_v55 = vmul.f32 %v1080_v6, %v91_v24 }
 0x36e   :  { %v6459_v30 = vadd.f32 %v1083_v32, %v6454_v55 }
 0x370   :  { %1156 = vmatmul.mubr.f32.vlgmr.msra.gmra.mrb[10].mxu0 %v6459_v30  ;;  %1227 = vmatmul.mubr.f32.vlgmr.msra.gmra.mrb[10].mxu1 %v6459_v30 }
 0x371   :  { %4639 = vmatpush1.bf16.msra.mxu0 %v6087_v12  ;;  %4671 = vmatpush1.bf16.msra.mxu1 %v6090_v13 }
 0x372   :  { %4641 = vmatprep.subr.bf16.mxu0 %v6096_v19  ;;  %4673 = vmatprep.subr.bf16.mxu1 %v6098_v21 }
 0x373   :  { %1352 = vmatprep.mubr.f32.mxu0 %v7704_v60  ;;  %1423 = vmatprep.mubr.f32.mxu1 %v7704_v60 }
 0x375   :  { %4643 = vmatpush1.bf16.msra.mxu0 %v6102_v27  ;;  %4675 = vmatpush1.bf16.msra.mxu1 %v6106_v28 }
 0x376   :  { %4645 = vmatprep.subr.bf16.mxu0 %v6108_v29  ;;  %4677 = vmatprep.subr.bf16.mxu1 %v6112_v33 }
 0x379   :  { %4647 = vmatpush1.bf16.msra.mxu0 %v6116_v39  ;;  %4679 = vmatpush1.bf16.msra.mxu1 %v6120_v40 }
 0x37a   :  { %4649 = vmatprep.subr.bf16.mxu0 %v6122_v41  ;;  %4681 = vmatprep.subr.bf16.mxu1 %v6125_v45 }
 0x37d   :  { %4651 = vmatpush1.bf16.msra.mxu0 %v6130_v51  ;;  %4683 = vmatpush1.bf16.msra.mxu1 %v6134_v52 }
 0x37e   :  { %4653 = vmatprep.subr.bf16.mxu0 %v6136_v53  ;;  %4685 = vmatprep.subr.bf16.mxu1 %v6139_v58 }
 0x381   :  { %4655 = vmatpush1.bf16.msra.mxu0 %v6142_v1  ;;  %4687 = vmatpush1.bf16.msra.mxu1 %v6146_v3 }
 0x382   :  { %4657 = vmatprep.subr.bf16.mxu0 %v6148_v4  ;;  %4689 = vmatprep.subr.bf16.mxu1 %v6151_v8 }
 0x385   :  { %4659 = vmatpush1.bf16.msra.mxu0 %v6154_v16  ;;  %4691 = vmatpush1.bf16.msra.mxu1 %v6158_v17 }
 0x386   :  { %4661 = vmatprep.subr.bf16.mxu0 %v6160_v18  ;;  %4693 = vmatprep.subr.bf16.mxu1 %v6163_v25 }
 0x389   :  { %4663 = vmatpush1.bf16.msra.mxu0 %v6166_v34  ;;  %4695 = vmatpush1.bf16.msra.mxu1 %v6170_v35 }
 0x38a   :  { %4665 = vmatprep.subr.bf16.mxu0 %v6172_v36  ;;  %4697 = vmatprep.subr.bf16.mxu1 %v6175_v42 }
 0x38d   :  { %4667 = vmatpush1.bf16.msra.mxu0 %v6178_v46  ;;  %4699 = vmatpush1.bf16.msra.mxu1 %v6182_v47 }
 0x38e   :  { %4701 = vmatprep.subr.bf16.mxu0 %v7705_v11  ;;  %4733 = vmatprep.subr.bf16.mxu1 %v7706_v9 }
 0x443   :  { %v1157_v23 = vpop.f32.mrb[10].mxu0  ;;  %v1228_v59 = vpop.f32.mrb[10].mxu1 }
 0x444   :  { %v1237_v56 = vrot.slane %v1157_v23, 2  ;;  %v1159_v37 = vpop.f32.mrb[11].mxu0  ;;  %v1230_v5 = vpop.f32.mrb[11].mxu1  ;;  %v1239_v48 = vrot.slane %v1228_v59, 2  ;;  %v1269_v23 = vrot.slane %v6452_v43, 2 }
 0x445   :  { %v1238_v50 = vrot.slane %v1159_v37, 2  ;;  %v1240_v44 = vrot.slane %v1230_v5, 2 }
 0x446   :  { %v1245_v57 = vadd.f32 %v1237_v56, %v6270_v10  ;;  %v1247_v26 = vadd.f32 %v1239_v48, %v6282_v61  ;;  %v92_v61 = vld [vmem:[%s7614_s1 + $0x6] sm:$0x3] }
 0x447   :  { %v1246_v31 = vadd.f32 %v1238_v50, %v6286_v54  ;;  %v1248_v62 = vadd.f32 %v1240_v44, %v6294_v49  ;;  %v6505_v50 = vsub.f32 1.0, %v92_v61 }
 0x448   :  { %v4158_v0 = vmul.f32 -1.442695, %v1245_v57 }
 0x449   :  { %v4159_v24 = vmul.f32 -1.442695, %v1246_v31  ;;  %v4160_v20 = vmul.f32 -1.442695, %v1248_v62  ;;  %7710 = vst [vmem:[#allocation22_spill] sm:$0xff] %v6505_v50 }
 0x44a   :  { %5552 = vpow2.f32 %v4158_v0  ;;  %v1286_v0 = vmul.f32 %v6452_v43, %v6505_v50 }
 0x44b   :  { %5554 = vpow2.f32 %v4159_v24 }
 0x44c   :  { %5556 = vpow2.f32 %v4160_v20 }
 0x44d   :  { %5558 = vtanh.f32 %v1247_v26 }
 0x454   :  { %v5553_v63 = vpop.eup %5552 }
 0x455   :  { %v5555_v22 = vpop.eup %5554  ;;  %v1252_v38 = vadd.f32 1.0, %v5553_v63  ;;  %v1280_v63 = vmul.f32 %v6459_v30, %v6505_v50 }
 0x456   :  { %v1258_v6 = vadd.f32 1.0, %v5555_v22  ;;  %v5557_v10 = vpop.eup %5556 }
 0x457   :  { %5560 = vrcp.f32 %v1252_v38  ;;  %v5559_v54 = vpop.eup %5558  ;;  %v1265_v49 = vadd.f32 1.0, %v5557_v10 }
 0x458   :  { %5562 = vrcp.f32 %v1258_v6 }
 0x459   :  { %5564 = vrcp.f32 %v1265_v49 }
 0x461   :  { %v5561_v32 = vpop.eup %5560 }
 0x462   :  { %v5563_v56 = vpop.eup %5562  ;;  %v1272_v37 = vmul.f32 %v5561_v32, %v5559_v54  ;;  %v7711_v54 = vld [vmem:[#allocation13_spill] sm:$0xff] }
 0x463   :  { %v1271_v59 = vmul.f32 %v5563_v56, %v1269_v23  ;;  %v5565_v44 = vpop.eup %5564 }
 0x465   :  { %v1273_v5 = vadd.f32 %v1272_v37, %v1271_v59  ;;  %v7712_v37 = vld [vmem:[#allocation14_spill] sm:$0xff]  ;;  %v7713_v59 = vld [vmem:[#allocation12_spill] sm:$0xff] }
 0x467   :  { %5566 = vtanh.f32 %v1273_v5  ;;  %v1283_v57 = vrot.slane %v1273_v5, 6 }
 0x469   :  { %v1285_v31 = vmul.f32 %v1283_v57, %v92_v61 }
 0x46b   :  { %v6509_v24 = vadd.f32 %v1286_v0, %v1285_v31 }
 0x471   :  { %v5567_v62 = vpop.eup %5566 }
 0x472   :  { %v1275_v48 = vmul.f32 %v5567_v62, %v5565_v44 }
 0x474   :  { %v1277_v20 = vrot.slane %v1275_v48, 6 }
 0x476   :  { %v6511_v26 = vmul.f32 %v1277_v20, %v92_v61 }
 0x478   :  { %v6516_v22 = vadd.f32 %v1280_v63, %v6511_v26 }
 0x47a   :  { %1353 = vmatmul.mubr.f32.vlgmr.msra.gmra.mrb[12].mxu0 %v6516_v22  ;;  %1424 = vmatmul.mubr.f32.vlgmr.msra.gmra.mrb[12].mxu1 %v6516_v22 }
 0x47b   :  { %4703 = vmatpush1.bf16.msra.mxu0 %v6087_v12  ;;  %4735 = vmatpush1.bf16.msra.mxu1 %v6090_v13 }
 0x47c   :  { %4705 = vmatprep.subr.bf16.mxu0 %v6096_v19  ;;  %4737 = vmatprep.subr.bf16.mxu1 %v6098_v21 }
 0x47d   :  { %1528 = vmatprep.mubr.f32.mxu0 %v7704_v60  ;;  %1599 = vmatprep.mubr.f32.mxu1 %v7704_v60 }
 0x47f   :  { %4707 = vmatpush1.bf16.msra.mxu0 %v6102_v27  ;;  %4739 = vmatpush1.bf16.msra.mxu1 %v6106_v28 }
 0x480   :  { %4709 = vmatprep.subr.bf16.mxu0 %v6108_v29  ;;  %4741 = vmatprep.subr.bf16.mxu1 %v6112_v33 }
 0x483   :  { %4711 = vmatpush1.bf16.msra.mxu0 %v6116_v39  ;;  %4743 = vmatpush1.bf16.msra.mxu1 %v6120_v40 }
 0x484   :  { %4713 = vmatprep.subr.bf16.mxu0 %v6122_v41  ;;  %4745 = vmatprep.subr.bf16.mxu1 %v6125_v45 }
 0x487   :  { %4715 = vmatpush1.bf16.msra.mxu0 %v6130_v51  ;;  %4747 = vmatpush1.bf16.msra.mxu1 %v6134_v52 }
 0x488   :  { %4717 = vmatprep.subr.bf16.mxu0 %v6136_v53  ;;  %4749 = vmatprep.subr.bf16.mxu1 %v6139_v58 }
 0x48b   :  { %4719 = vmatpush1.bf16.msra.mxu0 %v6142_v1  ;;  %4751 = vmatpush1.bf16.msra.mxu1 %v6146_v3 }
 0x48c   :  { %4721 = vmatprep.subr.bf16.mxu0 %v6148_v4  ;;  %4753 = vmatprep.subr.bf16.mxu1 %v6151_v8 }
 0x48f   :  { %4723 = vmatpush1.bf16.msra.mxu0 %v6154_v16  ;;  %4755 = vmatpush1.bf16.msra.mxu1 %v6158_v17 }
 0x490   :  { %4725 = vmatprep.subr.bf16.mxu0 %v6160_v18  ;;  %4757 = vmatprep.subr.bf16.mxu1 %v6163_v25 }
 0x493   :  { %4727 = vmatpush1.bf16.msra.mxu0 %v6166_v34  ;;  %4759 = vmatpush1.bf16.msra.mxu1 %v6170_v35 }
 0x494   :  { %4729 = vmatprep.subr.bf16.mxu0 %v6172_v36  ;;  %4761 = vmatprep.subr.bf16.mxu1 %v6175_v42 }
 0x497   :  { %4731 = vmatpush1.bf16.msra.mxu0 %v6178_v46  ;;  %4763 = vmatpush1.bf16.msra.mxu1 %v6182_v47 }
 0x498   :  { %4765 = vmatprep.subr.bf16.mxu0 %v7705_v11  ;;  %4797 = vmatprep.subr.bf16.mxu1 %v7706_v9 }
 0x54d   :  { %v1354_v43 = vpop.f32.mrb[12].mxu0  ;;  %v1425_v30 = vpop.f32.mrb[12].mxu1 }
 0x54e   :  { %v1430_v38 = vadd.f32 %v1354_v43, %v6262_v14  ;;  %v1356_v6 = vpop.f32.mrb[13].mxu0  ;;  %v1427_v10 = vpop.f32.mrb[13].mxu1  ;;  %v1432_v5 = vadd.f32 %v1425_v30, %v7713_v59  ;;  %v6565_v30 = vld [vmem:[%s7614_s1 + $0x8] sm:$0x3] }
 0x54f   :  { %v1431_v32 = vadd.f32 %v1356_v6, %v7711_v54  ;;  %v1433_v49 = vadd.f32 %v1427_v10, %v7712_v37 }
 0x550   :  { %v4161_v23 = vmul.f32 -1.442695, %v1430_v38 }
 0x551   :  { %v4162_v56 = vmul.f32 -1.442695, %v1431_v32  ;;  %v4163_v61 = vmul.f32 -1.442695, %v1433_v49 }
 0x552   :  { %5568 = vpow2.f32 %v4161_v23 }
 0x553   :  { %5570 = vpow2.f32 %v4162_v56  ;;  %v6568_v56 = vsub.f32 1.0, %v6565_v30 }
 0x554   :  { %5572 = vpow2.f32 %v4163_v61 }
 0x555   :  { %5574 = vtanh.f32 %v1432_v5  ;;  %7714 = vst [vmem:[#allocation13_spill] sm:$0xff] %v6568_v56  ;;  %v1459_v5 = vmul.f32 %v6516_v22, %v6568_v56 }
 0x55c   :  { %v5569_v57 = vpop.eup %5568 }
 0x55d   :  { %v5571_v31 = vpop.eup %5570  ;;  %v1437_v0 = vadd.f32 1.0, %v5569_v57 }
 0x55e   :  { %v1443_v44 = vadd.f32 1.0, %v5571_v31  ;;  %v5573_v62 = vpop.eup %5572 }
 0x55f   :  { %5576 = vrcp.f32 %v1437_v0  ;;  %v5575_v48 = vpop.eup %5574  ;;  %v1450_v38 = vadd.f32 1.0, %v5573_v62 }
 0x560   :  { %5578 = vrcp.f32 %v1443_v44 }
 0x561   :  { %5580 = vrcp.f32 %v1450_v38 }
 0x569   :  { %v5577_v20 = vpop.eup %5576 }
 0x56a   :  { %v5579_v63 = vpop.eup %5578  ;;  %v1454_v43 = vmul.f32 %v5577_v20, %v5575_v48  ;;  %v7715_v20 = vld [vmem:[#allocation15_spill] sm:$0xff] }
 0x56b   :  { %v1453_v6 = vmul.f32 %v5579_v63, %v6509_v24  ;;  %v5581_v32 = vpop.eup %5580 }
 0x56d   :  { %v6559_v10 = vadd.f32 %v1454_v43, %v1453_v6  ;;  %v7716_v43 = vld [vmem:[#allocation17_spill] sm:$0xff] }
 0x56f   :  { %5582 = vtanh.f32 %v6559_v10 }
 0x579   :  { %v5583_v23 = vpop.eup %5582 }
 0x57a   :  { %v1457_v49 = vmul.f32 %v5583_v23, %v5581_v32 }
 0x57c   :  { %v6571_v61 = vmul.f32 %v1457_v49, %v6565_v30  ;;  %v7717_v49 = vld [vmem:[#allocation18_spill] sm:$0xff] }
 0x57e   :  { %v6576_v57 = vadd.f32 %v1459_v5, %v6571_v61 }
 0x580   :  { %1529 = vmatmul.mubr.f32.vlgmr.msra.gmra.mrb[14].mxu0 %v6576_v57  ;;  %1600 = vmatmul.mubr.f32.vlgmr.msra.gmra.mrb[14].mxu1 %v6576_v57 }
 0x581   :  { %4767 = vmatpush1.bf16.msra.mxu0 %v6087_v12  ;;  %4799 = vmatpush1.bf16.msra.mxu1 %v6090_v13 }
 0x582   :  { %4769 = vmatprep.subr.bf16.mxu0 %v6096_v19  ;;  %4801 = vmatprep.subr.bf16.mxu1 %v6098_v21 }
 0x583   :  { %1725 = vmatprep.mubr.f32.mxu0 %v7704_v60  ;;  %1796 = vmatprep.mubr.f32.mxu1 %v7704_v60 }
 0x585   :  { %4771 = vmatpush1.bf16.msra.mxu0 %v6102_v27  ;;  %4803 = vmatpush1.bf16.msra.mxu1 %v6106_v28 }
 0x586   :  { %4773 = vmatprep.subr.bf16.mxu0 %v6108_v29  ;;  %4805 = vmatprep.subr.bf16.mxu1 %v6112_v33 }
 0x589   :  { %4775 = vmatpush1.bf16.msra.mxu0 %v6116_v39  ;;  %4807 = vmatpush1.bf16.msra.mxu1 %v6120_v40 }
 0x58a   :  { %4777 = vmatprep.subr.bf16.mxu0 %v6122_v41  ;;  %4809 = vmatprep.subr.bf16.mxu1 %v6125_v45 }
 0x58d   :  { %4779 = vmatpush1.bf16.msra.mxu0 %v6130_v51  ;;  %4811 = vmatpush1.bf16.msra.mxu1 %v6134_v52 }
 0x58e   :  { %4781 = vmatprep.subr.bf16.mxu0 %v6136_v53  ;;  %4813 = vmatprep.subr.bf16.mxu1 %v6139_v58 }
 0x591   :  { %4783 = vmatpush1.bf16.msra.mxu0 %v6142_v1  ;;  %4815 = vmatpush1.bf16.msra.mxu1 %v6146_v3 }
 0x592   :  { %4785 = vmatprep.subr.bf16.mxu0 %v6148_v4  ;;  %4817 = vmatprep.subr.bf16.mxu1 %v6151_v8 }
 0x595   :  { %4787 = vmatpush1.bf16.msra.mxu0 %v6154_v16  ;;  %4819 = vmatpush1.bf16.msra.mxu1 %v6158_v17 }
 0x596   :  { %4789 = vmatprep.subr.bf16.mxu0 %v6160_v18  ;;  %4821 = vmatprep.subr.bf16.mxu1 %v6163_v25 }
 0x599   :  { %4791 = vmatpush1.bf16.msra.mxu0 %v6166_v34  ;;  %4823 = vmatpush1.bf16.msra.mxu1 %v6170_v35 }
 0x59a   :  { %4793 = vmatprep.subr.bf16.mxu0 %v6172_v36  ;;  %4825 = vmatprep.subr.bf16.mxu1 %v6175_v42 }
 0x59d   :  { %4795 = vmatpush1.bf16.msra.mxu0 %v6178_v46  ;;  %4827 = vmatpush1.bf16.msra.mxu1 %v6182_v47 }
 0x59e   :  { %4829 = vmatprep.subr.bf16.mxu0 %v7705_v11  ;;  %4861 = vmatprep.subr.bf16.mxu1 %v7706_v9  ;;  %v7718_v9 = vld [vmem:[#allocation16_spill] sm:$0xff] }
 0x653   :  { %v1530_v22 = vpop.f32.mrb[14].mxu0  ;;  %v1601_v31 = vpop.f32.mrb[14].mxu1 }
 0x654   :  { %v1610_v0 = vrot.slane %v1530_v22, 6  ;;  %v1532_v44 = vpop.f32.mrb[15].mxu0  ;;  %v1603_v62 = vpop.f32.mrb[15].mxu1  ;;  %v1612_v11 = vrot.slane %v1601_v31, 6 }
 0x655   :  { %v1611_v48 = vrot.slane %v1532_v44, 6  ;;  %v1613_v23 = vrot.slane %v1603_v62, 6  ;;  %v1462_v62 = vmul.f32 %v6509_v24, %v6568_v56 }
 0x656   :  { %v1618_v63 = vadd.f32 %v1610_v0, %v7715_v20  ;;  %v1620_v2 = vadd.f32 %v1612_v11, %v7718_v9  ;;  %v1461_v0 = vmul.f32 %v6559_v10, %v6565_v30 }
 0x657   :  { %v1619_v38 = vadd.f32 %v1611_v48, %v7716_v43  ;;  %v1621_v5 = vadd.f32 %v1613_v23, %v7717_v49 }
 0x658   :  { %v4164_v6 = vmul.f32 -1.442695, %v1618_v63  ;;  %v1463_v48 = vadd.f32 %v1462_v62, %v1461_v0 }
 0x659   :  { %v4165_v32 = vmul.f32 -1.442695, %v1619_v38  ;;  %v4166_v50 = vmul.f32 -1.442695, %v1621_v5 }
 0x65a   :  { %5584 = vpow2.f32 %v4164_v6  ;;  %v1642_v6 = vrot.slane %v1463_v48, 6 }
 0x65b   :  { %5586 = vpow2.f32 %v4165_v32 }
 0x65c   :  { %5588 = vpow2.f32 %v4166_v50 }
 0x65d   :  { %5590 = vtanh.f32 %v1620_v2 }
 0x664   :  { %v5585_v7 = vpop.eup %5584 }
 0x665   :  { %v5587_v22 = vpop.eup %5586  ;;  %v1625_v15 = vadd.f32 1.0, %v5585_v7  ;;  %v94_v7 = vld [vmem:[%s7614_s1 + $0xa] sm:$0x3] }
 0x666   :  { %v1631_v44 = vadd.f32 1.0, %v5587_v22  ;;  %v5589_v63 = vpop.eup %5588  ;;  %v6625_v50 = vsub.f32 1.0, %v94_v7 }
 0x667   :  { %5592 = vrcp.f32 %v1625_v15  ;;  %v5591_v31 = vpop.eup %5590  ;;  %v1638_v5 = vadd.f32 1.0, %v5589_v63 }
 0x668   :  { %5594 = vrcp.f32 %v1631_v44  ;;  %7719 = vst [vmem:[#allocation14_spill] sm:$0xff] %v6625_v50  ;;  %v1659_v30 = vmul.f32 %v1463_v48, %v6625_v50 }
 0x669   :  { %5596 = vrcp.f32 %v1638_v5 }
 0x671   :  { %v5593_v38 = vpop.eup %5592 }
 0x672   :  { %v5595_v32 = vpop.eup %5594  ;;  %v1645_v23 = vmul.f32 %v5593_v38, %v5591_v31  ;;  %v1653_v31 = vmul.f32 %v6576_v57, %v6625_v50 }
 0x673   :  { %v1644_v15 = vmul.f32 %v5595_v32, %v1642_v6  ;;  %v5597_v22 = vpop.eup %5596 }
 0x675   :  { %v1646_v2 = vadd.f32 %v1645_v23, %v1644_v15  ;;  %v2051_v23 = vsel %vm157_vm7, %v6571_v61, %v6511_v26 }
 0x677   :  { %5598 = vtanh.f32 %v1646_v2  ;;  %v1656_v10 = vrot.slane %v1646_v2, 2 }
 0x679   :  { %v1658_v24 = vmul.f32 %v1656_v10, %v94_v7 }
 0x67b   :  { %v6628_v11 = vadd.f32 %v1659_v30, %v1658_v24 }
 0x681   :  { %v5599_v44 = vpop.eup %5598 }
 0x682   :  { %v1648_v0 = vmul.f32 %v5599_v44, %v5597_v22  ;;  %v7722_v22 = vld [vmem:[#allocation6_spill] sm:$0xff] }
 0x684   :  { %v1650_v62 = vrot.slane %v1648_v0, 2 }
 0x686   :  { %v6630_v63 = vmul.f32 %v1650_v62, %v94_v7  ;;  %v4174_v62 = vld [vmem:[%s7615_s2 + $0x208] sm:$0xff] }
 0x688   :  { %v6635_v38 = vadd.f32 %v1653_v31, %v6630_v63  ;;  %v2052_v32 = vsel %vm157_vm7, %v6630_v63, %v6454_v55  ;;  %v4178_v31 = vld [vmem:[%s7615_s2 + $0x228] sm:$0xff] }
 0x689   :  { %v2065_v48 = vrot.slane %v2052_v32, 6  ;;  %v4892_v32 = vpack.c.bf16 %v4178_v31, %v4174_v62  ;;  %v4206_v62 = vld [vmem:[%s7615_s2 + $0x308] sm:$0xff] }
 0x68a   :  { %1726 = vmatmul.mubr.f32.vlgmr.msra.gmra.mrb[16].mxu0 %v6635_v38  ;;  %1797 = vmatmul.mubr.f32.vlgmr.msra.gmra.mrb[16].mxu1 %v6635_v38  ;;  %v4210_v31 = vld [vmem:[%s7615_s2 + $0x328] sm:$0xff] }
 0x68b   :  { %4831 = vmatpush1.bf16.msra.mxu0 %v6087_v12  ;;  %4863 = vmatpush1.bf16.msra.mxu1 %v6090_v13  ;;  %v6650_v57 = vsel %vm80_vm4, %v2051_v23, %v2065_v48  ;;  %v4180_v48 = vld [vmem:[%s7615_s2 + $0x238] sm:$0xff]  ;;  %v4173_v23 = vld [vmem:[%s7615_s2 + $0x200] sm:$0xff] }
 0x68c   :  { %4833 = vmatprep.subr.bf16.mxu0 %v6096_v19  ;;  %4865 = vmatprep.subr.bf16.mxu1 %v6098_v21 }
 0x68d   :  { %1922 = vmatprep.mubr.f32.mxu0 %v7704_v60  ;;  %1993 = vmatprep.mubr.f32.mxu1 %v7704_v60 }
 0x68f   :  { %4835 = vmatpush1.bf16.msra.mxu0 %v6102_v27  ;;  %4867 = vmatpush1.bf16.msra.mxu1 %v6106_v28 }
 0x690   :  { %4837 = vmatprep.subr.bf16.mxu0 %v6108_v29  ;;  %4869 = vmatprep.subr.bf16.mxu1 %v6112_v33 }
 0x693   :  { %4839 = vmatpush1.bf16.msra.mxu0 %v6116_v39  ;;  %4871 = vmatpush1.bf16.msra.mxu1 %v6120_v40 }
 0x694   :  { %4841 = vmatprep.subr.bf16.mxu0 %v6122_v41  ;;  %4873 = vmatprep.subr.bf16.mxu1 %v6125_v45 }
 0x697   :  { %4843 = vmatpush1.bf16.msra.mxu0 %v6130_v51  ;;  %4875 = vmatpush1.bf16.msra.mxu1 %v6134_v52 }
 0x698   :  { %4845 = vmatprep.subr.bf16.mxu0 %v6136_v53  ;;  %4877 = vmatprep.subr.bf16.mxu1 %v6139_v58 }
 0x69b   :  { %4847 = vmatpush1.bf16.msra.mxu0 %v6142_v1  ;;  %4879 = vmatpush1.bf16.msra.mxu1 %v6146_v3 }
 0x69c   :  { %4849 = vmatprep.subr.bf16.mxu0 %v6148_v4  ;;  %4881 = vmatprep.subr.bf16.mxu1 %v6151_v8 }
 0x69f   :  { %4851 = vmatpush1.bf16.msra.mxu0 %v6154_v16  ;;  %4883 = vmatpush1.bf16.msra.mxu1 %v6158_v17 }
 0x6a0   :  { %4853 = vmatprep.subr.bf16.mxu0 %v6160_v18  ;;  %4885 = vmatprep.subr.bf16.mxu1 %v6163_v25  ;;  %v1839_v18 = vrot.slane %v6628_v11, 4 }
 0x6a3   :  { %4855 = vmatpush1.bf16.msra.mxu0 %v6166_v34  ;;  %4887 = vmatpush1.bf16.msra.mxu1 %v6170_v35 }
 0x6a4   :  { %4857 = vmatprep.subr.bf16.mxu0 %v6172_v36  ;;  %4889 = vmatprep.subr.bf16.mxu1 %v6175_v42  ;;  %v95_v36 = vld [vmem:[%s7614_s1 + $0xc] sm:$0x3] }
 0x6a7   :  { %4859 = vmatpush1.bf16.msra.mxu0 %v6178_v46  ;;  %4891 = vmatpush1.bf16.msra.mxu1 %v6182_v47  ;;  %v6690_v47 = vsub.f32 1.0, %v95_v36 }
 0x6a8   :  { %4893 = vmatprep.subr.bf16.mxu0 %v4892_v32  ;;  %v4908_v32 = vpack.c.bf16 %v4210_v31, %v4206_v62  ;;  %v2323_v62 = vld [vmem:[#allocation2 + $0x208] sm:$0xff] }
 0x6a9   :  { %7721 = vst [vmem:[#allocation12_spill] sm:$0xff] %v6690_v47  ;;  %v1850_v24 = vmul.f32 %v6635_v38, %v6690_v47  ;;  %v4176_v38 = vld [vmem:[%s7615_s2 + $0x218] sm:$0xff]  ;;  %v2327_v31 = vld [vmem:[#allocation2 + $0x228] sm:$0xff] }
 0x75d   :  { %v1727_v12 = vpop.f32.mrb[16].mxu0  ;;  %v1798_v13 = vpop.f32.mrb[16].mxu1 }
 0x75e   :  { %v1807_v19 = vrot.slane %v1727_v12, 4  ;;  %v1729_v21 = vpop.f32.mrb[17].mxu0  ;;  %v1800_v27 = vpop.f32.mrb[17].mxu1  ;;  %v1809_v51 = vrot.slane %v1798_v13, 4  ;;  %v4924_v12 = vpack.c.bf16 %v4180_v48, %v4176_v38  ;;  %v4208_v48 = vld [vmem:[%s7615_s2 + $0x318] sm:$0xff] }
 0x75f   :  { %v1808_v28 = vrot.slane %v1729_v21, 4  ;;  %v1810_v41 = vrot.slane %v1800_v27, 4  ;;  %v4179_v21 = vld [vmem:[%s7615_s2 + $0x230] sm:$0xff] }
 0x760   :  { %v1815_v29 = vadd.f32 %v1807_v19, %v6262_v14  ;;  %v1817_v53 = vadd.f32 %v1809_v51, %v7713_v59  ;;  %v4175_v19 = vld [vmem:[%s7615_s2 + $0x210] sm:$0xff]  ;;  %4925 = vmatprep.subr.bf16.mxu1 %v4924_v12 }
 0x761   :  { %v1816_v33 = vadd.f32 %v1808_v28, %v7711_v54  ;;  %v1818_v45 = vadd.f32 %v1810_v41, %v7712_v37  ;;  %v1856_v37 = vmul.f32 %v6628_v11, %v6690_v47  ;;  %v4926_v27 = vpack.c.bf16 %v4179_v21, %v4175_v19  ;;  %v4182_v28 = vld [vmem:[%s7615_s2 + $0x248] sm:$0xff]  ;;  %v4181_v41 = vld [vmem:[%s7615_s2 + $0x240] sm:$0xff]  ;;  %v4207_v19 = vld [vmem:[%s7615_s2 + $0x310] sm:$0xff] }
 0x762   :  { %v4167_v39 = vmul.f32 -1.442695, %v1815_v29  ;;  %v4186_v29 = vld [vmem:[%s7615_s2 + $0x268] sm:$0xff]  ;;  %v4211_v21 = vld [vmem:[%s7615_s2 + $0x330] sm:$0xff] }
 0x763   :  { %v4168_v40 = vmul.f32 -1.442695, %v1816_v33  ;;  %v4169_v52 = vmul.f32 -1.442695, %v1818_v45  ;;  %v4184_v33 = vld [vmem:[%s7615_s2 + $0x258] sm:$0xff]  ;;  %v4185_v45 = vld [vmem:[%s7615_s2 + $0x260] sm:$0xff] }
 0x764   :  { %5600 = vpow2.f32 %v4167_v39  ;;  %v4896_v39 = vpack.c.bf16 %v4186_v29, %v4182_v28  ;;  %v4214_v28 = vld [vmem:[%s7615_s2 + $0x348] sm:$0xff] }
 0x765   :  { %5602 = vpow2.f32 %v4168_v40  ;;  %v4188_v40 = vld [vmem:[%s7615_s2 + $0x278] sm:$0xff]  ;;  %v4218_v29 = vld [vmem:[%s7615_s2 + $0x368] sm:$0xff] }
 0x766   :  { %5604 = vpow2.f32 %v4169_v52  ;;  %v4928_v51 = vpack.c.bf16 %v4188_v40, %v4184_v33  ;;  %v4898_v52 = vpack.c.bf16 %v4185_v45, %v4181_v41  ;;  %v4216_v33 = vld [vmem:[%s7615_s2 + $0x358] sm:$0xff]  ;;  %v4912_v40 = vpack.c.bf16 %v4218_v29, %v4214_v28  ;;  %v4213_v45 = vld [vmem:[%s7615_s2 + $0x340] sm:$0xff] }
 0x767   :  { %5606 = vtanh.f32 %v1817_v53  ;;  %v4183_v53 = vld [vmem:[%s7615_s2 + $0x250] sm:$0xff]  ;;  %v4220_v41 = vld [vmem:[%s7615_s2 + $0x378] sm:$0xff] }
 0x76e   :  { %v5601_v58 = vpop.eup %5600 }
 0x76f   :  { %v5603_v1 = vpop.eup %5602  ;;  %v1822_v3 = vadd.f32 1.0, %v5601_v58  ;;  %v4187_v58 = vld [vmem:[%s7615_s2 + $0x270] sm:$0xff] }
 0x770   :  { %v1828_v4 = vadd.f32 1.0, %v5603_v1  ;;  %v5605_v8 = vpop.eup %5604  ;;  %v4930_v1 = vpack.c.bf16 %v4187_v58, %v4183_v53  ;;  %v4215_v53 = vld [vmem:[%s7615_s2 + $0x350] sm:$0xff] }
 0x771   :  { %5608 = vrcp.f32 %v1822_v3  ;;  %v5607_v16 = vpop.eup %5606  ;;  %v1835_v35 = vadd.f32 1.0, %v5605_v8  ;;  %v4190_v3 = vld [vmem:[%s7615_s2 + $0x288] sm:$0xff]  ;;  %v4192_v8 = vld [vmem:[%s7615_s2 + $0x298] sm:$0xff]  ;;  %v4219_v58 = vld [vmem:[%s7615_s2 + $0x370] sm:$0xff] }
 0x772   :  { %5610 = vrcp.f32 %v1828_v4  ;;  %v4194_v4 = vld [vmem:[%s7615_s2 + $0x2a8] sm:$0xff] }
 0x773   :  { %5612 = vrcp.f32 %v1835_v35 }
 0x77b   :  { %v5609_v17 = vpop.eup %5608 }
 0x77c   :  { %v5611_v25 = vpop.eup %5610  ;;  %v1842_v34 = vmul.f32 %v5609_v17, %v5607_v16  ;;  %v4900_v16 = vpack.c.bf16 %v4194_v4, %v4190_v3  ;;  %v4196_v17 = vld [vmem:[%s7615_s2 + $0x2b8] sm:$0xff]  ;;  %v4226_v3 = vld [vmem:[%s7615_s2 + $0x3a8] sm:$0xff] }
 0x77d   :  { %v1841_v42 = vmul.f32 %v5611_v25, %v1839_v18  ;;  %v5613_v5 = vpop.eup %5612  ;;  %v4189_v18 = vld [vmem:[%s7615_s2 + $0x280] sm:$0xff]  ;;  %v4224_v4 = vld [vmem:[%s7615_s2 + $0x398] sm:$0xff] }
 0x77e   :  { %v4193_v25 = vld [vmem:[%s7615_s2 + $0x2a0] sm:$0xff] }
 0x77f   :  { %v1843_v46 = vadd.f32 %v1842_v34, %v1841_v42  ;;  %v4932_v34 = vpack.c.bf16 %v4196_v17, %v4192_v8  ;;  %v4902_v35 = vpack.c.bf16 %v4193_v25, %v4189_v18  ;;  %v4195_v42 = vld [vmem:[%s7615_s2 + $0x2b0] sm:$0xff]  ;;  %v4228_v8 = vld [vmem:[%s7615_s2 + $0x3b8] sm:$0xff]  ;;  %v4946_v17 = vpack.c.bf16 %v4219_v58, %v4215_v53  ;;  %v4221_v25 = vld [vmem:[%s7615_s2 + $0x380] sm:$0xff] }
 0x781   :  { %5614 = vtanh.f32 %v1843_v46  ;;  %v1853_v14 = vrot.slane %v1843_v46, 4  ;;  %v4198_v46 = vld [vmem:[%s7615_s2 + $0x2c8] sm:$0xff] }
 0x783   :  { %v1855_v54 = vmul.f32 %v1853_v14, %v95_v36 }
 0x785   :  { %v6694_v59 = vadd.f32 %v1856_v37, %v1855_v54  ;;  %v4202_v54 = vld [vmem:[%s7615_s2 + $0x2e8] sm:$0xff]  ;;  %v4200_v37 = vld [vmem:[%s7615_s2 + $0x2d8] sm:$0xff] }
 0x78b   :  { %v5615_v7 = vpop.eup %5614 }
 0x78c   :  { %v1845_v15 = vmul.f32 %v5615_v7, %v5613_v5  ;;  %v4204_v5 = vld [vmem:[%s7615_s2 + $0x2f8] sm:$0xff]  ;;  %v4904_v7 = vpack.c.bf16 %v4202_v54, %v4198_v46  ;;  %v4230_v46 = vld [vmem:[%s7615_s2 + $0x3c8] sm:$0xff] }
 0x78d   :  { %v4232_v54 = vld [vmem:[%s7615_s2 + $0x3d8] sm:$0xff] }
 0x78e   :  { %v1847_v2 = vrot.slane %v1845_v15, 4  ;;  %v4936_v15 = vpack.c.bf16 %v4204_v5, %v4200_v37  ;;  %v4236_v37 = vld [vmem:[%s7615_s2 + $0x3f8] sm:$0xff] }
 0x790   :  { %v6696_v10 = vmul.f32 %v1847_v2, %v95_v36  ;;  %v4191_v36 = vld [vmem:[%s7615_s2 + $0x290] sm:$0xff]  ;;  %v4197_v2 = vld [vmem:[%s7615_s2 + $0x2c0] sm:$0xff] }
 0x791   :  { %v4934_v14 = vpack.c.bf16 %v4195_v42, %v4191_v36  ;;  %v4948_v36 = vpack.c.bf16 %v4228_v8, %v4224_v4  ;;  %v4227_v42 = vld [vmem:[%s7615_s2 + $0x3b0] sm:$0xff] }
 0x792   :  { %v1851_v30 = vadd.f32 %v1850_v24, %v6696_v10  ;;  %v2053_v44 = vsel %vm157_vm7, %v6696_v10, %v7722_v22  ;;  %v4201_v24 = vld [vmem:[%s7615_s2 + $0x2e0] sm:$0xff] }
 0x793   :  { %v2068_v0 = vrot.slane %v2053_v44, 4  ;;  %v4906_v44 = vpack.c.bf16 %v4201_v24, %v4197_v2  ;;  %v4229_v2 = vld [vmem:[%s7615_s2 + $0x3c0] sm:$0xff] }
 0x794   :  { %1923 = vmatmul.mubr.f32.vlgmr.msra.gmra.mrb[18].mxu0 %v1851_v30  ;;  %1994 = vmatmul.mubr.f32.vlgmr.msra.gmra.mrb[18].mxu1 %v1851_v30  ;;  %v4199_v30 = vld [vmem:[%s7615_s2 + $0x2d0] sm:$0xff]  ;;  %v4233_v24 = vld [vmem:[%s7615_s2 + $0x3e0] sm:$0xff] }
 0x795   :  { %2231 = vmatprep.mubr.f32.mxu0 %v7704_v60  ;;  %2308 = vmatprep.mubr.f32.mxu1 %v7704_v60  ;;  %v6709_v11 = vsel %vm82_vm5, %v6650_v57, %v2068_v0  ;;  %v4177_v57 = vld [vmem:[%s7615_s2 + $0x220] sm:$0xff]  ;;  %v4203_v0 = vld [vmem:[%s7615_s2 + $0x2f0] sm:$0xff] }
 0x796   :  { %v4894_v13 = vpack.c.bf16 %v4177_v57, %v4173_v23  ;;  %4927 = vmatpush1.bf16.msra.mxu1 %v4926_v27  ;;  %v4938_v38 = vpack.c.bf16 %v4203_v0, %v4199_v30  ;;  %v4212_v23 = vld [vmem:[%s7615_s2 + $0x338] sm:$0xff]  ;;  %v4205_v57 = vld [vmem:[%s7615_s2 + $0x300] sm:$0xff]  ;;  %v4231_v30 = vld [vmem:[%s7615_s2 + $0x3d0] sm:$0xff] }
 0x797   :  { %4929 = vmatprep.subr.bf16.mxu1 %v4928_v51  ;;  %v4940_v12 = vpack.c.bf16 %v4212_v23, %v4208_v48  ;;  %v4217_v51 = vld [vmem:[%s7615_s2 + $0x360] sm:$0xff]  ;;  %v4235_v0 = vld [vmem:[%s7615_s2 + $0x3f0] sm:$0xff]  ;;  %v4922_v48 = vpack.c.bf16 %v4233_v24, %v4229_v2 }
 0x798   :  { %4895 = vmatpush1.bf16.msra.mxu0 %v4894_v13  ;;  %v4209_v13 = vld [vmem:[%s7615_s2 + $0x320] sm:$0xff]  ;;  %v4954_v23 = vpack.c.bf16 %v4235_v0, %v4231_v30  ;;  %v2324_v2 = vld [vmem:[#allocation2 + $0x210] sm:$0xff]  ;;  %v7725_v0 = vld [vmem:[#allocation20_spill] sm:$0xff] }
 0x799   :  { %4897 = vmatprep.subr.bf16.mxu0 %v4896_v39  ;;  %v4910_v27 = vpack.c.bf16 %v4209_v13, %v4205_v57  ;;  %v4942_v39 = vpack.c.bf16 %v4211_v21, %v4207_v19  ;;  %v6903_v57 = vpack.c.bf16 %v2327_v31, %v2323_v62  ;;  %v2328_v24 = vld [vmem:[#allocation2 + $0x230] sm:$0xff]  ;;  %v2335_v31 = vld [vmem:[#allocation2 + $0x268] sm:$0xff] }
 0x79a   :  { %4931 = vmatpush1.bf16.msra.mxu1 %v4930_v1  ;;  %v4222_v1 = vld [vmem:[%s7615_s2 + $0x388] sm:$0xff] }
 0x79b   :  { %4933 = vmatprep.subr.bf16.mxu1 %v4932_v34  ;;  %v4916_v18 = vpack.c.bf16 %v4226_v3, %v4222_v1  ;;  %v4225_v34 = vld [vmem:[%s7615_s2 + $0x3a0] sm:$0xff]  ;;  %7723 = vst [vmem:[#allocation15_spill] sm:$0xff] %v6903_v57 }
 0x79c   :  { %4899 = vmatpush1.bf16.msra.mxu0 %v4898_v52  ;;  %v4944_v52 = vpack.c.bf16 %v4220_v41, %v4216_v33  ;;  %v4918_v5 = vpack.c.bf16 %v4225_v34, %v4221_v25 }
 0x79d   :  { %4901 = vmatprep.subr.bf16.mxu0 %v4900_v16  ;;  %v4914_v16 = vpack.c.bf16 %v4217_v51, %v4213_v45 }
 0x79e   :  { %4935 = vmatpush1.bf16.msra.mxu1 %v4934_v14  ;;  %v4234_v14 = vld [vmem:[%s7615_s2 + $0x3e8] sm:$0xff] }
 0x79f   :  { %4937 = vmatprep.subr.bf16.mxu1 %v4936_v15  ;;  %v4920_v15 = vpack.c.bf16 %v4234_v14, %v4230_v46  ;;  %v96_v46 = vld [vmem:[%s7614_s1 + $0xe] sm:$0x3] }
 0x7a0   :  { %4903 = vmatpush1.bf16.msra.mxu0 %v4902_v35  ;;  %v4223_v35 = vld [vmem:[%s7615_s2 + $0x390] sm:$0xff] }
 0x7a1   :  { %4905 = vmatprep.subr.bf16.mxu0 %v4904_v7  ;;  %v4950_v7 = vpack.c.bf16 %v4227_v42, %v4223_v35 }
 0x7a2   :  { %4939 = vmatpush1.bf16.msra.mxu1 %v4938_v38  ;;  %v2325_v38 = vld [vmem:[#allocation2 + $0x218] sm:$0xff] }
 0x7a3   :  { %4941 = vmatprep.subr.bf16.mxu1 %v4940_v12 }
 0x7a4   :  { %4907 = vmatpush1.bf16.msra.mxu0 %v4906_v44  ;;  %v4952_v44 = vpack.c.bf16 %v4236_v37, %v4232_v54  ;;  %v2049_v54 = vsel %vm157_vm7, %v6454_v55, %v6630_v63  ;;  %v2050_v37 = vsel %vm157_vm7, %v6511_v26, %v6571_v61  ;;  %v2333_v55 = vld [vmem:[#allocation2 + $0x258] sm:$0xff] }
 0x7a5   :  { %4909 = vmatprep.subr.bf16.mxu0 %v4908_v32  ;;  %v2329_v32 = vld [vmem:[#allocation2 + $0x238] sm:$0xff]  ;;  %v2062_v62 = vrot.slane %v2050_v37, 2 }
 0x7a6   :  { %4943 = vmatpush1.bf16.msra.mxu1 %v4942_v39  ;;  %v6905_v12 = vpack.c.bf16 %v2329_v32, %v2325_v38  ;;  %v2337_v63 = vld [vmem:[#allocation2 + $0x278] sm:$0xff]  ;;  %v6938_v32 = vpack.c.bf16 %v2328_v24, %v2324_v2 }
 0x7a7   :  { %4945 = vmatprep.subr.bf16.mxu1 %v4944_v52 }
 0x7a8   :  { %4911 = vmatpush1.bf16.msra.mxu0 %v4910_v27  ;;  %7724 = vst [vmem:[#allocation17_spill] sm:$0xff] %v6905_v12 }
 0x7a9   :  { %4913 = vmatprep.subr.bf16.mxu0 %v4912_v40 }
 0x7aa   :  { %4947 = vmatpush1.bf16.msra.mxu1 %v4946_v17  ;;  %v2036_v17 = vrot.slane %v6694_v59, 2  ;;  %v2048_v59 = vsel %vm157_vm7, %v7722_v22, %v6696_v10  ;;  %v2059_v22 = vrot.slane %v2049_v54, 4  ;;  %v2361_v54 = vld [vmem:[#allocation2 + $0x338] sm:$0xff] }
 0x7ab   :  { %4949 = vmatprep.subr.bf16.mxu1 %v4948_v36  ;;  %v2056_v30 = vrot.slane %v2048_v59, 6  ;;  %v2357_v59 = vld [vmem:[#allocation2 + $0x318] sm:$0xff] }
 0x7ac   :  { %4915 = vmatpush1.bf16.msra.mxu0 %v4914_v16  ;;  %v6986_v24 = vpack.c.bf16 %v2361_v54, %v2357_v59  ;;  %v2384_v59 = vld [vmem:[#allocation2 + $0x3f0] sm:$0xff] }
 0x7ad   :  { %4917 = vmatprep.subr.bf16.mxu0 %v4916_v18 }
 0x7ae   :  { %4951 = vmatpush1.bf16.msra.mxu1 %v4950_v7 }
 0x7af   :  { %4953 = vmatprep.subr.bf16.mxu1 %v4952_v44  ;;  %v2331_v44 = vld [vmem:[#allocation2 + $0x248] sm:$0xff] }
 0x7b0   :  { %4919 = vmatpush1.bf16.msra.mxu0 %v4918_v5  ;;  %v2322_v5 = vld [vmem:[#allocation2 + $0x200] sm:$0xff] }
 0x7b1   :  { %4921 = vmatprep.subr.bf16.mxu0 %v4920_v15  ;;  %v2326_v15 = vld [vmem:[#allocation2 + $0x220] sm:$0xff] }
 0x7b2   :  { %4955 = vmatpush1.bf16.msra.mxu1 %v4954_v23  ;;  %v6936_v38 = vpack.c.bf16 %v2326_v15, %v2322_v5  ;;  %v2330_v23 = vld [vmem:[#allocation2 + $0x240] sm:$0xff] }
 0x7b3   :  { %4989 = vmatprep.subr.bf16.mxu1 %v6905_v12  ;;  %v2358_v15 = vld [vmem:[#allocation2 + $0x320] sm:$0xff] }
 0x7b4   :  { %4923 = vmatpush1.bf16.msra.mxu0 %v4922_v48 }
 0x7b5   :  { %4957 = vmatprep.subr.bf16.mxu0 %v6903_v57 }
 0x867   :  { %v1924_v13 = vpop.f32.mrb[18].mxu0  ;;  %v1995_v19 = vpop.f32.mrb[18].mxu1 }
 0x868   :  { %v2004_v21 = vrot.slane %v1924_v13, 2  ;;  %v1926_v27 = vpop.f32.mrb[19].mxu0  ;;  %v1997_v28 = vpop.f32.mrb[19].mxu1  ;;  %v2006_v52 = vrot.slane %v1995_v19, 2  ;;  %v2334_v13 = vld [vmem:[#allocation2 + $0x260] sm:$0xff] }
 0x869   :  { %v2005_v29 = vrot.slane %v1926_v27, 2  ;;  %v2007_v45 = vrot.slane %v1997_v28, 2  ;;  %v2336_v27 = vld [vmem:[#allocation2 + $0x270] sm:$0xff]  ;;  %v2339_v28 = vld [vmem:[#allocation2 + $0x288] sm:$0xff] }
 0x86a   :  { %v2012_v33 = vadd.f32 %v2004_v21, %v7715_v20  ;;  %v2014_v58 = vadd.f32 %v2006_v52, %v7718_v9  ;;  %v2332_v21 = vld [vmem:[#allocation2 + $0x250] sm:$0xff]  ;;  %v6950_v52 = vpack.c.bf16 %v2334_v13, %v2330_v23 }
 0x86b   :  { %v2013_v39 = vadd.f32 %v2005_v29, %v7716_v43  ;;  %v2015_v51 = vadd.f32 %v2007_v45, %v7717_v49  ;;  %v2341_v45 = vld [vmem:[#allocation2 + $0x298] sm:$0xff]  ;;  %v2364_v23 = vld [vmem:[#allocation2 + $0x350] sm:$0xff] }
 0x86c   :  { %v4170_v40 = vmul.f32 -1.442695, %v2012_v33  ;;  %v6942_v33 = vpack.c.bf16 %v2335_v31, %v2331_v44  ;;  %v2360_v44 = vld [vmem:[#allocation2 + $0x330] sm:$0xff] }
 0x86d   :  { %v4171_v41 = vmul.f32 -1.442695, %v2013_v39  ;;  %v4172_v53 = vmul.f32 -1.442695, %v2015_v51  ;;  %v6944_v39 = vpack.c.bf16 %v2337_v63, %v2333_v55  ;;  %v2345_v51 = vld [vmem:[#allocation2 + $0x2b8] sm:$0xff]  ;;  %v2362_v63 = vld [vmem:[#allocation2 + $0x340] sm:$0xff] }
 0x86e   :  { %5616 = vpow2.f32 %v4170_v40  ;;  %v2368_v13 = vld [vmem:[#allocation2 + $0x370] sm:$0xff] }
 0x86f   :  { %5618 = vpow2.f32 %v4171_v41  ;;  %v2343_v41 = vld [vmem:[#allocation2 + $0x2a8] sm:$0xff] }
 0x870   :  { %5620 = vpow2.f32 %v4172_v53  ;;  %v6952_v53 = vpack.c.bf16 %v2336_v27, %v2332_v21  ;;  %v2375_v21 = vld [vmem:[#allocation2 + $0x3a8] sm:$0xff]  ;;  %v2373_v27 = vld [vmem:[#allocation2 + $0x398] sm:$0xff] }
 0x871   :  { %5622 = vtanh.f32 %v2014_v58  ;;  %v2338_v58 = vld [vmem:[#allocation2 + $0x280] sm:$0xff] }
 0x878   :  { %v5617_v1 = vpop.eup %5616 }
 0x879   :  { %v5619_v3 = vpop.eup %5618  ;;  %v2019_v4 = vadd.f32 1.0, %v5617_v1  ;;  %v2342_v1 = vld [vmem:[#allocation2 + $0x2a0] sm:$0xff] }
 0x87a   :  { %v2025_v8 = vadd.f32 1.0, %v5619_v3  ;;  %v5621_v20 = vpop.eup %5620  ;;  %v6958_v3 = vpack.c.bf16 %v2345_v51, %v2341_v45  ;;  %v2374_v45 = vld [vmem:[#allocation2 + $0x3a0] sm:$0xff] }
 0x87b   :  { %5624 = vrcp.f32 %v2019_v4  ;;  %v5623_v43 = vpop.eup %5622  ;;  %v2032_v49 = vadd.f32 1.0, %v5621_v20  ;;  %v2340_v4 = vld [vmem:[#allocation2 + $0x290] sm:$0xff]  ;;  %v2347_v20 = vld [vmem:[#allocation2 + $0x2c8] sm:$0xff] }
 0x87c   :  { %5626 = vrcp.f32 %v2025_v8  ;;  %v2344_v8 = vld [vmem:[#allocation2 + $0x2b0] sm:$0xff] }
 0x87d   :  { %5628 = vrcp.f32 %v2032_v49  ;;  %v2346_v49 = vld [vmem:[#allocation2 + $0x2c0] sm:$0xff] }
 0x885   :  { %v5625_v16 = vpop.eup %5624 }
 0x886   :  { %v5627_v18 = vpop.eup %5626  ;;  %v2039_v25 = vmul.f32 %v5625_v16, %v5623_v43  ;;  %v2351_v43 = vld [vmem:[#allocation2 + $0x2e8] sm:$0xff]  ;;  %v2349_v16 = vld [vmem:[#allocation2 + $0x2d8] sm:$0xff] }
 0x887   :  { %v2038_v34 = vmul.f32 %v5627_v18, %v2036_v17  ;;  %v5629_v9 = vpop.eup %5628  ;;  %v2353_v17 = vld [vmem:[#allocation2 + $0x2f8] sm:$0xff]  ;;  %v6964_v18 = vpack.c.bf16 %v2342_v1, %v2338_v58  ;;  %v2372_v1 = vld [vmem:[#allocation2 + $0x390] sm:$0xff] }
 0x889   :  { %v2040_v35 = vadd.f32 %v2039_v25, %v2038_v34  ;;  %v6966_v25 = vpack.c.bf16 %v2344_v8, %v2340_v4  ;;  %v2350_v34 = vld [vmem:[#allocation2 + $0x2e0] sm:$0xff]  ;;  %v2376_v4 = vld [vmem:[#allocation2 + $0x3b0] sm:$0xff]  ;;  %v2379_v8 = vld [vmem:[#allocation2 + $0x3c8] sm:$0xff] }
 0x88a   :  { %v6978_v37 = vpack.c.bf16 %v2350_v34, %v2346_v49  ;;  %v7016_v49 = vpack.c.bf16 %v2376_v4, %v2372_v1  ;;  %v2378_v34 = vld [vmem:[#allocation2 + $0x3c0] sm:$0xff] }
 0x88b   :  { %5630 = vtanh.f32 %v2040_v35  ;;  %v6970_v35 = vpack.c.bf16 %v2351_v43, %v2347_v20  ;;  %v2383_v20 = vld [vmem:[#allocation2 + $0x3e8] sm:$0xff]  ;;  %v2381_v43 = vld [vmem:[#allocation2 + $0x3d8] sm:$0xff] }
 0x895   :  { %v5631_v36 = vpop.eup %5630 }
 0x896   :  { %v2042_v42 = vmul.f32 %v5631_v36, %v5629_v9  ;;  %v6972_v9 = vpack.c.bf16 %v2353_v17, %v2349_v16  ;;  %v2348_v36 = vld [vmem:[#allocation2 + $0x2d0] sm:$0xff]  ;;  %v2385_v16 = vld [vmem:[#allocation2 + $0x3f8] sm:$0xff] }
 0x898   :  { %v2044_v14 = vrot.slane %v2042_v42, 6  ;;  %v2352_v42 = vld [vmem:[#allocation2 + $0x2f0] sm:$0xff] }
 0x899   :  { %v6980_v5 = vpack.c.bf16 %v2352_v42, %v2348_v36  ;;  %v7020_v36 = vpack.c.bf16 %v2383_v20, %v2379_v8  ;;  %v7022_v42 = vpack.c.bf16 %v2385_v16, %v2381_v43 }
 0x89a   :  { %v2046_v7 = vmul.f32 %v2044_v14, %v96_v46  ;;  %v2355_v46 = vld [vmem:[#allocation2 + $0x308] sm:$0xff] }
 0x89b   :  { %v2359_v14 = vld [vmem:[#allocation2 + $0x328] sm:$0xff] }
 0x89c   :  { %v2047_v10 = vsel %vm157_vm7, %v7725_v0, %v2046_v7  ;;  %v2054_v26 = vsel %vm157_vm7, %v2046_v7, %v7725_v0  ;;  %v2354_v7 = vld [vmem:[#allocation2 + $0x300] sm:$0xff]  ;;  %v6984_v2 = vpack.c.bf16 %v2359_v14, %v2355_v46  ;;  %v2363_v0 = vld [vmem:[#allocation2 + $0x348] sm:$0xff]  ;;  %v2380_v14 = vld [vmem:[#allocation2 + $0x3d0] sm:$0xff] }
 0x89d   :  { %v2073_v61 = vsel %vm80_vm4, %v2047_v10, %v2056_v30  ;;  %v2071_v48 = vrot.slane %v2054_v26, 2  ;;  %v2356_v30 = vld [vmem:[#allocation2 + $0x310] sm:$0xff]  ;;  %v2367_v10 = vld [vmem:[#allocation2 + $0x368] sm:$0xff]  ;;  %v6990_v31 = vpack.c.bf16 %v2358_v15, %v2354_v7  ;;  %v2366_v26 = vld [vmem:[#allocation2 + $0x360] sm:$0xff]  ;;  %v7028_v7 = vpack.c.bf16 %v2384_v59, %v2380_v14 }
 0x89e   :  { %v2074_v19 = vsel %vm82_vm5, %v2073_v61, %v2059_v22  ;;  %v2365_v22 = vld [vmem:[#allocation2 + $0x358] sm:$0xff]  ;;  %v6992_v55 = vpack.c.bf16 %v2360_v44, %v2356_v30  ;;  %v6996_v61 = vpack.c.bf16 %v2367_v10, %v2363_v0  ;;  %v2382_v46 = vld [vmem:[#allocation2 + $0x3e0] sm:$0xff]  ;;  %v7726_v30 = vld [vmem:[#allocation7_spill] sm:$0xff] }
 0x89f   :  { %v2075_v29 = vsel %vm84_vm6, %v2074_v19, %v2062_v62  ;;  %v2078_v40 = vsel %vm84_vm6, %v6709_v11, %v2071_v48  ;;  %v6956_v11 = vpack.c.bf16 %v2343_v41, %v2339_v28  ;;  %v2369_v62 = vld [vmem:[#allocation2 + $0x378] sm:$0xff]  ;;  %v2371_v19 = vld [vmem:[#allocation2 + $0x388] sm:$0xff]  ;;  %v2370_v41 = vld [vmem:[#allocation2 + $0x380] sm:$0xff]  ;;  %v7026_v54 = vpack.c.bf16 %v2382_v46, %v2378_v34 }
 0x8a0   :  { %2232 = vmatmul.mubr.f32.vlgmr.msra.gmra.mrb[20].mxu0 %v2075_v29  ;;  %2309 = vmatmul.mubr.f32.vlgmr.msra.gmra.mrb[20].mxu1 %v2075_v29  ;;  %v6998_v48 = vpack.c.bf16 %v2369_v62, %v2365_v22  ;;  %v2377_v28 = vld [vmem:[#allocation2 + $0x3b8] sm:$0xff]  ;;  %v7002_v29 = vpack.c.bf16 %v2366_v26, %v2362_v63  ;;  %v7008_v51 = vpack.c.bf16 %v2375_v21, %v2371_v19  ;;  %v4237_v15 = vld [vmem:[%s7616_s3 + $0x4] sm:$0xf]  ;;  %v7727_v44 = vsub.s32 0, %v7726_v30 }
 0x8a1   :  { %4959 = vmatpush1.bf16.msra.mxu0 %v6936_v38  ;;  %4991 = vmatpush1.bf16.msra.mxu1 %v6938_v32  ;;  %v7010_v58 = vpack.c.bf16 %v2377_v28, %v2373_v27  ;;  %v7014_v17 = vpack.c.bf16 %v2374_v45, %v2370_v41  ;;  %v7728_v10 = vsub.s32 2, %v7726_v30  ;;  %v7729_v62 = vsub.s32 1, %v7726_v30 }
 0x8a2   :  { %2237 = vmatprep.mubr.f32.mxu0 %v7704_v60  ;;  %2314 = vmatprep.mubr.f32.mxu1 %v7704_v60  ;;  %v2150_v0 = vrot.slane %v4237_v15, %v7727_v44  ;;  %v7730_v26 = vsub.s32 3, %v7726_v30 }
 0x8a3   :  { %4961 = vmatprep.subr.bf16.mxu0 %v6942_v33  ;;  %4993 = vmatprep.subr.bf16.mxu1 %v6944_v39  ;;  %v2158_v22 = vrot.slane %v4237_v15, %v7728_v10  ;;  %v2154_v63 = vrot.slane %v4237_v15, %v7729_v62 }
 0x8a4   :  { %2238 = vmatmul.mubr.f32.gmra.mrb[22].mxu0 %v2078_v40  ;;  %2315 = vmatmul.mubr.f32.gmra.mrb[22].mxu1 %v2078_v40  ;;  %v7004_v40 = vpack.c.bf16 %v2368_v13, %v2364_v23  ;;  %v2162_v23 = vrot.slane %v4237_v15, %v7730_v26 }
 0x8a5   :  { %4963 = vmatpush1.bf16.msra.mxu0 %v6950_v52  ;;  %4995 = vmatpush1.bf16.msra.mxu1 %v6952_v53 }
 0x8a6   :  { %4965 = vmatprep.subr.bf16.mxu0 %v6956_v11  ;;  %4997 = vmatprep.subr.bf16.mxu1 %v6958_v3 }
 0x8a7   :  { %2506 = vmatprep.mubr.f32.mxu0 %v7704_v60  ;;  %2577 = vmatprep.mubr.f32.mxu1 %v7704_v60 }
 0x8a9   :  { %4967 = vmatpush1.bf16.msra.mxu0 %v6964_v18  ;;  %4999 = vmatpush1.bf16.msra.mxu1 %v6966_v25 }
 0x8aa   :  { %4969 = vmatprep.subr.bf16.mxu0 %v6970_v35  ;;  %5001 = vmatprep.subr.bf16.mxu1 %v6972_v9 }
 0x8ad   :  { %4971 = vmatpush1.bf16.msra.mxu0 %v6978_v37  ;;  %5003 = vmatpush1.bf16.msra.mxu1 %v6980_v5 }
 0x8ae   :  { %4973 = vmatprep.subr.bf16.mxu0 %v6984_v2  ;;  %5005 = vmatprep.subr.bf16.mxu1 %v6986_v24 }
 0x8b1   :  { %4975 = vmatpush1.bf16.msra.mxu0 %v6990_v31  ;;  %5007 = vmatpush1.bf16.msra.mxu1 %v6992_v55 }
 0x8b2   :  { %4977 = vmatprep.subr.bf16.mxu0 %v6996_v61  ;;  %5009 = vmatprep.subr.bf16.mxu1 %v6998_v48 }
 0x8b5   :  { %4979 = vmatpush1.bf16.msra.mxu0 %v7002_v29  ;;  %5011 = vmatpush1.bf16.msra.mxu1 %v7004_v40 }
 0x8b6   :  { %4981 = vmatprep.subr.bf16.mxu0 %v7008_v51  ;;  %5013 = vmatprep.subr.bf16.mxu1 %v7010_v58 }
 0x8b9   :  { %4983 = vmatpush1.bf16.msra.mxu0 %v7014_v17  ;;  %5015 = vmatpush1.bf16.msra.mxu1 %v7016_v49 }
 0x8ba   :  { %4985 = vmatprep.subr.bf16.mxu0 %v7020_v36  ;;  %5017 = vmatprep.subr.bf16.mxu1 %v7022_v42 }
 0x8bd   :  { %4987 = vmatpush1.bf16.msra.mxu0 %v7026_v54  ;;  %5019 = vmatpush1.bf16.msra.mxu1 %v7028_v7 }
 0x8be   :  { %5021 = vmatprep.subr.bf16.mxu0 %v6903_v57  ;;  %5053 = vmatprep.subr.bf16.mxu1 %v6905_v12 }
 0x8c0   :  { %2507 = vmatmul.mubr.f32.vlgmr.msra.gmra.mrb[24].mxu0 %v7704_v60  ;;  %2578 = vmatmul.mubr.f32.vlgmr.msra.gmra.mrb[24].mxu1 %v7704_v60 }
 0x8c1   :  { %5023 = vmatpush1.bf16.msra.mxu0 %v6936_v38  ;;  %5055 = vmatpush1.bf16.msra.mxu1 %v6938_v32 }
 0x8c2   :  { %5025 = vmatprep.subr.bf16.mxu0 %v6942_v33  ;;  %5057 = vmatprep.subr.bf16.mxu1 %v6944_v39 }
 0x8c3   :  { %2680 = vmatprep.mubr.f32.mxu0 %v7704_v60  ;;  %2751 = vmatprep.mubr.f32.mxu1 %v7704_v60 }
 0x8c5   :  { %5027 = vmatpush1.bf16.msra.mxu0 %v6950_v52  ;;  %5059 = vmatpush1.bf16.msra.mxu1 %v6952_v53 }
 0x8c6   :  { %5029 = vmatprep.subr.bf16.mxu0 %v6956_v11  ;;  %5061 = vmatprep.subr.bf16.mxu1 %v6958_v3 }
 0x8c9   :  { %5031 = vmatpush1.bf16.msra.mxu0 %v6964_v18  ;;  %5063 = vmatpush1.bf16.msra.mxu1 %v6966_v25 }
 0x8ca   :  { %5033 = vmatprep.subr.bf16.mxu0 %v6970_v35  ;;  %5065 = vmatprep.subr.bf16.mxu1 %v6972_v9 }
 0x8cd   :  { %5035 = vmatpush1.bf16.msra.mxu0 %v6978_v37  ;;  %5067 = vmatpush1.bf16.msra.mxu1 %v6980_v5 }
 0x8ce   :  { %5037 = vmatprep.subr.bf16.mxu0 %v6984_v2  ;;  %5069 = vmatprep.subr.bf16.mxu1 %v6986_v24 }
 0x8d1   :  { %5039 = vmatpush1.bf16.msra.mxu0 %v6990_v31  ;;  %5071 = vmatpush1.bf16.msra.mxu1 %v6992_v55 }
 0x8d2   :  { %5041 = vmatprep.subr.bf16.mxu0 %v6996_v61  ;;  %5073 = vmatprep.subr.bf16.mxu1 %v6998_v48 }
 0x8d5   :  { %5043 = vmatpush1.bf16.msra.mxu0 %v7002_v29  ;;  %5075 = vmatpush1.bf16.msra.mxu1 %v7004_v40 }
 0x8d6   :  { %5045 = vmatprep.subr.bf16.mxu0 %v7008_v51  ;;  %5077 = vmatprep.subr.bf16.mxu1 %v7010_v58 }
 0x8d9   :  { %5047 = vmatpush1.bf16.msra.mxu0 %v7014_v17  ;;  %5079 = vmatpush1.bf16.msra.mxu1 %v7016_v49 }
 0x8da   :  { %5049 = vmatprep.subr.bf16.mxu0 %v7020_v36  ;;  %5081 = vmatprep.subr.bf16.mxu1 %v7022_v42 }
 0x8dd   :  { %5051 = vmatpush1.bf16.msra.mxu0 %v7026_v54  ;;  %5083 = vmatpush1.bf16.msra.mxu1 %v7028_v7 }
 0x8de   :  { %5085 = vmatprep.subr.bf16.mxu0 %v6903_v57  ;;  %5117 = vmatprep.subr.bf16.mxu1 %v6905_v12 }
 0x973   :  { %v2233_v13 = vpop.f32.mrb[20].mxu0  ;;  %v2310_v19 = vpop.f32.mrb[20].mxu1 }
 0x974   :  { %v2234_v21 = vadd.f32 %v2233_v13, %v2150_v0  ;;  %v2311_v27 = vadd.f32 %v2310_v19, %v2158_v22  ;;  %v2235_v28 = vpop.f32.mrb[21].mxu0  ;;  %v2312_v41 = vpop.f32.mrb[21].mxu1 }
 0x975   :  { %v2236_v45 = vadd.f32 %v2235_v28, %v2154_v63  ;;  %v2313_v1 = vadd.f32 %v2312_v41, %v2162_v23 }
 0x976   :  { %v2418_v20 = vrot.slane %v2234_v21, 6  ;;  %v2420_v43 = vrot.slane %v2311_v27, 6  ;;  %v2430_v16 = vrot.slane %v2234_v21, 2  ;;  %v2432_v34 = vrot.slane %v2311_v27, 2 }
 0x977   :  { %v2239_v4 = vpop.f32.mrb[22].mxu0  ;;  %v2316_v8 = vpop.f32.mrb[22].mxu1  ;;  %v2419_v30 = vrot.slane %v2236_v45, 6  ;;  %v2421_v15 = vrot.slane %v2313_v1, 6  ;;  %v2431_v26 = vrot.slane %v2236_v45, 2  ;;  %v2433_v13 = vrot.slane %v2313_v1, 2 }
 0x978   :  { %v2240_v46 = vadd.f32 %v2239_v4, %v2150_v0  ;;  %v2317_v14 = vadd.f32 %v2316_v8, %v2158_v22  ;;  %v2241_v59 = vpop.f32.mrb[23].mxu0  ;;  %v2318_v44 = vpop.f32.mrb[23].mxu1 }
 0x979   :  { %v2242_v10 = vadd.f32 %v2241_v59, %v2154_v63  ;;  %v2319_v62 = vadd.f32 %v2318_v44, %v2162_v23 }
 0x97a   :  { %v2390_v19 = vrot.slane %v2240_v46, 6  ;;  %v2392_v47 = vrot.slane %v2317_v14, 6  ;;  %v2402_v28 = vrot.slane %v2240_v46, 2  ;;  %v2404_v41 = vrot.slane %v2317_v14, 2 }
 0x97b   :  { %v2391_v50 = vrot.slane %v2242_v10, 6  ;;  %v2393_v56 = vrot.slane %v2319_v62, 6  ;;  %v2403_v12 = vrot.slane %v2242_v10, 2  ;;  %v2405_v57 = vrot.slane %v2319_v62, 2 }
 0x97c   :  { %v7085_v0 = vsel %vm157_vm7, %v2234_v21, %v2390_v19  ;;  %v7089_v4 = vsel %vm6252_vm9, %v2311_v27, %v2392_v47  ;;  %v7093_v63 = vsel %vm157_vm7, %v2234_v21, %v2402_v28  ;;  %v7097_v23 = vsel %vm6252_vm9, %v2311_v27, %v2404_v41 }
 0x97d   :  { %v7101_v59 = vsel %vm6248_vm8, %v2236_v45, %v2391_v50  ;;  %v7105_v19 = vsel %vm6256_vm10, %v2313_v1, %v2393_v56  ;;  %v7109_v47 = vsel %vm6248_vm8, %v2236_v45, %v2403_v12  ;;  %v7113_v21 = vsel %vm6256_vm10, %v2313_v1, %v2405_v57 }
 0x97e   :  { %v7117_v27 = vsel %vm157_vm7, %v2240_v46, %v2418_v20  ;;  %v7121_v50 = vsel %vm6252_vm9, %v2317_v14, %v2420_v43  ;;  %v7125_v56 = vsel %vm6248_vm8, %v2242_v10, %v2419_v30  ;;  %v7129_v12 = vsel %vm6256_vm10, %v2319_v62, %v2421_v15 }
 0x97f   :  { %7734 = vst [vmem:[#allocation18_spill] sm:$0xff] %v7121_v50  ;;  %7735 = vst [vmem:[#allocation16_spill] sm:$0xff] %v7129_v12  ;;  %v7133_v57 = vsel %vm157_vm7, %v2240_v46, %v2430_v16  ;;  %v7137_v45 = vsel %vm6252_vm9, %v2317_v14, %v2432_v34  ;;  %v7141_v1 = vsel %vm6248_vm8, %v2242_v10, %v2431_v26 }
 0x980   :  { %7736 = vst [vmem:[#allocation6_spill] sm:$0xff] %v7133_v57  ;;  %7737 = vst [vmem:[#allocation20_spill] sm:$0xff] %v7137_v45  ;;  %v7145_v20 = vsel %vm6256_vm10, %v2319_v62, %v2433_v13 }
 0x981   :  { %7738 = vst [vmem:[#allocation7_spill] sm:$0xff] %v7141_v1  ;;  %7739 = vst [vmem:[#allocation10_spill] sm:$0xff] %v7145_v20 }
 0x993   :  { %v2508_v43 = vpop.f32.mrb[24].mxu0  ;;  %v2579_v30 = vpop.f32.mrb[24].mxu1 }
 0x994   :  { %v2584_v15 = vadd.f32 %v2508_v43, %v7085_v0  ;;  %v2510_v28 = vpop.f32.mrb[25].mxu0  ;;  %v2581_v41 = vpop.f32.mrb[25].mxu1  ;;  %v2586_v10 = vadd.f32 %v2579_v30, %v7089_v4 }
 0x995   :  { %v2585_v16 = vadd.f32 %v2510_v28, %v7101_v59  ;;  %v2587_v34 = vadd.f32 %v2581_v41, %v7105_v19 }
 0x996   :  { %v4238_v46 = vmul.f32 -1.442695, %v2584_v15 }
 0x997   :  { %v4239_v22 = vmul.f32 -1.442695, %v2585_v16  ;;  %v4240_v14 = vmul.f32 -1.442695, %v2587_v34 }
 0x998   :  { %5632 = vpow2.f32 %v4238_v46 }
 0x999   :  { %5634 = vpow2.f32 %v4239_v22 }
 0x99a   :  { %5636 = vpow2.f32 %v4240_v14  ;;  %v7157_v14 = vld [vmem:[%s7614_s1] sm:$0x3] }
 0x99b   :  { %5638 = vtanh.f32 %v2586_v10 }
 0x9a2   :  { %v5633_v26 = vpop.eup %5632 }
 0x9a3   :  { %v5635_v62 = vpop.eup %5634  ;;  %v2591_v13 = vadd.f32 1.0, %v5633_v26  ;;  %v7741_v26 = vld [vmem:[#allocation19_spill] sm:$0xff] }
 0x9a4   :  { %v2597_v8 = vadd.f32 1.0, %v5635_v62  ;;  %v5637_v44 = vpop.eup %5636 }
 0x9a5   :  { %5640 = vrcp.f32 %v2591_v13  ;;  %v5639_v43 = vpop.eup %5638  ;;  %v2604_v46 = vadd.f32 1.0, %v5637_v44  ;;  %v7742_v13 = vld [vmem:[#allocation15_spill] sm:$0xff] }
 0x9a6   :  { %5642 = vrcp.f32 %v2597_v8  ;;  %v7743_v8 = vld [vmem:[#allocation17_spill] sm:$0xff] }
 0x9a7   :  { %5644 = vrcp.f32 %v2604_v46 }
 0x9af   :  { %v5641_v28 = vpop.eup %5640 }
 0x9b0   :  { %v5643_v15 = vpop.eup %5642  ;;  %v2608_v16 = vmul.f32 %v5641_v28, %v5639_v43 }
 0x9b1   :  { %v2607_v22 = vmul.f32 0.0, %v5643_v15  ;;  %v5645_v30 = vpop.eup %5644 }
 0x9b3   :  { %v7151_v6 = vadd.f32 %v2608_v16, %v2607_v22 }
 0x9b5   :  { %5646 = vtanh.f32 %v7151_v6 }
 0x9bf   :  { %v5647_v41 = vpop.eup %5646 }
 0x9c0   :  { %v2611_v34 = vmul.f32 %v5647_v41, %v5645_v30 }
 0x9c2   :  { %v7160_v10 = vmul.f32 %v7157_v14, %v2611_v34 }
 0x9c4   :  { %7740 = vst [vmem:[#allocation9_spill] sm:$0xff] %v7160_v10  ;;  %v7164_v62 = vadd.f32 %v7160_v10, %v7741_v26 }
 0x9c6   :  { %2681 = vmatmul.mubr.f32.vlgmr.msra.gmra.mrb[26].mxu0 %v7164_v62  ;;  %2752 = vmatmul.mubr.f32.vlgmr.msra.gmra.mrb[26].mxu1 %v7164_v62 }
 0x9c7   :  { %5087 = vmatpush1.bf16.msra.mxu0 %v6936_v38  ;;  %5119 = vmatpush1.bf16.msra.mxu1 %v6938_v32 }
 0x9c8   :  { %5089 = vmatprep.subr.bf16.mxu0 %v6942_v33  ;;  %5121 = vmatprep.subr.bf16.mxu1 %v6944_v39 }
 0x9c9   :  { %2877 = vmatprep.mubr.f32.mxu0 %v7704_v60  ;;  %2948 = vmatprep.mubr.f32.mxu1 %v7704_v60 }
 0x9cb   :  { %5091 = vmatpush1.bf16.msra.mxu0 %v6950_v52  ;;  %5123 = vmatpush1.bf16.msra.mxu1 %v6952_v53 }
 0x9cc   :  { %5093 = vmatprep.subr.bf16.mxu0 %v6956_v11  ;;  %5125 = vmatprep.subr.bf16.mxu1 %v6958_v3 }
 0x9cf   :  { %5095 = vmatpush1.bf16.msra.mxu0 %v6964_v18  ;;  %5127 = vmatpush1.bf16.msra.mxu1 %v6966_v25 }
 0x9d0   :  { %5097 = vmatprep.subr.bf16.mxu0 %v6970_v35  ;;  %5129 = vmatprep.subr.bf16.mxu1 %v6972_v9 }
 0x9d3   :  { %5099 = vmatpush1.bf16.msra.mxu0 %v6978_v37  ;;  %5131 = vmatpush1.bf16.msra.mxu1 %v6980_v5 }
 0x9d4   :  { %5101 = vmatprep.subr.bf16.mxu0 %v6984_v2  ;;  %5133 = vmatprep.subr.bf16.mxu1 %v6986_v24 }
 0x9d7   :  { %5103 = vmatpush1.bf16.msra.mxu0 %v6990_v31  ;;  %5135 = vmatpush1.bf16.msra.mxu1 %v6992_v55 }
 0x9d8   :  { %5105 = vmatprep.subr.bf16.mxu0 %v6996_v61  ;;  %5137 = vmatprep.subr.bf16.mxu1 %v6998_v48 }
 0x9db   :  { %5107 = vmatpush1.bf16.msra.mxu0 %v7002_v29  ;;  %5139 = vmatpush1.bf16.msra.mxu1 %v7004_v40 }
 0x9dc   :  { %5109 = vmatprep.subr.bf16.mxu0 %v7008_v51  ;;  %5141 = vmatprep.subr.bf16.mxu1 %v7010_v58 }
 0x9df   :  { %5111 = vmatpush1.bf16.msra.mxu0 %v7014_v17  ;;  %5143 = vmatpush1.bf16.msra.mxu1 %v7016_v49 }
 0x9e0   :  { %5113 = vmatprep.subr.bf16.mxu0 %v7020_v36  ;;  %5145 = vmatprep.subr.bf16.mxu1 %v7022_v42 }
 0x9e3   :  { %5115 = vmatpush1.bf16.msra.mxu0 %v7026_v54  ;;  %5147 = vmatpush1.bf16.msra.mxu1 %v7028_v7 }
 0x9e4   :  { %5149 = vmatprep.subr.bf16.mxu0 %v7742_v13  ;;  %5181 = vmatprep.subr.bf16.mxu1 %v7743_v8 }
 0xa99   :  { %v2682_v44 = vpop.f32.mrb[26].mxu0  ;;  %v2753_v43 = vpop.f32.mrb[26].mxu1 }
 0xa9a   :  { %v2762_v28 = vrot.slane %v2682_v44, 6  ;;  %v2684_v15 = vpop.f32.mrb[27].mxu0  ;;  %v2755_v16 = vpop.f32.mrb[27].mxu1  ;;  %v2764_v20 = vrot.slane %v2753_v43, 6 }
 0xa9b   :  { %v2763_v46 = vrot.slane %v2684_v15, 6  ;;  %v2765_v10 = vrot.slane %v2755_v16, 6 }
 0xa9c   :  { %v2770_v22 = vadd.f32 %v2762_v28, %v7093_v63  ;;  %v2772_v57 = vadd.f32 %v2764_v20, %v7097_v23  ;;  %v2614_v28 = vmul.f32 %v7157_v14, %v7151_v6  ;;  %v5761_v6 = vld [vmem:[%s7614_s1 + $0x2] sm:$0x3] }
 0xa9d   :  { %v2771_v30 = vadd.f32 %v2763_v46, %v7109_v47  ;;  %v2773_v45 = vadd.f32 %v2765_v10, %v7113_v21 }
 0xa9e   :  { %v4241_v41 = vmul.f32 -1.442695, %v2770_v22  ;;  %v2615_v16 = vadd.f32 %v2614_v28, %v7741_v26 }
 0xa9f   :  { %v4242_v34 = vmul.f32 -1.442695, %v2771_v30  ;;  %v4243_v1 = vmul.f32 -1.442695, %v2773_v45 }
 0xaa0   :  { %5648 = vpow2.f32 %v4241_v41  ;;  %v2794_v43 = vrot.slane %v2615_v16, 6 }
 0xaa1   :  { %5650 = vpow2.f32 %v4242_v34 }
 0xaa2   :  { %5652 = vpow2.f32 %v4243_v1 }
 0xaa3   :  { %5654 = vtanh.f32 %v2772_v57  ;;  %v7744_v57 = vld [vmem:[#allocation5_spill] sm:$0xff] }
 0xaaa   :  { %v5649_v50 = vpop.eup %5648 }
 0xaab   :  { %v5651_v44 = vpop.eup %5650  ;;  %v2777_v12 = vadd.f32 1.0, %v5649_v50 }
 0xaac   :  { %v2783_v15 = vadd.f32 1.0, %v5651_v44  ;;  %v5653_v46 = vpop.eup %5652 }
 0xaad   :  { %5656 = vrcp.f32 %v2777_v12  ;;  %v5655_v22 = vpop.eup %5654  ;;  %v2790_v20 = vadd.f32 1.0, %v5653_v46  ;;  %v2811_v12 = vmul.f32 %v2615_v16, %v7744_v57  ;;  %v2805_v46 = vmul.f32 %v7164_v62, %v7744_v57 }
 0xaae   :  { %5658 = vrcp.f32 %v2783_v15 }
 0xaaf   :  { %5660 = vrcp.f32 %v2790_v20 }
 0xab7   :  { %v5657_v10 = vpop.eup %5656 }
 0xab8   :  { %v5659_v45 = vpop.eup %5658  ;;  %v2797_v30 = vmul.f32 %v5657_v10, %v5655_v22 }
 0xab9   :  { %v2796_v41 = vmul.f32 %v5659_v45, %v2794_v43  ;;  %v5661_v26 = vpop.eup %5660 }
 0xabb   :  { %v2798_v34 = vadd.f32 %v2797_v30, %v2796_v41 }
 0xabd   :  { %5662 = vtanh.f32 %v2798_v34  ;;  %v2808_v50 = vrot.slane %v2798_v34, 2 }
 0xabf   :  { %v2810_v1 = vmul.f32 %v5761_v6, %v2808_v50 }
 0xac1   :  { %v7213_v14 = vadd.f32 %v2811_v12, %v2810_v1 }
 0xac7   :  { %v5663_v44 = vpop.eup %5662 }
 0xac8   :  { %v2800_v15 = vmul.f32 %v5663_v44, %v5661_v26 }
 0xaca   :  { %v2802_v28 = vrot.slane %v2800_v15, 2 }
 0xacc   :  { %v7215_v22 = vmul.f32 %v5761_v6, %v2802_v28 }
 0xace   :  { %7745 = vst [vmem:[#allocation11_spill] sm:$0xff] %v7215_v22  ;;  %v7220_v10 = vadd.f32 %v2805_v46, %v7215_v22 }
 0xad0   :  { %2878 = vmatmul.mubr.f32.vlgmr.msra.gmra.mrb[28].mxu0 %v7220_v10  ;;  %2949 = vmatmul.mubr.f32.vlgmr.msra.gmra.mrb[28].mxu1 %v7220_v10 }
 0xad1   :  { %5151 = vmatpush1.bf16.msra.mxu0 %v6936_v38  ;;  %5183 = vmatpush1.bf16.msra.mxu1 %v6938_v32 }
 0xad2   :  { %5153 = vmatprep.subr.bf16.mxu0 %v6942_v33  ;;  %5185 = vmatprep.subr.bf16.mxu1 %v6944_v39 }
 0xad3   :  { %3074 = vmatprep.mubr.f32.mxu0 %v7704_v60  ;;  %3145 = vmatprep.mubr.f32.mxu1 %v7704_v60 }
 0xad5   :  { %5155 = vmatpush1.bf16.msra.mxu0 %v6950_v52  ;;  %5187 = vmatpush1.bf16.msra.mxu1 %v6952_v53 }
 0xad6   :  { %5157 = vmatprep.subr.bf16.mxu0 %v6956_v11  ;;  %5189 = vmatprep.subr.bf16.mxu1 %v6958_v3 }
 0xad9   :  { %5159 = vmatpush1.bf16.msra.mxu0 %v6964_v18  ;;  %5191 = vmatpush1.bf16.msra.mxu1 %v6966_v25 }
 0xada   :  { %5161 = vmatprep.subr.bf16.mxu0 %v6970_v35  ;;  %5193 = vmatprep.subr.bf16.mxu1 %v6972_v9 }
 0xadd   :  { %5163 = vmatpush1.bf16.msra.mxu0 %v6978_v37  ;;  %5195 = vmatpush1.bf16.msra.mxu1 %v6980_v5 }
 0xade   :  { %5165 = vmatprep.subr.bf16.mxu0 %v6984_v2  ;;  %5197 = vmatprep.subr.bf16.mxu1 %v6986_v24 }
 0xae1   :  { %5167 = vmatpush1.bf16.msra.mxu0 %v6990_v31  ;;  %5199 = vmatpush1.bf16.msra.mxu1 %v6992_v55 }
 0xae2   :  { %5169 = vmatprep.subr.bf16.mxu0 %v6996_v61  ;;  %5201 = vmatprep.subr.bf16.mxu1 %v6998_v48 }
 0xae5   :  { %5171 = vmatpush1.bf16.msra.mxu0 %v7002_v29  ;;  %5203 = vmatpush1.bf16.msra.mxu1 %v7004_v40 }
 0xae6   :  { %5173 = vmatprep.subr.bf16.mxu0 %v7008_v51  ;;  %5205 = vmatprep.subr.bf16.mxu1 %v7010_v58 }
 0xae9   :  { %5175 = vmatpush1.bf16.msra.mxu0 %v7014_v17  ;;  %5207 = vmatpush1.bf16.msra.mxu1 %v7016_v49 }
 0xaea   :  { %5177 = vmatprep.subr.bf16.mxu0 %v7020_v36  ;;  %5209 = vmatprep.subr.bf16.mxu1 %v7022_v42 }
 0xaed   :  { %5179 = vmatpush1.bf16.msra.mxu0 %v7026_v54  ;;  %5211 = vmatpush1.bf16.msra.mxu1 %v7028_v7 }
 0xaee   :  { %5213 = vmatprep.subr.bf16.mxu0 %v7742_v13  ;;  %5245 = vmatprep.subr.bf16.mxu1 %v7743_v8 }
 0xba3   :  { %v2879_v62 = vpop.f32.mrb[28].mxu0  ;;  %v2950_v16 = vpop.f32.mrb[28].mxu1 }
 0xba4   :  { %v2959_v43 = vrot.slane %v2879_v62, 4  ;;  %v2881_v45 = vpop.f32.mrb[29].mxu0  ;;  %v2952_v30 = vpop.f32.mrb[29].mxu1  ;;  %v2961_v1 = vrot.slane %v2950_v16, 4 }
 0xba5   :  { %v2960_v20 = vrot.slane %v2881_v45, 4  ;;  %v2962_v12 = vrot.slane %v2952_v30, 4  ;;  %v2991_v45 = vrot.slane %v7213_v14, 4 }
 0xba6   :  { %v2967_v41 = vadd.f32 %v2959_v43, %v7085_v0  ;;  %v2969_v44 = vadd.f32 %v2961_v1, %v7089_v4 }
 0xba7   :  { %v2968_v34 = vadd.f32 %v2960_v20, %v7101_v59  ;;  %v2970_v6 = vadd.f32 %v2962_v12, %v7105_v19 }
 0xba8   :  { %v4244_v50 = vmul.f32 -1.442695, %v2967_v41 }
 0xba9   :  { %v4245_v57 = vmul.f32 -1.442695, %v2968_v34  ;;  %v4246_v26 = vmul.f32 -1.442695, %v2970_v6  ;;  %v5762_v34 = vld [vmem:[%s7614_s1 + $0x4] sm:$0x3] }
 0xbaa   :  { %5664 = vpow2.f32 %v4244_v50 }
 0xbab   :  { %5666 = vpow2.f32 %v4245_v57  ;;  %v7746_v57 = vld [vmem:[#allocation21_spill] sm:$0xff] }
 0xbac   :  { %5668 = vpow2.f32 %v4246_v26  ;;  %v3008_v12 = vmul.f32 %v7213_v14, %v7746_v57 }
 0xbad   :  { %5670 = vtanh.f32 %v2969_v44 }
 0xbb4   :  { %v5665_v15 = vpop.eup %5664 }
 0xbb5   :  { %v5667_v28 = vpop.eup %5666  ;;  %v2974_v46 = vadd.f32 1.0, %v5665_v15 }
 0xbb6   :  { %v2980_v62 = vadd.f32 1.0, %v5667_v28  ;;  %v5669_v0 = vpop.eup %5668 }
 0xbb7   :  { %5672 = vrcp.f32 %v2974_v46  ;;  %v5671_v59 = vpop.eup %5670  ;;  %v2987_v19 = vadd.f32 1.0, %v5669_v0  ;;  %v3002_v46 = vmul.f32 %v7220_v10, %v7746_v57 }
 0xbb8   :  { %5674 = vrcp.f32 %v2980_v62 }
 0xbb9   :  { %5676 = vrcp.f32 %v2987_v19 }
 0xbc1   :  { %v5673_v43 = vpop.eup %5672 }
 0xbc2   :  { %v5675_v30 = vpop.eup %5674  ;;  %v2994_v20 = vmul.f32 %v5673_v43, %v5671_v59 }
 0xbc3   :  { %v2993_v16 = vmul.f32 %v5675_v30, %v2991_v45  ;;  %v5677_v1 = vpop.eup %5676 }
 0xbc5   :  { %v2995_v41 = vadd.f32 %v2994_v20, %v2993_v16 }
 0xbc7   :  { %5678 = vtanh.f32 %v2995_v41  ;;  %v3005_v4 = vrot.slane %v2995_v41, 4 }
 0xbc9   :  { %v3007_v50 = vmul.f32 %v5762_v34, %v3005_v4 }
 0xbcb   :  { %v7268_v6 = vadd.f32 %v3008_v12, %v3007_v50 }
 0xbd1   :  { %v5679_v26 = vpop.eup %5678 }
 0xbd2   :  { %v2997_v44 = vmul.f32 %v5679_v26, %v5677_v1 }
 0xbd4   :  { %v2999_v15 = vrot.slane %v2997_v44, 4 }
 0xbd6   :  { %v7270_v28 = vmul.f32 %v5762_v34, %v2999_v15 }
 0xbd8   :  { %v7275_v62 = vadd.f32 %v3002_v46, %v7270_v28  ;;  %v3188_v46 = vrot.slane %v7268_v6, 2 }
 0xbda   :  { %3075 = vmatmul.mubr.f32.vlgmr.msra.gmra.mrb[30].mxu0 %v7275_v62  ;;  %3146 = vmatmul.mubr.f32.vlgmr.msra.gmra.mrb[30].mxu1 %v7275_v62 }
 0xbdb   :  { %5215 = vmatpush1.bf16.msra.mxu0 %v6936_v38  ;;  %5247 = vmatpush1.bf16.msra.mxu1 %v6938_v32 }
 0xbdc   :  { %5217 = vmatprep.subr.bf16.mxu0 %v6942_v33  ;;  %5249 = vmatprep.subr.bf16.mxu1 %v6944_v39 }
 0xbdd   :  { %3271 = vmatprep.mubr.f32.mxu0 %v7704_v60  ;;  %3342 = vmatprep.mubr.f32.mxu1 %v7704_v60 }
 0xbdf   :  { %5219 = vmatpush1.bf16.msra.mxu0 %v6950_v52  ;;  %5251 = vmatpush1.bf16.msra.mxu1 %v6952_v53 }
 0xbe0   :  { %5221 = vmatprep.subr.bf16.mxu0 %v6956_v11  ;;  %5253 = vmatprep.subr.bf16.mxu1 %v6958_v3 }
 0xbe3   :  { %5223 = vmatpush1.bf16.msra.mxu0 %v6964_v18  ;;  %5255 = vmatpush1.bf16.msra.mxu1 %v6966_v25 }
 0xbe4   :  { %5225 = vmatprep.subr.bf16.mxu0 %v6970_v35  ;;  %5257 = vmatprep.subr.bf16.mxu1 %v6972_v9 }
 0xbe7   :  { %5227 = vmatpush1.bf16.msra.mxu0 %v6978_v37  ;;  %5259 = vmatpush1.bf16.msra.mxu1 %v6980_v5 }
 0xbe8   :  { %5229 = vmatprep.subr.bf16.mxu0 %v6984_v2  ;;  %5261 = vmatprep.subr.bf16.mxu1 %v6986_v24 }
 0xbeb   :  { %5231 = vmatpush1.bf16.msra.mxu0 %v6990_v31  ;;  %5263 = vmatpush1.bf16.msra.mxu1 %v6992_v55 }
 0xbec   :  { %5233 = vmatprep.subr.bf16.mxu0 %v6996_v61  ;;  %5265 = vmatprep.subr.bf16.mxu1 %v6998_v48 }
 0xbef   :  { %5235 = vmatpush1.bf16.msra.mxu0 %v7002_v29  ;;  %5267 = vmatpush1.bf16.msra.mxu1 %v7004_v40 }
 0xbf0   :  { %5237 = vmatprep.subr.bf16.mxu0 %v7008_v51  ;;  %5269 = vmatprep.subr.bf16.mxu1 %v7010_v58 }
 0xbf3   :  { %5239 = vmatpush1.bf16.msra.mxu0 %v7014_v17  ;;  %5271 = vmatpush1.bf16.msra.mxu1 %v7016_v49 }
 0xbf4   :  { %5241 = vmatprep.subr.bf16.mxu0 %v7020_v36  ;;  %5273 = vmatprep.subr.bf16.mxu1 %v7022_v42 }
 0xbf7   :  { %5243 = vmatpush1.bf16.msra.mxu0 %v7026_v54  ;;  %5275 = vmatpush1.bf16.msra.mxu1 %v7028_v7 }
 0xbf8   :  { %5277 = vmatprep.subr.bf16.mxu0 %v7742_v13  ;;  %5309 = vmatprep.subr.bf16.mxu1 %v7743_v8 }
 0xcad   :  { %v3076_v14 = vpop.f32.mrb[30].mxu0  ;;  %v3147_v10 = vpop.f32.mrb[30].mxu1 }
 0xcae   :  { %v3156_v0 = vrot.slane %v3076_v14, 2  ;;  %v3078_v59 = vpop.f32.mrb[31].mxu0  ;;  %v3149_v43 = vpop.f32.mrb[31].mxu1  ;;  %v3158_v34 = vrot.slane %v3147_v10, 2 }
 0xcaf   :  { %v3157_v45 = vrot.slane %v3078_v59, 2  ;;  %v3159_v41 = vrot.slane %v3149_v43, 2  ;;  %v5763_v43 = vld [vmem:[%s7614_s1 + $0x6] sm:$0x3] }
 0xcb0   :  { %v3164_v30 = vadd.f32 %v3156_v0, %v7093_v63  ;;  %v3166_v57 = vadd.f32 %v3158_v34, %v7097_v23 }
 0xcb1   :  { %v3165_v20 = vadd.f32 %v3157_v45, %v7109_v47  ;;  %v3167_v4 = vadd.f32 %v3159_v41, %v7113_v21 }
 0xcb2   :  { %v4247_v19 = vmul.f32 -1.442695, %v3164_v30  ;;  %v7747_v30 = vld [vmem:[#allocation22_spill] sm:$0xff] }
 0xcb3   :  { %v4248_v16 = vmul.f32 -1.442695, %v3165_v20  ;;  %v4249_v50 = vmul.f32 -1.442695, %v3167_v4  ;;  %v3205_v20 = vmul.f32 %v7268_v6, %v7747_v30 }
 0xcb4   :  { %5680 = vpow2.f32 %v4247_v19 }
 0xcb5   :  { %5682 = vpow2.f32 %v4248_v16 }
 0xcb6   :  { %5684 = vpow2.f32 %v4249_v50 }
 0xcb7   :  { %5686 = vtanh.f32 %v3166_v57  ;;  %v3199_v57 = vmul.f32 %v7275_v62, %v7747_v30 }
 0xcbe   :  { %v5681_v12 = vpop.eup %5680 }
 0xcbf   :  { %v5683_v1 = vpop.eup %5682  ;;  %v3171_v26 = vadd.f32 1.0, %v5681_v12 }
 0xcc0   :  { %v3177_v44 = vadd.f32 1.0, %v5683_v1  ;;  %v5685_v63 = vpop.eup %5684 }
 0xcc1   :  { %5688 = vrcp.f32 %v3171_v26  ;;  %v5687_v47 = vpop.eup %5686  ;;  %v3184_v21 = vadd.f32 1.0, %v5685_v63 }
 0xcc2   :  { %5690 = vrcp.f32 %v3177_v44 }
 0xcc3   :  { %5692 = vrcp.f32 %v3184_v21  ;;  %v7749_v21 = vld [vmem:[#allocation18_spill] sm:$0xff] }
 0xccb   :  { %v5689_v15 = vpop.eup %5688 }
 0xccc   :  { %v5691_v14 = vpop.eup %5690  ;;  %v3191_v0 = vmul.f32 %v5689_v15, %v5687_v47 }
 0xccd   :  { %v3190_v10 = vmul.f32 %v5691_v14, %v3188_v46  ;;  %v5693_v16 = vpop.eup %5692  ;;  %v7748_v46 = vld [vmem:[#allocation16_spill] sm:$0xff] }
 0xccf   :  { %v3192_v59 = vadd.f32 %v3191_v0, %v3190_v10 }
 0xcd1   :  { %5694 = vtanh.f32 %v3192_v59  ;;  %v3202_v23 = vrot.slane %v3192_v59, 6 }
 0xcd3   :  { %v3204_v45 = vmul.f32 %v5763_v43, %v3202_v23 }
 0xcd5   :  { %v7323_v19 = vadd.f32 %v3205_v20, %v3204_v45 }
 0xcdb   :  { %v5695_v41 = vpop.eup %5694 }
 0xcdc   :  { %v3194_v4 = vmul.f32 %v5695_v41, %v5693_v16 }
 0xcde   :  { %v3196_v34 = vrot.slane %v3194_v4, 6 }
 0xce0   :  { %v7325_v50 = vmul.f32 %v5763_v43, %v3196_v34 }
 0xce2   :  { %v7330_v12 = vadd.f32 %v3199_v57, %v7325_v50 }
 0xce4   :  { %3272 = vmatmul.mubr.f32.vlgmr.msra.gmra.mrb[32].mxu0 %v7330_v12  ;;  %3343 = vmatmul.mubr.f32.vlgmr.msra.gmra.mrb[32].mxu1 %v7330_v12 }
 0xce5   :  { %5279 = vmatpush1.bf16.msra.mxu0 %v6936_v38  ;;  %5311 = vmatpush1.bf16.msra.mxu1 %v6938_v32 }
 0xce6   :  { %5281 = vmatprep.subr.bf16.mxu0 %v6942_v33  ;;  %5313 = vmatprep.subr.bf16.mxu1 %v6944_v39 }
 0xce7   :  { %3447 = vmatprep.mubr.f32.mxu0 %v7704_v60  ;;  %3518 = vmatprep.mubr.f32.mxu1 %v7704_v60 }
 0xce9   :  { %5283 = vmatpush1.bf16.msra.mxu0 %v6950_v52  ;;  %5315 = vmatpush1.bf16.msra.mxu1 %v6952_v53 }
 0xcea   :  { %5285 = vmatprep.subr.bf16.mxu0 %v6956_v11  ;;  %5317 = vmatprep.subr.bf16.mxu1 %v6958_v3 }
 0xced   :  { %5287 = vmatpush1.bf16.msra.mxu0 %v6964_v18  ;;  %5319 = vmatpush1.bf16.msra.mxu1 %v6966_v25 }
 0xcee   :  { %5289 = vmatprep.subr.bf16.mxu0 %v6970_v35  ;;  %5321 = vmatprep.subr.bf16.mxu1 %v6972_v9 }
 0xcf1   :  { %5291 = vmatpush1.bf16.msra.mxu0 %v6978_v37  ;;  %5323 = vmatpush1.bf16.msra.mxu1 %v6980_v5 }
 0xcf2   :  { %5293 = vmatprep.subr.bf16.mxu0 %v6984_v2  ;;  %5325 = vmatprep.subr.bf16.mxu1 %v6986_v24 }
 0xcf5   :  { %5295 = vmatpush1.bf16.msra.mxu0 %v6990_v31  ;;  %5327 = vmatpush1.bf16.msra.mxu1 %v6992_v55 }
 0xcf6   :  { %5297 = vmatprep.subr.bf16.mxu0 %v6996_v61  ;;  %5329 = vmatprep.subr.bf16.mxu1 %v6998_v48 }
 0xcf9   :  { %5299 = vmatpush1.bf16.msra.mxu0 %v7002_v29  ;;  %5331 = vmatpush1.bf16.msra.mxu1 %v7004_v40 }
 0xcfa   :  { %5301 = vmatprep.subr.bf16.mxu0 %v7008_v51  ;;  %5333 = vmatprep.subr.bf16.mxu1 %v7010_v58 }
 0xcfd   :  { %5303 = vmatpush1.bf16.msra.mxu0 %v7014_v17  ;;  %5335 = vmatpush1.bf16.msra.mxu1 %v7016_v49 }
 0xcfe   :  { %5305 = vmatprep.subr.bf16.mxu0 %v7020_v36  ;;  %5337 = vmatprep.subr.bf16.mxu1 %v7022_v42 }
 0xd01   :  { %5307 = vmatpush1.bf16.msra.mxu0 %v7026_v54  ;;  %5339 = vmatpush1.bf16.msra.mxu1 %v7028_v7 }
 0xd02   :  { %5341 = vmatprep.subr.bf16.mxu0 %v7742_v13  ;;  %5373 = vmatprep.subr.bf16.mxu1 %v7743_v8 }
 0xdb7   :  { %v3273_v6 = vpop.f32.mrb[32].mxu0  ;;  %v3344_v62 = vpop.f32.mrb[32].mxu1 }
 0xdb8   :  { %v3349_v1 = vadd.f32 %v3273_v6, %v7117_v27  ;;  %v3275_v26 = vpop.f32.mrb[33].mxu0  ;;  %v3346_v44 = vpop.f32.mrb[33].mxu1  ;;  %v3351_v10 = vadd.f32 %v3344_v62, %v7749_v21 }
 0xdb9   :  { %v3350_v63 = vadd.f32 %v3275_v26, %v7125_v56  ;;  %v3352_v14 = vadd.f32 %v3346_v44, %v7748_v46  ;;  %v7379_v44 = vld [vmem:[%s7614_s1 + $0x8] sm:$0x3] }
 0xdba   :  { %v4250_v47 = vmul.f32 -1.442695, %v3349_v1 }
 0xdbb   :  { %v4251_v15 = vmul.f32 -1.442695, %v3350_v63  ;;  %v4252_v0 = vmul.f32 -1.442695, %v3352_v14 }
 0xdbc   :  { %5696 = vpow2.f32 %v4250_v47  ;;  %v7750_v47 = vld [vmem:[#allocation13_spill] sm:$0xff] }
 0xdbd   :  { %5698 = vpow2.f32 %v4251_v15  ;;  %v3378_v15 = vmul.f32 %v7330_v12, %v7750_v47 }
 0xdbe   :  { %5700 = vpow2.f32 %v4252_v0 }
 0xdbf   :  { %5702 = vtanh.f32 %v3351_v10 }
 0xdc6   :  { %v5697_v59 = vpop.eup %5696 }
 0xdc7   :  { %v5699_v23 = vpop.eup %5698  ;;  %v3356_v43 = vadd.f32 1.0, %v5697_v59 }
 0xdc8   :  { %v3362_v45 = vadd.f32 1.0, %v5699_v23  ;;  %v5701_v30 = vpop.eup %5700 }
 0xdc9   :  { %5704 = vrcp.f32 %v3356_v43  ;;  %v5703_v20 = vpop.eup %5702  ;;  %v3369_v34 = vadd.f32 1.0, %v5701_v30 }
 0xdca   :  { %5706 = vrcp.f32 %v3362_v45  ;;  %v7751_v45 = vld [vmem:[#allocation6_spill] sm:$0xff] }
 0xdcb   :  { %5708 = vrcp.f32 %v3369_v34 }
 0xdd3   :  { %v5705_v16 = vpop.eup %5704 }
 0xdd4   :  { %v5707_v41 = vpop.eup %5706  ;;  %v3373_v4 = vmul.f32 %v5705_v16, %v5703_v20  ;;  %v7752_v20 = vld [vmem:[#allocation7_spill] sm:$0xff] }
 0xdd5   :  { %v3372_v57 = vmul.f32 %v5707_v41, %v7323_v19  ;;  %v5709_v62 = vpop.eup %5708 }
 0xdd7   :  { %v7373_v6 = vadd.f32 %v3373_v4, %v3372_v57  ;;  %v7753_v57 = vld [vmem:[#allocation10_spill] sm:$0xff] }
 0xdd9   :  { %5710 = vtanh.f32 %v7373_v6 }
 0xde3   :  { %v5711_v1 = vpop.eup %5710 }
 0xde4   :  { %v3376_v26 = vmul.f32 %v5711_v1, %v5709_v62 }
 0xde6   :  { %v7382_v63 = vmul.f32 %v7379_v44, %v3376_v26 }
 0xde8   :  { %v7387_v14 = vadd.f32 %v3378_v15, %v7382_v63 }
 0xdea   :  { %3448 = vmatmul.mubr.f32.vlgmr.msra.gmra.mrb[34].mxu0 %v7387_v14  ;;  %3519 = vmatmul.mubr.f32.vlgmr.msra.gmra.mrb[34].mxu1 %v7387_v14 }
 0xdeb   :  { %5343 = vmatpush1.bf16.msra.mxu0 %v6936_v38  ;;  %5375 = vmatpush1.bf16.msra.mxu1 %v6938_v32 }
 0xdec   :  { %5345 = vmatprep.subr.bf16.mxu0 %v6942_v33  ;;  %5377 = vmatprep.subr.bf16.mxu1 %v6944_v39 }
 0xded   :  { %3644 = vmatprep.mubr.f32.mxu0 %v7704_v60  ;;  %3715 = vmatprep.mubr.f32.mxu1 %v7704_v60 }
 0xdef   :  { %5347 = vmatpush1.bf16.msra.mxu0 %v6950_v52  ;;  %5379 = vmatpush1.bf16.msra.mxu1 %v6952_v53 }
 0xdf0   :  { %5349 = vmatprep.subr.bf16.mxu0 %v6956_v11  ;;  %5381 = vmatprep.subr.bf16.mxu1 %v6958_v3 }
 0xdf3   :  { %5351 = vmatpush1.bf16.msra.mxu0 %v6964_v18  ;;  %5383 = vmatpush1.bf16.msra.mxu1 %v6966_v25 }
 0xdf4   :  { %5353 = vmatprep.subr.bf16.mxu0 %v6970_v35  ;;  %5385 = vmatprep.subr.bf16.mxu1 %v6972_v9 }
 0xdf7   :  { %5355 = vmatpush1.bf16.msra.mxu0 %v6978_v37  ;;  %5387 = vmatpush1.bf16.msra.mxu1 %v6980_v5 }
 0xdf8   :  { %5357 = vmatprep.subr.bf16.mxu0 %v6984_v2  ;;  %5389 = vmatprep.subr.bf16.mxu1 %v6986_v24 }
 0xdfb   :  { %5359 = vmatpush1.bf16.msra.mxu0 %v6990_v31  ;;  %5391 = vmatpush1.bf16.msra.mxu1 %v6992_v55 }
 0xdfc   :  { %5361 = vmatprep.subr.bf16.mxu0 %v6996_v61  ;;  %5393 = vmatprep.subr.bf16.mxu1 %v6998_v48 }
 0xdff   :  { %5363 = vmatpush1.bf16.msra.mxu0 %v7002_v29  ;;  %5395 = vmatpush1.bf16.msra.mxu1 %v7004_v40 }
 0xe00   :  { %5365 = vmatprep.subr.bf16.mxu0 %v7008_v51  ;;  %5397 = vmatprep.subr.bf16.mxu1 %v7010_v58 }
 0xe03   :  { %5367 = vmatpush1.bf16.msra.mxu0 %v7014_v17  ;;  %5399 = vmatpush1.bf16.msra.mxu1 %v7016_v49 }
 0xe04   :  { %5369 = vmatprep.subr.bf16.mxu0 %v7020_v36  ;;  %5401 = vmatprep.subr.bf16.mxu1 %v7022_v42 }
 0xe07   :  { %5371 = vmatpush1.bf16.msra.mxu0 %v7026_v54  ;;  %5403 = vmatpush1.bf16.msra.mxu1 %v7028_v7 }
 0xe08   :  { %5405 = vmatprep.subr.bf16.mxu0 %v7742_v13  ;;  %5437 = vmatprep.subr.bf16.mxu1 %v7743_v8  ;;  %v7754_v8 = vld [vmem:[#allocation20_spill] sm:$0xff] }
 0xebd   :  { %v3449_v12 = vpop.f32.mrb[34].mxu0  ;;  %v3520_v0 = vpop.f32.mrb[34].mxu1 }
 0xebe   :  { %v3529_v10 = vrot.slane %v3449_v12, 6  ;;  %v3451_v59 = vpop.f32.mrb[35].mxu0  ;;  %v3522_v23 = vpop.f32.mrb[35].mxu1  ;;  %v3531_v13 = vrot.slane %v3520_v0, 6 }
 0xebf   :  { %v3530_v43 = vrot.slane %v3451_v59, 6  ;;  %v3532_v34 = vrot.slane %v3522_v23, 6  ;;  %v3381_v23 = vmul.f32 %v7323_v19, %v7750_v47 }
 0xec0   :  { %v3537_v30 = vadd.f32 %v3529_v10, %v7751_v45  ;;  %v3539_v26 = vadd.f32 %v3531_v13, %v7754_v8  ;;  %v3380_v10 = vmul.f32 %v7379_v44, %v7373_v6  ;;  %v5765_v6 = vld [vmem:[%s7614_s1 + $0xa] sm:$0x3] }
 0xec1   :  { %v3538_v16 = vadd.f32 %v3530_v43, %v7752_v20  ;;  %v3540_v62 = vadd.f32 %v3532_v34, %v7753_v57 }
 0xec2   :  { %v4253_v41 = vmul.f32 -1.442695, %v3537_v30  ;;  %v3382_v43 = vadd.f32 %v3381_v23, %v3380_v10 }
 0xec3   :  { %v4254_v4 = vmul.f32 -1.442695, %v3538_v16  ;;  %v4255_v1 = vmul.f32 -1.442695, %v3540_v62 }
 0xec4   :  { %5712 = vpow2.f32 %v4253_v41  ;;  %v3561_v41 = vrot.slane %v3382_v43, 6 }
 0xec5   :  { %5714 = vpow2.f32 %v4254_v4 }
 0xec6   :  { %5716 = vpow2.f32 %v4255_v1 }
 0xec7   :  { %5718 = vtanh.f32 %v3539_v26  ;;  %v7755_v26 = vld [vmem:[#allocation14_spill] sm:$0xff] }
 0xec8   :  { %v3578_v19 = vmul.f32 %v3382_v43, %v7755_v26 }
 0xece   :  { %v5713_v15 = vpop.eup %5712 }
 0xecf   :  { %v5715_v12 = vpop.eup %5714  ;;  %v3544_v22 = vadd.f32 1.0, %v5713_v15 }
 0xed0   :  { %v3550_v59 = vadd.f32 1.0, %v5715_v12  ;;  %v5717_v30 = vpop.eup %5716 }
 0xed1   :  { %5720 = vrcp.f32 %v3544_v22  ;;  %v5719_v0 = vpop.eup %5718  ;;  %v3557_v62 = vadd.f32 1.0, %v5717_v30  ;;  %v3572_v30 = vmul.f32 %v7387_v14, %v7755_v26 }
 0xed2   :  { %5722 = vrcp.f32 %v3550_v59 }
 0xed3   :  { %5724 = vrcp.f32 %v3557_v62 }
 0xedb   :  { %v5721_v16 = vpop.eup %5720 }
 0xedc   :  { %v5723_v4 = vpop.eup %5722  ;;  %v3564_v34 = vmul.f32 %v5721_v16, %v5719_v0  ;;  %v7756_v16 = vld [vmem:[#allocation8_spill] sm:$0xff] }
 0xedd   :  { %v3563_v13 = vmul.f32 %v5723_v4, %v3561_v41  ;;  %v5725_v15 = vpop.eup %5724  ;;  %v3970_v4 = vsel %vm157_vm7, %v7382_v63, %v7325_v50  ;;  %vm4098_vm11 = vcmp.lt.s32.totalorder %v7756_v16, 10 }
 0xedf   :  { %v3565_v1 = vadd.f32 %v3564_v34, %v3563_v13 }
 0xee1   :  { %5726 = vtanh.f32 %v3565_v1  ;;  %v3575_v22 = vrot.slane %v3565_v1, 2 }
 0xee3   :  { %v3577_v44 = vmul.f32 %v5765_v6, %v3575_v22 }
 0xee5   :  { %v7437_v47 = vadd.f32 %v3578_v19, %v3577_v44  ;;  %v7758_v44 = vld [vmem:[#allocation11_spill] sm:$0xff] }
 0xeeb   :  { %v5727_v12 = vpop.eup %5726 }
 0xeec   :  { %v3567_v59 = vmul.f32 %v5727_v12, %v5725_v15  ;;  %v3998_v15 = vld [vmem:[%s7618_s5] sm:$0xff]  ;;  %v3999_v12 = vld [vmem:[%s7618_s5 + $0x8] sm:$0xff] }
 0xeee   :  { %v3569_v10 = vrot.slane %v3567_v59, 2  ;;  %v5468_v59 = vpack.c.bf16 %v3999_v12, %v3998_v15 }
 0xef0   :  { %v7439_v23 = vmul.f32 %v5765_v6, %v3569_v10  ;;  %v4000_v10 = vld [vmem:[%s7618_s5 + $0x10] sm:$0xff] }
 0xef2   :  { %v7444_v0 = vadd.f32 %v3572_v30, %v7439_v23  ;;  %v3971_v41 = vsel %vm157_vm7, %v7439_v23, %v7270_v28  ;;  %v4001_v30 = vld [vmem:[%s7618_s5 + $0x18] sm:$0xff] }
 0xef3   :  { %v3984_v43 = vrot.slane %v3971_v41, 6  ;;  %v4002_v41 = vld [vmem:[%s7618_s5 + $0x20] sm:$0xff] }
 0xef4   :  { %3645 = vmatmul.mubr.f32.vlgmr.msra.gmra.mrb[36].mxu0 %v7444_v0  ;;  %3716 = vmatmul.mubr.f32.vlgmr.msra.gmra.mrb[36].mxu1 %v7444_v0 }
 0xef5   :  { %5407 = vmatpush1.bf16.msra.mxu0 %v6936_v38  ;;  %5439 = vmatpush1.bf16.msra.mxu1 %v6938_v32  ;;  %v7459_v14 = vsel %vm80_vm4, %v3970_v4, %v3984_v43  ;;  %v4003_v43 = vld [vmem:[%s7618_s5 + $0x28] sm:$0xff] }
 0xef6   :  { %5409 = vmatprep.subr.bf16.mxu0 %v6942_v33  ;;  %5441 = vmatprep.subr.bf16.mxu1 %v6944_v39  ;;  %v5476_v4 = vpack.c.bf16 %v4003_v43, %v4002_v41  ;;  %v7759_v41 = vld [vmem:[#allocation9_spill] sm:$0xff] }
 0xef7   :  { %3841 = vmatprep.mubr.f32.mxu0 %v7704_v60  ;;  %3912 = vmatprep.mubr.f32.mxu1 %v7704_v60 }
 0xef9   :  { %5411 = vmatpush1.bf16.msra.mxu0 %v6950_v52  ;;  %5443 = vmatpush1.bf16.msra.mxu1 %v6952_v53 }
 0xefa   :  { %5413 = vmatprep.subr.bf16.mxu0 %v6956_v11  ;;  %5445 = vmatprep.subr.bf16.mxu1 %v6958_v3 }
 0xefd   :  { %5415 = vmatpush1.bf16.msra.mxu0 %v6964_v18  ;;  %5447 = vmatpush1.bf16.msra.mxu1 %v6966_v25 }
 0xefe   :  { %5417 = vmatprep.subr.bf16.mxu0 %v6970_v35  ;;  %5449 = vmatprep.subr.bf16.mxu1 %v6972_v9 }
 0xf01   :  { %5419 = vmatpush1.bf16.msra.mxu0 %v6978_v37  ;;  %5451 = vmatpush1.bf16.msra.mxu1 %v6980_v5 }
 0xf02   :  { %5421 = vmatprep.subr.bf16.mxu0 %v6984_v2  ;;  %5453 = vmatprep.subr.bf16.mxu1 %v6986_v24 }
 0xf05   :  { %5423 = vmatpush1.bf16.msra.mxu0 %v6990_v31  ;;  %5455 = vmatpush1.bf16.msra.mxu1 %v6992_v55 }
 0xf06   :  { %5425 = vmatprep.subr.bf16.mxu0 %v6996_v61  ;;  %5457 = vmatprep.subr.bf16.mxu1 %v6998_v48 }
 0xf09   :  { %5427 = vmatpush1.bf16.msra.mxu0 %v7002_v29  ;;  %5459 = vmatpush1.bf16.msra.mxu1 %v7004_v40  ;;  %v3758_v40 = vrot.slane %v7437_v47, 4 }
 0xf0a   :  { %5429 = vmatprep.subr.bf16.mxu0 %v7008_v51  ;;  %5461 = vmatprep.subr.bf16.mxu1 %v7010_v58 }
 0xf0d   :  { %5431 = vmatpush1.bf16.msra.mxu0 %v7014_v17  ;;  %5463 = vmatpush1.bf16.msra.mxu1 %v7016_v49 }
 0xf0e   :  { %5433 = vmatprep.subr.bf16.mxu0 %v7020_v36  ;;  %5465 = vmatprep.subr.bf16.mxu1 %v7022_v42 }
 0xf11   :  { %5435 = vmatpush1.bf16.msra.mxu0 %v7026_v54  ;;  %5467 = vmatpush1.bf16.msra.mxu1 %v7028_v7  ;;  %v5766_v54 = vld [vmem:[%s7614_s1 + $0xc] sm:$0x3] }
 0xf12   :  { %5469 = vmatprep.subr.bf16.mxu0 %v5468_v59 }
 0xfc7   :  { %v3646_v60 = vpop.f32.mrb[36].mxu0  ;;  %v3717_v38 = vpop.f32.mrb[36].mxu1 }
 0xfc8   :  { %v3726_v32 = vrot.slane %v3646_v60, 4  ;;  %v3648_v33 = vpop.f32.mrb[37].mxu0  ;;  %v3719_v39 = vpop.f32.mrb[37].mxu1  ;;  %v3728_v9 = vrot.slane %v3717_v38, 4  ;;  %v4005_v60 = vld [vmem:[%s7618_s5 + $0x38] sm:$0xff] }
 0xfc9   :  { %v3727_v52 = vrot.slane %v3648_v33, 4  ;;  %v3729_v25 = vrot.slane %v3719_v39, 4  ;;  %v4007_v33 = vld [vmem:[%s7618_s5 + $0x48] sm:$0xff] }
 0xfca   :  { %v3734_v53 = vadd.f32 %v3726_v32, %v7117_v27  ;;  %v3736_v5 = vadd.f32 %v3728_v9, %v7749_v21  ;;  %v7757_v27 = vld [vmem:[#allocation12_spill] sm:$0xff]  ;;  %v4006_v32 = vld [vmem:[%s7618_s5 + $0x40] sm:$0xff] }
 0xfcb   :  { %v3735_v11 = vadd.f32 %v3727_v52, %v7125_v56  ;;  %v3737_v35 = vadd.f32 %v3729_v25, %v7748_v46  ;;  %v3775_v56 = vmul.f32 %v7437_v47, %v7757_v27  ;;  %v3769_v22 = vmul.f32 %v7444_v0, %v7757_v27  ;;  %v4008_v52 = vld [vmem:[%s7618_s5 + $0x50] sm:$0xff]  ;;  %v4013_v9 = vld [vmem:[%s7618_s5 + $0x78] sm:$0xff] }
 0xfcc   :  { %v4256_v3 = vmul.f32 -1.442695, %v3734_v53  ;;  %v5472_v0 = vpack.c.bf16 %v4001_v30, %v4000_v10  ;;  %v5484_v39 = vpack.c.bf16 %v4007_v33, %v4006_v32  ;;  %v4009_v53 = vld [vmem:[%s7618_s5 + $0x58] sm:$0xff]  ;;  %v3969_v30 = vsel %vm157_vm7, %v7325_v50, %v7382_v63  ;;  %v4262_v63 = vld [vmem:[%s7619_s6] ss:$0 sm:$0xff] }
 0xfcd   :  { %v4257_v18 = vmul.f32 -1.442695, %v3735_v11  ;;  %v4258_v37 = vmul.f32 -1.442695, %v3737_v35  ;;  %v5488_v11 = vpack.c.bf16 %v4009_v53, %v4008_v52  ;;  %v4012_v35 = vld [vmem:[%s7618_s5 + $0x70] sm:$0xff] }
 0xfce   :  { %5728 = vpow2.f32 %v4256_v3  ;;  %v4010_v3 = vld [vmem:[%s7618_s5 + $0x60] sm:$0xff] }
 0xfcf   :  { %5730 = vpow2.f32 %v4257_v18  ;;  %v4011_v18 = vld [vmem:[%s7618_s5 + $0x68] sm:$0xff] }
 0xfd0   :  { %5732 = vpow2.f32 %v4258_v37  ;;  %v5492_v25 = vpack.c.bf16 %v4011_v18, %v4010_v3  ;;  %v5496_v37 = vpack.c.bf16 %v4013_v9, %v4012_v35 }
 0xfd1   :  { %5734 = vtanh.f32 %v3736_v5 }
 0xfd8   :  { %v5729_v2 = vpop.eup %5728 }
 0xfd9   :  { %v5731_v24 = vpop.eup %5730  ;;  %v3741_v31 = vadd.f32 1.0, %v5729_v2 }
 0xfda   :  { %v3747_v55 = vadd.f32 1.0, %v5731_v24  ;;  %v5733_v61 = vpop.eup %5732 }
 0xfdb   :  { %5736 = vrcp.f32 %v3741_v31  ;;  %v5735_v48 = vpop.eup %5734  ;;  %v3754_v17 = vadd.f32 1.0, %v5733_v61 }
 0xfdc   :  { %5738 = vrcp.f32 %v3747_v55 }
 0xfdd   :  { %5740 = vrcp.f32 %v3754_v17 }
 0xfe5   :  { %v5737_v29 = vpop.eup %5736 }
 0xfe6   :  { %v5739_v51 = vpop.eup %5738  ;;  %v3761_v58 = vmul.f32 %v5737_v29, %v5735_v48 }
 0xfe7   :  { %v3760_v49 = vmul.f32 %v5739_v51, %v3758_v40  ;;  %v5741_v21 = vpop.eup %5740 }
 0xfe9   :  { %v3762_v36 = vadd.f32 %v3761_v58, %v3760_v49 }
 0xfeb   :  { %5742 = vtanh.f32 %v3762_v36  ;;  %v3772_v42 = vrot.slane %v3762_v36, 4 }
 0xfed   :  { %v3774_v7 = vmul.f32 %v5766_v54, %v3772_v42 }
 0xfef   :  { %v7501_v46 = vadd.f32 %v3775_v56, %v3774_v7 }
 0xff5   :  { %v5743_v34 = vpop.eup %5742 }
 0xff6   :  { %v3764_v62 = vmul.f32 %v5743_v34, %v5741_v21  ;;  %v3955_v34 = vrot.slane %v7501_v46, 2  ;;  %v3968_v46 = vsel %vm157_vm7, %v7270_v28, %v7439_v23  ;;  %v3981_v23 = vrot.slane %v3969_v30, 2 }
 0xff8   :  { %v3766_v13 = vrot.slane %v3764_v62, 4 }
 0xffa   :  { %v7503_v1 = vmul.f32 %v5766_v54, %v3766_v13 }
 0xffc   :  { %v3770_v6 = vadd.f32 %v3769_v22, %v7503_v1  ;;  %v3972_v26 = vsel %vm157_vm7, %v7503_v1, %v7758_v44  ;;  %v3967_v12 = vsel %vm157_vm7, %v7758_v44, %v7503_v1  ;;  %v3978_v44 = vrot.slane %v3968_v46, 4 }
 0xffd   :  { %v3987_v19 = vrot.slane %v3972_v26, 4 }
 0xffe   :  { %3842 = vmatmul.mubr.f32.vlgmr.msra.gmra.mrb[38].mxu0 %v3770_v6  ;;  %3913 = vmatmul.mubr.f32.vlgmr.msra.gmra.mrb[38].mxu1 %v3770_v6 }
 0xfff   :  { %v7514_v47 = vsel %vm82_vm5, %v7459_v14, %v3987_v19  ;;  %5471 = vmatpush3.bf16.msra.mxu0 %v5468_v59  ;;  %v4004_v14 = vld [vmem:[%s7618_s5 + $0x30] sm:$0xff]  ;;  %v5767_v59 = vld [vmem:[%s7614_s1 + $0xe] sm:$0x3] }
0x1000   :  { %5473 = vmatprep.subr.bf16.mxu0 %v5472_v0  ;;  %v5480_v38 = vpack.c.bf16 %v4005_v60, %v4004_v14 }
0x1003   :  { %5475 = vmatpush3.bf16.msra.mxu0 %v5472_v0  ;;  %v3975_v0 = vrot.slane %v3967_v12, 6 }
0x1004   :  { %5477 = vmatprep.subr.bf16.mxu0 %v5476_v4 }
0x1007   :  { %5479 = vmatpush3.bf16.msra.mxu0 %v5476_v4 }
0x1008   :  { %5481 = vmatprep.subr.bf16.mxu0 %v5480_v38 }
0x100b   :  { %5483 = vmatpush3.bf16.msra.mxu0 %v5480_v38 }
0x100c   :  { %5485 = vmatprep.subr.bf16.mxu0 %v5484_v39 }
0x100f   :  { %5487 = vmatpush3.bf16.msra.mxu0 %v5484_v39 }
0x1010   :  { %5489 = vmatprep.subr.bf16.mxu0 %v5488_v11 }
0x1013   :  { %5491 = vmatpush3.bf16.msra.mxu0 %v5488_v11 }
0x1014   :  { %5493 = vmatprep.subr.bf16.mxu0 %v5492_v25 }
0x1017   :  { %5495 = vmatpush3.bf16.msra.mxu0 %v5492_v25 }
0x1018   :  { %5497 = vmatprep.subr.bf16.mxu0 %v5496_v37 }
0x101b   :  { %5499 = vmatpush3.bf16.msra.mxu0 %v5496_v37 }
0x10d1   :  { %v3843_v5 = vpop.f32.mrb[38].mxu0  ;;  %v3914_v2 = vpop.f32.mrb[38].mxu1 }
0x10d2   :  { %v3923_v24 = vrot.slane %v3843_v5, 2  ;;  %v3845_v31 = vpop.f32.mrb[39].mxu0  ;;  %v3916_v55 = vpop.f32.mrb[39].mxu1  ;;  %v3925_v49 = vrot.slane %v3914_v2, 2 }
0x10d3   :  { %v3924_v61 = vrot.slane %v3845_v31, 2  ;;  %v3926_v58 = vrot.slane %v3916_v55, 2 }
0x10d4   :  { %v3931_v48 = vadd.f32 %v3923_v24, %v7751_v45  ;;  %v3933_v42 = vadd.f32 %v3925_v49, %v7754_v8 }
0x10d5   :  { %v3932_v29 = vadd.f32 %v3924_v61, %v7752_v20  ;;  %v3934_v17 = vadd.f32 %v3926_v58, %v7753_v57 }
0x10d6   :  { %v4259_v40 = vmul.f32 -1.442695, %v3931_v48 }
0x10d7   :  { %v4260_v51 = vmul.f32 -1.442695, %v3932_v29  ;;  %v4261_v36 = vmul.f32 -1.442695, %v3934_v17 }
0x10d8   :  { %5744 = vpow2.f32 %v4259_v40 }
0x10d9   :  { %5746 = vpow2.f32 %v4260_v51 }
0x10da   :  { %5748 = vpow2.f32 %v4261_v36 }
0x10db   :  { %5750 = vtanh.f32 %v3933_v42 }
0x10e2   :  { %v5745_v54 = vpop.eup %5744 }
0x10e3   :  { %v5747_v7 = vpop.eup %5746  ;;  %v3938_v27 = vadd.f32 1.0, %v5745_v54 }
0x10e4   :  { %v3944_v56 = vadd.f32 1.0, %v5747_v7  ;;  %v5749_v45 = vpop.eup %5748 }
0x10e5   :  { %5752 = vrcp.f32 %v3938_v27  ;;  %v5751_v20 = vpop.eup %5750  ;;  %v3951_v57 = vadd.f32 1.0, %v5749_v45 }
0x10e6   :  { %5754 = vrcp.f32 %v3944_v56 }
0x10e7   :  { %5756 = vrcp.f32 %v3951_v57 }
0x10ef   :  { %v5753_v21 = vpop.eup %5752 }
0x10f0   :  { %v5755_v62 = vpop.eup %5754  ;;  %v3958_v13 = vmul.f32 %v5753_v21, %v5751_v20 }
0x10f1   :  { %v3957_v22 = vmul.f32 %v5755_v62, %v3955_v34  ;;  %v5757_v8 = vpop.eup %5756 }
0x10f3   :  { %v3959_v6 = vadd.f32 %v3958_v13, %v3957_v22 }
0x10f5   :  { %5758 = vtanh.f32 %v3959_v6 }
0x10ff   :  { %v5759_v26 = vpop.eup %5758 }
0x1100   :  { %v3961_v19 = vmul.f32 %v5759_v26, %v5757_v8 }
0x1102   :  { %v3963_v15 = vrot.slane %v3961_v19, 6 }
0x1104   :  { %v3965_v10 = vmul.f32 %v5767_v59, %v3963_v15 }
0x1106   :  { %v3966_v1 = vsel %vm157_vm7, %v7759_v41, %v3965_v10  ;;  %v3973_v28 = vsel %vm157_vm7, %v3965_v10, %v7759_v41 }
0x1107   :  { %v3992_v43 = vsel %vm80_vm4, %v3966_v1, %v3975_v0  ;;  %v3990_v4 = vrot.slane %v3973_v28, 2 }
0x1108   :  { %v3993_v14 = vsel %vm82_vm5, %v3992_v43, %v3978_v44 }
0x1109   :  { %v3994_v60 = vsel %vm84_vm6, %v3993_v14, %v3981_v23  ;;  %v3997_v50 = vsel %vm84_vm6, %v7514_v47, %v3990_v4 }
0x110a   :  { %4313 = vmatprep.mubr.f32.mxu0 %v3994_v60 }
0x110b   :  { %4314 = vmatmul.mubr.f32.vlgmr.msra.gmra.mrb[40].mxu0 %v3997_v50 }
0x11de   :  { %v4315_v38 = vpop.f32.mrb[40].mxu0 }
0x11df   :  { %v4093_v32 = vadd.f32 %v4315_v38, %v4262_v63  ;;  %v4087_v33 = vpop.f32.mrb[41].mxu0 }
0x11e0   :  { %v4088_v39 = vadd.f32 %v4262_v63, %v4087_v33 }
0x11e1   :  { %4097 = vst [vmem:[%s7620_s7 + $0x8] sm:$0xff] %v4093_v32  ;;  %v4100_v52 = vsel %vm4098_vm11, %v4093_v32, -1e+30 }
0x11e2   :  { %4096 = vst [vmem:[%s7620_s7] sm:$0xff] %v4088_v39  ;;  %v4099_v47 = vsel %vm4098_vm11, %v4088_v39, -1e+30 }
0x11e3   :  { %4101 = vmax.xlane.f32.xlu0 %v4099_v47 }
0x11e7   :  { %4103 = vmax.xlane.f32.xlu0 %v4100_v52 }
0x1270   :  { %v4102_v53 = vpop.xlane.xlu0 %4101 }
0x1271   :  { %vm4105_vm12 = vcmp.eq.f32.partialorder %v4099_v47, %v4102_v53 }
0x1272   :  { %v4107_v11 = vsel %vm4105_vm12, %v7756_v16, 128 }
0x1273   :  { %v4110_v3 = vshra.s32 %v4107_v11, 16  ;;  %v4109_v5 = vand.u32 65535, %v4107_v11 }
0x1274   :  { %v4104_v18 = vpop.xlane.xlu0 %4103 }
0x1275   :  { %vm4106_vm13 = vcmp.eq.f32.partialorder %v4100_v52, %v4104_v18  ;;  %v4112_v25 = vcvt.s32.f32 %v4110_v3  ;;  %v4111_v31 = vcvt.s32.f32 %v4109_v5 }
0x1276   :  { %v4108_v35 = vsel %vm4106_vm13, %v7756_v16, 128 }
0x1277   :  { %4113 = vmin.xlane.f32.xlu1 %v4112_v25  ;;  %v4124_v9 = vshra.s32 %v4108_v35, 16  ;;  %v4123_v2 = vand.u32 65535, %v4108_v35 }
0x1279   :  { %v4126_v37 = vcvt.s32.f32 %v4124_v9  ;;  %v4125_v48 = vcvt.s32.f32 %v4123_v2 }
0x127b   :  { %4127 = vmin.xlane.f32.xlu1 %v4126_v37 }
0x1304   :  { %v4114_v24 = vpop.xlane.xlu1 %4113 }
0x1305   :  { %vm4115_vm14 = vcmp.eq.f32.partialorder %v4112_v25, %v4114_v24  ;;  %v4120_v40 = vcvt.f32.s32 %v4114_v24 }
0x1306   :  { %v4116_v55 = vsel %vm4115_vm14, %v4111_v31, inf }
0x1307   :  { %4117 = vmin.xlane.f32.xlu0 %v4116_v55  ;;  %v4121_v58 = vshll.u32 %v4120_v40, 16 }
0x1308   :  { %v4128_v61 = vpop.xlane.xlu1 %4127 }
0x1309   :  { %vm4129_vm15 = vcmp.eq.f32.partialorder %v4126_v37, %v4128_v61  ;;  %v4134_v16 = vcvt.f32.s32 %v4128_v61 }
0x130a   :  { %v4130_v29 = vsel %vm4129_vm15, %v4125_v48, inf }
0x130b   :  { %4131 = vmin.xlane.f32.xlu1 %v4130_v29  ;;  %v4135_v42 = vshll.u32 %v4134_v16, 16 }
0x1394   :  { %v4118_v51 = vpop.xlane.xlu0 %4117 }
0x1395   :  { %v4119_v17 = vcvt.f32.s32 %v4118_v51 }
0x1397   :  { %v4122_v49 = vadd.s32 %v4121_v58, %v4119_v17 }
0x1398   :  { %v4132_v36 = vpop.xlane.xlu1 %4131 }
0x1399   :  { %4138 = vst.msk [vmem:[%s7621_s8] sm:$0xff] %vm4137_vm0, %v4122_v49  ;;  %v4133_v54 = vcvt.f32.s32 %v4132_v36 }
0x139b   :  { %v4136_v7 = vadd.s32 %v4135_v42, %v4133_v54 }
0x139d   :  { %4139 = vst.msk [vmem:[%s7621_s8 + $0x8] sm:$0xff] %vm4137_vm0, %v4136_v7 }
0x139e   :  { %4148 = vsyncpa [#allocation3], 1 }

</bundles_post_ra>
